<compile_context>
chip_gen: v7x
topology: tpu7x:2x2x1
jax: 0.10.0
libtpu: 0.0.40
codegen_flags: <defaults>
</compile_context>

<pallas_src>
import math
import numpy as np

import jax
import jax.numpy as jnp
from jax import lax
from jax.experimental import pallas as pl
from jax.experimental.pallas import tpu as pltpu

# ----------------------------- configuration --------------------------------
B = 2
C = 3
H = W = 112
PATCH = 16
GH, GW = H // PATCH, W // PATCH          # 7, 7
NPATCH = GH * GW                         # 49
SEQ = NPATCH + 1                         # 50 (CLS + patches)
SEQ_PAD = 64                             # sublane-aligned token count
D = 128                                  # vit hidden dim (scaled down from 768)
HEADS = 4
HDIM = D // HEADS                        # 32
MLP = 256
LAYERS = 2
MAX_POINTS = 32
EDGE_FEATURES = 14 * 14                  # 196 (hardcoded in the module)
EDGE_PAD = 256                           # lane-padded edge features
TOTAL_FEATURES = D + EDGE_FEATURES       # 324
FEAT_PAD = D + EDGE_PAD                  # 384 (lane-aligned head K)
OUT_PAD = 128                            # lane-padded head output (real = 96)
PATCH_DIM = 3 * PATCH * PATCH            # 768


def _gaussian_kernel1d(ksize, sigma):
    # matches torchvision.transforms.functional gaussian kernel
    half = (ksize - 1) * 0.5
    x = np.linspace(-half, half, ksize)
    pdf = np.exp(-0.5 * (x / sigma) ** 2)
    return (pdf / pdf.sum()).astype(np.float32)


GAUSS7 = _gaussian_kernel1d(7, 1.0)      # kernel_size=7, sigma=1.0


def _build_edge_matrices():
    """Banded mixing matrices so blur / sobel / pool become MXU matmuls.

    blur = A^T @ gray @ A          (7-tap gaussian, reflect padding)
    gx   = Mu  @ blur @ Mv         (sobel_x, zero padding; Mu symmetric)
    -gy  = Mv  @ blur @ Mu         (sobel_y; sign irrelevant, it is squared)
    pool = P^T @ |grad| @ P        (exact 8x8 average -> 14x14)
    """
    A = np.zeros((W, W), np.float32)
    for c in range(W):
        for d in range(7):
            t = c + d - 3
            if t < 0:
                t = -t
            elif t >= W:
                t = 2 * (W - 1) - t
            A[t, c] += GAUSS7[d]
    u = np.array([1.0, 2.0, 1.0], np.float32)
    v = np.array([-1.0, 0.0, 1.0], np.float32)
    Mu = np.zeros((H, H), np.float32)
    Mv = np.zeros((H, H), np.float32)
    for r in range(H):
        for d in range(3):
            t = r + d - 1
            if 0 <= t < H:
                Mu[t, r] += u[d]
                Mv[t, r] += v[d]
    P = np.zeros((H, 14), np.float32)
    for j in range(14):
        P[8 * j:8 * j + 8, j] = 1.0 / 8.0
    return A, Mu, Mv, P


_A_NP, _MU_NP, _MV_NP, _P_NP = _build_edge_matrices()
A_MAT = jnp.asarray(_A_NP)
AT_MAT = jnp.asarray(np.ascontiguousarray(_A_NP.T))
MU_MAT = jnp.asarray(_MU_NP)
MV_MAT = jnp.asarray(_MV_NP)
P_MAT = jnp.asarray(_P_NP)
PT_MAT = jnp.asarray(np.ascontiguousarray(_P_NP.T))


# ------------------------------ Pallas kernels -------------------------------
def edge_kernel(x_ref, a_ref, at_ref, mu_ref, mv_ref, p_ref, pt_ref, o_ref):
    """Fused edge path: gray -> gaussian blur -> sobel magnitude -> 14x14 pool."""
    r = x_ref[0, 0]
    g = x_ref[0, 1]
    b = x_ref[0, 2]
    gray = 0.299 * r + 0.587 * g + 0.114 * b                      # (H, W) f32

    ga = jnp.dot(gray, a_ref[...], preferred_element_type=jnp.float32)
    blur = jnp.dot(at_ref[...], ga, preferred_element_type=jnp.float32)

    gx = jnp.dot(mu_ref[...],
                 jnp.dot(blur, mv_ref[...], preferred_element_type=jnp.float32),
                 preferred_element_type=jnp.float32)
    gyn = jnp.dot(mv_ref[...],
                  jnp.dot(blur, mu_ref[...], preferred_element_type=jnp.float32),
                  preferred_element_type=jnp.float32)              # = -grad_y
    mag = jnp.sqrt(gx * gx + gyn * gyn)

    pooled = jnp.dot(pt_ref[...],
                     jnp.dot(mag, p_ref[...], preferred_element_type=jnp.float32),
                     preferred_element_type=jnp.float32)           # (14, 14)
    o_ref[0] = pooled


def vit_head_kernel(patches_ref, edges_ref, tokb_ref, convw_ref,
                    ln1w_ref, ln1b_ref, wqkv_ref, bqkv_ref, wo_ref, bo_ref,
                    ln2w_ref, ln2b_ref, wm1_ref, bm1_ref, wm2_ref, bm2_ref,
                    sfw1_ref, sfb1_ref, sfw2_ref, sfb2_ref,
                    ahw1_ref, ahb1_ref, ahw2_ref, ahb2_ref, o_ref):
    """Fused ViT: conv_proj + CLS/pos + 2 encoder blocks + head MLP (one batch)."""
    f32 = jnp.float32
    bf16 = jnp.bfloat16

    # conv_proj (bias + cls + pos folded into tokb); pad tokens 50..63 are zero.
    x = jnp.dot(patches_ref[0], convw_ref[...], preferred_element_type=f32)
    x = x + tokb_ref[...]                                          # (64, 128) f32

    # key mask for padded tokens
    col = lax.broadcasted_iota(jnp.int32, (1, SEQ_PAD), 1)
    key_bias = jnp.where(col < SEQ, 0.0, -1e30).astype(f32)        # (1, 64)

    scale = 1.0 / math.sqrt(HDIM)
    for l in range(LAYERS):
        # ---- LayerNorm 1 (eps = 1e-6, f32) ----
        mu = jnp.mean(x, axis=-1, keepdims=True)
        var = jnp.mean((x - mu) ** 2, axis=-1, keepdims=True)
        xn = (x - mu) * lax.rsqrt(var + 1e-6) * ln1w_ref[l] + ln1b_ref[l]

        # ---- multi-head self-attention (bf16 matmuls, f32 accumulation) ----
        qkv = (jnp.dot(xn.astype(bf16), wqkv_ref[l],
                       preferred_element_type=f32) + bqkv_ref[l])  # (64, 3D)
        attn = jnp.zeros((SEQ_PAD, D), f32)
        for h in range(HEADS):
            q = qkv[:, h * HDIM:(h + 1) * HDIM].astype(bf16)
            k = qkv[:, D + h * HDIM:D + (h + 1) * HDIM].astype(bf16)
            v = qkv[:, 2 * D + h * HDIM:2 * D + (h + 1) * HDIM].astype(bf16)
            s = lax.dot_general(q, k, (((1,), (1,)), ((), ())),
                                preferred_element_type=f32) * scale
            s = s + key_bias
            s = s - jnp.max(s, axis=-1, keepdims=True)
            p = jnp.exp(s)
            p = p * pl.reciprocal(jnp.sum(p, axis=-1, keepdims=True), approx=True)
            hv = jnp.dot(p.astype(bf16), v, preferred_element_type=f32)
            # fold output projection into the accumulation (no concatenate)
            attn = attn + jnp.dot(hv.astype(bf16), wo_ref[l, h],
                                  preferred_element_type=f32)
        x = x + attn + bo_ref[l]                                   # residual

        # ---- LayerNorm 2 + MLP ----
        mu2 = jnp.mean(x, axis=-1, keepdims=True)
        var2 = jnp.mean((x - mu2) ** 2, axis=-1, keepdims=True)
        yn = (x - mu2) * lax.rsqrt(var2 + 1e-6) * ln2w_ref[l] + ln2b_ref[l]
        h1 = (jnp.dot(yn.astype(bf16), wm1_ref[l],
                      preferred_element_type=f32) + bm1_ref[l])
        # TODO(synk): torch uses exact erf GELU; tanh approximation used here.
        h1 = jax.nn.gelu(h1, approximate=True)
        h2 = (jnp.dot(h1.astype(bf16), wm2_ref[l],
                      preferred_element_type=f32) + bm2_ref[l])
        x = x + h2

    # ---- CLS features + edge features -> spatial_features + attention_head ----
    feats = jnp.concatenate([x[0:1, :], edges_ref[0]], axis=1)     # (1, 384) f32
    hh = jnp.dot(feats.astype(bf16), sfw1_ref[...],
                 preferred_element_type=f32) + sfb1_ref[...]
    hh = jnp.maximum(hh, 0.0)
    hh = jnp.dot(hh.astype(bf16), sfw2_ref[...],
                 preferred_element_type=f32) + sfb2_ref[...]
    hh = jnp.maximum(hh, 0.0)
    hh = jnp.dot(hh.astype(bf16), ahw1_ref[...],
                 preferred_element_type=f32) + ahb1_ref[...]
    hh = jnp.maximum(hh, 0.0)
    out = jnp.dot(hh.astype(bf16), ahw2_ref[...],
                  preferred_element_type=f32) + ahb2_ref[...]      # (1, 128)
    o_ref[0] = out


# ----------------------------- Pallas wrappers --------------------------------
def _const_spec(shape):
    n = len(shape)
    return pl.BlockSpec(shape, lambda i, _n=n: (0,) * _n)


def run_edge(x):
    b = x.shape[0]
    return pl.pallas_call(
        edge_kernel,
        out_shape=jax.ShapeDtypeStruct((b, 14, 14), jnp.float32),
        grid=(b,),
        in_specs=[pl.BlockSpec((1, 3, H, W), lambda i: (i, 0, 0, 0)),
                  _const_spec((W, W)), _const_spec((W, W)),
                  _const_spec((H, H)), _const_spec((H, H)),
                  _const_spec((H, 14)), _const_spec((14, W))],
        out_specs=pl.BlockSpec((1, 14, 14), lambda i: (i, 0, 0)),
        compiler_params=pltpu.CompilerParams(dimension_semantics=("parallel",)),
    )(x, A_MAT, AT_MAT, MU_MAT, MV_MAT, P_MAT, PT_MAT)


def run_vit_head(patches, edges, token_bias, conv_w, *rest):
    b = patches.shape[0]
    in_specs = [
        pl.BlockSpec((1, SEQ_PAD, PATCH_DIM), lambda i: (i, 0, 0)),
        pl.BlockSpec((1, 1, EDGE_PAD), lambda i: (i, 0, 0)),
        _const_spec((SEQ_PAD, D)),
        _const_spec((PATCH_DIM, D)),
        _const_spec((LAYERS, 1, D)), _const_spec((LAYERS, 1, D)),
        _const_spec((LAYERS, D, 3 * D)), _const_spec((LAYERS, 1, 3 * D)),
        _const_spec((LAYERS, HEADS, HDIM, D)), _const_spec((LAYERS, 1, D)),
        _const_spec((LAYERS, 1, D)), _const_spec((LAYERS, 1, D)),
        _const_spec((LAYERS, D, MLP)), _const_spec((LAYERS, 1, MLP)),
        _const_spec((LAYERS, MLP, D)), _const_spec((LAYERS, 1, D)),
        _const_spec((FEAT_PAD, 512)), _const_spec((1, 512)),
        _const_spec((512, 256)), _const_spec((1, 256)),
        _const_spec((256, 128)), _const_spec((1, 128)),
        _const_spec((128, OUT_PAD)), _const_spec((1, OUT_PAD)),
    ]
    return pl.pallas_call(
        vit_head_kernel,
        out_shape=jax.ShapeDtypeStruct((b, 1, OUT_PAD), jnp.float32),
        grid=(b,),
        in_specs=in_specs,
        out_specs=pl.BlockSpec((1, 1, OUT_PAD), lambda i: (i, 0, 0)),
        compiler_params=pltpu.CompilerParams(dimension_semantics=("parallel",)),
    )(patches, edges, token_bias, conv_w, *rest)


# ------------------------------ model pieces ---------------------------------
def distribute_points(batch_size, key):
    """Reference: grid of 5x5 points in [0.1, 0.9] + gaussian noise*0.05, clamped."""
    num_points = min(25, MAX_POINTS)
    gs = int(np.sqrt(num_points))
    lin = jnp.linspace(0.1, 0.9, gs)
    gx, gy = jnp.meshgrid(lin, lin, indexing='xy')
    gp = jnp.stack([gx.flatten(), gy.flatten()], axis=1)[:num_points]
    gp = jnp.broadcast_to(gp[None], (batch_size, num_points, 2))
    noise = jax.random.normal(key, gp.shape, jnp.float32) * 0.05
    return jnp.clip(gp + noise, 0.0, 1.0)


def filter_attention_points(points, scores, min_points=5,
                            min_score_threshold=0.3, max_points=15):
    # TODO(synk): data-dependent output shape -> implemented host-side in numpy.
    bsz, n = points.shape[0], points.shape[1]
    f_pts, f_scs = [], []
    for b in range(bsz):
        cs, cp = scores[b, :n], points[b, :n]
        idx = np.argsort(-cs, kind='stable')
        ss, sp = cs[idx], cp[idx]
        mask = ss >= min_score_threshold
        if mask.sum() < min_points:
            mask[:min_points] = True
        max_idx = min(max_points, len(mask))
        mask = mask[:max_idx]
        f_pts.append(sp[:max_idx][mask])
        f_scs.append(ss[:max_idx][mask])
    max_filtered = min(max(len(p) for p in f_pts), max_points)
    pp = np.zeros((bsz, max_filtered, 2), np.float32)
    ps = np.zeros((bsz, max_filtered), np.float32)
    for b in range(bsz):
        k = min(len(f_pts[b]), max_filtered)
        pp[b, :k] = f_pts[b][:k]
        ps[b, :k] = f_scs[b][:k]
    return pp, ps


@jax.jit
def forward_device(x, params, noise_key):
    """Device part of AttentionPointsModel.forward (inference mode)."""
    bsz = x.shape[0]
    if x.shape[1] == 1:
        x = jnp.tile(x, (1, 3, 1, 1))

    # ---- fused edge branch: gray -> blur -> sobel -> 14x14 pool (one kernel) ----
    edges14 = run_edge(x)                                          # (B, 14, 14)
    edges = edges14.reshape(bsz, EDGE_FEATURES)
    edges = jnp.pad(edges, ((0, 0), (0, EDGE_PAD - EDGE_FEATURES)))
    edges = edges.reshape(bsz, 1, EDGE_PAD)

    # ---- patchify for conv_proj; shift by one row (CLS) and pad to 64 tokens ----
    patches = x.reshape(bsz, 3, GH, PATCH, GW, PATCH)
    patches = patches.transpose(0, 2, 4, 1, 3, 5).reshape(bsz, NPATCH, PATCH_DIM)
    patches = jnp.pad(patches, ((0, 0), (1, SEQ_PAD - SEQ), (0, 0)))
    patches = patches.astype(jnp.bfloat16)                         # (B, 64, 768)

    # per-token bias: row0 = cls + pos0, rows 1..49 = conv_b + pos, pads = 0
    token_bias = jnp.concatenate([
        params['cls'][0] + params['pos'][0, :1],
        params['conv_b'] + params['pos'][0, 1:SEQ],
        jnp.zeros((SEQ_PAD - SEQ, D), jnp.float32)], axis=0)       # (64, 128)

    bf = lambda a: a.astype(jnp.bfloat16)
    sf_w1 = bf(jnp.pad(params['sf_w1'],
                       ((0, FEAT_PAD - TOTAL_FEATURES), (0, 0))))
    ah_w2 = bf(jnp.pad(params['ah_w2'],
                       ((0, 0), (0, OUT_PAD - MAX_POINTS * 3))))
    ah_b2 = jnp.pad(params['ah_b2'], ((0, 0), (0, OUT_PAD - MAX_POINTS * 3)))

    out = run_vit_head(
        patches, edges, token_bias, bf(params['conv_w']),
        params['ln1_w'], params['ln1_b'],
        bf(params['w_qkv']), params['b_qkv'],
        bf(params['w_o']), params['b_o'],
        params['ln2_w'], params['ln2_b'],
        bf(params['w_mlp1']), params['b_mlp1'],
        bf(params['w_mlp2']), params['b_mlp2'],
        sf_w1, params['sf_b1'],
        bf(params['sf_w2']), params['sf_b2'],
        bf(params['ah_w1']), params['ah_b1'],
        ah_w2, ah_b2)                                              # (B, 1, 128)

    raw = out[:, 0, :MAX_POINTS * 3].reshape(bsz, MAX_POINTS, 3)
    _raw_points = raw[:, :, :2]          # discarded by distribute_points (as in ref)
    scores = jax.nn.sigmoid(raw[:, :, 2])                          # (B, 32)
    points = distribute_points(bsz, noise_key)                     # (B, 25, 2)
    return points, scores


# --------------------------- parameter construction --------------------------
def init_params(key):
    ks = jax.random.split(key, 10)

    def normal(k, shape, scale=0.02):
        return scale * jax.random.normal(k, shape, jnp.float32)

    def xavier(k, fan_in, fan_out):
        lim = float(np.sqrt(6.0 / (fan_in + fan_out)))
        return jax.random.uniform(k, (fan_in, fan_out), jnp.float32, -lim, lim)

    params = {
        'conv_w': normal(ks[0], (PATCH_DIM, D)),
        'conv_b': jnp.zeros((1, D), jnp.float32),
        'cls': normal(ks[1], (1, 1, D)),
        'pos': normal(ks[2], (1, SEQ, D)),
    }

    w_qkv, w_o, w_m1, w_m2 = [], [], [], []
    for lk in jax.random.split(ks[3], LAYERS):
        sk = jax.random.split(lk, 4)
        w_qkv.append(normal(sk[0], (D, 3 * D)))
        w_o.append(normal(sk[1], (D, D)))
        w_m1.append(normal(sk[2], (D, MLP)))
        w_m2.append(normal(sk[3], (MLP, D)))
    params['w_qkv'] = jnp.stack(w_qkv)                             # (L, D, 3D)
    params['b_qkv'] = jnp.zeros((LAYERS, 1, 3 * D), jnp.float32)
    params['w_o'] = jnp.stack(w_o).reshape(LAYERS, HEADS, HDIM, D)  # per-head split
    params['b_o'] = jnp.zeros((LAYERS, 1, D), jnp.float32)
    params['ln1_w'] = jnp.ones((LAYERS, 1, D), jnp.float32)
    params['ln1_b'] = jnp.zeros((LAYERS, 1, D), jnp.float32)
    params['ln2_w'] = jnp.ones((LAYERS, 1, D), jnp.float32)
    params['ln2_b'] = jnp.zeros((LAYERS, 1, D), jnp.float32)
    params['w_mlp1'] = jnp.stack(w_m1)                             # (L, D, MLP)
    params['b_mlp1'] = jnp.zeros((LAYERS, 1, MLP), jnp.float32)
    params['w_mlp2'] = jnp.stack(w_m2)                             # (L, MLP, D)
    params['b_mlp2'] = jnp.zeros((LAYERS, 1, D), jnp.float32)

    # spatial_features: xavier-uniform weights, zero bias (as _init_weights)
    params['sf_w1'] = xavier(ks[4], TOTAL_FEATURES, 512)
    params['sf_b1'] = jnp.zeros((1, 512), jnp.float32)
    params['sf_w2'] = xavier(ks[5], 512, 256)
    params['sf_b2'] = jnp.zeros((1, 256), jnp.float32)
    # attention_head: default-ish init for first layer, uniform(-0.1, 0.1) + zero
    # bias for the last layer (as _init_weights)
    params['ah_w1'] = xavier(ks[6], 256, 128)
    params['ah_b1'] = jnp.zeros((1, 128), jnp.float32)
    params['ah_w2'] = jax.random.uniform(ks[7], (128, MAX_POINTS * 3),
                                         jnp.float32, -0.1, 0.1)
    params['ah_b2'] = jnp.zeros((1, MAX_POINTS * 3), jnp.float32)
    return params


# ----------------------------------- main -------------------------------------
if __name__ == "__main__":
    key = jax.random.PRNGKey(0)
    pkey, xkey, nkey = jax.random.split(key, 3)

    params = init_params(pkey)
    x = jax.random.uniform(xkey, (B, C, H, W), jnp.float32)

    points_dev, scores_dev = forward_device(x, params, nkey)
    jax.block_until_ready((points_dev, scores_dev))

    points, scores = filter_attention_points(np.asarray(points_dev),
                                             np.asarray(scores_dev),
                                             min_points=5,
                                             min_score_threshold=0.3,
                                             max_points=15)

    assert points.ndim == 3 and points.shape[0] == B and points.shape[2] == 2
    assert scores.shape == points.shape[:2]
    assert points.shape[1] <= 15
    assert np.all(np.isfinite(points)) and np.all(np.isfinite(scores))

    print("KERNEL_OK")
</pallas_src>

<mosaic_0001>
module attributes {stable_mosaic.version = 11 : i64} {
  func.func @vit_head_kernel(%arg0: i32, %arg1: memref<1x64x768xbf16, #tpu.memory_space<vmem>>, %arg2: memref<1x1x256xf32, #tpu.memory_space<vmem>>, %arg3: memref<64x128xf32, #tpu.memory_space<vmem>>, %arg4: memref<768x128xbf16, #tpu.memory_space<vmem>>, %arg5: memref<2x1x128xf32, #tpu.memory_space<vmem>>, %arg6: memref<2x1x128xf32, #tpu.memory_space<vmem>>, %arg7: memref<2x128x384xbf16, #tpu.memory_space<vmem>>, %arg8: memref<2x1x384xf32, #tpu.memory_space<vmem>>, %arg9: memref<2x4x32x128xbf16, #tpu.memory_space<vmem>>, %arg10: memref<2x1x128xf32, #tpu.memory_space<vmem>>, %arg11: memref<2x1x128xf32, #tpu.memory_space<vmem>>, %arg12: memref<2x1x128xf32, #tpu.memory_space<vmem>>, %arg13: memref<2x128x256xbf16, #tpu.memory_space<vmem>>, %arg14: memref<2x1x256xf32, #tpu.memory_space<vmem>>, %arg15: memref<2x256x128xbf16, #tpu.memory_space<vmem>>, %arg16: memref<2x1x128xf32, #tpu.memory_space<vmem>>, %arg17: memref<384x512xbf16, #tpu.memory_space<vmem>>, %arg18: memref<1x512xf32, #tpu.memory_space<vmem>>, %arg19: memref<512x256xbf16, #tpu.memory_space<vmem>>, %arg20: memref<1x256xf32, #tpu.memory_space<vmem>>, %arg21: memref<256x128xbf16, #tpu.memory_space<vmem>>, %arg22: memref<1x128xf32, #tpu.memory_space<vmem>>, %arg23: memref<128x128xbf16, #tpu.memory_space<vmem>>, %arg24: memref<1x128xf32, #tpu.memory_space<vmem>>, %arg25: memref<1x1x128xf32, #tpu.memory_space<vmem>>) attributes {dimension_semantics = [#tpu.dimension_semantics<parallel>], iteration_bounds = array<i64: 2>, scalar_prefetch = 0 : i64, scratch_operands = 0 : i64, tpu.core_type = #tpu.core_type<tc>, window_params = [{transform_indices = @transform_0, window_bounds = array<i64: 1, 64, 768>}, {transform_indices = @transform_1, window_bounds = array<i64: 1, 1, 256>}, {pipeline_mode = #tpu.pipeline_mode<synchronous>, transform_indices = @transform_2, window_bounds = array<i64: 64, 128>}, {pipeline_mode = #tpu.pipeline_mode<synchronous>, transform_indices = @transform_3, window_bounds = array<i64: 768, 128>}, {pipeline_mode = #tpu.pipeline_mode<synchronous>, transform_indices = @transform_4, window_bounds = array<i64: 2, 1, 128>}, {pipeline_mode = #tpu.pipeline_mode<synchronous>, transform_indices = @transform_5, window_bounds = array<i64: 2, 1, 128>}, {pipeline_mode = #tpu.pipeline_mode<synchronous>, transform_indices = @transform_6, window_bounds = array<i64: 2, 128, 384>}, {pipeline_mode = #tpu.pipeline_mode<synchronous>, transform_indices = @transform_7, window_bounds = array<i64: 2, 1, 384>}, {pipeline_mode = #tpu.pipeline_mode<synchronous>, transform_indices = @transform_8, window_bounds = array<i64: 2, 4, 32, 128>}, {pipeline_mode = #tpu.pipeline_mode<synchronous>, transform_indices = @transform_9, window_bounds = array<i64: 2, 1, 128>}, {pipeline_mode = #tpu.pipeline_mode<synchronous>, transform_indices = @transform_10, window_bounds = array<i64: 2, 1, 128>}, {pipeline_mode = #tpu.pipeline_mode<synchronous>, transform_indices = @transform_11, window_bounds = array<i64: 2, 1, 128>}, {pipeline_mode = #tpu.pipeline_mode<synchronous>, transform_indices = @transform_12, window_bounds = array<i64: 2, 128, 256>}, {pipeline_mode = #tpu.pipeline_mode<synchronous>, transform_indices = @transform_13, window_bounds = array<i64: 2, 1, 256>}, {pipeline_mode = #tpu.pipeline_mode<synchronous>, transform_indices = @transform_14, window_bounds = array<i64: 2, 256, 128>}, {pipeline_mode = #tpu.pipeline_mode<synchronous>, transform_indices = @transform_15, window_bounds = array<i64: 2, 1, 128>}, {pipeline_mode = #tpu.pipeline_mode<synchronous>, transform_indices = @transform_16, window_bounds = array<i64: 384, 512>}, {pipeline_mode = #tpu.pipeline_mode<synchronous>, transform_indices = @transform_17, window_bounds = array<i64: 1, 512>}, {pipeline_mode = #tpu.pipeline_mode<synchronous>, transform_indices = @transform_18, window_bounds = array<i64: 512, 256>}, {pipeline_mode = #tpu.pipeline_mode<synchronous>, transform_indices = @transform_19, window_bounds = array<i64: 1, 256>}, {pipeline_mode = #tpu.pipeline_mode<synchronous>, transform_indices = @transform_20, window_bounds = array<i64: 256, 128>}, {pipeline_mode = #tpu.pipeline_mode<synchronous>, transform_indices = @transform_21, window_bounds = array<i64: 1, 128>}, {pipeline_mode = #tpu.pipeline_mode<synchronous>, transform_indices = @transform_22, window_bounds = array<i64: 128, 128>}, {pipeline_mode = #tpu.pipeline_mode<synchronous>, transform_indices = @transform_23, window_bounds = array<i64: 1, 128>}, {transform_indices = @transform_24, window_bounds = array<i64: 1, 1, 128>}]} {
    %c0 = arith.constant 0 : index
    %c0_0 = arith.constant 0 : index
    %c0_1 = arith.constant 0 : index
    %0 = vector.load %arg1[%c0, %c0_0, %c0_1] : memref<1x64x768xbf16, #tpu.memory_space<vmem>>, vector<1x64x768xbf16>
    %1 = vector.shape_cast %0 : vector<1x64x768xbf16> to vector<64x768xbf16>
    %c0_2 = arith.constant 0 : index
    %c0_3 = arith.constant 0 : index
    %2 = vector.load %arg4[%c0_2, %c0_3] : memref<768x128xbf16, #tpu.memory_space<vmem>>, vector<768x128xbf16>
    %cst = arith.constant dense<0.000000e+00> : vector<64x128xf32>
    %3 = tpu.matmul %1, %2, %cst {dimension_numbers = #tpu.dot_dimension_numbers<[1], [0], [0], [1], [0, 0, 1, 1], [], []>} : vector<64x768xbf16>, vector<768x128xbf16>, vector<64x128xf32> -> vector<64x128xf32>
    %c0_4 = arith.constant 0 : index
    %c0_5 = arith.constant 0 : index
    %4 = vector.load %arg3[%c0_4, %c0_5] : memref<64x128xf32, #tpu.memory_space<vmem>>, vector<64x128xf32>
    %5 = arith.addf %3, %4 : vector<64x128xf32>
    %6 = tpu.iota {dimensions = array<i32: 1>} : vector<1x64xi32>
    %c50_i32 = arith.constant 50 : i32
    %7 = vector.broadcast %c50_i32 : i32 to vector<1x64xi32>
    %8 = arith.cmpi slt, %6, %7 : vector<1x64xi32>
    %cst_6 = arith.constant 0.000000e+00 : f32
    %cst_7 = arith.constant -1.000000e+30 : f32
    %9 = vector.broadcast %cst_6 : f32 to vector<1x64xf32>
    %10 = vector.broadcast %cst_7 : f32 to vector<1x64xf32>
    %11 = arith.select %8, %9, %10 : vector<1x64xi1>, vector<1x64xf32>
    %cst_8 = arith.constant dense<0.000000e+00> : vector<64xf32>
    %12 = vector.multi_reduction <add>, %5, %cst_8 [1] : vector<64x128xf32> to vector<64xf32>
    %13 = vector.shape_cast %12 : vector<64xf32> to vector<64x1xf32>
    %cst_9 = arith.constant 1.280000e+02 : f32
    %14 = vector.broadcast %cst_9 : f32 to vector<64x1xf32>
    %15 = arith.divf %13, %14 : vector<64x1xf32>
    %16 = vector.broadcast %15 : vector<64x1xf32> to vector<64x128xf32>
    %17 = arith.subf %5, %16 : vector<64x128xf32>
    %18 = arith.mulf %17, %17 : vector<64x128xf32>
    %cst_10 = arith.constant dense<0.000000e+00> : vector<64xf32>
    %19 = vector.multi_reduction <add>, %18, %cst_10 [1] : vector<64x128xf32> to vector<64xf32>
    %20 = vector.shape_cast %19 : vector<64xf32> to vector<64x1xf32>
    %cst_11 = arith.constant 1.280000e+02 : f32
    %21 = vector.broadcast %cst_11 : f32 to vector<64x1xf32>
    %22 = arith.divf %20, %21 : vector<64x1xf32>
    %23 = vector.broadcast %15 : vector<64x1xf32> to vector<64x128xf32>
    %24 = arith.subf %5, %23 : vector<64x128xf32>
    %cst_12 = arith.constant 9.99999997E-7 : f32
    %25 = vector.broadcast %cst_12 : f32 to vector<64x1xf32>
    %26 = arith.addf %22, %25 : vector<64x1xf32>
    %27 = math.rsqrt %26 : vector<64x1xf32>
    %28 = vector.broadcast %27 : vector<64x1xf32> to vector<64x128xf32>
    %29 = arith.mulf %24, %28 : vector<64x128xf32>
    %c0_13 = arith.constant 0 : index
    %c0_14 = arith.constant 0 : index
    %c0_15 = arith.constant 0 : index
    %30 = vector.load %arg5[%c0_13, %c0_14, %c0_15] : memref<2x1x128xf32, #tpu.memory_space<vmem>>, vector<1x1x128xf32>
    %31 = vector.shape_cast %30 : vector<1x1x128xf32> to vector<1x128xf32>
    %32 = vector.broadcast %31 : vector<1x128xf32> to vector<64x128xf32>
    %33 = arith.mulf %29, %32 : vector<64x128xf32>
    %c0_16 = arith.constant 0 : index
    %c0_17 = arith.constant 0 : index
    %c0_18 = arith.constant 0 : index
    %34 = vector.load %arg6[%c0_16, %c0_17, %c0_18] : memref<2x1x128xf32, #tpu.memory_space<vmem>>, vector<1x1x128xf32>
    %35 = vector.shape_cast %34 : vector<1x1x128xf32> to vector<1x128xf32>
    %36 = vector.broadcast %35 : vector<1x128xf32> to vector<64x128xf32>
    %37 = arith.addf %33, %36 : vector<64x128xf32>
    %38 = arith.truncf %37 : vector<64x128xf32> to vector<64x128xbf16>
    %c0_19 = arith.constant 0 : index
    %c0_20 = arith.constant 0 : index
    %c0_21 = arith.constant 0 : index
    %39 = vector.load %arg7[%c0_19, %c0_20, %c0_21] : memref<2x128x384xbf16, #tpu.memory_space<vmem>>, vector<1x128x384xbf16>
    %40 = vector.shape_cast %39 : vector<1x128x384xbf16> to vector<128x384xbf16>
    %cst_22 = arith.constant dense<0.000000e+00> : vector<64x384xf32>
    %41 = tpu.matmul %38, %40, %cst_22 {dimension_numbers = #tpu.dot_dimension_numbers<[1], [0], [0], [1], [0, 0, 1, 1], [], []>} : vector<64x128xbf16>, vector<128x384xbf16>, vector<64x384xf32> -> vector<64x384xf32>
    %c0_23 = arith.constant 0 : index
    %c0_24 = arith.constant 0 : index
    %c0_25 = arith.constant 0 : index
    %42 = vector.load %arg8[%c0_23, %c0_24, %c0_25] : memref<2x1x384xf32, #tpu.memory_space<vmem>>, vector<1x1x384xf32>
    %43 = vector.shape_cast %42 : vector<1x1x384xf32> to vector<1x384xf32>
    %44 = vector.broadcast %43 : vector<1x384xf32> to vector<64x384xf32>
    %45 = arith.addf %41, %44 : vector<64x384xf32>
    %cst_26 = arith.constant 0.000000e+00 : f32
    %46 = vector.broadcast %cst_26 : f32 to vector<64x128xf32>
    %47 = vector.extract_strided_slice %45 {offsets = [0, 0], sizes = [64, 32], strides = [1, 1]} : vector<64x384xf32> to vector<64x32xf32>
    %48 = arith.truncf %47 : vector<64x32xf32> to vector<64x32xbf16>
    %49 = vector.extract_strided_slice %45 {offsets = [0, 128], sizes = [64, 32], strides = [1, 1]} : vector<64x384xf32> to vector<64x32xf32>
    %50 = arith.truncf %49 : vector<64x32xf32> to vector<64x32xbf16>
    %51 = vector.extract_strided_slice %45 {offsets = [0, 256], sizes = [64, 32], strides = [1, 1]} : vector<64x384xf32> to vector<64x32xf32>
    %52 = arith.truncf %51 : vector<64x32xf32> to vector<64x32xbf16>
    %cst_27 = arith.constant dense<0.000000e+00> : vector<64x64xf32>
    %53 = tpu.matmul %48, %50, %cst_27 {dimension_numbers = #tpu.dot_dimension_numbers<[1], [1], [0], [0], [0, 0, 1, 0], [], []>} : vector<64x32xbf16>, vector<64x32xbf16>, vector<64x64xf32> -> vector<64x64xf32>
    %cst_28 = arith.constant 0.176776692 : f32
    %54 = vector.broadcast %cst_28 : f32 to vector<64x64xf32>
    %55 = arith.mulf %53, %54 : vector<64x64xf32>
    %56 = vector.broadcast %11 : vector<1x64xf32> to vector<64x64xf32>
    %57 = arith.addf %55, %56 : vector<64x64xf32>
    %cst_29 = arith.constant dense<0xFF800000> : vector<64xf32>
    %58 = vector.multi_reduction <maximumf>, %57, %cst_29 [1] : vector<64x64xf32> to vector<64xf32>
    %59 = vector.shape_cast %58 : vector<64xf32> to vector<64x1xf32>
    %60 = vector.broadcast %59 : vector<64x1xf32> to vector<64x64xf32>
    %61 = arith.subf %57, %60 : vector<64x64xf32>
    %62 = math.exp %61 : vector<64x64xf32>
    %cst_30 = arith.constant dense<0.000000e+00> : vector<64xf32>
    %63 = vector.multi_reduction <add>, %62, %cst_30 [1] : vector<64x64xf32> to vector<64xf32>
    %64 = vector.shape_cast %63 : vector<64xf32> to vector<64x1xf32>
    %65 = tpu.reciprocal %64 {approx = true} : vector<64x1xf32> -> vector<64x1xf32>
    %66 = vector.broadcast %65 : vector<64x1xf32> to vector<64x64xf32>
    %67 = arith.mulf %62, %66 : vector<64x64xf32>
    %68 = arith.truncf %67 : vector<64x64xf32> to vector<64x64xbf16>
    %cst_31 = arith.constant dense<0.000000e+00> : vector<64x32xf32>
    %69 = tpu.matmul %68, %52, %cst_31 {dimension_numbers = #tpu.dot_dimension_numbers<[1], [0], [0], [1], [0, 0, 1, 1], [], []>} : vector<64x64xbf16>, vector<64x32xbf16>, vector<64x32xf32> -> vector<64x32xf32>
    %70 = arith.truncf %69 : vector<64x32xf32> to vector<64x32xbf16>
    %c0_32 = arith.constant 0 : index
    %c0_33 = arith.constant 0 : index
    %c0_34 = arith.constant 0 : index
    %c0_35 = arith.constant 0 : index
    %71 = vector.load %arg9[%c0_32, %c0_33, %c0_34, %c0_35] : memref<2x4x32x128xbf16, #tpu.memory_space<vmem>>, vector<1x1x32x128xbf16>
    %72 = vector.shape_cast %71 : vector<1x1x32x128xbf16> to vector<32x128xbf16>
    %cst_36 = arith.constant dense<0.000000e+00> : vector<64x128xf32>
    %73 = tpu.matmul %70, %72, %cst_36 {dimension_numbers = #tpu.dot_dimension_numbers<[1], [0], [0], [1], [0, 0, 1, 1], [], []>} : vector<64x32xbf16>, vector<32x128xbf16>, vector<64x128xf32> -> vector<64x128xf32>
    %74 = arith.addf %46, %73 : vector<64x128xf32>
    %75 = vector.extract_strided_slice %45 {offsets = [0, 32], sizes = [64, 32], strides = [1, 1]} : vector<64x384xf32> to vector<64x32xf32>
    %76 = arith.truncf %75 : vector<64x32xf32> to vector<64x32xbf16>
    %77 = vector.extract_strided_slice %45 {offsets = [0, 160], sizes = [64, 32], strides = [1, 1]} : vector<64x384xf32> to vector<64x32xf32>
    %78 = arith.truncf %77 : vector<64x32xf32> to vector<64x32xbf16>
    %79 = vector.extract_strided_slice %45 {offsets = [0, 288], sizes = [64, 32], strides = [1, 1]} : vector<64x384xf32> to vector<64x32xf32>
    %80 = arith.truncf %79 : vector<64x32xf32> to vector<64x32xbf16>
    %cst_37 = arith.constant dense<0.000000e+00> : vector<64x64xf32>
    %81 = tpu.matmul %76, %78, %cst_37 {dimension_numbers = #tpu.dot_dimension_numbers<[1], [1], [0], [0], [0, 0, 1, 0], [], []>} : vector<64x32xbf16>, vector<64x32xbf16>, vector<64x64xf32> -> vector<64x64xf32>
    %cst_38 = arith.constant 0.176776692 : f32
    %82 = vector.broadcast %cst_38 : f32 to vector<64x64xf32>
    %83 = arith.mulf %81, %82 : vector<64x64xf32>
    %84 = vector.broadcast %11 : vector<1x64xf32> to vector<64x64xf32>
    %85 = arith.addf %83, %84 : vector<64x64xf32>
    %cst_39 = arith.constant dense<0xFF800000> : vector<64xf32>
    %86 = vector.multi_reduction <maximumf>, %85, %cst_39 [1] : vector<64x64xf32> to vector<64xf32>
    %87 = vector.shape_cast %86 : vector<64xf32> to vector<64x1xf32>
    %88 = vector.broadcast %87 : vector<64x1xf32> to vector<64x64xf32>
    %89 = arith.subf %85, %88 : vector<64x64xf32>
    %90 = math.exp %89 : vector<64x64xf32>
    %cst_40 = arith.constant dense<0.000000e+00> : vector<64xf32>
    %91 = vector.multi_reduction <add>, %90, %cst_40 [1] : vector<64x64xf32> to vector<64xf32>
    %92 = vector.shape_cast %91 : vector<64xf32> to vector<64x1xf32>
    %93 = tpu.reciprocal %92 {approx = true} : vector<64x1xf32> -> vector<64x1xf32>
    %94 = vector.broadcast %93 : vector<64x1xf32> to vector<64x64xf32>
    %95 = arith.mulf %90, %94 : vector<64x64xf32>
    %96 = arith.truncf %95 : vector<64x64xf32> to vector<64x64xbf16>
    %cst_41 = arith.constant dense<0.000000e+00> : vector<64x32xf32>
    %97 = tpu.matmul %96, %80, %cst_41 {dimension_numbers = #tpu.dot_dimension_numbers<[1], [0], [0], [1], [0, 0, 1, 1], [], []>} : vector<64x64xbf16>, vector<64x32xbf16>, vector<64x32xf32> -> vector<64x32xf32>
    %98 = arith.truncf %97 : vector<64x32xf32> to vector<64x32xbf16>
    %c0_42 = arith.constant 0 : index
    %c1 = arith.constant 1 : index
    %c0_43 = arith.constant 0 : index
    %c0_44 = arith.constant 0 : index
    %99 = vector.load %arg9[%c0_42, %c1, %c0_43, %c0_44] : memref<2x4x32x128xbf16, #tpu.memory_space<vmem>>, vector<1x1x32x128xbf16>
    %100 = vector.shape_cast %99 : vector<1x1x32x128xbf16> to vector<32x128xbf16>
    %cst_45 = arith.constant dense<0.000000e+00> : vector<64x128xf32>
    %101 = tpu.matmul %98, %100, %cst_45 {dimension_numbers = #tpu.dot_dimension_numbers<[1], [0], [0], [1], [0, 0, 1, 1], [], []>} : vector<64x32xbf16>, vector<32x128xbf16>, vector<64x128xf32> -> vector<64x128xf32>
    %102 = arith.addf %74, %101 : vector<64x128xf32>
    %103 = vector.extract_strided_slice %45 {offsets = [0, 64], sizes = [64, 32], strides = [1, 1]} : vector<64x384xf32> to vector<64x32xf32>
    %104 = arith.truncf %103 : vector<64x32xf32> to vector<64x32xbf16>
    %105 = vector.extract_strided_slice %45 {offsets = [0, 192], sizes = [64, 32], strides = [1, 1]} : vector<64x384xf32> to vector<64x32xf32>
    %106 = arith.truncf %105 : vector<64x32xf32> to vector<64x32xbf16>
    %107 = vector.extract_strided_slice %45 {offsets = [0, 320], sizes = [64, 32], strides = [1, 1]} : vector<64x384xf32> to vector<64x32xf32>
    %108 = arith.truncf %107 : vector<64x32xf32> to vector<64x32xbf16>
    %cst_46 = arith.constant dense<0.000000e+00> : vector<64x64xf32>
    %109 = tpu.matmul %104, %106, %cst_46 {dimension_numbers = #tpu.dot_dimension_numbers<[1], [1], [0], [0], [0, 0, 1, 0], [], []>} : vector<64x32xbf16>, vector<64x32xbf16>, vector<64x64xf32> -> vector<64x64xf32>
    %cst_47 = arith.constant 0.176776692 : f32
    %110 = vector.broadcast %cst_47 : f32 to vector<64x64xf32>
    %111 = arith.mulf %109, %110 : vector<64x64xf32>
    %112 = vector.broadcast %11 : vector<1x64xf32> to vector<64x64xf32>
    %113 = arith.addf %111, %112 : vector<64x64xf32>
    %cst_48 = arith.constant dense<0xFF800000> : vector<64xf32>
    %114 = vector.multi_reduction <maximumf>, %113, %cst_48 [1] : vector<64x64xf32> to vector<64xf32>
    %115 = vector.shape_cast %114 : vector<64xf32> to vector<64x1xf32>
    %116 = vector.broadcast %115 : vector<64x1xf32> to vector<64x64xf32>
    %117 = arith.subf %113, %116 : vector<64x64xf32>
    %118 = math.exp %117 : vector<64x64xf32>
    %cst_49 = arith.constant dense<0.000000e+00> : vector<64xf32>
    %119 = vector.multi_reduction <add>, %118, %cst_49 [1] : vector<64x64xf32> to vector<64xf32>
    %120 = vector.shape_cast %119 : vector<64xf32> to vector<64x1xf32>
    %121 = tpu.reciprocal %120 {approx = true} : vector<64x1xf32> -> vector<64x1xf32>
    %122 = vector.broadcast %121 : vector<64x1xf32> to vector<64x64xf32>
    %123 = arith.mulf %118, %122 : vector<64x64xf32>
    %124 = arith.truncf %123 : vector<64x64xf32> to vector<64x64xbf16>
    %cst_50 = arith.constant dense<0.000000e+00> : vector<64x32xf32>
    %125 = tpu.matmul %124, %108, %cst_50 {dimension_numbers = #tpu.dot_dimension_numbers<[1], [0], [0], [1], [0, 0, 1, 1], [], []>} : vector<64x64xbf16>, vector<64x32xbf16>, vector<64x32xf32> -> vector<64x32xf32>
    %126 = arith.truncf %125 : vector<64x32xf32> to vector<64x32xbf16>
    %c0_51 = arith.constant 0 : index
    %c2 = arith.constant 2 : index
    %c0_52 = arith.constant 0 : index
    %c0_53 = arith.constant 0 : index
    %127 = vector.load %arg9[%c0_51, %c2, %c0_52, %c0_53] : memref<2x4x32x128xbf16, #tpu.memory_space<vmem>>, vector<1x1x32x128xbf16>
    %128 = vector.shape_cast %127 : vector<1x1x32x128xbf16> to vector<32x128xbf16>
    %cst_54 = arith.constant dense<0.000000e+00> : vector<64x128xf32>
    %129 = tpu.matmul %126, %128, %cst_54 {dimension_numbers = #tpu.dot_dimension_numbers<[1], [0], [0], [1], [0, 0, 1, 1], [], []>} : vector<64x32xbf16>, vector<32x128xbf16>, vector<64x128xf32> -> vector<64x128xf32>
    %130 = arith.addf %102, %129 : vector<64x128xf32>
    %131 = vector.extract_strided_slice %45 {offsets = [0, 96], sizes = [64, 32], strides = [1, 1]} : vector<64x384xf32> to vector<64x32xf32>
    %132 = arith.truncf %131 : vector<64x32xf32> to vector<64x32xbf16>
    %133 = vector.extract_strided_slice %45 {offsets = [0, 224], sizes = [64, 32], strides = [1, 1]} : vector<64x384xf32> to vector<64x32xf32>
    %134 = arith.truncf %133 : vector<64x32xf32> to vector<64x32xbf16>
    %135 = vector.extract_strided_slice %45 {offsets = [0, 352], sizes = [64, 32], strides = [1, 1]} : vector<64x384xf32> to vector<64x32xf32>
    %136 = arith.truncf %135 : vector<64x32xf32> to vector<64x32xbf16>
    %cst_55 = arith.constant dense<0.000000e+00> : vector<64x64xf32>
    %137 = tpu.matmul %132, %134, %cst_55 {dimension_numbers = #tpu.dot_dimension_numbers<[1], [1], [0], [0], [0, 0, 1, 0], [], []>} : vector<64x32xbf16>, vector<64x32xbf16>, vector<64x64xf32> -> vector<64x64xf32>
    %cst_56 = arith.constant 0.176776692 : f32
    %138 = vector.broadcast %cst_56 : f32 to vector<64x64xf32>
    %139 = arith.mulf %137, %138 : vector<64x64xf32>
    %140 = vector.broadcast %11 : vector<1x64xf32> to vector<64x64xf32>
    %141 = arith.addf %139, %140 : vector<64x64xf32>
    %cst_57 = arith.constant dense<0xFF800000> : vector<64xf32>
    %142 = vector.multi_reduction <maximumf>, %141, %cst_57 [1] : vector<64x64xf32> to vector<64xf32>
    %143 = vector.shape_cast %142 : vector<64xf32> to vector<64x1xf32>
    %144 = vector.broadcast %143 : vector<64x1xf32> to vector<64x64xf32>
    %145 = arith.subf %141, %144 : vector<64x64xf32>
    %146 = math.exp %145 : vector<64x64xf32>
    %cst_58 = arith.constant dense<0.000000e+00> : vector<64xf32>
    %147 = vector.multi_reduction <add>, %146, %cst_58 [1] : vector<64x64xf32> to vector<64xf32>
    %148 = vector.shape_cast %147 : vector<64xf32> to vector<64x1xf32>
    %149 = tpu.reciprocal %148 {approx = true} : vector<64x1xf32> -> vector<64x1xf32>
    %150 = vector.broadcast %149 : vector<64x1xf32> to vector<64x64xf32>
    %151 = arith.mulf %146, %150 : vector<64x64xf32>
    %152 = arith.truncf %151 : vector<64x64xf32> to vector<64x64xbf16>
    %cst_59 = arith.constant dense<0.000000e+00> : vector<64x32xf32>
    %153 = tpu.matmul %152, %136, %cst_59 {dimension_numbers = #tpu.dot_dimension_numbers<[1], [0], [0], [1], [0, 0, 1, 1], [], []>} : vector<64x64xbf16>, vector<64x32xbf16>, vector<64x32xf32> -> vector<64x32xf32>
    %154 = arith.truncf %153 : vector<64x32xf32> to vector<64x32xbf16>
    %c0_60 = arith.constant 0 : index
    %c3 = arith.constant 3 : index
    %c0_61 = arith.constant 0 : index
    %c0_62 = arith.constant 0 : index
    %155 = vector.load %arg9[%c0_60, %c3, %c0_61, %c0_62] : memref<2x4x32x128xbf16, #tpu.memory_space<vmem>>, vector<1x1x32x128xbf16>
    %156 = vector.shape_cast %155 : vector<1x1x32x128xbf16> to vector<32x128xbf16>
    %cst_63 = arith.constant dense<0.000000e+00> : vector<64x128xf32>
    %157 = tpu.matmul %154, %156, %cst_63 {dimension_numbers = #tpu.dot_dimension_numbers<[1], [0], [0], [1], [0, 0, 1, 1], [], []>} : vector<64x32xbf16>, vector<32x128xbf16>, vector<64x128xf32> -> vector<64x128xf32>
    %158 = arith.addf %130, %157 : vector<64x128xf32>
    %159 = arith.addf %5, %158 : vector<64x128xf32>
    %c0_64 = arith.constant 0 : index
    %c0_65 = arith.constant 0 : index
    %c0_66 = arith.constant 0 : index
    %160 = vector.load %arg10[%c0_64, %c0_65, %c0_66] : memref<2x1x128xf32, #tpu.memory_space<vmem>>, vector<1x1x128xf32>
    %161 = vector.shape_cast %160 : vector<1x1x128xf32> to vector<1x128xf32>
    %162 = vector.broadcast %161 : vector<1x128xf32> to vector<64x128xf32>
    %163 = arith.addf %159, %162 : vector<64x128xf32>
    %cst_67 = arith.constant dense<0.000000e+00> : vector<64xf32>
    %164 = vector.multi_reduction <add>, %163, %cst_67 [1] : vector<64x128xf32> to vector<64xf32>
    %165 = vector.shape_cast %164 : vector<64xf32> to vector<64x1xf32>
    %cst_68 = arith.constant 1.280000e+02 : f32
    %166 = vector.broadcast %cst_68 : f32 to vector<64x1xf32>
    %167 = arith.divf %165, %166 : vector<64x1xf32>
    %168 = vector.broadcast %167 : vector<64x1xf32> to vector<64x128xf32>
    %169 = arith.subf %163, %168 : vector<64x128xf32>
    %170 = arith.mulf %169, %169 : vector<64x128xf32>
    %cst_69 = arith.constant dense<0.000000e+00> : vector<64xf32>
    %171 = vector.multi_reduction <add>, %170, %cst_69 [1] : vector<64x128xf32> to vector<64xf32>
    %172 = vector.shape_cast %171 : vector<64xf32> to vector<64x1xf32>
    %cst_70 = arith.constant 1.280000e+02 : f32
    %173 = vector.broadcast %cst_70 : f32 to vector<64x1xf32>
    %174 = arith.divf %172, %173 : vector<64x1xf32>
    %175 = vector.broadcast %167 : vector<64x1xf32> to vector<64x128xf32>
    %176 = arith.subf %163, %175 : vector<64x128xf32>
    %cst_71 = arith.constant 9.99999997E-7 : f32
    %177 = vector.broadcast %cst_71 : f32 to vector<64x1xf32>
    %178 = arith.addf %174, %177 : vector<64x1xf32>
    %179 = math.rsqrt %178 : vector<64x1xf32>
    %180 = vector.broadcast %179 : vector<64x1xf32> to vector<64x128xf32>
    %181 = arith.mulf %176, %180 : vector<64x128xf32>
    %c0_72 = arith.constant 0 : index
    %c0_73 = arith.constant 0 : index
    %c0_74 = arith.constant 0 : index
    %182 = vector.load %arg11[%c0_72, %c0_73, %c0_74] : memref<2x1x128xf32, #tpu.memory_space<vmem>>, vector<1x1x128xf32>
    %183 = vector.shape_cast %182 : vector<1x1x128xf32> to vector<1x128xf32>
    %184 = vector.broadcast %183 : vector<1x128xf32> to vector<64x128xf32>
    %185 = arith.mulf %181, %184 : vector<64x128xf32>
    %c0_75 = arith.constant 0 : index
    %c0_76 = arith.constant 0 : index
    %c0_77 = arith.constant 0 : index
    %186 = vector.load %arg12[%c0_75, %c0_76, %c0_77] : memref<2x1x128xf32, #tpu.memory_space<vmem>>, vector<1x1x128xf32>
    %187 = vector.shape_cast %186 : vector<1x1x128xf32> to vector<1x128xf32>
    %188 = vector.broadcast %187 : vector<1x128xf32> to vector<64x128xf32>
    %189 = arith.addf %185, %188 : vector<64x128xf32>
    %190 = arith.truncf %189 : vector<64x128xf32> to vector<64x128xbf16>
    %c0_78 = arith.constant 0 : index
    %c0_79 = arith.constant 0 : index
    %c0_80 = arith.constant 0 : index
    %191 = vector.load %arg13[%c0_78, %c0_79, %c0_80] : memref<2x128x256xbf16, #tpu.memory_space<vmem>>, vector<1x128x256xbf16>
    %192 = vector.shape_cast %191 : vector<1x128x256xbf16> to vector<128x256xbf16>
    %cst_81 = arith.constant dense<0.000000e+00> : vector<64x256xf32>
    %193 = tpu.matmul %190, %192, %cst_81 {dimension_numbers = #tpu.dot_dimension_numbers<[1], [0], [0], [1], [0, 0, 1, 1], [], []>} : vector<64x128xbf16>, vector<128x256xbf16>, vector<64x256xf32> -> vector<64x256xf32>
    %c0_82 = arith.constant 0 : index
    %c0_83 = arith.constant 0 : index
    %c0_84 = arith.constant 0 : index
    %194 = vector.load %arg14[%c0_82, %c0_83, %c0_84] : memref<2x1x256xf32, #tpu.memory_space<vmem>>, vector<1x1x256xf32>
    %195 = vector.shape_cast %194 : vector<1x1x256xf32> to vector<1x256xf32>
    %196 = vector.broadcast %195 : vector<1x256xf32> to vector<64x256xf32>
    %197 = arith.addf %193, %196 : vector<64x256xf32>
    %198 = arith.mulf %197, %197 : vector<64x256xf32>
    %199 = arith.mulf %197, %198 : vector<64x256xf32>
    %cst_85 = arith.constant 4.471500e-02 : f32
    %200 = vector.broadcast %cst_85 : f32 to vector<64x256xf32>
    %201 = arith.mulf %200, %199 : vector<64x256xf32>
    %202 = arith.addf %197, %201 : vector<64x256xf32>
    %cst_86 = arith.constant 0.797884583 : f32
    %203 = vector.broadcast %cst_86 : f32 to vector<64x256xf32>
    %204 = arith.mulf %203, %202 : vector<64x256xf32>
    %205 = math.tanh %204 : vector<64x256xf32>
    %cst_87 = arith.constant 1.000000e+00 : f32
    %206 = vector.broadcast %cst_87 : f32 to vector<64x256xf32>
    %207 = arith.addf %206, %205 : vector<64x256xf32>
    %cst_88 = arith.constant 5.000000e-01 : f32
    %208 = vector.broadcast %cst_88 : f32 to vector<64x256xf32>
    %209 = arith.mulf %208, %207 : vector<64x256xf32>
    %210 = arith.mulf %197, %209 : vector<64x256xf32>
    %211 = arith.truncf %210 : vector<64x256xf32> to vector<64x256xbf16>
    %c0_89 = arith.constant 0 : index
    %c0_90 = arith.constant 0 : index
    %c0_91 = arith.constant 0 : index
    %212 = vector.load %arg15[%c0_89, %c0_90, %c0_91] : memref<2x256x128xbf16, #tpu.memory_space<vmem>>, vector<1x256x128xbf16>
    %213 = vector.shape_cast %212 : vector<1x256x128xbf16> to vector<256x128xbf16>
    %cst_92 = arith.constant dense<0.000000e+00> : vector<64x128xf32>
    %214 = tpu.matmul %211, %213, %cst_92 {dimension_numbers = #tpu.dot_dimension_numbers<[1], [0], [0], [1], [0, 0, 1, 1], [], []>} : vector<64x256xbf16>, vector<256x128xbf16>, vector<64x128xf32> -> vector<64x128xf32>
    %c0_93 = arith.constant 0 : index
    %c0_94 = arith.constant 0 : index
    %c0_95 = arith.constant 0 : index
    %215 = vector.load %arg16[%c0_93, %c0_94, %c0_95] : memref<2x1x128xf32, #tpu.memory_space<vmem>>, vector<1x1x128xf32>
    %216 = vector.shape_cast %215 : vector<1x1x128xf32> to vector<1x128xf32>
    %217 = vector.broadcast %216 : vector<1x128xf32> to vector<64x128xf32>
    %218 = arith.addf %214, %217 : vector<64x128xf32>
    %219 = arith.addf %163, %218 : vector<64x128xf32>
    %cst_96 = arith.constant dense<0.000000e+00> : vector<64xf32>
    %220 = vector.multi_reduction <add>, %219, %cst_96 [1] : vector<64x128xf32> to vector<64xf32>
    %221 = vector.shape_cast %220 : vector<64xf32> to vector<64x1xf32>
    %cst_97 = arith.constant 1.280000e+02 : f32
    %222 = vector.broadcast %cst_97 : f32 to vector<64x1xf32>
    %223 = arith.divf %221, %222 : vector<64x1xf32>
    %224 = vector.broadcast %223 : vector<64x1xf32> to vector<64x128xf32>
    %225 = arith.subf %219, %224 : vector<64x128xf32>
    %226 = arith.mulf %225, %225 : vector<64x128xf32>
    %cst_98 = arith.constant dense<0.000000e+00> : vector<64xf32>
    %227 = vector.multi_reduction <add>, %226, %cst_98 [1] : vector<64x128xf32> to vector<64xf32>
    %228 = vector.shape_cast %227 : vector<64xf32> to vector<64x1xf32>
    %cst_99 = arith.constant 1.280000e+02 : f32
    %229 = vector.broadcast %cst_99 : f32 to vector<64x1xf32>
    %230 = arith.divf %228, %229 : vector<64x1xf32>
    %231 = vector.broadcast %223 : vector<64x1xf32> to vector<64x128xf32>
    %232 = arith.subf %219, %231 : vector<64x128xf32>
    %cst_100 = arith.constant 9.99999997E-7 : f32
    %233 = vector.broadcast %cst_100 : f32 to vector<64x1xf32>
    %234 = arith.addf %230, %233 : vector<64x1xf32>
    %235 = math.rsqrt %234 : vector<64x1xf32>
    %236 = vector.broadcast %235 : vector<64x1xf32> to vector<64x128xf32>
    %237 = arith.mulf %232, %236 : vector<64x128xf32>
    %c1_101 = arith.constant 1 : index
    %c0_102 = arith.constant 0 : index
    %c0_103 = arith.constant 0 : index
    %238 = vector.load %arg5[%c1_101, %c0_102, %c0_103] : memref<2x1x128xf32, #tpu.memory_space<vmem>>, vector<1x1x128xf32>
    %239 = vector.shape_cast %238 : vector<1x1x128xf32> to vector<1x128xf32>
    %240 = vector.broadcast %239 : vector<1x128xf32> to vector<64x128xf32>
    %241 = arith.mulf %237, %240 : vector<64x128xf32>
    %c1_104 = arith.constant 1 : index
    %c0_105 = arith.constant 0 : index
    %c0_106 = arith.constant 0 : index
    %242 = vector.load %arg6[%c1_104, %c0_105, %c0_106] : memref<2x1x128xf32, #tpu.memory_space<vmem>>, vector<1x1x128xf32>
    %243 = vector.shape_cast %242 : vector<1x1x128xf32> to vector<1x128xf32>
    %244 = vector.broadcast %243 : vector<1x128xf32> to vector<64x128xf32>
    %245 = arith.addf %241, %244 : vector<64x128xf32>
    %246 = arith.truncf %245 : vector<64x128xf32> to vector<64x128xbf16>
    %c1_107 = arith.constant 1 : index
    %c0_108 = arith.constant 0 : index
    %c0_109 = arith.constant 0 : index
    %247 = vector.load %arg7[%c1_107, %c0_108, %c0_109] : memref<2x128x384xbf16, #tpu.memory_space<vmem>>, vector<1x128x384xbf16>
    %248 = vector.shape_cast %247 : vector<1x128x384xbf16> to vector<128x384xbf16>
    %cst_110 = arith.constant dense<0.000000e+00> : vector<64x384xf32>
    %249 = tpu.matmul %246, %248, %cst_110 {dimension_numbers = #tpu.dot_dimension_numbers<[1], [0], [0], [1], [0, 0, 1, 1], [], []>} : vector<64x128xbf16>, vector<128x384xbf16>, vector<64x384xf32> -> vector<64x384xf32>
    %c1_111 = arith.constant 1 : index
    %c0_112 = arith.constant 0 : index
    %c0_113 = arith.constant 0 : index
    %250 = vector.load %arg8[%c1_111, %c0_112, %c0_113] : memref<2x1x384xf32, #tpu.memory_space<vmem>>, vector<1x1x384xf32>
    %251 = vector.shape_cast %250 : vector<1x1x384xf32> to vector<1x384xf32>
    %252 = vector.broadcast %251 : vector<1x384xf32> to vector<64x384xf32>
    %253 = arith.addf %249, %252 : vector<64x384xf32>
    %cst_114 = arith.constant 0.000000e+00 : f32
    %254 = vector.broadcast %cst_114 : f32 to vector<64x128xf32>
    %255 = vector.extract_strided_slice %253 {offsets = [0, 0], sizes = [64, 32], strides = [1, 1]} : vector<64x384xf32> to vector<64x32xf32>
    %256 = arith.truncf %255 : vector<64x32xf32> to vector<64x32xbf16>
    %257 = vector.extract_strided_slice %253 {offsets = [0, 128], sizes = [64, 32], strides = [1, 1]} : vector<64x384xf32> to vector<64x32xf32>
    %258 = arith.truncf %257 : vector<64x32xf32> to vector<64x32xbf16>
    %259 = vector.extract_strided_slice %253 {offsets = [0, 256], sizes = [64, 32], strides = [1, 1]} : vector<64x384xf32> to vector<64x32xf32>
    %260 = arith.truncf %259 : vector<64x32xf32> to vector<64x32xbf16>
    %cst_115 = arith.constant dense<0.000000e+00> : vector<64x64xf32>
    %261 = tpu.matmul %256, %258, %cst_115 {dimension_numbers = #tpu.dot_dimension_numbers<[1], [1], [0], [0], [0, 0, 1, 0], [], []>} : vector<64x32xbf16>, vector<64x32xbf16>, vector<64x64xf32> -> vector<64x64xf32>
    %cst_116 = arith.constant 0.176776692 : f32
    %262 = vector.broadcast %cst_116 : f32 to vector<64x64xf32>
    %263 = arith.mulf %261, %262 : vector<64x64xf32>
    %264 = vector.broadcast %11 : vector<1x64xf32> to vector<64x64xf32>
    %265 = arith.addf %263, %264 : vector<64x64xf32>
    %cst_117 = arith.constant dense<0xFF800000> : vector<64xf32>
    %266 = vector.multi_reduction <maximumf>, %265, %cst_117 [1] : vector<64x64xf32> to vector<64xf32>
    %267 = vector.shape_cast %266 : vector<64xf32> to vector<64x1xf32>
    %268 = vector.broadcast %267 : vector<64x1xf32> to vector<64x64xf32>
    %269 = arith.subf %265, %268 : vector<64x64xf32>
    %270 = math.exp %269 : vector<64x64xf32>
    %cst_118 = arith.constant dense<0.000000e+00> : vector<64xf32>
    %271 = vector.multi_reduction <add>, %270, %cst_118 [1] : vector<64x64xf32> to vector<64xf32>
    %272 = vector.shape_cast %271 : vector<64xf32> to vector<64x1xf32>
    %273 = tpu.reciprocal %272 {approx = true} : vector<64x1xf32> -> vector<64x1xf32>
    %274 = vector.broadcast %273 : vector<64x1xf32> to vector<64x64xf32>
    %275 = arith.mulf %270, %274 : vector<64x64xf32>
    %276 = arith.truncf %275 : vector<64x64xf32> to vector<64x64xbf16>
    %cst_119 = arith.constant dense<0.000000e+00> : vector<64x32xf32>
    %277 = tpu.matmul %276, %260, %cst_119 {dimension_numbers = #tpu.dot_dimension_numbers<[1], [0], [0], [1], [0, 0, 1, 1], [], []>} : vector<64x64xbf16>, vector<64x32xbf16>, vector<64x32xf32> -> vector<64x32xf32>
    %278 = arith.truncf %277 : vector<64x32xf32> to vector<64x32xbf16>
    %c1_120 = arith.constant 1 : index
    %c0_121 = arith.constant 0 : index
    %c0_122 = arith.constant 0 : index
    %c0_123 = arith.constant 0 : index
    %279 = vector.load %arg9[%c1_120, %c0_121, %c0_122, %c0_123] : memref<2x4x32x128xbf16, #tpu.memory_space<vmem>>, vector<1x1x32x128xbf16>
    %280 = vector.shape_cast %279 : vector<1x1x32x128xbf16> to vector<32x128xbf16>
    %cst_124 = arith.constant dense<0.000000e+00> : vector<64x128xf32>
    %281 = tpu.matmul %278, %280, %cst_124 {dimension_numbers = #tpu.dot_dimension_numbers<[1], [0], [0], [1], [0, 0, 1, 1], [], []>} : vector<64x32xbf16>, vector<32x128xbf16>, vector<64x128xf32> -> vector<64x128xf32>
    %282 = arith.addf %254, %281 : vector<64x128xf32>
    %283 = vector.extract_strided_slice %253 {offsets = [0, 32], sizes = [64, 32], strides = [1, 1]} : vector<64x384xf32> to vector<64x32xf32>
    %284 = arith.truncf %283 : vector<64x32xf32> to vector<64x32xbf16>
    %285 = vector.extract_strided_slice %253 {offsets = [0, 160], sizes = [64, 32], strides = [1, 1]} : vector<64x384xf32> to vector<64x32xf32>
    %286 = arith.truncf %285 : vector<64x32xf32> to vector<64x32xbf16>
    %287 = vector.extract_strided_slice %253 {offsets = [0, 288], sizes = [64, 32], strides = [1, 1]} : vector<64x384xf32> to vector<64x32xf32>
    %288 = arith.truncf %287 : vector<64x32xf32> to vector<64x32xbf16>
    %cst_125 = arith.constant dense<0.000000e+00> : vector<64x64xf32>
    %289 = tpu.matmul %284, %286, %cst_125 {dimension_numbers = #tpu.dot_dimension_numbers<[1], [1], [0], [0], [0, 0, 1, 0], [], []>} : vector<64x32xbf16>, vector<64x32xbf16>, vector<64x64xf32> -> vector<64x64xf32>
    %cst_126 = arith.constant 0.176776692 : f32
    %290 = vector.broadcast %cst_126 : f32 to vector<64x64xf32>
    %291 = arith.mulf %289, %290 : vector<64x64xf32>
    %292 = vector.broadcast %11 : vector<1x64xf32> to vector<64x64xf32>
    %293 = arith.addf %291, %292 : vector<64x64xf32>
    %cst_127 = arith.constant dense<0xFF800000> : vector<64xf32>
    %294 = vector.multi_reduction <maximumf>, %293, %cst_127 [1] : vector<64x64xf32> to vector<64xf32>
    %295 = vector.shape_cast %294 : vector<64xf32> to vector<64x1xf32>
    %296 = vector.broadcast %295 : vector<64x1xf32> to vector<64x64xf32>
    %297 = arith.subf %293, %296 : vector<64x64xf32>
    %298 = math.exp %297 : vector<64x64xf32>
    %cst_128 = arith.constant dense<0.000000e+00> : vector<64xf32>
    %299 = vector.multi_reduction <add>, %298, %cst_128 [1] : vector<64x64xf32> to vector<64xf32>
    %300 = vector.shape_cast %299 : vector<64xf32> to vector<64x1xf32>
    %301 = tpu.reciprocal %300 {approx = true} : vector<64x1xf32> -> vector<64x1xf32>
    %302 = vector.broadcast %301 : vector<64x1xf32> to vector<64x64xf32>
    %303 = arith.mulf %298, %302 : vector<64x64xf32>
    %304 = arith.truncf %303 : vector<64x64xf32> to vector<64x64xbf16>
    %cst_129 = arith.constant dense<0.000000e+00> : vector<64x32xf32>
    %305 = tpu.matmul %304, %288, %cst_129 {dimension_numbers = #tpu.dot_dimension_numbers<[1], [0], [0], [1], [0, 0, 1, 1], [], []>} : vector<64x64xbf16>, vector<64x32xbf16>, vector<64x32xf32> -> vector<64x32xf32>
    %306 = arith.truncf %305 : vector<64x32xf32> to vector<64x32xbf16>
    %c1_130 = arith.constant 1 : index
    %c1_131 = arith.constant 1 : index
    %c0_132 = arith.constant 0 : index
    %c0_133 = arith.constant 0 : index
    %307 = vector.load %arg9[%c1_130, %c1_131, %c0_132, %c0_133] : memref<2x4x32x128xbf16, #tpu.memory_space<vmem>>, vector<1x1x32x128xbf16>
    %308 = vector.shape_cast %307 : vector<1x1x32x128xbf16> to vector<32x128xbf16>
    %cst_134 = arith.constant dense<0.000000e+00> : vector<64x128xf32>
    %309 = tpu.matmul %306, %308, %cst_134 {dimension_numbers = #tpu.dot_dimension_numbers<[1], [0], [0], [1], [0, 0, 1, 1], [], []>} : vector<64x32xbf16>, vector<32x128xbf16>, vector<64x128xf32> -> vector<64x128xf32>
    %310 = arith.addf %282, %309 : vector<64x128xf32>
    %311 = vector.extract_strided_slice %253 {offsets = [0, 64], sizes = [64, 32], strides = [1, 1]} : vector<64x384xf32> to vector<64x32xf32>
    %312 = arith.truncf %311 : vector<64x32xf32> to vector<64x32xbf16>
    %313 = vector.extract_strided_slice %253 {offsets = [0, 192], sizes = [64, 32], strides = [1, 1]} : vector<64x384xf32> to vector<64x32xf32>
    %314 = arith.truncf %313 : vector<64x32xf32> to vector<64x32xbf16>
    %315 = vector.extract_strided_slice %253 {offsets = [0, 320], sizes = [64, 32], strides = [1, 1]} : vector<64x384xf32> to vector<64x32xf32>
    %316 = arith.truncf %315 : vector<64x32xf32> to vector<64x32xbf16>
    %cst_135 = arith.constant dense<0.000000e+00> : vector<64x64xf32>
    %317 = tpu.matmul %312, %314, %cst_135 {dimension_numbers = #tpu.dot_dimension_numbers<[1], [1], [0], [0], [0, 0, 1, 0], [], []>} : vector<64x32xbf16>, vector<64x32xbf16>, vector<64x64xf32> -> vector<64x64xf32>
    %cst_136 = arith.constant 0.176776692 : f32
    %318 = vector.broadcast %cst_136 : f32 to vector<64x64xf32>
    %319 = arith.mulf %317, %318 : vector<64x64xf32>
    %320 = vector.broadcast %11 : vector<1x64xf32> to vector<64x64xf32>
    %321 = arith.addf %319, %320 : vector<64x64xf32>
    %cst_137 = arith.constant dense<0xFF800000> : vector<64xf32>
    %322 = vector.multi_reduction <maximumf>, %321, %cst_137 [1] : vector<64x64xf32> to vector<64xf32>
    %323 = vector.shape_cast %322 : vector<64xf32> to vector<64x1xf32>
    %324 = vector.broadcast %323 : vector<64x1xf32> to vector<64x64xf32>
    %325 = arith.subf %321, %324 : vector<64x64xf32>
    %326 = math.exp %325 : vector<64x64xf32>
    %cst_138 = arith.constant dense<0.000000e+00> : vector<64xf32>
    %327 = vector.multi_reduction <add>, %326, %cst_138 [1] : vector<64x64xf32> to vector<64xf32>
    %328 = vector.shape_cast %327 : vector<64xf32> to vector<64x1xf32>
    %329 = tpu.reciprocal %328 {approx = true} : vector<64x1xf32> -> vector<64x1xf32>
    %330 = vector.broadcast %329 : vector<64x1xf32> to vector<64x64xf32>
    %331 = arith.mulf %326, %330 : vector<64x64xf32>
    %332 = arith.truncf %331 : vector<64x64xf32> to vector<64x64xbf16>
    %cst_139 = arith.constant dense<0.000000e+00> : vector<64x32xf32>
    %333 = tpu.matmul %332, %316, %cst_139 {dimension_numbers = #tpu.dot_dimension_numbers<[1], [0], [0], [1], [0, 0, 1, 1], [], []>} : vector<64x64xbf16>, vector<64x32xbf16>, vector<64x32xf32> -> vector<64x32xf32>
    %334 = arith.truncf %333 : vector<64x32xf32> to vector<64x32xbf16>
    %c1_140 = arith.constant 1 : index
    %c2_141 = arith.constant 2 : index
    %c0_142 = arith.constant 0 : index
    %c0_143 = arith.constant 0 : index
    %335 = vector.load %arg9[%c1_140, %c2_141, %c0_142, %c0_143] : memref<2x4x32x128xbf16, #tpu.memory_space<vmem>>, vector<1x1x32x128xbf16>
    %336 = vector.shape_cast %335 : vector<1x1x32x128xbf16> to vector<32x128xbf16>
    %cst_144 = arith.constant dense<0.000000e+00> : vector<64x128xf32>
    %337 = tpu.matmul %334, %336, %cst_144 {dimension_numbers = #tpu.dot_dimension_numbers<[1], [0], [0], [1], [0, 0, 1, 1], [], []>} : vector<64x32xbf16>, vector<32x128xbf16>, vector<64x128xf32> -> vector<64x128xf32>
    %338 = arith.addf %310, %337 : vector<64x128xf32>
    %339 = vector.extract_strided_slice %253 {offsets = [0, 96], sizes = [64, 32], strides = [1, 1]} : vector<64x384xf32> to vector<64x32xf32>
    %340 = arith.truncf %339 : vector<64x32xf32> to vector<64x32xbf16>
    %341 = vector.extract_strided_slice %253 {offsets = [0, 224], sizes = [64, 32], strides = [1, 1]} : vector<64x384xf32> to vector<64x32xf32>
    %342 = arith.truncf %341 : vector<64x32xf32> to vector<64x32xbf16>
    %343 = vector.extract_strided_slice %253 {offsets = [0, 352], sizes = [64, 32], strides = [1, 1]} : vector<64x384xf32> to vector<64x32xf32>
    %344 = arith.truncf %343 : vector<64x32xf32> to vector<64x32xbf16>
    %cst_145 = arith.constant dense<0.000000e+00> : vector<64x64xf32>
    %345 = tpu.matmul %340, %342, %cst_145 {dimension_numbers = #tpu.dot_dimension_numbers<[1], [1], [0], [0], [0, 0, 1, 0], [], []>} : vector<64x32xbf16>, vector<64x32xbf16>, vector<64x64xf32> -> vector<64x64xf32>
    %cst_146 = arith.constant 0.176776692 : f32
    %346 = vector.broadcast %cst_146 : f32 to vector<64x64xf32>
    %347 = arith.mulf %345, %346 : vector<64x64xf32>
    %348 = vector.broadcast %11 : vector<1x64xf32> to vector<64x64xf32>
    %349 = arith.addf %347, %348 : vector<64x64xf32>
    %cst_147 = arith.constant dense<0xFF800000> : vector<64xf32>
    %350 = vector.multi_reduction <maximumf>, %349, %cst_147 [1] : vector<64x64xf32> to vector<64xf32>
    %351 = vector.shape_cast %350 : vector<64xf32> to vector<64x1xf32>
    %352 = vector.broadcast %351 : vector<64x1xf32> to vector<64x64xf32>
    %353 = arith.subf %349, %352 : vector<64x64xf32>
    %354 = math.exp %353 : vector<64x64xf32>
    %cst_148 = arith.constant dense<0.000000e+00> : vector<64xf32>
    %355 = vector.multi_reduction <add>, %354, %cst_148 [1] : vector<64x64xf32> to vector<64xf32>
    %356 = vector.shape_cast %355 : vector<64xf32> to vector<64x1xf32>
    %357 = tpu.reciprocal %356 {approx = true} : vector<64x1xf32> -> vector<64x1xf32>
    %358 = vector.broadcast %357 : vector<64x1xf32> to vector<64x64xf32>
    %359 = arith.mulf %354, %358 : vector<64x64xf32>
    %360 = arith.truncf %359 : vector<64x64xf32> to vector<64x64xbf16>
    %cst_149 = arith.constant dense<0.000000e+00> : vector<64x32xf32>
    %361 = tpu.matmul %360, %344, %cst_149 {dimension_numbers = #tpu.dot_dimension_numbers<[1], [0], [0], [1], [0, 0, 1, 1], [], []>} : vector<64x64xbf16>, vector<64x32xbf16>, vector<64x32xf32> -> vector<64x32xf32>
    %362 = arith.truncf %361 : vector<64x32xf32> to vector<64x32xbf16>
    %c1_150 = arith.constant 1 : index
    %c3_151 = arith.constant 3 : index
    %c0_152 = arith.constant 0 : index
    %c0_153 = arith.constant 0 : index
    %363 = vector.load %arg9[%c1_150, %c3_151, %c0_152, %c0_153] : memref<2x4x32x128xbf16, #tpu.memory_space<vmem>>, vector<1x1x32x128xbf16>
    %364 = vector.shape_cast %363 : vector<1x1x32x128xbf16> to vector<32x128xbf16>
    %cst_154 = arith.constant dense<0.000000e+00> : vector<64x128xf32>
    %365 = tpu.matmul %362, %364, %cst_154 {dimension_numbers = #tpu.dot_dimension_numbers<[1], [0], [0], [1], [0, 0, 1, 1], [], []>} : vector<64x32xbf16>, vector<32x128xbf16>, vector<64x128xf32> -> vector<64x128xf32>
    %366 = arith.addf %338, %365 : vector<64x128xf32>
    %367 = arith.addf %219, %366 : vector<64x128xf32>
    %c1_155 = arith.constant 1 : index
    %c0_156 = arith.constant 0 : index
    %c0_157 = arith.constant 0 : index
    %368 = vector.load %arg10[%c1_155, %c0_156, %c0_157] : memref<2x1x128xf32, #tpu.memory_space<vmem>>, vector<1x1x128xf32>
    %369 = vector.shape_cast %368 : vector<1x1x128xf32> to vector<1x128xf32>
    %370 = vector.broadcast %369 : vector<1x128xf32> to vector<64x128xf32>
    %371 = arith.addf %367, %370 : vector<64x128xf32>
    %cst_158 = arith.constant dense<0.000000e+00> : vector<64xf32>
    %372 = vector.multi_reduction <add>, %371, %cst_158 [1] : vector<64x128xf32> to vector<64xf32>
    %373 = vector.shape_cast %372 : vector<64xf32> to vector<64x1xf32>
    %cst_159 = arith.constant 1.280000e+02 : f32
    %374 = vector.broadcast %cst_159 : f32 to vector<64x1xf32>
    %375 = arith.divf %373, %374 : vector<64x1xf32>
    %376 = vector.broadcast %375 : vector<64x1xf32> to vector<64x128xf32>
    %377 = arith.subf %371, %376 : vector<64x128xf32>
    %378 = arith.mulf %377, %377 : vector<64x128xf32>
    %cst_160 = arith.constant dense<0.000000e+00> : vector<64xf32>
    %379 = vector.multi_reduction <add>, %378, %cst_160 [1] : vector<64x128xf32> to vector<64xf32>
    %380 = vector.shape_cast %379 : vector<64xf32> to vector<64x1xf32>
    %cst_161 = arith.constant 1.280000e+02 : f32
    %381 = vector.broadcast %cst_161 : f32 to vector<64x1xf32>
    %382 = arith.divf %380, %381 : vector<64x1xf32>
    %383 = vector.broadcast %375 : vector<64x1xf32> to vector<64x128xf32>
    %384 = arith.subf %371, %383 : vector<64x128xf32>
    %cst_162 = arith.constant 9.99999997E-7 : f32
    %385 = vector.broadcast %cst_162 : f32 to vector<64x1xf32>
    %386 = arith.addf %382, %385 : vector<64x1xf32>
    %387 = math.rsqrt %386 : vector<64x1xf32>
    %388 = vector.broadcast %387 : vector<64x1xf32> to vector<64x128xf32>
    %389 = arith.mulf %384, %388 : vector<64x128xf32>
    %c1_163 = arith.constant 1 : index
    %c0_164 = arith.constant 0 : index
    %c0_165 = arith.constant 0 : index
    %390 = vector.load %arg11[%c1_163, %c0_164, %c0_165] : memref<2x1x128xf32, #tpu.memory_space<vmem>>, vector<1x1x128xf32>
    %391 = vector.shape_cast %390 : vector<1x1x128xf32> to vector<1x128xf32>
    %392 = vector.broadcast %391 : vector<1x128xf32> to vector<64x128xf32>
    %393 = arith.mulf %389, %392 : vector<64x128xf32>
    %c1_166 = arith.constant 1 : index
    %c0_167 = arith.constant 0 : index
    %c0_168 = arith.constant 0 : index
    %394 = vector.load %arg12[%c1_166, %c0_167, %c0_168] : memref<2x1x128xf32, #tpu.memory_space<vmem>>, vector<1x1x128xf32>
    %395 = vector.shape_cast %394 : vector<1x1x128xf32> to vector<1x128xf32>
    %396 = vector.broadcast %395 : vector<1x128xf32> to vector<64x128xf32>
    %397 = arith.addf %393, %396 : vector<64x128xf32>
    %398 = arith.truncf %397 : vector<64x128xf32> to vector<64x128xbf16>
    %c1_169 = arith.constant 1 : index
    %c0_170 = arith.constant 0 : index
    %c0_171 = arith.constant 0 : index
    %399 = vector.load %arg13[%c1_169, %c0_170, %c0_171] : memref<2x128x256xbf16, #tpu.memory_space<vmem>>, vector<1x128x256xbf16>
    %400 = vector.shape_cast %399 : vector<1x128x256xbf16> to vector<128x256xbf16>
    %cst_172 = arith.constant dense<0.000000e+00> : vector<64x256xf32>
    %401 = tpu.matmul %398, %400, %cst_172 {dimension_numbers = #tpu.dot_dimension_numbers<[1], [0], [0], [1], [0, 0, 1, 1], [], []>} : vector<64x128xbf16>, vector<128x256xbf16>, vector<64x256xf32> -> vector<64x256xf32>
    %c1_173 = arith.constant 1 : index
    %c0_174 = arith.constant 0 : index
    %c0_175 = arith.constant 0 : index
    %402 = vector.load %arg14[%c1_173, %c0_174, %c0_175] : memref<2x1x256xf32, #tpu.memory_space<vmem>>, vector<1x1x256xf32>
    %403 = vector.shape_cast %402 : vector<1x1x256xf32> to vector<1x256xf32>
    %404 = vector.broadcast %403 : vector<1x256xf32> to vector<64x256xf32>
    %405 = arith.addf %401, %404 : vector<64x256xf32>
    %406 = arith.mulf %405, %405 : vector<64x256xf32>
    %407 = arith.mulf %405, %406 : vector<64x256xf32>
    %cst_176 = arith.constant 4.471500e-02 : f32
    %408 = vector.broadcast %cst_176 : f32 to vector<64x256xf32>
    %409 = arith.mulf %408, %407 : vector<64x256xf32>
    %410 = arith.addf %405, %409 : vector<64x256xf32>
    %cst_177 = arith.constant 0.797884583 : f32
    %411 = vector.broadcast %cst_177 : f32 to vector<64x256xf32>
    %412 = arith.mulf %411, %410 : vector<64x256xf32>
    %413 = math.tanh %412 : vector<64x256xf32>
    %cst_178 = arith.constant 1.000000e+00 : f32
    %414 = vector.broadcast %cst_178 : f32 to vector<64x256xf32>
    %415 = arith.addf %414, %413 : vector<64x256xf32>
    %cst_179 = arith.constant 5.000000e-01 : f32
    %416 = vector.broadcast %cst_179 : f32 to vector<64x256xf32>
    %417 = arith.mulf %416, %415 : vector<64x256xf32>
    %418 = arith.mulf %405, %417 : vector<64x256xf32>
    %419 = arith.truncf %418 : vector<64x256xf32> to vector<64x256xbf16>
    %c1_180 = arith.constant 1 : index
    %c0_181 = arith.constant 0 : index
    %c0_182 = arith.constant 0 : index
    %420 = vector.load %arg15[%c1_180, %c0_181, %c0_182] : memref<2x256x128xbf16, #tpu.memory_space<vmem>>, vector<1x256x128xbf16>
    %421 = vector.shape_cast %420 : vector<1x256x128xbf16> to vector<256x128xbf16>
    %cst_183 = arith.constant dense<0.000000e+00> : vector<64x128xf32>
    %422 = tpu.matmul %419, %421, %cst_183 {dimension_numbers = #tpu.dot_dimension_numbers<[1], [0], [0], [1], [0, 0, 1, 1], [], []>} : vector<64x256xbf16>, vector<256x128xbf16>, vector<64x128xf32> -> vector<64x128xf32>
    %c1_184 = arith.constant 1 : index
    %c0_185 = arith.constant 0 : index
    %c0_186 = arith.constant 0 : index
    %423 = vector.load %arg16[%c1_184, %c0_185, %c0_186] : memref<2x1x128xf32, #tpu.memory_space<vmem>>, vector<1x1x128xf32>
    %424 = vector.shape_cast %423 : vector<1x1x128xf32> to vector<1x128xf32>
    %425 = vector.broadcast %424 : vector<1x128xf32> to vector<64x128xf32>
    %426 = arith.addf %422, %425 : vector<64x128xf32>
    %427 = arith.addf %371, %426 : vector<64x128xf32>
    %428 = vector.extract_strided_slice %427 {offsets = [0, 0], sizes = [1, 128], strides = [1, 1]} : vector<64x128xf32> to vector<1x128xf32>
    %c0_187 = arith.constant 0 : index
    %c0_188 = arith.constant 0 : index
    %c0_189 = arith.constant 0 : index
    %429 = vector.load %arg2[%c0_187, %c0_188, %c0_189] : memref<1x1x256xf32, #tpu.memory_space<vmem>>, vector<1x1x256xf32>
    %430 = vector.shape_cast %429 : vector<1x1x256xf32> to vector<1x256xf32>
    %431 = tpu.concatenate %428, %430 in 1 : vector<1x128xf32>, vector<1x256xf32> -> vector<1x384xf32>
    %432 = arith.truncf %431 : vector<1x384xf32> to vector<1x384xbf16>
    %c0_190 = arith.constant 0 : index
    %c0_191 = arith.constant 0 : index
    %433 = vector.load %arg17[%c0_190, %c0_191] : memref<384x512xbf16, #tpu.memory_space<vmem>>, vector<384x512xbf16>
    %cst_192 = arith.constant dense<0.000000e+00> : vector<1x512xf32>
    %434 = tpu.matmul %432, %433, %cst_192 {dimension_numbers = #tpu.dot_dimension_numbers<[1], [0], [0], [1], [0, 0, 1, 1], [], []>} : vector<1x384xbf16>, vector<384x512xbf16>, vector<1x512xf32> -> vector<1x512xf32>
    %c0_193 = arith.constant 0 : index
    %c0_194 = arith.constant 0 : index
    %435 = vector.load %arg18[%c0_193, %c0_194] : memref<1x512xf32, #tpu.memory_space<vmem>>, vector<1x512xf32>
    %436 = arith.addf %434, %435 : vector<1x512xf32>
    %cst_195 = arith.constant 0.000000e+00 : f32
    %437 = vector.broadcast %cst_195 : f32 to vector<1x512xf32>
    %438 = arith.maximumf %436, %437 : vector<1x512xf32>
    %439 = arith.truncf %438 : vector<1x512xf32> to vector<1x512xbf16>
    %c0_196 = arith.constant 0 : index
    %c0_197 = arith.constant 0 : index
    %440 = vector.load %arg19[%c0_196, %c0_197] : memref<512x256xbf16, #tpu.memory_space<vmem>>, vector<512x256xbf16>
    %cst_198 = arith.constant dense<0.000000e+00> : vector<1x256xf32>
    %441 = tpu.matmul %439, %440, %cst_198 {dimension_numbers = #tpu.dot_dimension_numbers<[1], [0], [0], [1], [0, 0, 1, 1], [], []>} : vector<1x512xbf16>, vector<512x256xbf16>, vector<1x256xf32> -> vector<1x256xf32>
    %c0_199 = arith.constant 0 : index
    %c0_200 = arith.constant 0 : index
    %442 = vector.load %arg20[%c0_199, %c0_200] : memref<1x256xf32, #tpu.memory_space<vmem>>, vector<1x256xf32>
    %443 = arith.addf %441, %442 : vector<1x256xf32>
    %cst_201 = arith.constant 0.000000e+00 : f32
    %444 = vector.broadcast %cst_201 : f32 to vector<1x256xf32>
    %445 = arith.maximumf %443, %444 : vector<1x256xf32>
    %446 = arith.truncf %445 : vector<1x256xf32> to vector<1x256xbf16>
    %c0_202 = arith.constant 0 : index
    %c0_203 = arith.constant 0 : index
    %447 = vector.load %arg21[%c0_202, %c0_203] : memref<256x128xbf16, #tpu.memory_space<vmem>>, vector<256x128xbf16>
    %cst_204 = arith.constant dense<0.000000e+00> : vector<1x128xf32>
    %448 = tpu.matmul %446, %447, %cst_204 {dimension_numbers = #tpu.dot_dimension_numbers<[1], [0], [0], [1], [0, 0, 1, 1], [], []>} : vector<1x256xbf16>, vector<256x128xbf16>, vector<1x128xf32> -> vector<1x128xf32>
    %c0_205 = arith.constant 0 : index
    %c0_206 = arith.constant 0 : index
    %449 = vector.load %arg22[%c0_205, %c0_206] : memref<1x128xf32, #tpu.memory_space<vmem>>, vector<1x128xf32>
    %450 = arith.addf %448, %449 : vector<1x128xf32>
    %cst_207 = arith.constant 0.000000e+00 : f32
    %451 = vector.broadcast %cst_207 : f32 to vector<1x128xf32>
    %452 = arith.maximumf %450, %451 : vector<1x128xf32>
    %453 = arith.truncf %452 : vector<1x128xf32> to vector<1x128xbf16>
    %c0_208 = arith.constant 0 : index
    %c0_209 = arith.constant 0 : index
    %454 = vector.load %arg23[%c0_208, %c0_209] : memref<128x128xbf16, #tpu.memory_space<vmem>>, vector<128x128xbf16>
    %cst_210 = arith.constant dense<0.000000e+00> : vector<1x128xf32>
    %455 = tpu.matmul %453, %454, %cst_210 {dimension_numbers = #tpu.dot_dimension_numbers<[1], [0], [0], [1], [0, 0, 1, 1], [], []>} : vector<1x128xbf16>, vector<128x128xbf16>, vector<1x128xf32> -> vector<1x128xf32>
    %c0_211 = arith.constant 0 : index
    %c0_212 = arith.constant 0 : index
    %456 = vector.load %arg24[%c0_211, %c0_212] : memref<1x128xf32, #tpu.memory_space<vmem>>, vector<1x128xf32>
    %457 = arith.addf %455, %456 : vector<1x128xf32>
    %c0_213 = arith.constant 0 : index
    %c0_214 = arith.constant 0 : index
    %c0_215 = arith.constant 0 : index
    %458 = vector.load %arg25[%c0_213, %c0_214, %c0_215] : memref<1x1x128xf32, #tpu.memory_space<vmem>>, vector<1x1x128xf32>
    %459 = vector.shape_cast %458 : vector<1x1x128xf32> to vector<1x128xf32>
    %460 = vector.shape_cast %457 : vector<1x128xf32> to vector<1x1x128xf32>
    tpu.vector_store %arg25[%c0_213, %c0_214, %c0_215], %460 {strides = array<i32>} : memref<1x1x128xf32, #tpu.memory_space<vmem>>, vector<1x1x128xf32>,
    return
  }
  func.func @transform_0(%arg0: i32) -> (i32, i32, i32) {
    %c0_i32 = arith.constant 0 : i32
    %c0_i32_0 = arith.constant 0 : i32
    %c0_i32_1 = arith.constant 0 : i32
    return %arg0, %c0_i32, %c0_i32_0 : i32, i32, i32
  }
  func.func @transform_1(%arg0: i32) -> (i32, i32, i32) {
    %c0_i32 = arith.constant 0 : i32
    %c0_i32_0 = arith.constant 0 : i32
    %c0_i32_1 = arith.constant 0 : i32
    return %arg0, %c0_i32, %c0_i32_0 : i32, i32, i32
  }
  func.func @transform_2(%arg0: i32) -> (i32, i32) {
    %c0_i32 = arith.constant 0 : i32
    %c0_i32_0 = arith.constant 0 : i32
    %c0_i32_1 = arith.constant 0 : i32
    return %c0_i32, %c0_i32_0 : i32, i32
  }
  func.func @transform_3(%arg0: i32) -> (i32, i32) {
    %c0_i32 = arith.constant 0 : i32
    %c0_i32_0 = arith.constant 0 : i32
    %c0_i32_1 = arith.constant 0 : i32
    return %c0_i32, %c0_i32_0 : i32, i32
  }
  func.func @transform_4(%arg0: i32) -> (i32, i32, i32) {
    %c0_i32 = arith.constant 0 : i32
    %c0_i32_0 = arith.constant 0 : i32
    %c0_i32_1 = arith.constant 0 : i32
    %c0_i32_2 = arith.constant 0 : i32
    return %c0_i32, %c0_i32_0, %c0_i32_1 : i32, i32, i32
  }
  func.func @transform_5(%arg0: i32) -> (i32, i32, i32) {
    %c0_i32 = arith.constant 0 : i32
    %c0_i32_0 = arith.constant 0 : i32
    %c0_i32_1 = arith.constant 0 : i32
    %c0_i32_2 = arith.constant 0 : i32
    return %c0_i32, %c0_i32_0, %c0_i32_1 : i32, i32, i32
  }
  func.func @transform_6(%arg0: i32) -> (i32, i32, i32) {
    %c0_i32 = arith.constant 0 : i32
    %c0_i32_0 = arith.constant 0 : i32
    %c0_i32_1 = arith.constant 0 : i32
    %c0_i32_2 = arith.constant 0 : i32
    return %c0_i32, %c0_i32_0, %c0_i32_1 : i32, i32, i32
  }
  func.func @transform_7(%arg0: i32) -> (i32, i32, i32) {
    %c0_i32 = arith.constant 0 : i32
    %c0_i32_0 = arith.constant 0 : i32
    %c0_i32_1 = arith.constant 0 : i32
    %c0_i32_2 = arith.constant 0 : i32
    return %c0_i32, %c0_i32_0, %c0_i32_1 : i32, i32, i32
  }
  func.func @transform_8(%arg0: i32) -> (i32, i32, i32, i32) {
    %c0_i32 = arith.constant 0 : i32
    %c0_i32_0 = arith.constant 0 : i32
    %c0_i32_1 = arith.constant 0 : i32
    %c0_i32_2 = arith.constant 0 : i32
    %c0_i32_3 = arith.constant 0 : i32
    return %c0_i32, %c0_i32_0, %c0_i32_1, %c0_i32_2 : i32, i32, i32, i32
  }
  func.func @transform_9(%arg0: i32) -> (i32, i32, i32) {
    %c0_i32 = arith.constant 0 : i32
    %c0_i32_0 = arith.constant 0 : i32
    %c0_i32_1 = arith.constant 0 : i32
    %c0_i32_2 = arith.constant 0 : i32
    return %c0_i32, %c0_i32_0, %c0_i32_1 : i32, i32, i32
  }
  func.func @transform_10(%arg0: i32) -> (i32, i32, i32) {
    %c0_i32 = arith.constant 0 : i32
    %c0_i32_0 = arith.constant 0 : i32
    %c0_i32_1 = arith.constant 0 : i32
    %c0_i32_2 = arith.constant 0 : i32
    return %c0_i32, %c0_i32_0, %c0_i32_1 : i32, i32, i32
  }
  func.func @transform_11(%arg0: i32) -> (i32, i32, i32) {
    %c0_i32 = arith.constant 0 : i32
    %c0_i32_0 = arith.constant 0 : i32
    %c0_i32_1 = arith.constant 0 : i32
    %c0_i32_2 = arith.constant 0 : i32
    return %c0_i32, %c0_i32_0, %c0_i32_1 : i32, i32, i32
  }
  func.func @transform_12(%arg0: i32) -> (i32, i32, i32) {
    %c0_i32 = arith.constant 0 : i32
    %c0_i32_0 = arith.constant 0 : i32
    %c0_i32_1 = arith.constant 0 : i32
    %c0_i32_2 = arith.constant 0 : i32
    return %c0_i32, %c0_i32_0, %c0_i32_1 : i32, i32, i32
  }
  func.func @transform_13(%arg0: i32) -> (i32, i32, i32) {
    %c0_i32 = arith.constant 0 : i32
    %c0_i32_0 = arith.constant 0 : i32
    %c0_i32_1 = arith.constant 0 : i32
    %c0_i32_2 = arith.constant 0 : i32
    return %c0_i32, %c0_i32_0, %c0_i32_1 : i32, i32, i32
  }
  func.func @transform_14(%arg0: i32) -> (i32, i32, i32) {
    %c0_i32 = arith.constant 0 : i32
    %c0_i32_0 = arith.constant 0 : i32
    %c0_i32_1 = arith.constant 0 : i32
    %c0_i32_2 = arith.constant 0 : i32
    return %c0_i32, %c0_i32_0, %c0_i32_1 : i32, i32, i32
  }
  func.func @transform_15(%arg0: i32) -> (i32, i32, i32) {
    %c0_i32 = arith.constant 0 : i32
    %c0_i32_0 = arith.constant 0 : i32
    %c0_i32_1 = arith.constant 0 : i32
    %c0_i32_2 = arith.constant 0 : i32
    return %c0_i32, %c0_i32_0, %c0_i32_1 : i32, i32, i32
  }
  func.func @transform_16(%arg0: i32) -> (i32, i32) {
    %c0_i32 = arith.constant 0 : i32
    %c0_i32_0 = arith.constant 0 : i32
    %c0_i32_1 = arith.constant 0 : i32
    return %c0_i32, %c0_i32_0 : i32, i32
  }
  func.func @transform_17(%arg0: i32) -> (i32, i32) {
    %c0_i32 = arith.constant 0 : i32
    %c0_i32_0 = arith.constant 0 : i32
    %c0_i32_1 = arith.constant 0 : i32
    return %c0_i32, %c0_i32_0 : i32, i32
  }
  func.func @transform_18(%arg0: i32) -> (i32, i32) {
    %c0_i32 = arith.constant 0 : i32
    %c0_i32_0 = arith.constant 0 : i32
    %c0_i32_1 = arith.constant 0 : i32
    return %c0_i32, %c0_i32_0 : i32, i32
  }
  func.func @transform_19(%arg0: i32) -> (i32, i32) {
    %c0_i32 = arith.constant 0 : i32
    %c0_i32_0 = arith.constant 0 : i32
    %c0_i32_1 = arith.constant 0 : i32
    return %c0_i32, %c0_i32_0 : i32, i32
  }
  func.func @transform_20(%arg0: i32) -> (i32, i32) {
    %c0_i32 = arith.constant 0 : i32
    %c0_i32_0 = arith.constant 0 : i32
    %c0_i32_1 = arith.constant 0 : i32
    return %c0_i32, %c0_i32_0 : i32, i32
  }
  func.func @transform_21(%arg0: i32) -> (i32, i32) {
    %c0_i32 = arith.constant 0 : i32
    %c0_i32_0 = arith.constant 0 : i32
    %c0_i32_1 = arith.constant 0 : i32
    return %c0_i32, %c0_i32_0 : i32, i32
  }
  func.func @transform_22(%arg0: i32) -> (i32, i32) {
    %c0_i32 = arith.constant 0 : i32
    %c0_i32_0 = arith.constant 0 : i32
    %c0_i32_1 = arith.constant 0 : i32
    return %c0_i32, %c0_i32_0 : i32, i32
  }
  func.func @transform_23(%arg0: i32) -> (i32, i32) {
    %c0_i32 = arith.constant 0 : i32
    %c0_i32_0 = arith.constant 0 : i32
    %c0_i32_1 = arith.constant 0 : i32
    return %c0_i32, %c0_i32_0 : i32, i32
  }
  func.func @transform_24(%arg0: i32) -> (i32, i32, i32) {
    %c0_i32 = arith.constant 0 : i32
    %c0_i32_0 = arith.constant 0 : i32
    %c0_i32_1 = arith.constant 0 : i32
    return %arg0, %c0_i32, %c0_i32_0 : i32, i32, i32
  }
}

module attributes {stable_mosaic.version = 11 : i64} {
  func.func @edge_kernel(%arg0: i32, %arg1: memref<1x3x112x112xf32, #tpu.memory_space<vmem>>, %arg2: memref<112x112xf32, #tpu.memory_space<vmem>>, %arg3: memref<112x112xf32, #tpu.memory_space<vmem>>, %arg4: memref<112x112xf32, #tpu.memory_space<vmem>>, %arg5: memref<112x112xf32, #tpu.memory_space<vmem>>, %arg6: memref<112x14xf32, #tpu.memory_space<vmem>>, %arg7: memref<14x112xf32, #tpu.memory_space<vmem>>, %arg8: memref<1x14x14xf32, #tpu.memory_space<vmem>>) attributes {dimension_semantics = [#tpu.dimension_semantics<parallel>], iteration_bounds = array<i64: 2>, scalar_prefetch = 0 : i64, scratch_operands = 0 : i64, tpu.core_type = #tpu.core_type<tc>, window_params = [{transform_indices = @transform_0, window_bounds = array<i64: 1, 3, 112, 112>}, {pipeline_mode = #tpu.pipeline_mode<synchronous>, transform_indices = @transform_1, window_bounds = array<i64: 112, 112>}, {pipeline_mode = #tpu.pipeline_mode<synchronous>, transform_indices = @transform_2, window_bounds = array<i64: 112, 112>}, {pipeline_mode = #tpu.pipeline_mode<synchronous>, transform_indices = @transform_3, window_bounds = array<i64: 112, 112>}, {pipeline_mode = #tpu.pipeline_mode<synchronous>, transform_indices = @transform_4, window_bounds = array<i64: 112, 112>}, {pipeline_mode = #tpu.pipeline_mode<synchronous>, transform_indices = @transform_5, window_bounds = array<i64: 112, 14>}, {pipeline_mode = #tpu.pipeline_mode<synchronous>, transform_indices = @transform_6, window_bounds = array<i64: 14, 112>}, {transform_indices = @transform_7, window_bounds = array<i64: 1, 14, 14>}]} {
    %c0 = arith.constant 0 : index
    %c0_0 = arith.constant 0 : index
    %c0_1 = arith.constant 0 : index
    %c0_2 = arith.constant 0 : index
    %0 = vector.load %arg1[%c0, %c0_0, %c0_1, %c0_2] : memref<1x3x112x112xf32, #tpu.memory_space<vmem>>, vector<1x1x112x112xf32>
    %1 = vector.shape_cast %0 : vector<1x1x112x112xf32> to vector<112x112xf32>
    %c0_3 = arith.constant 0 : index
    %c1 = arith.constant 1 : index
    %c0_4 = arith.constant 0 : index
    %c0_5 = arith.constant 0 : index
    %2 = vector.load %arg1[%c0_3, %c1, %c0_4, %c0_5] : memref<1x3x112x112xf32, #tpu.memory_space<vmem>>, vector<1x1x112x112xf32>
    %3 = vector.shape_cast %2 : vector<1x1x112x112xf32> to vector<112x112xf32>
    %c0_6 = arith.constant 0 : index
    %c2 = arith.constant 2 : index
    %c0_7 = arith.constant 0 : index
    %c0_8 = arith.constant 0 : index
    %4 = vector.load %arg1[%c0_6, %c2, %c0_7, %c0_8] : memref<1x3x112x112xf32, #tpu.memory_space<vmem>>, vector<1x1x112x112xf32>
    %5 = vector.shape_cast %4 : vector<1x1x112x112xf32> to vector<112x112xf32>
    %cst = arith.constant 2.990000e-01 : f32
    %6 = vector.broadcast %cst : f32 to vector<112x112xf32>
    %7 = arith.mulf %6, %1 : vector<112x112xf32>
    %cst_9 = arith.constant 5.870000e-01 : f32
    %8 = vector.broadcast %cst_9 : f32 to vector<112x112xf32>
    %9 = arith.mulf %8, %3 : vector<112x112xf32>
    %10 = arith.addf %7, %9 : vector<112x112xf32>
    %cst_10 = arith.constant 1.140000e-01 : f32
    %11 = vector.broadcast %cst_10 : f32 to vector<112x112xf32>
    %12 = arith.mulf %11, %5 : vector<112x112xf32>
    %13 = arith.addf %10, %12 : vector<112x112xf32>
    %c0_11 = arith.constant 0 : index
    %c0_12 = arith.constant 0 : index
    %14 = vector.load %arg2[%c0_11, %c0_12] : memref<112x112xf32, #tpu.memory_space<vmem>>, vector<112x112xf32>
    %cst_13 = arith.constant dense<0.000000e+00> : vector<112x112xf32>
    %15 = tpu.matmul %13, %14, %cst_13 {dimension_numbers = #tpu.dot_dimension_numbers<[1], [0], [0], [1], [0, 0, 1, 1], [], []>} : vector<112x112xf32>, vector<112x112xf32>, vector<112x112xf32> -> vector<112x112xf32>
    %c0_14 = arith.constant 0 : index
    %c0_15 = arith.constant 0 : index
    %16 = vector.load %arg3[%c0_14, %c0_15] : memref<112x112xf32, #tpu.memory_space<vmem>>, vector<112x112xf32>
    %cst_16 = arith.constant dense<0.000000e+00> : vector<112x112xf32>
    %17 = tpu.matmul %16, %15, %cst_16 {dimension_numbers = #tpu.dot_dimension_numbers<[1], [0], [0], [1], [0, 0, 1, 1], [], []>} : vector<112x112xf32>, vector<112x112xf32>, vector<112x112xf32> -> vector<112x112xf32>
    %c0_17 = arith.constant 0 : index
    %c0_18 = arith.constant 0 : index
    %18 = vector.load %arg4[%c0_17, %c0_18] : memref<112x112xf32, #tpu.memory_space<vmem>>, vector<112x112xf32>
    %c0_19 = arith.constant 0 : index
    %c0_20 = arith.constant 0 : index
    %19 = vector.load %arg5[%c0_19, %c0_20] : memref<112x112xf32, #tpu.memory_space<vmem>>, vector<112x112xf32>
    %cst_21 = arith.constant dense<0.000000e+00> : vector<112x112xf32>
    %20 = tpu.matmul %17, %19, %cst_21 {dimension_numbers = #tpu.dot_dimension_numbers<[1], [0], [0], [1], [0, 0, 1, 1], [], []>} : vector<112x112xf32>, vector<112x112xf32>, vector<112x112xf32> -> vector<112x112xf32>
    %cst_22 = arith.constant dense<0.000000e+00> : vector<112x112xf32>
    %21 = tpu.matmul %18, %20, %cst_22 {dimension_numbers = #tpu.dot_dimension_numbers<[1], [0], [0], [1], [0, 0, 1, 1], [], []>} : vector<112x112xf32>, vector<112x112xf32>, vector<112x112xf32> -> vector<112x112xf32>
    %c0_23 = arith.constant 0 : index
    %c0_24 = arith.constant 0 : index
    %22 = vector.load %arg5[%c0_23, %c0_24] : memref<112x112xf32, #tpu.memory_space<vmem>>, vector<112x112xf32>
    %c0_25 = arith.constant 0 : index
    %c0_26 = arith.constant 0 : index
    %23 = vector.load %arg4[%c0_25, %c0_26] : memref<112x112xf32, #tpu.memory_space<vmem>>, vector<112x112xf32>
    %cst_27 = arith.constant dense<0.000000e+00> : vector<112x112xf32>
    %24 = tpu.matmul %17, %23, %cst_27 {dimension_numbers = #tpu.dot_dimension_numbers<[1], [0], [0], [1], [0, 0, 1, 1], [], []>} : vector<112x112xf32>, vector<112x112xf32>, vector<112x112xf32> -> vector<112x112xf32>
    %cst_28 = arith.constant dense<0.000000e+00> : vector<112x112xf32>
    %25 = tpu.matmul %22, %24, %cst_28 {dimension_numbers = #tpu.dot_dimension_numbers<[1], [0], [0], [1], [0, 0, 1, 1], [], []>} : vector<112x112xf32>, vector<112x112xf32>, vector<112x112xf32> -> vector<112x112xf32>
    %26 = arith.mulf %21, %21 : vector<112x112xf32>
    %27 = arith.mulf %25, %25 : vector<112x112xf32>
    %28 = arith.addf %26, %27 : vector<112x112xf32>
    %29 = math.sqrt %28 : vector<112x112xf32>
    %c0_29 = arith.constant 0 : index
    %c0_30 = arith.constant 0 : index
    %30 = vector.load %arg7[%c0_29, %c0_30] : memref<14x112xf32, #tpu.memory_space<vmem>>, vector<14x112xf32>
    %c0_31 = arith.constant 0 : index
    %c0_32 = arith.constant 0 : index
    %31 = vector.load %arg6[%c0_31, %c0_32] : memref<112x14xf32, #tpu.memory_space<vmem>>, vector<112x14xf32>
    %cst_33 = arith.constant dense<0.000000e+00> : vector<112x14xf32>
    %32 = tpu.matmul %29, %31, %cst_33 {dimension_numbers = #tpu.dot_dimension_numbers<[1], [0], [0], [1], [0, 0, 1, 1], [], []>} : vector<112x112xf32>, vector<112x14xf32>, vector<112x14xf32> -> vector<112x14xf32>
    %cst_34 = arith.constant dense<0.000000e+00> : vector<14x14xf32>
    %33 = tpu.matmul %30, %32, %cst_34 {dimension_numbers = #tpu.dot_dimension_numbers<[1], [0], [0], [1], [0, 0, 1, 1], [], []>} : vector<14x112xf32>, vector<112x14xf32>, vector<14x14xf32> -> vector<14x14xf32>
    %c0_35 = arith.constant 0 : index
    %c0_36 = arith.constant 0 : index
    %c0_37 = arith.constant 0 : index
    %34 = vector.load %arg8[%c0_35, %c0_36, %c0_37] : memref<1x14x14xf32, #tpu.memory_space<vmem>>, vector<1x14x14xf32>
    %35 = vector.shape_cast %34 : vector<1x14x14xf32> to vector<14x14xf32>
    %36 = vector.shape_cast %33 : vector<14x14xf32> to vector<1x14x14xf32>
    tpu.vector_store %arg8[%c0_35, %c0_36, %c0_37], %36 {strides = array<i32>} : memref<1x14x14xf32, #tpu.memory_space<vmem>>, vector<1x14x14xf32>,
    return
  }
  func.func @transform_0(%arg0: i32) -> (i32, i32, i32, i32) {
    %c0_i32 = arith.constant 0 : i32
    %c0_i32_0 = arith.constant 0 : i32
    %c0_i32_1 = arith.constant 0 : i32
    %c0_i32_2 = arith.constant 0 : i32
    return %arg0, %c0_i32, %c0_i32_0, %c0_i32_1 : i32, i32, i32, i32
  }
  func.func @transform_1(%arg0: i32) -> (i32, i32) {
    %c0_i32 = arith.constant 0 : i32
    %c0_i32_0 = arith.constant 0 : i32
    %c0_i32_1 = arith.constant 0 : i32
    return %c0_i32, %c0_i32_0 : i32, i32
  }
  func.func @transform_2(%arg0: i32) -> (i32, i32) {
    %c0_i32 = arith.constant 0 : i32
    %c0_i32_0 = arith.constant 0 : i32
    %c0_i32_1 = arith.constant 0 : i32
    return %c0_i32, %c0_i32_0 : i32, i32
  }
  func.func @transform_3(%arg0: i32) -> (i32, i32) {
    %c0_i32 = arith.constant 0 : i32
    %c0_i32_0 = arith.constant 0 : i32
    %c0_i32_1 = arith.constant 0 : i32
    return %c0_i32, %c0_i32_0 : i32, i32
  }
  func.func @transform_4(%arg0: i32) -> (i32, i32) {
    %c0_i32 = arith.constant 0 : i32
    %c0_i32_0 = arith.constant 0 : i32
    %c0_i32_1 = arith.constant 0 : i32
    return %c0_i32, %c0_i32_0 : i32, i32
  }
  func.func @transform_5(%arg0: i32) -> (i32, i32) {
    %c0_i32 = arith.constant 0 : i32
    %c0_i32_0 = arith.constant 0 : i32
    %c0_i32_1 = arith.constant 0 : i32
    return %c0_i32, %c0_i32_0 : i32, i32
  }
  func.func @transform_6(%arg0: i32) -> (i32, i32) {
    %c0_i32 = arith.constant 0 : i32
    %c0_i32_0 = arith.constant 0 : i32
    %c0_i32_1 = arith.constant 0 : i32
    return %c0_i32, %c0_i32_0 : i32, i32
  }
  func.func @transform_7(%arg0: i32) -> (i32, i32, i32) {
    %c0_i32 = arith.constant 0 : i32
    %c0_i32_0 = arith.constant 0 : i32
    %c0_i32_1 = arith.constant 0 : i32
    return %arg0, %c0_i32, %c0_i32_0 : i32, i32, i32
  }
}

</mosaic_0001>

<bundles_post_ra>
// kernel: squeeze.12
= control target key start
LH: loop header
LB: loop body
LE: loop exit
PB: predicated region body
PF: predicated region fallthrough
CT: control target
= control target key end

     0   :  { %s354_s8 = smov 119   ;;  %s355_s9 = smov 122   ;;  %vm7_vm0 = vcmask 23552   ;;  %s653_s0 = inlined_call_operand.vmem [shape: f32[2,96], index: 0, kind: input, shape index: {}]   ;;  %s654_s1 = inlined_call_operand.vmem [shape: f32[2,32,3], index: 1, kind: output, shape index: {}]  }
   0x1   :  { %v4_v0 = vld [vmem:[%s653_s0] sm:$0x3]  ;;  %s353_s0 = smov 125   ;;  %s356_s10 = smov 116  }
   0x2   :  { %5 = vst [vmem:[#allocation0] sm:$0x3] %v4_v0  ;;  %s357_s11 = smov 113   ;;  %s358_s12 = smov 110  }
   0x3   :  { %s359_s13 = smov 107   ;;  %s360_s14 = smov 104  }
   0x4   :  { %s361_s15 = smov 101   ;;  %s362_s16 = smov 98  }
   0x5   :  { %s363_s17 = smov 95   ;;  %s364_s18 = smov 92  }
   0x6   :  { %s365_s19 = smov 89   ;;  %s366_s20 = smov 86  }
   0x7   :  { %s367_s21 = smov 83   ;;  %s368_s22 = smov 80  }
   0x8   :  { %s369_s23 = smov 77   ;;  %s370_s24 = smov 74  }
   0x9   :  { %v11_v1 = vld [vmem:[#allocation0] sm:$0x3]   ;;  %s371_s25 = smov 71   ;;  %s372_s26 = smov 68  }
   0xa   :  { %v27_v2 = vld [vmem:[#allocation0] sm:$0x3]   ;;  %12 = vrot.lane.b32.xlu0 %v11_v1, %s353_s0  ;;  %s373_s27 = smov 65   ;;  %s374_s28 = smov 62  }
   0xb   :  { %28 = vrot.lane.b32.xlu1 %v27_v2, %s354_s8  ;;  %v19_v3 = vld [vmem:[#allocation0] sm:$0x3]   ;;  %s375_s29 = smov 59   ;;  %s376_s30 = smov 56  }
   0xc   :  { %v35_v4 = vld [vmem:[#allocation0] sm:$0x3]   ;;  %s377_s6 = smov 53   ;;  %s378_s7 = smov 50  }
   0xd   :  { %v43_v5 = vld [vmem:[#allocation0] sm:$0x3]   ;;  %s379_s0 = smov 47   ;;  %s380_s8 = smov 44  }
   0xe   :  { %20 = vrot.lane.b32.xlu0 %v19_v3, %s355_s9  ;;  %v51_v6 = vld [vmem:[#allocation0] sm:$0x3]   ;;  %s381_s9 = smov 41  }
   0xf   :  { %36 = vrot.lane.b32.xlu1 %v35_v4, %s356_s10  ;;  %v59_v7 = vld [vmem:[#allocation0] sm:$0x3]   ;;  %s382_s10 = smov 38  }
  0x10   :  { %v67_v8 = vld [vmem:[#allocation0] sm:$0x3]  }
  0x11   :  { %v75_v9 = vld [vmem:[#allocation0] sm:$0x3]  }
  0x12   :  { %44 = vrot.lane.b32.xlu0 %v43_v5, %s357_s11  ;;  %v83_v10 = vld [vmem:[#allocation0] sm:$0x3]   ;;  %s383_s11 = smov 35  }
  0x13   :  { %52 = vrot.lane.b32.xlu1 %v51_v6, %s358_s12  ;;  %v91_v11 = vld [vmem:[#allocation0] sm:$0x3]  }
  0x14   :  { %v99_v12 = vld [vmem:[#allocation0] sm:$0x3]  }
  0x15   :  { %v107_v13 = vld [vmem:[#allocation0] sm:$0x3]  }
  0x16   :  { %60 = vrot.lane.b32.xlu0 %v59_v7, %s359_s13  ;;  %v115_v14 = vld [vmem:[#allocation0] sm:$0x3]  }
  0x17   :  { %68 = vrot.lane.b32.xlu1 %v67_v8, %s360_s14  ;;  %v123_v15 = vld [vmem:[#allocation0] sm:$0x3]  }
  0x18   :  { %v131_v16 = vld [vmem:[#allocation0] sm:$0x3]  }
  0x19   :  { %v139_v17 = vld [vmem:[#allocation0] sm:$0x3]  }
  0x1a   :  { %76 = vrot.lane.b32.xlu0 %v75_v9, %s361_s15  ;;  %v147_v18 = vld [vmem:[#allocation0] sm:$0x3]  }
  0x1b   :  { %84 = vrot.lane.b32.xlu1 %v83_v10, %s362_s16  ;;  %v155_v19 = vld [vmem:[#allocation0] sm:$0x3]  }
  0x1c   :  { %v163_v20 = vld [vmem:[#allocation0] sm:$0x3]  }
  0x1d   :  { %v171_v21 = vld [vmem:[#allocation0] sm:$0x3]  }
  0x1e   :  { %92 = vrot.lane.b32.xlu0 %v91_v11, %s363_s17  ;;  %v179_v22 = vld [vmem:[#allocation0] sm:$0x3]  }
  0x1f   :  { %100 = vrot.lane.b32.xlu1 %v99_v12, %s364_s18  ;;  %v187_v23 = vld [vmem:[#allocation0] sm:$0x3]  }
  0x20   :  { %v195_v24 = vld [vmem:[#allocation0] sm:$0x3]  }
  0x21   :  { %v203_v25 = vld [vmem:[#allocation0] sm:$0x3]  }
  0x22   :  { %108 = vrot.lane.b32.xlu0 %v107_v13, %s365_s19  ;;  %v211_v26 = vld [vmem:[#allocation0] sm:$0x3]  }
  0x23   :  { %116 = vrot.lane.b32.xlu1 %v115_v14, %s366_s20  ;;  %v6_v27 = vld [vmem:[#allocation0] sm:$0x3]  }
  0x24   :  { %8 = vst.msk [vmem:[%s654_s1] sm:$0x1] %vm7_vm0, %v6_v27   ;;  %259 = vst.msk [vmem:[%s654_s1 + $0x1f] sm:$0x2] %vm7_vm0, %v6_v27   ;;  %v219_v28 = vld [vmem:[#allocation0] sm:$0x3]  }
  0x25   :  { %v227_v29 = vld [vmem:[#allocation0] sm:$0x3]  }
  0x26   :  { %124 = vrot.lane.b32.xlu0 %v123_v15, %s367_s21  ;;  %v235_v30 = vld [vmem:[#allocation0] sm:$0x3]  }
  0x27   :  { %132 = vrot.lane.b32.xlu1 %v131_v16, %s368_s22  ;;  %v243_v31 = vld [vmem:[#allocation0] sm:$0x3]  }
  0x28   :  { %v251_v32 = vld [vmem:[#allocation0] sm:$0x3]  }
  0x2a   :  { %140 = vrot.lane.b32.xlu0 %v139_v17, %s369_s23 }
  0x2b   :  { %148 = vrot.lane.b32.xlu1 %v147_v18, %s370_s24 }
  0x2e   :  { %156 = vrot.lane.b32.xlu0 %v155_v19, %s371_s25 }
  0x2f   :  { %164 = vrot.lane.b32.xlu1 %v163_v20, %s372_s26 }
  0x32   :  { %172 = vrot.lane.b32.xlu0 %v171_v21, %s373_s27 }
  0x33   :  { %180 = vrot.lane.b32.xlu1 %v179_v22, %s374_s28 }
  0x36   :  { %188 = vrot.lane.b32.xlu0 %v187_v23, %s375_s29 }
  0x37   :  { %196 = vrot.lane.b32.xlu1 %v195_v24, %s376_s30 }
  0x3a   :  { %204 = vrot.lane.b32.xlu0 %v203_v25, %s377_s6 }
  0x3b   :  { %212 = vrot.lane.b32.xlu1 %v211_v26, %s378_s7 }
  0x3e   :  { %220 = vrot.lane.b32.xlu0 %v219_v28, %s379_s0 }
  0x3f   :  { %228 = vrot.lane.b32.xlu1 %v227_v29, %s380_s8 }
  0x42   :  { %236 = vrot.lane.b32.xlu0 %v235_v30, %s381_s9 }
  0x43   :  { %244 = vrot.lane.b32.xlu1 %v243_v31, %s382_s10 }
  0x46   :  { %252 = vrot.lane.b32.xlu0 %v251_v32, %s383_s11 }
  0x7c   :  { %v13_v33 = vpop.permute.xlu0 %12  }
  0x7d   :  { %v29_v34 = vpop.permute.xlu1 %28   ;;  %260 = vst.msk [vmem:[%s654_s1 + $0x1] sm:$0x1] %vm7_vm0, %v13_v33   ;;  %261 = vst.msk [vmem:[%s654_s1 + $0x20] sm:$0x2] %vm7_vm0, %v13_v33  }
  0x7e   :  { %264 = vst.msk [vmem:[%s654_s1 + $0x3] sm:$0x1] %vm7_vm0, %v29_v34   ;;  %265 = vst.msk [vmem:[%s654_s1 + $0x22] sm:$0x2] %vm7_vm0, %v29_v34  }
  0x80   :  { %v21_v35 = vpop.permute.xlu0 %20  }
  0x81   :  { %v37_v36 = vpop.permute.xlu1 %36   ;;  %262 = vst.msk [vmem:[%s654_s1 + $0x2] sm:$0x1] %vm7_vm0, %v21_v35   ;;  %263 = vst.msk [vmem:[%s654_s1 + $0x21] sm:$0x2] %vm7_vm0, %v21_v35  }
  0x82   :  { %266 = vst.msk [vmem:[%s654_s1 + $0x4] sm:$0x1] %vm7_vm0, %v37_v36   ;;  %267 = vst.msk [vmem:[%s654_s1 + $0x23] sm:$0x2] %vm7_vm0, %v37_v36  }
  0x84   :  { %v45_v37 = vpop.permute.xlu0 %44  }
  0x85   :  { %v53_v38 = vpop.permute.xlu1 %52   ;;  %268 = vst.msk [vmem:[%s654_s1 + $0x5] sm:$0x1] %vm7_vm0, %v45_v37   ;;  %269 = vst.msk [vmem:[%s654_s1 + $0x24] sm:$0x2] %vm7_vm0, %v45_v37  }
  0x86   :  { %270 = vst.msk [vmem:[%s654_s1 + $0x6] sm:$0x1] %vm7_vm0, %v53_v38   ;;  %271 = vst.msk [vmem:[%s654_s1 + $0x25] sm:$0x2] %vm7_vm0, %v53_v38  }
  0x88   :  { %v61_v39 = vpop.permute.xlu0 %60  }
  0x89   :  { %v69_v40 = vpop.permute.xlu1 %68   ;;  %272 = vst.msk [vmem:[%s654_s1 + $0x7] sm:$0x1] %vm7_vm0, %v61_v39   ;;  %273 = vst.msk [vmem:[%s654_s1 + $0x26] sm:$0x2] %vm7_vm0, %v61_v39  }
  0x8a   :  { %274 = vst.msk [vmem:[%s654_s1 + $0x8] sm:$0x1] %vm7_vm0, %v69_v40   ;;  %275 = vst.msk [vmem:[%s654_s1 + $0x27] sm:$0x2] %vm7_vm0, %v69_v40  }
  0x8c   :  { %v77_v41 = vpop.permute.xlu0 %76  }
  0x8d   :  { %v85_v42 = vpop.permute.xlu1 %84   ;;  %276 = vst.msk [vmem:[%s654_s1 + $0x9] sm:$0x1] %vm7_vm0, %v77_v41   ;;  %277 = vst.msk [vmem:[%s654_s1 + $0x28] sm:$0x2] %vm7_vm0, %v77_v41  }
  0x8e   :  { %278 = vst.msk [vmem:[%s654_s1 + $0xa] sm:$0x1] %vm7_vm0, %v85_v42   ;;  %279 = vst.msk [vmem:[%s654_s1 + $0x29] sm:$0x2] %vm7_vm0, %v85_v42  }
  0x90   :  { %v93_v43 = vpop.permute.xlu0 %92  }
  0x91   :  { %v101_v44 = vpop.permute.xlu1 %100   ;;  %280 = vst.msk [vmem:[%s654_s1 + $0xb] sm:$0x1] %vm7_vm0, %v93_v43   ;;  %281 = vst.msk [vmem:[%s654_s1 + $0x2a] sm:$0x2] %vm7_vm0, %v93_v43  }
  0x92   :  { %282 = vst.msk [vmem:[%s654_s1 + $0xc] sm:$0x1] %vm7_vm0, %v101_v44   ;;  %283 = vst.msk [vmem:[%s654_s1 + $0x2b] sm:$0x2] %vm7_vm0, %v101_v44  }
  0x94   :  { %v109_v45 = vpop.permute.xlu0 %108  }
  0x95   :  { %v117_v46 = vpop.permute.xlu1 %116   ;;  %284 = vst.msk [vmem:[%s654_s1 + $0xd] sm:$0x1] %vm7_vm0, %v109_v45   ;;  %285 = vst.msk [vmem:[%s654_s1 + $0x2c] sm:$0x2] %vm7_vm0, %v109_v45  }
  0x96   :  { %286 = vst.msk [vmem:[%s654_s1 + $0xe] sm:$0x1] %vm7_vm0, %v117_v46   ;;  %287 = vst.msk [vmem:[%s654_s1 + $0x2d] sm:$0x2] %vm7_vm0, %v117_v46  }
  0x98   :  { %v125_v47 = vpop.permute.xlu0 %124  }
  0x99   :  { %v133_v48 = vpop.permute.xlu1 %132   ;;  %288 = vst.msk [vmem:[%s654_s1 + $0xf] sm:$0x1] %vm7_vm0, %v125_v47   ;;  %289 = vst.msk [vmem:[%s654_s1 + $0x2e] sm:$0x2] %vm7_vm0, %v125_v47  }
  0x9a   :  { %290 = vst.msk [vmem:[%s654_s1 + $0x10] sm:$0x1] %vm7_vm0, %v133_v48   ;;  %291 = vst.msk [vmem:[%s654_s1 + $0x2f] sm:$0x2] %vm7_vm0, %v133_v48  }
  0x9c   :  { %v141_v49 = vpop.permute.xlu0 %140  }
  0x9d   :  { %v149_v50 = vpop.permute.xlu1 %148   ;;  %292 = vst.msk [vmem:[%s654_s1 + $0x11] sm:$0x1] %vm7_vm0, %v141_v49   ;;  %293 = vst.msk [vmem:[%s654_s1 + $0x30] sm:$0x2] %vm7_vm0, %v141_v49  }
  0x9e   :  { %294 = vst.msk [vmem:[%s654_s1 + $0x12] sm:$0x1] %vm7_vm0, %v149_v50   ;;  %295 = vst.msk [vmem:[%s654_s1 + $0x31] sm:$0x2] %vm7_vm0, %v149_v50  }
  0xa0   :  { %v157_v51 = vpop.permute.xlu0 %156  }
  0xa1   :  { %v165_v52 = vpop.permute.xlu1 %164   ;;  %296 = vst.msk [vmem:[%s654_s1 + $0x13] sm:$0x1] %vm7_vm0, %v157_v51   ;;  %297 = vst.msk [vmem:[%s654_s1 + $0x32] sm:$0x2] %vm7_vm0, %v157_v51  }
  0xa2   :  { %298 = vst.msk [vmem:[%s654_s1 + $0x14] sm:$0x1] %vm7_vm0, %v165_v52   ;;  %299 = vst.msk [vmem:[%s654_s1 + $0x33] sm:$0x2] %vm7_vm0, %v165_v52  }
  0xa4   :  { %v173_v53 = vpop.permute.xlu0 %172  }
  0xa5   :  { %v181_v54 = vpop.permute.xlu1 %180   ;;  %300 = vst.msk [vmem:[%s654_s1 + $0x15] sm:$0x1] %vm7_vm0, %v173_v53   ;;  %301 = vst.msk [vmem:[%s654_s1 + $0x34] sm:$0x2] %vm7_vm0, %v173_v53  }
  0xa6   :  { %302 = vst.msk [vmem:[%s654_s1 + $0x16] sm:$0x1] %vm7_vm0, %v181_v54   ;;  %303 = vst.msk [vmem:[%s654_s1 + $0x35] sm:$0x2] %vm7_vm0, %v181_v54  }
  0xa8   :  { %v189_v55 = vpop.permute.xlu0 %188  }
  0xa9   :  { %v197_v56 = vpop.permute.xlu1 %196   ;;  %304 = vst.msk [vmem:[%s654_s1 + $0x17] sm:$0x1] %vm7_vm0, %v189_v55   ;;  %305 = vst.msk [vmem:[%s654_s1 + $0x36] sm:$0x2] %vm7_vm0, %v189_v55  }
  0xaa   :  { %306 = vst.msk [vmem:[%s654_s1 + $0x18] sm:$0x1] %vm7_vm0, %v197_v56   ;;  %307 = vst.msk [vmem:[%s654_s1 + $0x37] sm:$0x2] %vm7_vm0, %v197_v56  }
  0xac   :  { %v205_v57 = vpop.permute.xlu0 %204  }
  0xad   :  { %v213_v58 = vpop.permute.xlu1 %212   ;;  %308 = vst.msk [vmem:[%s654_s1 + $0x19] sm:$0x1] %vm7_vm0, %v205_v57   ;;  %309 = vst.msk [vmem:[%s654_s1 + $0x38] sm:$0x2] %vm7_vm0, %v205_v57  }
  0xae   :  { %310 = vst.msk [vmem:[%s654_s1 + $0x1a] sm:$0x1] %vm7_vm0, %v213_v58   ;;  %311 = vst.msk [vmem:[%s654_s1 + $0x39] sm:$0x2] %vm7_vm0, %v213_v58  }
  0xb0   :  { %v221_v59 = vpop.permute.xlu0 %220  }
  0xb1   :  { %v229_v60 = vpop.permute.xlu1 %228   ;;  %312 = vst.msk [vmem:[%s654_s1 + $0x1b] sm:$0x1] %vm7_vm0, %v221_v59   ;;  %313 = vst.msk [vmem:[%s654_s1 + $0x3a] sm:$0x2] %vm7_vm0, %v221_v59  }
  0xb2   :  { %314 = vst.msk [vmem:[%s654_s1 + $0x1c] sm:$0x1] %vm7_vm0, %v229_v60   ;;  %315 = vst.msk [vmem:[%s654_s1 + $0x3b] sm:$0x2] %vm7_vm0, %v229_v60  }
  0xb4   :  { %v237_v61 = vpop.permute.xlu0 %236  }
  0xb5   :  { %v245_v62 = vpop.permute.xlu1 %244   ;;  %316 = vst.msk [vmem:[%s654_s1 + $0x1d] sm:$0x1] %vm7_vm0, %v237_v61   ;;  %317 = vst.msk [vmem:[%s654_s1 + $0x3c] sm:$0x2] %vm7_vm0, %v237_v61  }
  0xb6   :  { %318 = vst.msk [vmem:[%s654_s1 + $0x1e] sm:$0x1] %vm7_vm0, %v245_v62   ;;  %319 = vst.msk [vmem:[%s654_s1 + $0x3d] sm:$0x2] %vm7_vm0, %v245_v62  }
  0xb8   :  { %v253_v63 = vpop.permute.xlu0 %252  }
  0xb9   :  { %320 = vst.msk [vmem:[%s654_s1 + $0x1f] sm:$0x1] %vm7_vm0, %v253_v63   ;;  %321 = vst.msk [vmem:[%s654_s1 + $0x3e] sm:$0x2] %vm7_vm0, %v253_v63  }

// kernel: forward_device.2
= control target key start
LH: loop header
LB: loop body
LE: loop exit
PB: predicated region body
PF: predicated region fallthrough
CT: control target
= control target key end

     0   :  { %s2977_s24 = smov 0   ;;  %s3600_s0 = inlined_call_operand.vmem [shape: f32[2,3,112,112], index: 0, kind: input, shape index: {}]   ;;  %s3601_s1 = inlined_call_operand.vmem [shape: f32[112,112], index: 1, kind: input, shape index: {}]   ;;  %s3602_s2 = inlined_call_operand.vmem [shape: f32[112,112], index: 2, kind: input, shape index: {}]   ;;  %s3603_s3 = inlined_call_operand.vmem [shape: f32[112,112], index: 3, kind: input, shape index: {}]   ;;  %s3604_s4 = inlined_call_operand.vmem [shape: f32[112,112], index: 4, kind: input, shape index: {}]   ;;  %s3605_s5 = inlined_call_operand.vmem [shape: f32[112,14], index: 5, kind: input, shape index: {}]   ;;  %s3606_s6 = inlined_call_operand.vmem [shape: f32[14,112], index: 6, kind: input, shape index: {}]   ;;  %s3607_s7 = inlined_call_operand.vmem [shape: f32[2,14,14], index: 7, kind: output, shape index: {}]  }
   0x1 LB: > { %s1943_s25 = sadd.s32 4294967295, %s2935_s24   ;;  %p1947_p0 = scmp.ge.s32.totalorder %s2935_s24, 1  ;;  %s2935_s24 = sphi %s2977_s24, %s17_s24  }
   0x2   : > { %p237_p1 = scmp.lt.s32.totalorder %s2935_s24, 3 }
   0x4   : > { %p238_p2 = pnand %p1947_p0, %p237_p1 }
   0x5   : > { %v393_v0 = vld [vmem:[%s3601_s1] sm:$0xff] (!%p238_p2)  ;;  %v394_v1 = vld [vmem:[%s3601_s1 + $0x8] sm:$0xff] (!%p238_p2)  ;;  %v395_v2 = vld [vmem:[%s3601_s1 + $0x10] sm:$0xff] (!%p238_p2)  ;;  %p269_p3 = scmp.lt.s32.totalorder (!%p238_p2), %s1943_s25, 1  ;;  %vm407_vm0 = vcmask (!%p238_p2), 916480  }
   0x6   : > { %241 = sbr.rel (%p238_p2) target bundleno = 1454 (0x5ae), region = 48  ;;  %v2668_v3 = vpack.c.bf16 (!%p238_p2), %v394_v1, %v393_v0  ;;  %v396_v4 = vld [vmem:[%s3601_s1 + $0x18] sm:$0xff] (!%p238_p2)  ;;  %v397_v6 = vld [vmem:[%s3601_s1 + $0x20] sm:$0xff] (!%p238_p2)  ;;  %v398_v7 = vld [vmem:[%s3601_s1 + $0x28] sm:$0xff] (!%p238_p2) }
   0x7   : > { %v2672_v5 = vpack.c.bf16 (!%p238_p2), %v396_v4, %v395_v2  ;;  %v2676_v8 = vpack.c.bf16 (!%p238_p2), %v398_v7, %v397_v6  ;;  %v399_v9 = vld [vmem:[%s3601_s1 + $0x30] sm:$0xff] (!%p238_p2)  ;;  %v400_v10 = vld [vmem:[%s3601_s1 + $0x38] sm:$0xff] (!%p238_p2)  ;;  %v401_v18 = vld [vmem:[%s3601_s1 + $0x40] sm:$0xff] (!%p238_p2) }
   0x8   : > { %2669 = vmatprep.subr.bf16.mxu0 (!%p238_p2), %v2668_v3  ;;  %v2680_v17 = vpack.c.bf16 (!%p238_p2), %v400_v10, %v399_v9  ;;  %v402_v19 = vld [vmem:[%s3601_s1 + $0x48] sm:$0xff] (!%p238_p2)  ;;  %v403_v23 = vld [vmem:[%s3601_s1 + $0x50] sm:$0xff] (!%p238_p2)  ;;  %v404_v24 = vld [vmem:[%s3601_s1 + $0x58] sm:$0xff] (!%p238_p2) }
   0x9   : > { %2671 = vmatpush3.bf16.msra.mxu0 (!%p238_p2), %v2668_v3  ;;  %v2684_v22 = vpack.c.bf16 (!%p238_p2), %v402_v19, %v401_v18  ;;  %v2688_v27 = vpack.c.bf16 (!%p238_p2), %v404_v24, %v403_v23  ;;  %v405_v30 = vld [vmem:[%s3601_s1 + $0x60] sm:$0xff] (!%p238_p2)  ;;  %v406_v31 = vld [vmem:[%s3601_s1 + $0x68] sm:$0xff] (!%p238_p2) }
   0xa   : > { %2673 = vmatprep.subr.bf16.mxu0 (!%p238_p2), %v2672_v5  ;;  %v2692_v40 = vpack.c.bf16 (!%p238_p2), %v406_v31, %v405_v30 }
   0xd   : > { %s3609_s25 = smov (!%p269_p3, %s1943_s25), 1  ;;  %2675 = vmatpush3.bf16.msra.mxu0 %v2672_v5 }
   0xe   : > { %s2892_s15 = smul.u32 336, %s3609_s25  ;;  %2677 = vmatprep.subr.bf16.mxu0 %v2676_v8  ;;  %s2081_s27 = sshll.u32 %s3609_s25, 4 }
   0xf   : > { %s278_s30 = scalar_lea.vmem %s3607_s7, %s2081_s27 }
  0x10   : > { %s3015_s22 = scalar_lea.vmem %s3600_s0, %s2892_s15 }
  0x11   : > { %v279_v11 = vld [vmem:[%s3015_s22] sm:$0xff]  ;;  %v1951_v12 = vld [vmem:[%s3015_s22 + $0x70] sm:$0xff]  ;;  %2679 = vmatpush3.bf16.msra.mxu0 %v2676_v8  ;;  %v280_v25 = vld [vmem:[%s3015_s22 + $0x8] sm:$0xff] }
  0x12   : > { %v1965_v13 = vld [vmem:[%s3015_s22 + $0xe0] sm:$0xff]  ;;  %v323_v14 = vmul.f32 0.299, %v279_v11  ;;  %v337_v15 = vmul.f32 0.587, %v1951_v12  ;;  %2681 = vmatprep.subr.bf16.mxu0 %v2680_v17  ;;  %v1952_v26 = vld [vmem:[%s3015_s22 + $0x78] sm:$0xff] }
  0x13   : > { %v365_v16 = vmul.f32 0.114, %v1965_v13  ;;  %v281_v28 = vld [vmem:[%s3015_s22 + $0x10] sm:$0xff]  ;;  %v1953_v29 = vld [vmem:[%s3015_s22 + $0x80] sm:$0xff]  ;;  %v1966_v32 = vld [vmem:[%s3015_s22 + $0xe8] sm:$0xff] }
  0x14   : > { %v351_v20 = vadd.f32 %v337_v15, %v323_v14  ;;  %v324_v33 = vmul.f32 0.299, %v280_v25  ;;  %v338_v34 = vmul.f32 0.587, %v1952_v26  ;;  %v1967_v35 = vld [vmem:[%s3015_s22 + $0xf0] sm:$0xff]  ;;  %v282_v38 = vld [vmem:[%s3015_s22 + $0x18] sm:$0xff] }
  0x15   : > { %2683 = vmatpush3.bf16.msra.mxu0 %v2680_v17  ;;  %v325_v36 = vmul.f32 0.299, %v281_v28  ;;  %v339_v37 = vmul.f32 0.587, %v1953_v29  ;;  %v1954_v39 = vld [vmem:[%s3015_s22 + $0x88] sm:$0xff]  ;;  %v283_v41 = vld [vmem:[%s3015_s22 + $0x20] sm:$0xff] }
  0x16   : > { %v379_v21 = vadd.f32 %v365_v16, %v351_v20  ;;  %2685 = vmatprep.subr.bf16.mxu0 %v2684_v22  ;;  %v1955_v42 = vld [vmem:[%s3015_s22 + $0x90] sm:$0xff]  ;;  %v366_v43 = vmul.f32 0.114, %v1966_v32  ;;  %v367_v44 = vmul.f32 0.114, %v1967_v35  ;;  %v352_v45 = vadd.f32 %v338_v34, %v324_v33  ;;  %v1968_v46 = vld [vmem:[%s3015_s22 + $0xf8] sm:$0xff] }
  0x17   : > { %v326_v47 = vmul.f32 0.299, %v282_v38  ;;  %v340_v48 = vmul.f32 0.587, %v1954_v39  ;;  %v1969_v49 = vld [vmem:[%s3015_s22 + $0x100] sm:$0xff]  ;;  %v353_v50 = vadd.f32 %v339_v37, %v325_v36  ;;  %v284_v53 = vld [vmem:[%s3015_s22 + $0x28] sm:$0xff] }
  0x18   : > { %2322 = vmatprep.mubr.msk.f32.mxu0 %vm407_vm0, %v379_v21  ;;  %v327_v51 = vmul.f32 0.299, %v283_v41  ;;  %v341_v52 = vmul.f32 0.587, %v1955_v42  ;;  %v1956_v54 = vld [vmem:[%s3015_s22 + $0x98] sm:$0xff]  ;;  %v285_v55 = vld [vmem:[%s3015_s22 + $0x30] sm:$0xff]  ;;  %v380_v59 = vadd.f32 %v366_v43, %v352_v45 }
  0x19   : > { %2687 = vmatpush3.bf16.msra.mxu0 %v2684_v22  ;;  %v1957_v56 = vld [vmem:[%s3015_s22 + $0xa0] sm:$0xff]  ;;  %v368_v57 = vmul.f32 0.114, %v1968_v46  ;;  %v369_v58 = vmul.f32 0.114, %v1969_v49  ;;  %v354_v60 = vadd.f32 %v340_v48, %v326_v47  ;;  %v1970_v61 = vld [vmem:[%s3015_s22 + $0x108] sm:$0xff]  ;;  %v381_v1 = vadd.f32 %v367_v44, %v353_v50 }
  0x1a   : > { %2689 = vmatprep.subr.bf16.mxu0 %v2688_v27  ;;  %v328_v62 = vmul.f32 0.299, %v284_v53  ;;  %v342_v63 = vmul.f32 0.587, %v1956_v54  ;;  %v1971_v0 = vld [vmem:[%s3015_s22 + $0x110] sm:$0xff]  ;;  %v355_v2 = vadd.f32 %v341_v52, %v327_v51  ;;  %v286_v5 = vld [vmem:[%s3015_s22 + $0x38] sm:$0xff] }
  0x1b   : > { %v329_v3 = vmul.f32 0.299, %v285_v55  ;;  %v343_v4 = vmul.f32 0.587, %v1957_v56  ;;  %v1958_v6 = vld [vmem:[%s3015_s22 + $0xa8] sm:$0xff]  ;;  %v287_v7 = vld [vmem:[%s3015_s22 + $0x40] sm:$0xff]  ;;  %v382_v11 = vadd.f32 %v368_v57, %v354_v60 }
  0x1c   : > { %v1959_v8 = vld [vmem:[%s3015_s22 + $0xb0] sm:$0xff]  ;;  %v370_v9 = vmul.f32 0.114, %v1970_v61  ;;  %v371_v10 = vmul.f32 0.114, %v1971_v0  ;;  %v356_v12 = vadd.f32 %v342_v63, %v328_v62  ;;  %v288_v15 = vld [vmem:[%s3015_s22 + $0x48] sm:$0xff]  ;;  %v383_v17 = vadd.f32 %v369_v58, %v355_v2 }
  0x1d   : > { %2691 = vmatpush3.bf16.msra.mxu0 %v2688_v27  ;;  %v330_v13 = vmul.f32 0.299, %v286_v5  ;;  %v344_v14 = vmul.f32 0.587, %v1958_v6  ;;  %v1960_v16 = vld [vmem:[%s3015_s22 + $0xb8] sm:$0xff]  ;;  %v357_v18 = vadd.f32 %v343_v4, %v329_v3  ;;  %v1973_v20 = vld [vmem:[%s3015_s22 + $0x120] sm:$0xff] }
  0x1e   : > { %2693 = vmatprep.subr.bf16.mxu0 %v2692_v40  ;;  %v1972_v19 = vld [vmem:[%s3015_s22 + $0x118] sm:$0xff]  ;;  %v331_v21 = vmul.f32 0.299, %v287_v7  ;;  %v345_v22 = vmul.f32 0.587, %v1959_v8  ;;  %v289_v23 = vld [vmem:[%s3015_s22 + $0x50] sm:$0xff]  ;;  %v384_v27 = vadd.f32 %v370_v9, %v356_v12 }
  0x1f   : > { %v1961_v24 = vld [vmem:[%s3015_s22 + $0xc0] sm:$0xff]  ;;  %v332_v25 = vmul.f32 0.299, %v288_v15  ;;  %v346_v26 = vmul.f32 0.587, %v1960_v16  ;;  %v358_v28 = vadd.f32 %v344_v14, %v330_v13  ;;  %v1974_v31 = vld [vmem:[%s3015_s22 + $0x128] sm:$0xff]  ;;  %v385_v33 = vadd.f32 %v371_v10, %v357_v18 }
  0x20   : > { %v372_v29 = vmul.f32 0.114, %v1972_v19  ;;  %v373_v30 = vmul.f32 0.114, %v1973_v20  ;;  %v1975_v32 = vld [vmem:[%s3015_s22 + $0x130] sm:$0xff]  ;;  %v359_v34 = vadd.f32 %v345_v22, %v331_v21  ;;  %v290_v37 = vld [vmem:[%s3015_s22 + $0x58] sm:$0xff] }
  0x21   : > { %2695 = vmatpush3.bf16.msra.mxu0 %v2692_v40  ;;  %v333_v35 = vmul.f32 0.299, %v289_v23  ;;  %v347_v36 = vmul.f32 0.587, %v1961_v24  ;;  %v1962_v38 = vld [vmem:[%s3015_s22 + $0xc8] sm:$0xff]  ;;  %v291_v39 = vld [vmem:[%s3015_s22 + $0x60] sm:$0xff]  ;;  %v360_v41 = vadd.f32 %v346_v26, %v332_v25 }
  0x22   : > { %v1963_v40 = vld [vmem:[%s3015_s22 + $0xd0] sm:$0xff]  ;;  %v374_v42 = vmul.f32 0.114, %v1974_v31  ;;  %v375_v43 = vmul.f32 0.114, %v1975_v32  ;;  %v386_v44 = vadd.f32 %v372_v29, %v358_v28  ;;  %v1976_v45 = vld [vmem:[%s3015_s22 + $0x138] sm:$0xff]  ;;  %v387_v48 = vadd.f32 %v373_v30, %v359_v34 }
  0x23   : > { %v334_v46 = vmul.f32 0.299, %v290_v37  ;;  %v348_v47 = vmul.f32 0.587, %v1962_v38  ;;  %v361_v49 = vadd.f32 %v347_v36, %v333_v35  ;;  %v335_v50 = vmul.f32 0.299, %v291_v39 }
  0x24   : > { %2323 = vmatmul.mubr.msk.f32.vlgmr.msra.gmra.mrb[0].mxu0 %vm407_vm0, %v380_v59  ;;  %v349_v51 = vmul.f32 0.587, %v1963_v40  ;;  %v292_v52 = vld [vmem:[%s3015_s22 + $0x68] sm:$0xff]  ;;  %v1964_v53 = vld [vmem:[%s3015_s22 + $0xd8] sm:$0xff]  ;;  %v1977_v54 = vld [vmem:[%s3015_s22 + $0x140] sm:$0xff]  ;;  %v388_v55 = vadd.f32 %v374_v42, %v360_v41 }
  0x25   : > { %2325 = vmatprep.mubr.msk.f32.mxu0 %vm407_vm0, %v381_v1  ;;  %v362_v56 = vadd.f32 %v348_v47, %v334_v46  ;;  %v376_v57 = vmul.f32 0.114, %v1976_v45  ;;  %v336_v58 = vmul.f32 0.299, %v292_v52  ;;  %v350_v59 = vmul.f32 0.587, %v1964_v53 }
  0x26   : > { %v389_v60 = vadd.f32 %v375_v43, %v361_v49  ;;  %v363_v61 = vadd.f32 %v349_v51, %v335_v50  ;;  %v377_v62 = vmul.f32 0.114, %v1977_v54  ;;  %v1978_v63 = vld [vmem:[%s3015_s22 + $0x148] sm:$0xff]  ;;  %v585_v5 = vld [vmem:[%s3602_s2] sm:$0xff]  ;;  %v3108_v8 = vld [vmem:[%s3604_s4 + $0x10] sm:$0xff] }
  0x27   : > { %v390_v0 = vadd.f32 %v376_v57, %v362_v56  ;;  %v364_v1 = vadd.f32 %v350_v59, %v336_v58  ;;  %v378_v2 = vmul.f32 0.114, %v1978_v63  ;;  %2371 = vmatprep.mubr.msk.f32.mxu1 %vm407_vm0, %v585_v5  ;;  %v3098_v6 = vld [vmem:[%s3604_s4] sm:$0xff]  ;;  %v3103_v7 = vld [vmem:[%s3604_s4 + $0x8] sm:$0xff]  ;;  %v3115_v10 = vld [vmem:[%s3604_s4 + $0x18] sm:$0xff] }
  0x28   : > { %2326 = vmatmul.mubr.msk.f32.gmra.mrb[2].mxu0 %vm407_vm0, %v382_v11  ;;  %v391_v3 = vadd.f32 %v377_v62, %v363_v61  ;;  %v2724_v9 = vpack.c.bf16 %v3103_v7, %v3098_v6  ;;  %v2728_v11 = vpack.c.bf16 %v3115_v10, %v3108_v8  ;;  %v3122_v12 = vld [vmem:[%s3604_s4 + $0x20] sm:$0xff]  ;;  %v3127_v13 = vld [vmem:[%s3604_s4 + $0x28] sm:$0xff]  ;;  %v3134_v15 = vld [vmem:[%s3604_s4 + $0x30] sm:$0xff] }
  0x29   : > { %2328 = vmatprep.mubr.msk.f32.mxu0 %vm407_vm0, %v383_v17  ;;  %v392_v4 = vadd.f32 %v378_v2, %v364_v1  ;;  %v2732_v14 = vpack.c.bf16 %v3127_v13, %v3122_v12  ;;  %v3139_v16 = vld [vmem:[%s3604_s4 + $0x38] sm:$0xff]  ;;  %v3146_v18 = vld [vmem:[%s3604_s4 + $0x40] sm:$0xff]  ;;  %v3151_v19 = vld [vmem:[%s3604_s4 + $0x48] sm:$0xff] }
  0x2a   : > { %2725 = vmatprep.subr.bf16.mxu0 %v2724_v9  ;;  %v2736_v17 = vpack.c.bf16 %v3139_v16, %v3134_v15  ;;  %v2740_v20 = vpack.c.bf16 %v3151_v19, %v3146_v18  ;;  %v3158_v21 = vld [vmem:[%s3604_s4 + $0x50] sm:$0xff]  ;;  %v3163_v22 = vld [vmem:[%s3604_s4 + $0x58] sm:$0xff]  ;;  %v3170_v24 = vld [vmem:[%s3604_s4 + $0x60] sm:$0xff] }
  0x2b   : > { %2727 = vmatpush3.bf16.msra.mxu0 %v2724_v9  ;;  %v2744_v23 = vpack.c.bf16 %v3163_v22, %v3158_v21  ;;  %v3175_v25 = vld [vmem:[%s3604_s4 + $0x68] sm:$0xff]  ;;  %v587_v49 = vld [vmem:[%s3602_s2 + $0x10] sm:$0xff]  ;;  %v588_v50 = vld [vmem:[%s3602_s2 + $0x18] sm:$0xff] }
  0x2c   : > { %2329 = vmatmul.mubr.msk.f32.gmra.mrb[4].mxu0 %vm407_vm0, %v384_v27  ;;  %2729 = vmatprep.subr.bf16.mxu0 %v2728_v11  ;;  %v2748_v26 = vpack.c.bf16 %v3175_v25, %v3170_v24  ;;  %v589_v51 = vld [vmem:[%s3602_s2 + $0x20] sm:$0xff]  ;;  %v590_v52 = vld [vmem:[%s3602_s2 + $0x28] sm:$0xff]  ;;  %v591_v53 = vld [vmem:[%s3602_s2 + $0x30] sm:$0xff] }
  0x2d   : > { %2331 = vmatprep.mubr.msk.f32.mxu0 %vm407_vm0, %v385_v33  ;;  %v592_v54 = vld [vmem:[%s3602_s2 + $0x38] sm:$0xff]  ;;  %v594_v56 = vld [vmem:[%s3602_s2 + $0x48] sm:$0xff]  ;;  %v595_v57 = vld [vmem:[%s3602_s2 + $0x50] sm:$0xff] }
  0x2e   : > { %v596_v58 = vld [vmem:[%s3602_s2 + $0x58] sm:$0xff]  ;;  %v597_v59 = vld [vmem:[%s3602_s2 + $0x60] sm:$0xff]  ;;  %v3237_v62 = vld [vmem:[%s3603_s3 + $0x8] sm:$0xff] }
  0x2f   : > { %2731 = vmatpush3.bf16.msra.mxu0 %v2728_v11  ;;  %v776_v61 = vld [vmem:[%s3603_s3] sm:$0xff]  ;;  %v3249_v1 = vld [vmem:[%s3603_s3 + $0x18] sm:$0xff]  ;;  %v3262_v9 = vld [vmem:[%s3603_s3 + $0x28] sm:$0xff] }
  0x30   : > { %2332 = vmatmul.mubr.msk.f32.gmra.mrb[6].mxu0 %vm407_vm0, %v386_v44  ;;  %2733 = vmatprep.subr.bf16.mxu0 %v2732_v14  ;;  %v2780_v63 = vpack.c.bf16 %v3237_v62, %v776_v61  ;;  %v3257_v5 = vld [vmem:[%s3603_s3 + $0x20] sm:$0xff] }
  0x31   : > { %2334 = vmatprep.mubr.msk.f32.mxu0 %vm407_vm0, %v387_v48  ;;  %v586_v48 = vld [vmem:[%s3602_s2 + $0x8] sm:$0xff] }
  0x33   : > { %2735 = vmatpush3.bf16.msra.mxu0 %v2732_v14 }
  0x34   : > { %2335 = vmatmul.mubr.msk.f32.gmra.mrb[8].mxu0 %vm407_vm0, %v388_v55  ;;  %2737 = vmatprep.subr.bf16.mxu0 %v2736_v17  ;;  %v593_v55 = vld [vmem:[%s3602_s2 + $0x40] sm:$0xff] }
  0x35   : > { %2337 = vmatprep.mubr.msk.f32.mxu0 %vm407_vm0, %v389_v60  ;;  %v598_v60 = vld [vmem:[%s3602_s2 + $0x68] sm:$0xff] }
  0x37   : > { %2739 = vmatpush3.bf16.msra.mxu0 %v2736_v17  ;;  %v2788_v17 = vpack.c.bf16 %v3262_v9, %v3257_v5 }
  0x38   : > { %2338 = vmatmul.mubr.msk.f32.gmra.mrb[10].mxu0 %vm407_vm0, %v390_v0  ;;  %2741 = vmatprep.subr.bf16.mxu0 %v2740_v20  ;;  %v3244_v0 = vld [vmem:[%s3603_s3 + $0x10] sm:$0xff] }
  0x39   : > { %2340 = vmatprep.mubr.msk.f32.mxu0 %vm407_vm0, %v391_v3 }
  0x3b   : > { %2743 = vmatpush3.bf16.msra.mxu0 %v2740_v20  ;;  %v3271_v20 = vld [vmem:[%s3603_s3 + $0x30] sm:$0xff] }
  0x3c   : > { %2341 = vmatmul.mubr.msk.f32.gmra.mrb[12].mxu0 %vm407_vm0, %v392_v4  ;;  %2745 = vmatprep.subr.bf16.mxu0 %v2744_v23  ;;  %v2784_v4 = vpack.c.bf16 %v3249_v1, %v3244_v0 }
  0x3f   : > { %2747 = vmatpush3.bf16.msra.mxu0 %v2744_v23  ;;  %v3276_v23 = vld [vmem:[%s3603_s3 + $0x38] sm:$0xff] }
  0x40   : > { %2749 = vmatprep.subr.bf16.mxu0 %v2748_v26 }
  0x43   : > { %2751 = vmatpush3.bf16.msra.mxu0 %v2748_v26 }
  0x44   : > { %2781 = vmatprep.subr.bf16.mxu0 %v2780_v63 }
  0xf7   : > { %v2324_v27 = vpop.f32.mrb[0].mxu0 }
  0xf8   : > { %v516_v28 = vpop.f32.mrb[1].mxu0 }
  0xf9   : > { %v2696_v29 = vpack.c.bf16 %v2324_v27, %v516_v28  ;;  %v2792_v28 = vpack.c.bf16 %v3276_v23, %v3271_v20 }
  0xfb   : > { %v2327_v30 = vpop.f32.mrb[2].mxu0  ;;  %2697 = vmatprep.subr.bf16.mxu1 %v2696_v29 }
  0xfc   : > { %v526_v31 = vpop.f32.mrb[3].mxu0  ;;  %2699 = vmatpush3.bf16.msra.mxu1 %v2696_v29  ;;  %v3285_v29 = vld [vmem:[%s3603_s3 + $0x40] sm:$0xff] }
  0xfd   : > { %v2700_v32 = vpack.c.bf16 %v2327_v30, %v526_v31  ;;  %v3290_v30 = vld [vmem:[%s3603_s3 + $0x48] sm:$0xff] }
  0xff   : > { %v2330_v33 = vpop.f32.mrb[4].mxu0  ;;  %2701 = vmatprep.subr.bf16.mxu1 %v2700_v32 }
 0x100   : > { %v536_v34 = vpop.f32.mrb[5].mxu0  ;;  %2703 = vmatpush3.bf16.msra.mxu1 %v2700_v32 }
 0x101   : > { %v2704_v35 = vpack.c.bf16 %v2330_v33, %v536_v34  ;;  %v2796_v33 = vpack.c.bf16 %v3290_v30, %v3285_v29  ;;  %v3299_v34 = vld [vmem:[%s3603_s3 + $0x50] sm:$0xff] }
 0x103   : > { %v2333_v36 = vpop.f32.mrb[6].mxu0  ;;  %2705 = vmatprep.subr.bf16.mxu1 %v2704_v35 }
 0x104   : > { %v546_v37 = vpop.f32.mrb[7].mxu0  ;;  %2707 = vmatpush3.bf16.msra.mxu1 %v2704_v35  ;;  %v3304_v35 = vld [vmem:[%s3603_s3 + $0x58] sm:$0xff] }
 0x105   : > { %v2708_v38 = vpack.c.bf16 %v2333_v36, %v546_v37 }
 0x107   : > { %v2336_v39 = vpop.f32.mrb[8].mxu0  ;;  %2709 = vmatprep.subr.bf16.mxu1 %v2708_v38 }
 0x108   : > { %v556_v40 = vpop.f32.mrb[9].mxu0  ;;  %2711 = vmatpush3.bf16.msra.mxu1 %v2708_v38  ;;  %v2800_v38 = vpack.c.bf16 %v3304_v35, %v3299_v34 }
 0x109   : > { %v2712_v41 = vpack.c.bf16 %v2336_v39, %v556_v40  ;;  %v3313_v39 = vld [vmem:[%s3603_s3 + $0x60] sm:$0xff]  ;;  %v3318_v40 = vld [vmem:[%s3603_s3 + $0x68] sm:$0xff] }
 0x10b   : > { %v2339_v42 = vpop.f32.mrb[10].mxu0  ;;  %2713 = vmatprep.subr.bf16.mxu1 %v2712_v41 }
 0x10c   : > { %v566_v43 = vpop.f32.mrb[11].mxu0  ;;  %2715 = vmatpush3.bf16.msra.mxu1 %v2712_v41 }
 0x10d   : > { %v2716_v44 = vpack.c.bf16 %v2339_v42, %v566_v43  ;;  %v2804_v43 = vpack.c.bf16 %v3318_v40, %v3313_v39 }
 0x10f   : > { %v2342_v45 = vpop.f32.mrb[12].mxu0  ;;  %2717 = vmatprep.subr.bf16.mxu1 %v2716_v44 }
 0x110   : > { %v576_v46 = vpop.f32.mrb[13].mxu0  ;;  %2719 = vmatpush3.bf16.msra.mxu1 %v2716_v44 }
 0x111   : > { %v2720_v47 = vpack.c.bf16 %v2342_v45, %v576_v46 }
 0x113   : > { %2721 = vmatprep.subr.bf16.mxu1 %v2720_v47 }
 0x114   : > { %2723 = vmatpush3.bf16.msra.mxu1 %v2720_v47 }
 0x117   : > { %2372 = vmatmul.mubr.msk.f32.vlgmr.msra.gmra.mrb[0].mxu1 %vm407_vm0, %v586_v48 }
 0x118   : > { %2374 = vmatprep.mubr.msk.f32.mxu1 %vm407_vm0, %v587_v49 }
 0x11b   : > { %2375 = vmatmul.mubr.msk.f32.gmra.mrb[2].mxu1 %vm407_vm0, %v588_v50 }
 0x11c   : > { %2377 = vmatprep.mubr.msk.f32.mxu1 %vm407_vm0, %v589_v51 }
 0x11f   : > { %2378 = vmatmul.mubr.msk.f32.gmra.mrb[4].mxu1 %vm407_vm0, %v590_v52 }
 0x120   : > { %2380 = vmatprep.mubr.msk.f32.mxu1 %vm407_vm0, %v591_v53 }
 0x123   : > { %2381 = vmatmul.mubr.msk.f32.gmra.mrb[6].mxu1 %vm407_vm0, %v592_v54 }
 0x124   : > { %2383 = vmatprep.mubr.msk.f32.mxu1 %vm407_vm0, %v593_v55 }
 0x127   : > { %2384 = vmatmul.mubr.msk.f32.gmra.mrb[8].mxu1 %vm407_vm0, %v594_v56 }
 0x128   : > { %2386 = vmatprep.mubr.msk.f32.mxu1 %vm407_vm0, %v595_v57 }
 0x12b   : > { %2387 = vmatmul.mubr.msk.f32.gmra.mrb[10].mxu1 %vm407_vm0, %v596_v58 }
 0x12c   : > { %2389 = vmatprep.mubr.msk.f32.mxu1 %vm407_vm0, %v597_v59 }
 0x12f   : > { %2390 = vmatmul.mubr.msk.f32.gmra.mrb[12].mxu1 %vm407_vm0, %v598_v60 }
 0x130   : > { %2469 = vmatprep.mubr.msk.f32.mxu1 %vm407_vm0, %v776_v61 }
 0x1ea   : > { %v2373_v2 = vpop.f32.mrb[0].mxu1 }
 0x1eb   : > { %v707_v3 = vpop.f32.mrb[1].mxu1 }
 0x1ec   : > { %2420 = vmatprep.mubr.msk.f32.mxu0 %vm407_vm0, %v707_v3 }
 0x1ed   : > { %2421 = vmatmul.mubr.msk.f32.vlgmr.msra.gmra.mrb[14].mxu0 %vm407_vm0, %v2373_v2 }
 0x1ee   : > { %v2376_v11 = vpop.f32.mrb[2].mxu1  ;;  %2783 = vmatpush3.bf16.msra.mxu0 %v2780_v63 }
 0x1ef   : > { %v717_v14 = vpop.f32.mrb[3].mxu1  ;;  %2785 = vmatprep.subr.bf16.mxu0 %v2784_v4 }
 0x1f0   : > { %2423 = vmatprep.mubr.msk.f32.mxu0 %vm407_vm0, %v717_v14 }
 0x1f1   : > { %2424 = vmatmul.mubr.msk.f32.gmra.mrb[16].mxu0 %vm407_vm0, %v2376_v11 }
 0x1f2   : > { %v2379_v26 = vpop.f32.mrb[4].mxu1  ;;  %2787 = vmatpush3.bf16.msra.mxu0 %v2784_v4 }
 0x1f3   : > { %v727_v27 = vpop.f32.mrb[5].mxu1  ;;  %2789 = vmatprep.subr.bf16.mxu0 %v2788_v17 }
 0x1f4   : > { %2426 = vmatprep.mubr.msk.f32.mxu0 %vm407_vm0, %v727_v27 }
 0x1f5   : > { %2427 = vmatmul.mubr.msk.f32.gmra.mrb[18].mxu0 %vm407_vm0, %v2379_v26 }
 0x1f6   : > { %v2382_v31 = vpop.f32.mrb[6].mxu1  ;;  %2791 = vmatpush3.bf16.msra.mxu0 %v2788_v17 }
 0x1f7   : > { %v737_v32 = vpop.f32.mrb[7].mxu1  ;;  %2793 = vmatprep.subr.bf16.mxu0 %v2792_v28 }
 0x1f8   : > { %2429 = vmatprep.mubr.msk.f32.mxu0 %vm407_vm0, %v737_v32 }
 0x1f9   : > { %2430 = vmatmul.mubr.msk.f32.gmra.mrb[20].mxu0 %vm407_vm0, %v2382_v31 }
 0x1fa   : > { %v2385_v36 = vpop.f32.mrb[8].mxu1  ;;  %2795 = vmatpush3.bf16.msra.mxu0 %v2792_v28 }
 0x1fb   : > { %v747_v37 = vpop.f32.mrb[9].mxu1  ;;  %2797 = vmatprep.subr.bf16.mxu0 %v2796_v33 }
 0x1fc   : > { %2432 = vmatprep.mubr.msk.f32.mxu0 %vm407_vm0, %v747_v37 }
 0x1fd   : > { %2433 = vmatmul.mubr.msk.f32.gmra.mrb[22].mxu0 %vm407_vm0, %v2385_v36 }
 0x1fe   : > { %v2388_v41 = vpop.f32.mrb[10].mxu1  ;;  %2799 = vmatpush3.bf16.msra.mxu0 %v2796_v33 }
 0x1ff   : > { %v757_v42 = vpop.f32.mrb[11].mxu1  ;;  %2801 = vmatprep.subr.bf16.mxu0 %v2800_v38 }
 0x200   : > { %2435 = vmatprep.mubr.msk.f32.mxu0 %vm407_vm0, %v757_v42 }
 0x201   : > { %2436 = vmatmul.mubr.msk.f32.gmra.mrb[24].mxu0 %vm407_vm0, %v2388_v41 }
 0x202   : > { %v2391_v44 = vpop.f32.mrb[12].mxu1  ;;  %2803 = vmatpush3.bf16.msra.mxu0 %v2800_v38 }
 0x203   : > { %v767_v45 = vpop.f32.mrb[13].mxu1  ;;  %2805 = vmatprep.subr.bf16.mxu0 %v2804_v43 }
 0x204   : > { %2438 = vmatprep.mubr.msk.f32.mxu0 %vm407_vm0, %v767_v45 }
 0x205   : > { %2439 = vmatmul.mubr.msk.f32.gmra.mrb[26].mxu0 %vm407_vm0, %v2391_v44 }
 0x206   : > { %2807 = vmatpush3.bf16.msra.mxu0 %v2804_v43  ;;  %2518 = vmatprep.mubr.msk.f32.mxu0 %vm407_vm0, %v707_v3  ;;  %v1625_v43 = vld [vmem:[%s3605_s5 + $0x68] sm:$0xff] }
 0x209   : > { %2519 = vmatmul.mubr.msk.f32.vlgmr.msra.gmra.mrb[28].mxu0 %vm407_vm0, %v2373_v2 }
 0x20a   : > { %2521 = vmatprep.mubr.msk.f32.mxu0 %vm407_vm0, %v717_v14 }
 0x20d   : > { %2522 = vmatmul.mubr.msk.f32.gmra.mrb[30].mxu0 %vm407_vm0, %v2376_v11 }
 0x20e   : > { %2524 = vmatprep.mubr.msk.f32.mxu0 %vm407_vm0, %v727_v27 }
 0x211   : > { %2525 = vmatmul.mubr.msk.f32.gmra.mrb[32].mxu0 %vm407_vm0, %v2379_v26 }
 0x212   : > { %2527 = vmatprep.mubr.msk.f32.mxu0 %vm407_vm0, %v737_v32 }
 0x215   : > { %2528 = vmatmul.mubr.msk.f32.gmra.mrb[34].mxu0 %vm407_vm0, %v2382_v31 }
 0x216   : > { %2530 = vmatprep.mubr.msk.f32.mxu0 %vm407_vm0, %v747_v37 }
 0x219   : > { %2531 = vmatmul.mubr.msk.f32.gmra.mrb[36].mxu0 %vm407_vm0, %v2385_v36 }
 0x21a   : > { %2533 = vmatprep.mubr.msk.f32.mxu0 %vm407_vm0, %v757_v42 }
 0x21d   : > { %2534 = vmatmul.mubr.msk.f32.gmra.mrb[38].mxu0 %vm407_vm0, %v2388_v41 }
 0x21e   : > { %2536 = vmatprep.mubr.msk.f32.mxu0 %vm407_vm0, %v767_v45 }
 0x221   : > { %2537 = vmatmul.mubr.msk.f32.gmra.mrb[40].mxu0 %vm407_vm0, %v2391_v44 }
 0x2c0   : > { %v2422_v46 = vpop.f32.mrb[14].mxu0 }
 0x2c1   : > { %v912_v47 = vpop.f32.mrb[15].mxu0 }
 0x2c2   : > { %v2752_v48 = vpack.c.bf16 %v2422_v46, %v912_v47 }
 0x2c4   : > { %v2425_v49 = vpop.f32.mrb[16].mxu0  ;;  %2753 = vmatprep.subr.bf16.mxu1 %v2752_v48 }
 0x2c5   : > { %v922_v50 = vpop.f32.mrb[17].mxu0  ;;  %2755 = vmatpush3.bf16.msra.mxu1 %v2752_v48 }
 0x2c6   : > { %v2756_v51 = vpack.c.bf16 %v2425_v49, %v922_v50 }
 0x2c8   : > { %v2428_v52 = vpop.f32.mrb[18].mxu0  ;;  %2757 = vmatprep.subr.bf16.mxu1 %v2756_v51 }
 0x2c9   : > { %v932_v53 = vpop.f32.mrb[19].mxu0  ;;  %2759 = vmatpush3.bf16.msra.mxu1 %v2756_v51 }
 0x2ca   : > { %v2760_v54 = vpack.c.bf16 %v2428_v52, %v932_v53 }
 0x2cc   : > { %v2431_v55 = vpop.f32.mrb[20].mxu0  ;;  %2761 = vmatprep.subr.bf16.mxu1 %v2760_v54 }
 0x2cd   : > { %v942_v56 = vpop.f32.mrb[21].mxu0  ;;  %2763 = vmatpush3.bf16.msra.mxu1 %v2760_v54 }
 0x2ce   : > { %v2764_v57 = vpack.c.bf16 %v2431_v55, %v942_v56 }
 0x2d0   : > { %v2434_v58 = vpop.f32.mrb[22].mxu0  ;;  %2765 = vmatprep.subr.bf16.mxu1 %v2764_v57 }
 0x2d1   : > { %v952_v59 = vpop.f32.mrb[23].mxu0  ;;  %2767 = vmatpush3.bf16.msra.mxu1 %v2764_v57 }
 0x2d2   : > { %v2768_v60 = vpack.c.bf16 %v2434_v58, %v952_v59 }
 0x2d4   : > { %v2437_v61 = vpop.f32.mrb[24].mxu0  ;;  %2769 = vmatprep.subr.bf16.mxu1 %v2768_v60 }
 0x2d5   : > { %v962_v63 = vpop.f32.mrb[25].mxu0  ;;  %2771 = vmatpush3.bf16.msra.mxu1 %v2768_v60 }
 0x2d6   : > { %v2772_v2 = vpack.c.bf16 %v2437_v61, %v962_v63 }
 0x2d8   : > { %v2440_v3 = vpop.f32.mrb[26].mxu0  ;;  %2773 = vmatprep.subr.bf16.mxu1 %v2772_v2 }
 0x2d9   : > { %v972_v4 = vpop.f32.mrb[27].mxu0  ;;  %2775 = vmatpush3.bf16.msra.mxu1 %v2772_v2 }
 0x2da   : > { %v2776_v11 = vpack.c.bf16 %v2440_v3, %v972_v4 }
 0x2dc   : > { %2777 = vmatprep.subr.bf16.mxu1 %v2776_v11  ;;  %v2520_v14 = vpop.f32.mrb[28].mxu0 }
 0x2dd   : > { %2779 = vmatpush3.bf16.msra.mxu1 %v2776_v11  ;;  %v1224_v17 = vpop.f32.mrb[29].mxu0 }
 0x2de   : > { %v2808_v26 = vpack.c.bf16 %v2520_v14, %v1224_v17 }
 0x2e0   : > { %2470 = vmatmul.mubr.msk.f32.vlgmr.msra.gmra.mrb[14].mxu1 %vm407_vm0, %v3237_v62  ;;  %v2523_v27 = vpop.f32.mrb[30].mxu0  ;;  %2809 = vmatprep.subr.bf16.mxu1 %v2808_v26 }
 0x2e1   : > { %v1234_v28 = vpop.f32.mrb[31].mxu0  ;;  %2811 = vmatpush3.bf16.msra.mxu1 %v2808_v26  ;;  %2472 = vmatprep.mubr.msk.f32.mxu1 %vm407_vm0, %v3244_v0 }
 0x2e2   : > { %v2812_v31 = vpack.c.bf16 %v2523_v27, %v1234_v28 }
 0x2e4   : > { %2473 = vmatmul.mubr.msk.f32.gmra.mrb[16].mxu1 %vm407_vm0, %v3249_v1  ;;  %v2526_v32 = vpop.f32.mrb[32].mxu0  ;;  %2813 = vmatprep.subr.bf16.mxu1 %v2812_v31 }
 0x2e5   : > { %v1244_v33 = vpop.f32.mrb[33].mxu0  ;;  %2815 = vmatpush3.bf16.msra.mxu1 %v2812_v31  ;;  %2475 = vmatprep.mubr.msk.f32.mxu1 %vm407_vm0, %v3257_v5 }
 0x2e6   : > { %v2816_v36 = vpack.c.bf16 %v2526_v32, %v1244_v33 }
 0x2e8   : > { %2476 = vmatmul.mubr.msk.f32.gmra.mrb[18].mxu1 %vm407_vm0, %v3262_v9  ;;  %v2529_v62 = vpop.f32.mrb[34].mxu0  ;;  %2817 = vmatprep.subr.bf16.mxu1 %v2816_v36 }
 0x2e9   : > { %v1254_v37 = vpop.f32.mrb[35].mxu0  ;;  %2819 = vmatpush3.bf16.msra.mxu1 %v2816_v36  ;;  %2478 = vmatprep.mubr.msk.f32.mxu1 %vm407_vm0, %v3271_v20 }
 0x2ea   : > { %v2820_v0 = vpack.c.bf16 %v2529_v62, %v1254_v37 }
 0x2ec   : > { %2479 = vmatmul.mubr.msk.f32.gmra.mrb[20].mxu1 %vm407_vm0, %v3276_v23  ;;  %v2532_v1 = vpop.f32.mrb[36].mxu0  ;;  %2821 = vmatprep.subr.bf16.mxu1 %v2820_v0 }
 0x2ed   : > { %v1264_v38 = vpop.f32.mrb[37].mxu0  ;;  %2823 = vmatpush3.bf16.msra.mxu1 %v2820_v0  ;;  %2481 = vmatprep.mubr.msk.f32.mxu1 %vm407_vm0, %v3285_v29 }
 0x2ee   : > { %v2824_v5 = vpack.c.bf16 %v2532_v1, %v1264_v38 }
 0x2f0   : > { %2482 = vmatmul.mubr.msk.f32.gmra.mrb[22].mxu1 %vm407_vm0, %v3290_v30  ;;  %v2535_v9 = vpop.f32.mrb[38].mxu0  ;;  %2825 = vmatprep.subr.bf16.mxu1 %v2824_v5 }
 0x2f1   : > { %v1274_v41 = vpop.f32.mrb[39].mxu0  ;;  %2827 = vmatpush3.bf16.msra.mxu1 %v2824_v5  ;;  %2484 = vmatprep.mubr.msk.f32.mxu1 %vm407_vm0, %v3299_v34  ;;  %v1622_v34 = vld [vmem:[%s3605_s5 + $0x50] sm:$0xff] }
 0x2f2   : > { %v2828_v20 = vpack.c.bf16 %v2535_v9, %v1274_v41 }
 0x2f4   : > { %2485 = vmatmul.mubr.msk.f32.gmra.mrb[24].mxu1 %vm407_vm0, %v3304_v35  ;;  %v2538_v23 = vpop.f32.mrb[40].mxu0  ;;  %2829 = vmatprep.subr.bf16.mxu1 %v2828_v20  ;;  %v1623_v35 = vld [vmem:[%s3605_s5 + $0x58] sm:$0xff] }
 0x2f5   : > { %v1284_v42 = vpop.f32.mrb[41].mxu0  ;;  %2831 = vmatpush3.bf16.msra.mxu1 %v2828_v20  ;;  %2487 = vmatprep.mubr.msk.f32.mxu1 %vm407_vm0, %v3313_v39  ;;  %v2856_v39 = vpack.c.bf16 %v1623_v35, %v1622_v34 }
 0x2f6   : > { %v2832_v29 = vpack.c.bf16 %v2538_v23, %v1284_v42 }
 0x2f8   : > { %2488 = vmatmul.mubr.msk.f32.gmra.mrb[26].mxu1 %vm407_vm0, %v3318_v40  ;;  %2833 = vmatprep.subr.bf16.mxu1 %v2832_v29  ;;  %v1624_v40 = vld [vmem:[%s3605_s5 + $0x60] sm:$0xff] }
 0x2f9   : > { %2835 = vmatpush3.bf16.msra.mxu1 %v2832_v29  ;;  %2567 = vmatprep.mubr.msk.f32.mxu1 %vm407_vm0, %v3098_v6  ;;  %v1612_v6 = vld [vmem:[%s3605_s5] sm:$0xff]  ;;  %v2860_v44 = vpack.c.bf16 %v1625_v43, %v1624_v40 }
 0x2fc   : > { %2568 = vmatmul.mubr.msk.f32.vlgmr.msra.gmra.mrb[28].mxu1 %vm407_vm0, %v3103_v7  ;;  %v1613_v7 = vld [vmem:[%s3605_s5 + $0x8] sm:$0xff] }
 0x2fd   : > { %2570 = vmatprep.mubr.msk.f32.mxu1 %vm407_vm0, %v3108_v8  ;;  %v2836_v8 = vpack.c.bf16 %v1613_v7, %v1612_v6 }
 0x2ff   : > { %2837 = vmatprep.subr.bf16.mxu0 %v2836_v8 }
 0x300   : > { %2571 = vmatmul.mubr.msk.f32.gmra.mrb[30].mxu1 %vm407_vm0, %v3115_v10  ;;  %2839 = vmatpush3.bf16.msra.mxu0 %v2836_v8  ;;  %v1614_v10 = vld [vmem:[%s3605_s5 + $0x10] sm:$0xff] }
 0x301   : > { %2573 = vmatprep.mubr.msk.f32.mxu1 %vm407_vm0, %v3122_v12  ;;  %v1615_v12 = vld [vmem:[%s3605_s5 + $0x18] sm:$0xff] }
 0x304   : > { %2574 = vmatmul.mubr.msk.f32.gmra.mrb[32].mxu1 %vm407_vm0, %v3127_v13  ;;  %v2840_v13 = vpack.c.bf16 %v1615_v12, %v1614_v10 }
 0x305   : > { %2576 = vmatprep.mubr.msk.f32.mxu1 %vm407_vm0, %v3134_v15  ;;  %v1616_v15 = vld [vmem:[%s3605_s5 + $0x20] sm:$0xff] }
 0x306   : > { %2841 = vmatprep.subr.bf16.mxu0 %v2840_v13 }
 0x307   : > { %2843 = vmatpush3.bf16.msra.mxu0 %v2840_v13 }
 0x308   : > { %2577 = vmatmul.mubr.msk.f32.gmra.mrb[34].mxu1 %vm407_vm0, %v3139_v16  ;;  %v1617_v16 = vld [vmem:[%s3605_s5 + $0x28] sm:$0xff] }
 0x309   : > { %2579 = vmatprep.mubr.msk.f32.mxu1 %vm407_vm0, %v3146_v18  ;;  %v2844_v18 = vpack.c.bf16 %v1617_v16, %v1616_v15 }
 0x30b   : > { %2845 = vmatprep.subr.bf16.mxu0 %v2844_v18 }
 0x30c   : > { %2580 = vmatmul.mubr.msk.f32.gmra.mrb[36].mxu1 %vm407_vm0, %v3151_v19  ;;  %2847 = vmatpush3.bf16.msra.mxu0 %v2844_v18  ;;  %v1618_v19 = vld [vmem:[%s3605_s5 + $0x30] sm:$0xff] }
 0x30d   : > { %2582 = vmatprep.mubr.msk.f32.mxu1 %vm407_vm0, %v3158_v21  ;;  %v1619_v21 = vld [vmem:[%s3605_s5 + $0x38] sm:$0xff] }
 0x310   : > { %2583 = vmatmul.mubr.msk.f32.gmra.mrb[38].mxu1 %vm407_vm0, %v3163_v22  ;;  %v2848_v22 = vpack.c.bf16 %v1619_v21, %v1618_v19 }
 0x311   : > { %2585 = vmatprep.mubr.msk.f32.mxu1 %vm407_vm0, %v3170_v24  ;;  %v1620_v24 = vld [vmem:[%s3605_s5 + $0x40] sm:$0xff] }
 0x312   : > { %2849 = vmatprep.subr.bf16.mxu0 %v2848_v22 }
 0x313   : > { %2851 = vmatpush3.bf16.msra.mxu0 %v2848_v22 }
 0x314   : > { %2586 = vmatmul.mubr.msk.f32.gmra.mrb[40].mxu1 %vm407_vm0, %v3175_v25  ;;  %v1621_v25 = vld [vmem:[%s3605_s5 + $0x48] sm:$0xff] }
 0x315   : > { %v2852_v30 = vpack.c.bf16 %v1621_v25, %v1620_v24 }
 0x317   : > { %2853 = vmatprep.subr.bf16.mxu0 %v2852_v30 }
 0x318   : > { %2855 = vmatpush3.bf16.msra.mxu0 %v2852_v30 }
 0x319   : > { %2857 = vmatprep.subr.bf16.mxu0 %v2856_v39 }
 0x31c   : > { %2859 = vmatpush3.bf16.msra.mxu0 %v2856_v39 }
 0x31d   : > { %2861 = vmatprep.subr.bf16.mxu0 %v2860_v44 }
 0x320   : > { %2863 = vmatpush3.bf16.msra.mxu0 %v2860_v44 }
 0x3b3   : > { %v2471_v45 = vpop.f32.mrb[14].mxu1 }
 0x3b4   : > { %v1089_v46 = vpop.f32.mrb[15].mxu1  ;;  %v1471_v60 = vmul.f32 %v2471_v45, %v2471_v45 }
 0x3b5   : > { %v1470_v2 = vmul.f32 %v1089_v46, %v1089_v46 }
 0x3b7   : > { %v2474_v47 = vpop.f32.mrb[16].mxu1 }
 0x3b8   : > { %v1099_v48 = vpop.f32.mrb[17].mxu1  ;;  %v1473_v17 = vmul.f32 %v2474_v47, %v2474_v47 }
 0x3b9   : > { %v1472_v28 = vmul.f32 %v1099_v48, %v1099_v48 }
 0x3bb   : > { %v2477_v49 = vpop.f32.mrb[18].mxu1 }
 0x3bc   : > { %v1109_v50 = vpop.f32.mrb[19].mxu1  ;;  %v1475_v62 = vmul.f32 %v2477_v49, %v2477_v49 }
 0x3bd   : > { %v1474_v1 = vmul.f32 %v1109_v50, %v1109_v50 }
 0x3bf   : > { %v2480_v51 = vpop.f32.mrb[20].mxu1 }
 0x3c0   : > { %v1119_v52 = vpop.f32.mrb[21].mxu1  ;;  %v1477_v5 = vmul.f32 %v2480_v51, %v2480_v51 }
 0x3c1   : > { %v1476_v41 = vmul.f32 %v1119_v52, %v1119_v52 }
 0x3c3   : > { %v2483_v53 = vpop.f32.mrb[22].mxu1 }
 0x3c4   : > { %v1129_v54 = vpop.f32.mrb[23].mxu1  ;;  %v1479_v20 = vmul.f32 %v2483_v53, %v2483_v53 }
 0x3c5   : > { %v1478_v23 = vmul.f32 %v1129_v54, %v1129_v54 }
 0x3c7   : > { %v2486_v55 = vpop.f32.mrb[24].mxu1 }
 0x3c8   : > { %v1139_v56 = vpop.f32.mrb[25].mxu1  ;;  %v1481_v6 = vmul.f32 %v2486_v55, %v2486_v55 }
 0x3c9   : > { %v1480_v7 = vmul.f32 %v1139_v56, %v1139_v56 }
 0x3cb   : > { %v2489_v57 = vpop.f32.mrb[26].mxu1 }
 0x3cc   : > { %v1149_v58 = vpop.f32.mrb[27].mxu1  ;;  %v3454_v12 = vmul.f32 %v2489_v57, %v2489_v57 }
 0x3cd   : > { %v3456_v13 = vmul.f32 %v1149_v58, %v1149_v58 }
 0x3cf   : > { %v2569_v59 = vpop.f32.mrb[28].mxu1 }
 0x3d0   : > { %v1485_v61 = vmul.f32 %v2569_v59, %v2569_v59  ;;  %v1401_v63 = vpop.f32.mrb[29].mxu1 }
 0x3d1   : > { %v1484_v3 = vmul.f32 %v1401_v63, %v1401_v63 }
 0x3d2   : > { %v3437_v4 = vadd.f32 %v1485_v61, %v1471_v60 }
 0x3d3   : > { %v3439_v11 = vadd.f32 %v1484_v3, %v1470_v2  ;;  %v2572_v14 = vpop.f32.mrb[30].mxu1 }
 0x3d4   : > { %2901 = vrsqrt.f32 %v3437_v4  ;;  %v1487_v26 = vmul.f32 %v2572_v14, %v2572_v14  ;;  %v1411_v27 = vpop.f32.mrb[31].mxu1  ;;  %vm1521_vm2 = vcmp.eq.f32.partialorder %v3437_v4, inf  ;;  %vm1523_vm3 = vcmp.eq.f32.partialorder %v3437_v4, 0.0 }
 0x3d5   : > { %2903 = vrsqrt.f32 %v3439_v11  ;;  %v1486_v31 = vmul.f32 %v1411_v27, %v1411_v27  ;;  %vm1514_vm1 = vcmp.eq.f32.partialorder %v3439_v11, inf  ;;  %vm1516_vm4 = vcmp.eq.f32.partialorder %v3439_v11, 0.0 }
 0x3d6   : > { %v3443_v32 = vadd.f32 %v1487_v26, %v1473_v17  ;;  %v1517_v24 = vand.u32 2147483648, %v3439_v11  ;;  %v1524_v39 = vand.u32 2147483648, %v3437_v4 }
 0x3d7   : > { %v3445_v33 = vadd.f32 %v1486_v31, %v1472_v28  ;;  %v2575_v36 = vpop.f32.mrb[32].mxu1 }
 0x3d8   : > { %2905 = vrsqrt.f32 %v3443_v32  ;;  %v1489_v37 = vmul.f32 %v2575_v36, %v2575_v36  ;;  %v1421_v0 = vpop.f32.mrb[33].mxu1  ;;  %vm1535_vm5 = vcmp.eq.f32.partialorder %v3443_v32, inf  ;;  %vm1537_vm7 = vcmp.eq.f32.partialorder %v3443_v32, 0.0 }
 0x3d9   : > { %2907 = vrsqrt.f32 %v3445_v33  ;;  %v1488_v38 = vmul.f32 %v1421_v0, %v1421_v0  ;;  %vm1528_vm6 = vcmp.eq.f32.partialorder %v3445_v33, inf  ;;  %vm1530_vm8 = vcmp.eq.f32.partialorder %v3445_v33, 0.0 }
 0x3da   : > { %v3449_v9 = vadd.f32 %v1489_v37, %v1475_v62  ;;  %v1531_v57 = vand.u32 2147483648, %v3445_v33  ;;  %v1538_v63 = vand.u32 2147483648, %v3443_v32 }
 0x3db   : > { %v3451_v42 = vadd.f32 %v1488_v38, %v1474_v1  ;;  %v2578_v29 = vpop.f32.mrb[34].mxu1 }
 0x3dc   : > { %2909 = vrsqrt.f32 %v3449_v9  ;;  %v1491_v8 = vmul.f32 %v2578_v29, %v2578_v29  ;;  %v1431_v10 = vpop.f32.mrb[35].mxu1  ;;  %vm1549_vm9 = vcmp.eq.f32.partialorder %v3449_v9, inf  ;;  %v1552_v0 = vand.u32 2147483648, %v3449_v9 }
 0x3dd   : > { %2911 = vrsqrt.f32 %v3451_v42  ;;  %v1490_v15 = vmul.f32 %v1431_v10, %v1431_v10  ;;  %vm1542_vm10 = vcmp.eq.f32.partialorder %v3451_v42, inf  ;;  %vm1544_vm11 = vcmp.eq.f32.partialorder %v3451_v42, 0.0 }
 0x3de   : > { %v2902_v16 = vpop.eup %2901  ;;  %v3459_v18 = vadd.f32 %v1491_v8, %v1477_v5  ;;  %vm1551_vm12 = vcmp.eq.f32.partialorder %v3449_v9, 0.0 }
 0x3df   : > { %v2904_v19 = vpop.eup %2903  ;;  %v3464_v21 = vadd.f32 %v1490_v15, %v1476_v41  ;;  %v2581_v22 = vpop.f32.mrb[36].mxu1  ;;  %v1520_v25 = vmul.f32 %v2902_v16, %v3437_v4 }
 0x3e0   : > { %2913 = vrsqrt.f32 %v3459_v18  ;;  %v1493_v30 = vmul.f32 %v2581_v22, %v2581_v22  ;;  %v1441_v34 = vpop.f32.mrb[37].mxu1  ;;  %v1513_v35 = vmul.f32 %v2904_v19, %v3439_v11  ;;  %vm1563_vm13 = vcmp.eq.f32.partialorder %v3459_v18, inf }
 0x3e1   : > { %2915 = vrsqrt.f32 %v3464_v21  ;;  %v1492_v40 = vmul.f32 %v1441_v34, %v1441_v34  ;;  %v1522_v43 = vsel %vm1521_vm2, %v3437_v4, %v1520_v25  ;;  %vm1556_vm14 = vcmp.eq.f32.partialorder %v3464_v21, inf }
 0x3e2   : > { %v2906_v44 = vpop.eup %2905  ;;  %v3475_v45 = vadd.f32 %v1493_v30, %v1479_v20  ;;  %v1515_v46 = vsel %vm1514_vm1, %v3439_v11, %v1513_v35  ;;  %v1525_v54 = vsel %vm1523_vm3, %v1524_v39, %v1522_v43  ;;  %vm1558_vm15 = vcmp.eq.f32.partialorder %v3464_v21, 0.0 }
 0x3e3   : > { %v2908_v47 = vpop.eup %2907  ;;  %v3482_v48 = vadd.f32 %v1492_v40, %v1478_v23  ;;  %v2584_v49 = vpop.f32.mrb[38].mxu1  ;;  %v1518_v50 = vsel %vm1516_vm4, %v1517_v24, %v1515_v46  ;;  %v1534_v51 = vmul.f32 %v2906_v44, %v3443_v32  ;;  %vm1565_vm1 = vcmp.eq.f32.partialorder %v3459_v18, 0.0 }
 0x3e4   : > { %2917 = vrsqrt.f32 %v3475_v45  ;;  %v1495_v52 = vmul.f32 %v2584_v49, %v2584_v49  ;;  %v1451_v53 = vpop.f32.mrb[39].mxu1  ;;  %2616 = vmatprep.mubr.msk.f32.mxu0 %vm407_vm0, %v1518_v50  ;;  %v1527_v55 = vmul.f32 %v2908_v47, %v3445_v33  ;;  %vm1577_vm2 = vcmp.eq.f32.partialorder %v3475_v45, inf }
 0x3e5   : > { %2919 = vrsqrt.f32 %v3482_v48  ;;  %v1494_v56 = vmul.f32 %v1451_v53, %v1451_v53  ;;  %2617 = vmatmul.mubr.msk.f32.vlgmr.msra.gmra.mrb[42].mxu0 %vm407_vm0, %v1525_v54  ;;  %v1536_v58 = vsel %vm1535_vm5, %v3443_v32, %v1534_v51  ;;  %vm1570_vm3 = vcmp.eq.f32.partialorder %v3482_v48, inf }
 0x3e6   : > { %v2910_v59 = vpop.eup %2909  ;;  %v3499_v60 = vadd.f32 %v1495_v52, %v1481_v6  ;;  %v1529_v61 = vsel %vm1528_vm6, %v3445_v33, %v1527_v55  ;;  %v1539_v27 = vsel %vm1537_vm7, %v1538_v63, %v1536_v58  ;;  %v1545_v33 = vand.u32 2147483648, %v3451_v42 }
 0x3e7   : > { %v2912_v2 = vpop.eup %2911  ;;  %v3506_v3 = vadd.f32 %v1494_v56, %v1480_v7  ;;  %v2587_v4 = vpop.f32.mrb[40].mxu1  ;;  %v1532_v11 = vsel %vm1530_vm8, %v1531_v57, %v1529_v61  ;;  %v1548_v14 = vmul.f32 %v2910_v59, %v3449_v9  ;;  %v1566_v7 = vand.u32 2147483648, %v3459_v18  ;;  %v1610_v57 = vld [vmem:[%s3606_s6] sm:$0xff] }
 0x3e8   : > { %2921 = vrsqrt.f32 %v3499_v60  ;;  %v1497_v17 = vmul.f32 %v2587_v4, %v2587_v4  ;;  %v1461_v26 = vpop.f32.mrb[41].mxu1  ;;  %2619 = vmatprep.mubr.msk.f32.mxu0 %vm407_vm0, %v1532_v11  ;;  %v1541_v28 = vmul.f32 %v2912_v2, %v3451_v42  ;;  %v1573_v16 = vand.u32 2147483648, %v3482_v48  ;;  %2665 = vmatprep.mubr.msk.f32.mxu1 %vm407_vm0, %v1610_v57 }
 0x3e9   : > { %2923 = vrsqrt.f32 %v3506_v3  ;;  %v1496_v31 = vmul.f32 %v1461_v26, %v1461_v26  ;;  %2620 = vmatmul.mubr.msk.f32.gmra.mrb[44].mxu0 %vm407_vm0, %v1539_v27  ;;  %v1550_v36 = vsel %vm1549_vm9, %v3449_v9, %v1548_v14  ;;  %vm1572_vm4 = vcmp.eq.f32.partialorder %v3482_v48, 0.0 }
 0x3ea   : > { %v2914_v62 = vpop.eup %2913  ;;  %v3524_v37 = vadd.f32 %v1497_v17, %v3454_v12  ;;  %v1543_v32 = vsel %vm1542_vm10, %v3451_v42, %v1541_v28  ;;  %v1553_v20 = vsel %vm1551_vm12, %v1552_v0, %v1550_v36  ;;  %v1559_v42 = vand.u32 2147483648, %v3464_v21 }
 0x3eb   : > { %v2916_v1 = vpop.eup %2915  ;;  %v3530_v38 = vadd.f32 %v1496_v31, %v3456_v13  ;;  %v1546_v5 = vsel %vm1544_vm11, %v1545_v33, %v1543_v32  ;;  %v1562_v41 = vmul.f32 %v2914_v62, %v3459_v18  ;;  %v1580_v22 = vand.u32 2147483648, %v3475_v45 }
 0x3ec   : > { %2925 = vrsqrt.f32 %v3524_v37  ;;  %2622 = vmatprep.mubr.msk.f32.mxu0 %vm407_vm0, %v1546_v5  ;;  %v1555_v23 = vmul.f32 %v2916_v1, %v3464_v21  ;;  %vm1579_vm5 = vcmp.eq.f32.partialorder %v3475_v45, 0.0  ;;  %vm1591_vm6 = vcmp.eq.f32.partialorder %v3499_v60, inf  ;;  %v1611_v1 = vld [vmem:[%s3606_s6 + $0x8] sm:$0x3f] }
 0x3ed   : > { %2927 = vrsqrt.f32 %v3530_v38  ;;  %2623 = vmatmul.mubr.msk.f32.gmra.mrb[46].mxu0 %vm407_vm0, %v1553_v20  ;;  %v1564_v9 = vsel %vm1563_vm13, %v3459_v18, %v1562_v41  ;;  %vm1584_vm7 = vcmp.eq.f32.partialorder %v3506_v3, inf  ;;  %v1587_v39 = vand.u32 2147483648, %v3506_v3 }
 0x3ee   : > { %v2918_v29 = vpop.eup %2917  ;;  %v1557_v6 = vsel %vm1556_vm14, %v3464_v21, %v1555_v23  ;;  %v1567_v13 = vsel %vm1565_vm1, %v1566_v7, %v1564_v9  ;;  %vm1586_vm8 = vcmp.eq.f32.partialorder %v3506_v3, 0.0  ;;  %vm1593_vm9 = vcmp.eq.f32.partialorder %v3499_v60, 0.0 }
 0x3ef   : > { %v2920_v8 = vpop.eup %2919  ;;  %v1560_v10 = vsel %vm1558_vm15, %v1559_v42, %v1557_v6  ;;  %v1576_v12 = vmul.f32 %v2918_v29, %v3475_v45  ;;  %vm1605_vm10 = vcmp.eq.f32.partialorder %v3524_v37, inf  ;;  %vm1598_vm11 = vcmp.eq.f32.partialorder %v3530_v38, inf }
 0x3f0   : > { %2625 = vmatprep.mubr.msk.f32.mxu0 %vm407_vm0, %v1560_v10  ;;  %v1569_v15 = vmul.f32 %v2920_v8, %v3482_v48  ;;  %v1601_v51 = vand.u32 2147483648, %v3530_v38  ;;  %vm1600_vm12 = vcmp.eq.f32.partialorder %v3530_v38, 0.0  ;;  %v1608_v54 = vand.u32 2147483648, %v3524_v37 }
 0x3f1   : > { %2626 = vmatmul.mubr.msk.f32.gmra.mrb[48].mxu0 %vm407_vm0, %v1567_v13  ;;  %v1578_v19 = vsel %vm1577_vm2, %v3475_v45, %v1576_v12  ;;  %v1594_v45 = vand.u32 2147483648, %v3499_v60  ;;  %vm1607_vm13 = vcmp.eq.f32.partialorder %v3524_v37, 0.0  ;;  %vm1886_vm14 = vcmask 111616  }
 0x3f2   : > { %v2922_v21 = vpop.eup %2921  ;;  %v1571_v18 = vsel %vm1570_vm3, %v3482_v48, %v1569_v15  ;;  %v1581_v34 = vsel %vm1579_vm5, %v1580_v22, %v1578_v19  ;;  %vm1884_vm15 = vcmask 113664  }
 0x3f3   : > { %v2924_v24 = vpop.eup %2923  ;;  %v1574_v25 = vsel %vm1572_vm4, %v1573_v16, %v1571_v18  ;;  %v1590_v30 = vmul.f32 %v2922_v21, %v3499_v60 }
 0x3f4   : > { %2628 = vmatprep.mubr.msk.f32.mxu0 %vm407_vm0, %v1574_v25  ;;  %v1583_v35 = vmul.f32 %v2924_v24, %v3506_v3 }
 0x3f5   : > { %2629 = vmatmul.mubr.msk.f32.gmra.mrb[50].mxu0 %vm407_vm0, %v1581_v34  ;;  %v1592_v40 = vsel %vm1591_vm6, %v3499_v60, %v1590_v30 }
 0x3f6   : > { %v2926_v43 = vpop.eup %2925  ;;  %v1585_v44 = vsel %vm1584_vm7, %v3506_v3, %v1583_v35  ;;  %v1595_v49 = vsel %vm1593_vm9, %v1594_v45, %v1592_v40 }
 0x3f7   : > { %v2928_v46 = vpop.eup %2927  ;;  %v1588_v47 = vsel %vm1586_vm8, %v1587_v39, %v1585_v44  ;;  %v1604_v48 = vmul.f32 %v2926_v43, %v3524_v37 }
 0x3f8   : > { %2631 = vmatprep.mubr.msk.f32.mxu0 %vm407_vm0, %v1588_v47  ;;  %v1597_v50 = vmul.f32 %v2928_v46, %v3530_v38 }
 0x3f9   : > { %2632 = vmatmul.mubr.msk.f32.gmra.mrb[52].mxu0 %vm407_vm0, %v1595_v49  ;;  %v1606_v52 = vsel %vm1605_vm10, %v3524_v37, %v1604_v48 }
 0x3fa   : > { %v1599_v53 = vsel %vm1598_vm11, %v3530_v38, %v1597_v50  ;;  %v1609_v56 = vsel %vm1607_vm13, %v1608_v54, %v1606_v52 }
 0x3fb   : > { %v1602_v55 = vsel %vm1600_vm12, %v1601_v51, %v1599_v53 }
 0x3fc   : > { %2634 = vmatprep.mubr.msk.f32.mxu0 %vm407_vm0, %v1602_v55 }
 0x3fd   : > { %2635 = vmatmul.mubr.msk.f32.gmra.mrb[54].mxu0 %vm407_vm0, %v1609_v56 }
 0x4b8   : > { %v2618_v58 = vpop.f32.mrb[42].mxu0 }
 0x4b9   : > { %v1734_v59 = vpop.f32.mrb[43].mxu0 }
 0x4ba   : > { %v2864_v60 = vpack.c.bf16 %v2618_v58, %v1734_v59 }
 0x4bc   : > { %v2621_v61 = vpop.f32.mrb[44].mxu0  ;;  %2865 = vmatprep.subr.bf16.mxu1 %v2864_v60 }
 0x4bd   : > { %v1744_v63 = vpop.f32.mrb[45].mxu0  ;;  %2867 = vmatpush3.bf16.msra.mxu1 %v2864_v60 }
 0x4be   : > { %v2868_v2 = vpack.c.bf16 %v2621_v61, %v1744_v63 }
 0x4c0   : > { %v2624_v3 = vpop.f32.mrb[46].mxu0  ;;  %2869 = vmatprep.subr.bf16.mxu1 %v2868_v2 }
 0x4c1   : > { %v1754_v4 = vpop.f32.mrb[47].mxu0  ;;  %2871 = vmatpush3.bf16.msra.mxu1 %v2868_v2 }
 0x4c2   : > { %v2872_v11 = vpack.c.bf16 %v2624_v3, %v1754_v4 }
 0x4c4   : > { %v2627_v14 = vpop.f32.mrb[48].mxu0  ;;  %2873 = vmatprep.subr.bf16.mxu1 %v2872_v11 }
 0x4c5   : > { %v1764_v17 = vpop.f32.mrb[49].mxu0  ;;  %2875 = vmatpush3.bf16.msra.mxu1 %v2872_v11 }
 0x4c6   : > { %v2876_v26 = vpack.c.bf16 %v2627_v14, %v1764_v17 }
 0x4c8   : > { %v2630_v27 = vpop.f32.mrb[50].mxu0  ;;  %2877 = vmatprep.subr.bf16.mxu1 %v2876_v26 }
 0x4c9   : > { %v1774_v28 = vpop.f32.mrb[51].mxu0  ;;  %2879 = vmatpush3.bf16.msra.mxu1 %v2876_v26 }
 0x4ca   : > { %v2880_v31 = vpack.c.bf16 %v2630_v27, %v1774_v28 }
 0x4cc   : > { %v2633_v33 = vpop.f32.mrb[52].mxu0  ;;  %2881 = vmatprep.subr.bf16.mxu1 %v2880_v31 }
 0x4cd   : > { %v1784_v36 = vpop.f32.mrb[53].mxu0  ;;  %2883 = vmatpush3.bf16.msra.mxu1 %v2880_v31 }
 0x4ce   : > { %v2884_v62 = vpack.c.bf16 %v2633_v33, %v1784_v36 }
 0x4d0   : > { %v2636_v37 = vpop.f32.mrb[54].mxu0  ;;  %2885 = vmatprep.subr.bf16.mxu1 %v2884_v62 }
 0x4d1   : > { %v1794_v32 = vpop.f32.mrb[55].mxu0  ;;  %2887 = vmatpush3.bf16.msra.mxu1 %v2884_v62 }
 0x4d2   : > { %v2888_v0 = vpack.c.bf16 %v2636_v37, %v1794_v32 }
 0x4d4   : > { %2889 = vmatprep.subr.bf16.mxu1 %v2888_v0 }
 0x4d5   : > { %2891 = vmatpush3.bf16.msra.mxu1 %v2888_v0 }
 0x4d8   : > { %2666 = vmatmul.mubr.msk.f32.vlgmr.msra.gmra.mrb[42].mxu1 %vm407_vm0, %v1611_v1 }
 0x5ab   : > { %v2667_v38 = vpop.f32.mrb[42].mxu1 }
 0x5ac   : > { %1887 = vst.msk [vmem:[%s278_s30 + $0x8] sm:$0x3f] %vm1886_vm14, %v2667_v38  ;;  %v1875_v5 = vpop.f32.mrb[43].mxu1 }
 0x5ad   : > { %1885 = vst.msk [vmem:[%s278_s30] sm:$0xff] %vm1884_vm15, %v1875_v5 }
 0x5ae PF: > { %s17_s24 = sadd.s32 1, %s2935_s24  }
 0x5af   : > { %p14_p4 = scmp.ge.s32.totalorder %s17_s24, 4  }
 0x5b1   :  { %16 = sbr.rel (!%p14_p4) target bundleno = 1 (0x1), region = 80 }

// kernel: forward_device.3
= control target key start
LH: loop header
LB: loop body
LE: loop exit
PB: predicated region body
PF: predicated region fallthrough
CT: control target
= control target key end

     0   :  { %s14216_s0 = inlined_call_operand.vmem [shape: bf16[2,64,768], index: 0, kind: input, shape index: {}]   ;;  %s14217_s1 = inlined_call_operand.vmem [shape: f32[2,1,256], index: 1, kind: input, shape index: {}]   ;;  %s14218_s2 = inlined_call_operand.vmem [shape: f32[64,128], index: 2, kind: input, shape index: {}]   ;;  %s14219_s3 = inlined_call_operand.vmem [shape: bf16[768,128], index: 3, kind: input, shape index: {}]   ;;  %s14220_s4 = inlined_call_operand.vmem [shape: f32[2,1,128], index: 4, kind: input, shape index: {}]   ;;  %s14221_s5 = inlined_call_operand.vmem [shape: f32[2,1,128], index: 5, kind: input, shape index: {}]   ;;  %s14222_s6 = inlined_call_operand.vmem [shape: bf16[2,128,384], index: 6, kind: input, shape index: {}]   ;;  %s14223_s7 = inlined_call_operand.vmem [shape: f32[2,1,384], index: 7, kind: input, shape index: {}]   ;;  %s14224_s8 = inlined_call_operand.vmem [shape: bf16[2,4,32,128], index: 8, kind: input, shape index: {}]   ;;  %s14225_s9 = inlined_call_operand.vmem [shape: f32[2,1,128], index: 9, kind: input, shape index: {}]   ;;  %s14226_s10 = inlined_call_operand.vmem [shape: f32[2,1,128], index: 10, kind: input, shape index: {}]   ;;  %s14227_s11 = inlined_call_operand.vmem [shape: f32[2,1,128], index: 11, kind: input, shape index: {}]   ;;  %s14228_s12 = inlined_call_operand.vmem [shape: bf16[2,128,256], index: 12, kind: input, shape index: {}]   ;;  %s14229_s13 = inlined_call_operand.vmem [shape: f32[2,1,256], index: 13, kind: input, shape index: {}]   ;;  %s14230_s14 = inlined_call_operand.vmem [shape: bf16[2,256,128], index: 14, kind: input, shape index: {}]   ;;  %s14231_s15 = inlined_call_operand.vmem [shape: f32[2,1,128], index: 15, kind: input, shape index: {}]   ;;  %s14232_s16 = inlined_call_operand.vmem [shape: bf16[384,512], index: 16, kind: input, shape index: {}]   ;;  %s14233_s17 = inlined_call_operand.vmem [shape: f32[1,512], index: 17, kind: input, shape index: {}]   ;;  %s14234_s18 = inlined_call_operand.vmem [shape: bf16[512,256], index: 18, kind: input, shape index: {}]   ;;  %s14235_s19 = inlined_call_operand.vmem [shape: f32[1,256], index: 19, kind: input, shape index: {}]   ;;  %s14236_s20 = inlined_call_operand.vmem [shape: bf16[256,128], index: 20, kind: input, shape index: {}]   ;;  %s14237_s21 = inlined_call_operand.vmem [shape: f32[1,128], index: 21, kind: input, shape index: {}]   ;;  %s14238_s22 = inlined_call_operand.vmem [shape: bf16[128,128], index: 22, kind: input, shape index: {}]   ;;  %s14239_s23 = inlined_call_operand.vmem [shape: f32[1,128], index: 23, kind: input, shape index: {}]   ;;  %s14240_s24 = inlined_call_operand.vmem [shape: f32[2,1,128], index: 24, kind: output, shape index: {}]  }
   0x1   :  { %14263 = sst [smem:[#allocation4_spill]] %s14216_s0 }
   0x2   :  { %14264 = sst [smem:[#allocation5_spill]] %s14217_s1 }
   0x3   :  { %14265 = sst [smem:[#allocation6_spill]] %s14218_s2 }
   0x4   :  { %14266 = sst [smem:[#allocation7_spill]] %s14219_s3 }
   0x5   :  { %14267 = sst [smem:[#allocation8_spill]] %s14220_s4 }
   0x6   :  { %14268 = sst [smem:[#allocation9_spill]] %s14221_s5  ;;  %s11173_s5 = smov 0  }
   0x7   :  { %14269 = sst [smem:[#allocation10_spill]] %s14222_s6 }
   0x8   :  { %14270 = sst [smem:[#allocation11_spill]] %s14223_s7 }
   0x9   :  { %14271 = sst [smem:[#allocation12_spill]] %s14224_s8 }
   0xa   :  { %14272 = sst [smem:[#allocation13_spill]] %s14240_s24 }
   0xb LB: > { %14273 = sst [smem:[#allocation2_spill]] %s11039_s5  ;;  %s8559_s26 = sadd.s32 4294967295, %s11039_s5   ;;  %s11039_s5 = sphi %s11173_s5, %s34_s5  }
   0xc   : > { %p8563_p0 = scmp.ge.s32.totalorder %s11039_s5, 1  ;;  %p671_p1 = scmp.lt.s32.totalorder %s11039_s5, 3 }
   0xe   : > { %p672_p2 = pnand %p8563_p0, %p671_p1 }
  0x10   : > { %675 = sbr.rel (%p672_p2) target bundleno = 7471 (0x1d2f), region = 116 }
  0x17   : > { %s14274_s6 = sld [smem:[#allocation7_spill]]  ;;  %p739_p3 = scmp.lt.s32.totalorder %s8559_s26, 1  ;;  %vm1937_vm0 = vcmask 261120   ;;  %vm2043_vm2 = vcmask 523264   ;;  %vm11047_vm3 = vmmov 0  }
  0x18   : > { %s14275_s28 = sld [smem:[#allocation4_spill]]  ;;  %s14276_s4 = sld [smem:[#allocation6_spill]] }
  0x19   : > { %s14292_s26 = smov (!%p739_p3, %s8559_s26), 1  ;;  %s14277_s7 = sld [smem:[#allocation10_spill]] }
  0x1a   : > { %s10125_s2 = smul.u32 192, %s14292_s26  ;;  %s14279_s3 = sld [smem:[#allocation9_spill]] }
  0x1b   : > { %s14280_s8 = sld [smem:[#allocation11_spill]]  ;;  %s14250_s1 = smov 96  }
  0x1c   : > { %s14254_s27 = smov 64   ;;  %s14286_s24 = smov 32  }
  0x1d   : > { %v10141_v0 = vld [vmem:[%s14274_s6 + $0x40] sm:$0xff]   ;;  %v10145_v4 = vld [vmem:[%s14274_s6 + $0x48] sm:$0xff]   ;;  %v10149_v8 = vld [vmem:[%s14274_s6 + $0x50] sm:$0xff]   ;;  %s8565_s25 = sshll.u32 %s14292_s26, 1  ;;  %s14287_s5 = sld [smem:[#allocation5_spill]] }
  0x1e   : > { %v10142_v1 = vld [vmem:[%s14274_s6] sm:$0xff]   ;;  %9176 = vmatprep.subr.bf16.mxu0 %v10141_v0  ;;  %v10146_v5 = vld [vmem:[%s14274_s6 + $0x8] sm:$0xff]   ;;  %v10150_v9 = vld [vmem:[%s14274_s6 + $0x10] sm:$0xff]   ;;  %s11278_s29 = scalar_lea.vmem %s14275_s28, %s10125_s2  ;;  %s14278_s28 = sld [smem:[#allocation8_spill]] }
  0x1f   : > { %v10143_v2 = vld [vmem:[%s14274_s6 + $0xc0] sm:$0xff]   ;;  %9177 = vmatpush3.bf16.msra.mxu0 %v10142_v1  ;;  %v10147_v6 = vld [vmem:[%s14274_s6 + $0xc8] sm:$0xff]   ;;  %v10151_v10 = vld [vmem:[%s14274_s6 + $0xd0] sm:$0xff]   ;;  %s14283_s2 = sld [smem:[#allocation12_spill]] }
  0x20   : > { %v10144_v3 = vld [vmem:[%s14274_s6 + $0x80] sm:$0xff]   ;;  %9216 = vmatprep.subr.bf16.mxu1 %v10143_v2  ;;  %9178 = vmatprep.subr.bf16.mxu0 %v10145_v4  ;;  %v10148_v7 = vld [vmem:[%s14274_s6 + $0x88] sm:$0xff]   ;;  %v10152_v11 = vld [vmem:[%s14274_s6 + $0x90] sm:$0xff]  }
  0x21   : > { %9217 = vmatpush3.bf16.msra.mxu1 %v10144_v3  ;;  %v10153_v12 = vld [vmem:[%s14274_s6 + $0x58] sm:$0xff]   ;;  %v10157_v16 = vld [vmem:[%s14274_s6 + $0x60] sm:$0xff]   ;;  %v10161_v20 = vld [vmem:[%s14274_s6 + $0x68] sm:$0xff]  }
  0x22   : > { %9218 = vmatprep.subr.bf16.mxu1 %v10147_v6  ;;  %v10154_v13 = vld [vmem:[%s14274_s6 + $0x18] sm:$0xff]   ;;  %v10158_v17 = vld [vmem:[%s14274_s6 + $0x20] sm:$0xff]   ;;  %v10162_v21 = vld [vmem:[%s14274_s6 + $0x28] sm:$0xff]  }
  0x23   : > { %9179 = vmatpush3.bf16.msra.mxu0 %v10146_v5  ;;  %v10155_v14 = vld [vmem:[%s14274_s6 + $0xd8] sm:$0xff]   ;;  %v10159_v18 = vld [vmem:[%s14274_s6 + $0xe0] sm:$0xff]   ;;  %v10163_v22 = vld [vmem:[%s14274_s6 + $0xe8] sm:$0xff]  }
  0x24   : > { %9180 = vmatprep.subr.bf16.mxu0 %v10149_v8  ;;  %v10156_v15 = vld [vmem:[%s14274_s6 + $0x98] sm:$0xff]   ;;  %v10160_v19 = vld [vmem:[%s14274_s6 + $0xa0] sm:$0xff]   ;;  %v10164_v23 = vld [vmem:[%s14274_s6 + $0xa8] sm:$0xff]  }
  0x25   : > { %9219 = vmatpush3.bf16.msra.mxu1 %v10148_v7  ;;  %v10165_v24 = vld [vmem:[%s14274_s6 + $0x70] sm:$0xff]   ;;  %v10169_v28 = vld [vmem:[%s14274_s6 + $0x78] sm:$0xff]   ;;  %v10176_v34 = vld [vmem:[%s14274_s6 + $0x140] sm:$0xff]  }
  0x26   : > { %9220 = vmatprep.subr.bf16.mxu1 %v10151_v10  ;;  %v10166_v25 = vld [vmem:[%s14274_s6 + $0x30] sm:$0xff]   ;;  %v10170_v29 = vld [vmem:[%s14274_s6 + $0x38] sm:$0xff]   ;;  %v10177_v35 = vld [vmem:[%s11278_s29 + $0x8] ss:$24 sps:$4 sm:$0xff]  }
  0x27   : > { %9181 = vmatpush3.bf16.msra.mxu0 %v10150_v9  ;;  %v10167_v26 = vld [vmem:[%s14274_s6 + $0xf0] sm:$0xff]   ;;  %v10171_v30 = vld [vmem:[%s14274_s6 + $0xf8] sm:$0xff]   ;;  %v10179_v36 = vld [vmem:[%s11278_s29 + $0xc] ss:$24 sps:$4 sm:$0xff]  }
  0x28   : > { %9182 = vmatprep.subr.bf16.mxu0 %v10153_v12  ;;  %v10168_v27 = vld [vmem:[%s14274_s6 + $0xb0] sm:$0xff]   ;;  %v10172_v31 = vld [vmem:[%s11278_s29] ss:$24 sps:$4 sm:$0xff]   ;;  %v10174_v32 = vld [vmem:[%s11278_s29 + $0x4] ss:$24 sps:$4 sm:$0xff]   ;;  %1385 = vmatprep.mubr.bf16.mxu1 %v10179_v36 }
  0x29   : > { %9221 = vmatpush3.bf16.msra.mxu1 %v10152_v11  ;;  %v10175_v33 = vld [vmem:[%s14274_s6 + $0xb8] sm:$0xff]   ;;  %1320 = vmatprep.mubr.bf16.mxu0 %v10174_v32  ;;  %v10180_v37 = vld [vmem:[%s14274_s6 + $0x100] sm:$0xff]   ;;  %v10181_v38 = vld [vmem:[%s14274_s6 + $0x148] sm:$0xff]  }
  0x2a   : > { %9222 = vmatprep.subr.bf16.mxu1 %v10155_v14  ;;  %v10182_v39 = vld [vmem:[%s14274_s6 + $0x108] sm:$0xff]   ;;  %v10186_v42 = vld [vmem:[%s14274_s6 + $0x150] sm:$0xff]   ;;  %v10191_v46 = vld [vmem:[%s14274_s6 + $0x158] sm:$0xff]  }
  0x2b   : > { %9183 = vmatpush3.bf16.msra.mxu0 %v10154_v13  ;;  %v10183_v40 = vld [vmem:[%s11278_s29 + $0x34] ss:$24 sps:$4 sm:$0xff]   ;;  %v10185_v41 = vld [vmem:[%s11278_s29 + $0x30] ss:$24 sps:$4 sm:$0xff]   ;;  %v10192_v47 = vld [vmem:[%s14274_s6 + $0x118] sm:$0xff]  }
  0x2c   : > { %9184 = vmatprep.subr.bf16.mxu0 %v10157_v16  ;;  %v10187_v43 = vld [vmem:[%s11278_s29 + $0x3c] ss:$24 sps:$4 sm:$0xff]   ;;  %v10190_v45 = vld [vmem:[%s11278_s29 + $0x38] ss:$24 sps:$4 sm:$0xff]   ;;  %v10196_v50 = vld [vmem:[%s14274_s6 + $0x160] sm:$0xff]  }
  0x2d   : > { %9223 = vmatpush3.bf16.msra.mxu1 %v10156_v15  ;;  %v10189_v44 = vld [vmem:[%s14274_s6 + $0x110] sm:$0xff]   ;;  %v10193_v48 = vld [vmem:[%s11278_s29 + $0x64] ss:$24 sps:$4 sm:$0xff]   ;;  %v10195_v49 = vld [vmem:[%s11278_s29 + $0x60] ss:$24 sps:$4 sm:$0xff]  }
  0x2e   : > { %9224 = vmatprep.subr.bf16.mxu1 %v10159_v18  ;;  %v10197_v51 = vld [vmem:[%s11278_s29 + $0x6c] ss:$24 sps:$4 sm:$0xff]   ;;  %v10200_v53 = vld [vmem:[%s11278_s29 + $0x68] ss:$24 sps:$4 sm:$0xff]   ;;  %v10206_v58 = vld [vmem:[%s14274_s6 + $0x170] sm:$0xff]  }
  0x2f   : > { %9185 = vmatpush3.bf16.msra.mxu0 %v10158_v17  ;;  %v10199_v52 = vld [vmem:[%s14274_s6 + $0x120] sm:$0xff]   ;;  %v10201_v54 = vld [vmem:[%s14274_s6 + $0x168] sm:$0xff]   ;;  %v10207_v59 = vld [vmem:[%s11278_s29 + $0x9c] ss:$24 sps:$4 sm:$0xff]  }
  0x30   : > { %9186 = vmatprep.subr.bf16.mxu0 %v10161_v20  ;;  %v10202_v55 = vld [vmem:[%s14274_s6 + $0x128] sm:$0xff]   ;;  %v10209_v60 = vld [vmem:[%s14274_s6 + $0x130] sm:$0xff]   ;;  %v10211_v62 = vld [vmem:[%s14274_s6 + $0x178] sm:$0xff]  }
  0x31   : > { %9225 = vmatpush3.bf16.msra.mxu1 %v10160_v19  ;;  %v10203_v56 = vld [vmem:[%s11278_s29 + $0x94] ss:$24 sps:$4 sm:$0xff]   ;;  %v10205_v57 = vld [vmem:[%s11278_s29 + $0x90] ss:$24 sps:$4 sm:$0xff]   ;;  %v10212_v0 = vld [vmem:[%s14274_s6 + $0x138] sm:$0xff]   ;;  %s14284_s6 = smov 96  }
  0x32   : > { %9226 = vmatprep.subr.bf16.mxu1 %v10163_v22  ;;  %v10210_v61 = vld [vmem:[%s11278_s29 + $0x98] ss:$24 sps:$4 sm:$0xff]   ;;  %v10215_v63 = vld [vmem:[%s11278_s29 + $0x14] ss:$24 sps:$4 sm:$0xff]   ;;  %v10216_v2 = vld [vmem:[%s11278_s29 + $0x44] ss:$24 sps:$4 sm:$0xff]  }
  0x33   : > { %9187 = vmatpush3.bf16.msra.mxu0 %v10162_v21  ;;  %v10213_v1 = vld [vmem:[%s11278_s29 + $0x10] ss:$24 sps:$4 sm:$0xff]   ;;  %v10218_v3 = vld [vmem:[%s11278_s29 + $0x40] ss:$24 sps:$4 sm:$0xff]   ;;  %v10219_v4 = vld [vmem:[%s11278_s29 + $0x74] ss:$24 sps:$4 sm:$0xff]  }
  0x34   : > { %9188 = vmatprep.subr.bf16.mxu0 %v10165_v24  ;;  %v10221_v5 = vld [vmem:[%s11278_s29 + $0x70] ss:$24 sps:$4 sm:$0xff]   ;;  %v10222_v6 = vld [vmem:[%s11278_s29 + $0xa4] ss:$24 sps:$4 sm:$0xff]   ;;  %v10224_v7 = vld [vmem:[%s11278_s29 + $0xa0] ss:$24 sps:$4 sm:$0xff]  }
  0x35   : > { %9227 = vmatpush3.bf16.msra.mxu1 %v10164_v23  ;;  %v872_v9 = vld [vmem:[%s14276_s4] sm:$0xff]  ;;  %v873_v14 = vld [vmem:[%s14276_s4 + $0x8] sm:$0xff]  ;;  %v875_v32 = vld [vmem:[%s14276_s4 + $0x18] sm:$0xff]  ;;  %s14252_s29 = smov 32  }
  0x36   : > { %9228 = vmatprep.subr.bf16.mxu1 %v10167_v26 }
  0x37   : > { %9189 = vmatpush3.bf16.msra.mxu0 %v10166_v25 }
  0x38   : > { %9190 = vmatprep.subr.bf16.mxu0 %v10169_v28 }
  0x39   : > { %9229 = vmatpush3.bf16.msra.mxu1 %v10168_v27  ;;  %v874_v27 = vld [vmem:[%s14276_s4 + $0x10] sm:$0xff] }
  0x3a   : > { %9230 = vmatprep.subr.bf16.mxu1 %v10171_v30 }
  0x3b   : > { %9191 = vmatpush3.bf16.msra.mxu0 %v10170_v29 }
  0x3c   : > { %9256 = vmatprep.subr.bf16.mxu0 %v10176_v34 }
  0x3d   : > { %9231 = vmatpush3.bf16.msra.mxu1 %v10175_v33 }
  0x3e   : > { %1321 = vmatmul.mubr.bf16.vlgmr.msra.gmra.mrb[0].mxu0 %v10172_v31 }
  0x3f   : > { %9257 = vmatpush3.bf16.msra.mxu0 %v10180_v37  ;;  %1328 = vmatprep.mubr.bf16.mxu0 %v10183_v40 }
  0x40   : > { %1386 = vmatmul.mubr.bf16.vlgmr.msra.gmra.mrb[0].mxu1 %v10177_v35  ;;  %9258 = vmatprep.subr.bf16.mxu0 %v10181_v38 }
  0x41   : > { %1393 = vmatprep.mubr.bf16.mxu1 %v10187_v43 }
  0x43   : > { %9259 = vmatpush3.bf16.msra.mxu0 %v10182_v39 }
  0x44   : > { %9260 = vmatprep.subr.bf16.mxu0 %v10186_v42 }
  0x46   : > { %1329 = vmatmul.mubr.bf16.gmra.mrb[4].mxu0 %v10185_v41 }
  0x47   : > { %9261 = vmatpush3.bf16.msra.mxu0 %v10189_v44  ;;  %1336 = vmatprep.mubr.bf16.mxu0 %v10193_v48 }
  0x48   : > { %1394 = vmatmul.mubr.bf16.gmra.mrb[4].mxu1 %v10190_v45  ;;  %9262 = vmatprep.subr.bf16.mxu0 %v10191_v46  ;;  %v876_v45 = vld [vmem:[%s14276_s4 + $0x20] sm:$0xff] }
  0x49   : > { %1401 = vmatprep.mubr.bf16.mxu1 %v10197_v51 }
  0x4b   : > { %9263 = vmatpush3.bf16.msra.mxu0 %v10192_v47 }
  0x4c   : > { %9264 = vmatprep.subr.bf16.mxu0 %v10196_v50  ;;  %v877_v50 = vld [vmem:[%s14276_s4 + $0x28] sm:$0xff] }
  0x4e   : > { %1337 = vmatmul.mubr.bf16.gmra.mrb[8].mxu0 %v10195_v49 }
  0x4f   : > { %9265 = vmatpush3.bf16.msra.mxu0 %v10199_v52  ;;  %1344 = vmatprep.mubr.bf16.mxu0 %v10203_v56 }
  0x50   : > { %1402 = vmatmul.mubr.bf16.gmra.mrb[8].mxu1 %v10200_v53  ;;  %9266 = vmatprep.subr.bf16.mxu0 %v10201_v54 }
  0x51   : > { %1409 = vmatprep.mubr.bf16.mxu1 %v10207_v59 }
  0x53   : > { %9267 = vmatpush3.bf16.msra.mxu0 %v10202_v55 }
  0x54   : > { %9268 = vmatprep.subr.bf16.mxu0 %v10206_v58 }
  0x56   : > { %1345 = vmatmul.mubr.bf16.gmra.mrb[12].mxu0 %v10205_v57 }
  0x57   : > { %1450 = vmatprep.mubr.bf16.mxu0 %v10215_v63  ;;  %9269 = vmatpush3.bf16.msra.mxu0 %v10209_v60  ;;  %v878_v63 = vld [vmem:[%s14276_s4 + $0x30] sm:$0xff] }
  0x58   : > { %1410 = vmatmul.mubr.bf16.gmra.mrb[12].mxu1 %v10210_v61  ;;  %9270 = vmatprep.subr.bf16.mxu0 %v10211_v62 }
  0x5b   : > { %9271 = vmatpush3.bf16.msra.mxu0 %v10212_v0 }
  0x5e   : > { %1451 = vmatmul.mubr.bf16.vlgmr.msra.gmra.mrb[16].mxu0 %v10213_v1 }
  0x5f   : > { %1458 = vmatprep.mubr.bf16.mxu0 %v10216_v2 }
  0x66   : > { %1459 = vmatmul.mubr.bf16.gmra.mrb[20].mxu0 %v10218_v3 }
  0x67   : > { %1466 = vmatprep.mubr.bf16.mxu0 %v10219_v4  ;;  %v879_v4 = vld [vmem:[%s14276_s4 + $0x38] sm:$0xff]  ;;  %s14285_s4 = smov 64  }
  0x6e   : > { %1467 = vmatmul.mubr.bf16.gmra.mrb[24].mxu0 %v10221_v5 }
  0x6f   : > { %1474 = vmatprep.mubr.bf16.mxu0 %v10222_v6 }
  0x76   : > { %1475 = vmatmul.mubr.bf16.gmra.mrb[28].mxu0 %v10224_v7 }
 0x111   : > { %v9192_v8 = vpop.f32.mrb[0].mxu0 }
 0x112   : > { %v9193_v10 = vpop.f32.mrb[1].mxu0 }
 0x113   : > { %v9194_v11 = vadd.f32 %v9193_v10, %v9192_v8  ;;  %v9195_v12 = vpop.f32.mrb[2].mxu0  ;;  %v9232_v13 = vpop.f32.mrb[0].mxu1 }
 0x114   : > { %v9196_v15 = vpop.f32.mrb[3].mxu0  ;;  %v9233_v18 = vpop.f32.mrb[1].mxu1 }
 0x115   : > { %v1323_v16 = vadd.f32 %v9194_v11, %v872_v9  ;;  %v9197_v17 = vadd.f32 %v9196_v15, %v9195_v12  ;;  %v9234_v19 = vadd.f32 %v9233_v18, %v9232_v13  ;;  %v9235_v20 = vpop.f32.mrb[2].mxu1 }
 0x116   : > { %v9236_v22 = vpop.f32.mrb[3].mxu1 }
 0x117   : > { %v1326_v21 = vadd.f32 %v9197_v17, %v873_v14  ;;  %v1388_v23 = vadd.f32 %v9234_v19, %v1323_v16  ;;  %v9237_v24 = vadd.f32 %v9236_v22, %v9235_v20 }
 0x119   : > { %v9198_v25 = vpop.f32.mrb[4].mxu0  ;;  %v1391_v26 = vadd.f32 %v9237_v24, %v1326_v21 }
 0x11a   : > { %v9199_v28 = vpop.f32.mrb[5].mxu0 }
 0x11b   : > { %v9200_v29 = vadd.f32 %v9199_v28, %v9198_v25  ;;  %v9201_v30 = vpop.f32.mrb[6].mxu0  ;;  %v9238_v31 = vpop.f32.mrb[4].mxu1 }
 0x11c   : > { %v9202_v33 = vpop.f32.mrb[7].mxu0  ;;  %v9239_v36 = vpop.f32.mrb[5].mxu1 }
 0x11d   : > { %v1331_v34 = vadd.f32 %v9200_v29, %v874_v27  ;;  %v9203_v35 = vadd.f32 %v9202_v33, %v9201_v30  ;;  %v9240_v37 = vadd.f32 %v9239_v36, %v9238_v31  ;;  %v9241_v38 = vpop.f32.mrb[6].mxu1 }
 0x11e   : > { %v9242_v40 = vpop.f32.mrb[7].mxu1 }
 0x11f   : > { %v1334_v39 = vadd.f32 %v9203_v35, %v875_v32  ;;  %v1396_v41 = vadd.f32 %v9240_v37, %v1331_v34  ;;  %v9243_v42 = vadd.f32 %v9242_v40, %v9241_v38 }
 0x121   : > { %v9204_v43 = vpop.f32.mrb[8].mxu0  ;;  %v1399_v44 = vadd.f32 %v9243_v42, %v1334_v39 }
 0x122   : > { %v9205_v46 = vpop.f32.mrb[9].mxu0 }
 0x123   : > { %v9206_v47 = vadd.f32 %v9205_v46, %v9204_v43  ;;  %v9207_v48 = vpop.f32.mrb[10].mxu0  ;;  %v9244_v49 = vpop.f32.mrb[8].mxu1 }
 0x124   : > { %v9208_v51 = vpop.f32.mrb[11].mxu0  ;;  %v9245_v54 = vpop.f32.mrb[9].mxu1 }
 0x125   : > { %v1339_v52 = vadd.f32 %v9206_v47, %v876_v45  ;;  %v9209_v53 = vadd.f32 %v9208_v51, %v9207_v48  ;;  %v9246_v55 = vadd.f32 %v9245_v54, %v9244_v49  ;;  %v9247_v56 = vpop.f32.mrb[10].mxu1  ;;  %v10225_v48 = vld [vmem:[%s14277_s7] ss:$12 sps:$4 sm:$0xff]   ;;  %v10227_v49 = vld [vmem:[%s14277_s7 + $0x4] ss:$12 sps:$4 sm:$0xff]  }
 0x126   : > { %v9248_v58 = vpop.f32.mrb[11].mxu1  ;;  %1787 = vmatprep.subr.bf16.mxu1 %v10227_v49  ;;  %v10228_v51 = vld [vmem:[%s14277_s7 + $0x18] ss:$12 sps:$4 sm:$0xff]  }
 0x127   : > { %v1342_v57 = vadd.f32 %v9209_v53, %v877_v50  ;;  %v1404_v59 = vadd.f32 %v9246_v55, %v1339_v52  ;;  %v9249_v60 = vadd.f32 %v9248_v58, %v9247_v56  ;;  %v10230_v50 = vld [vmem:[%s14277_s7 + $0x1c] ss:$12 sps:$4 sm:$0xff]   ;;  %1788 = vmatpush1.bf16.msra.mxu1 %v10225_v48 }
 0x128   : > { %1789 = vmatprep.subr.bf16.mxu1 %v10230_v50  ;;  %v10256_v48 = vld [vmem:[%s14277_s7 + $0xb0] ss:$12 sps:$4 sm:$0xff]  }
 0x129   : > { %v9210_v61 = vpop.f32.mrb[12].mxu0  ;;  %v1407_v62 = vadd.f32 %v9249_v60, %v1342_v57 }
 0x12a   : > { %v9211_v0 = vpop.f32.mrb[13].mxu0 }
 0x12b   : > { %v9212_v1 = vadd.f32 %v9211_v0, %v9210_v61  ;;  %v9213_v2 = vpop.f32.mrb[14].mxu0  ;;  %v9250_v3 = vpop.f32.mrb[12].mxu1  ;;  %1790 = vmatpush1.bf16.msra.mxu1 %v10228_v51 }
 0x12c   : > { %v9214_v5 = vpop.f32.mrb[15].mxu0  ;;  %v9251_v8 = vpop.f32.mrb[13].mxu1 }
 0x12d   : > { %v1347_v6 = vadd.f32 %v9212_v1, %v878_v63  ;;  %v9215_v7 = vadd.f32 %v9214_v5, %v9213_v2  ;;  %v9252_v9 = vadd.f32 %v9251_v8, %v9250_v3  ;;  %v9253_v10 = vpop.f32.mrb[14].mxu1 }
 0x12e   : > { %v9254_v12 = vpop.f32.mrb[15].mxu1 }
 0x12f   : > { %v1350_v11 = vadd.f32 %v9215_v7, %v879_v4  ;;  %v1412_v13 = vadd.f32 %v9252_v9, %v1347_v6  ;;  %v9255_v14 = vadd.f32 %v9254_v12, %v9253_v10  ;;  %v10234_v12 = vld [vmem:[%s14277_s7 + $0x8] ss:$12 sps:$4 sm:$0xff]  }
 0x130   : > { %9607 = vmatprep.subr.bf16.mxu0 %v10234_v12 }
 0x131   : > { %v1415_v15 = vadd.f32 %v9255_v14, %v1350_v11  ;;  %v9272_v16 = vpop.f32.mrb[16].mxu0  ;;  %v10233_v11 = vld [vmem:[%s14277_s7 + $0x34] ss:$12 sps:$4 sm:$0xff]   ;;  %v10231_v14 = vld [vmem:[%s14277_s7 + $0x30] ss:$12 sps:$4 sm:$0xff]   ;;  %9608 = vmatpush3.bf16.msra.mxu0 %v10234_v12 }
 0x132   : > { %v9273_v17 = vpop.f32.mrb[17].mxu0  ;;  %1791 = vmatprep.subr.bf16.mxu1 %v10233_v11 }
 0x133   : > { %v9274_v18 = vadd.f32 %v9273_v17, %v9272_v16  ;;  %v9275_v19 = vpop.f32.mrb[18].mxu0  ;;  %1792 = vmatpush1.bf16.msra.mxu1 %v10231_v14 }
 0x134   : > { %v9276_v20 = vpop.f32.mrb[19].mxu0 }
 0x135   : > { %v11385_v21 = vadd.f32 %v9274_v18, %v1388_v23  ;;  %v9277_v22 = vadd.f32 %v9276_v20, %v9275_v19  ;;  %v10237_v18 = vld [vmem:[%s14277_s7 + $0x4c] ss:$12 sps:$4 sm:$0xff]  }
 0x136   : > { %v10238_v19 = vld [vmem:[%s14277_s7 + $0x20] ss:$12 sps:$4 sm:$0xff]   ;;  %1793 = vmatprep.subr.bf16.mxu1 %v10237_v18 }
 0x137   : > { %v11387_v24 = vadd.f32 %v9277_v22, %v1391_v26  ;;  %1487 = vadd.xlane.f32.xlu0 %v11385_v21  ;;  %9609 = vmatprep.subr.bf16.mxu0 %v10238_v19 }
 0x138   : > { %9610 = vmatpush3.bf16.msra.mxu0 %v10238_v19 }
 0x139   : > { %v9278_v25 = vpop.f32.mrb[20].mxu0 }
 0x13a   : > { %v9279_v27 = vpop.f32.mrb[21].mxu0 }
 0x13b   : > { %v9280_v28 = vadd.f32 %v9279_v27, %v9278_v25  ;;  %v9281_v29 = vpop.f32.mrb[22].mxu0  ;;  %1489 = vadd.xlane.f32.xlu0 %v11387_v24  ;;  %v10235_v25 = vld [vmem:[%s14277_s7 + $0x48] ss:$12 sps:$4 sm:$0xff]  }
 0x13c   : > { %v9282_v30 = vpop.f32.mrb[23].mxu0  ;;  %1794 = vmatpush1.bf16.msra.mxu1 %v10235_v25 }
 0x13d   : > { %v11391_v31 = vadd.f32 %v9280_v28, %v1396_v41  ;;  %v9283_v32 = vadd.f32 %v9282_v30, %v9281_v29  ;;  %v10241_v29 = vld [vmem:[%s14277_s7 + $0x64] ss:$12 sps:$4 sm:$0xff]  }
 0x13e   : > { %v10242_v30 = vld [vmem:[%s14277_s7 + $0x38] ss:$12 sps:$4 sm:$0xff]   ;;  %1795 = vmatprep.subr.bf16.mxu1 %v10241_v29 }
 0x13f   : > { %v11393_v33 = vadd.f32 %v9283_v32, %v1399_v44  ;;  %1491 = vadd.xlane.f32.xlu1 %v11391_v31  ;;  %9611 = vmatprep.subr.bf16.mxu0 %v10242_v30 }
 0x140   : > { %9612 = vmatpush3.bf16.msra.mxu0 %v10242_v30 }
 0x141   : > { %v9284_v23 = vpop.f32.mrb[24].mxu0 }
 0x142   : > { %v9285_v34 = vpop.f32.mrb[25].mxu0 }
 0x143   : > { %v9286_v26 = vadd.f32 %v9285_v34, %v9284_v23  ;;  %v9287_v35 = vpop.f32.mrb[26].mxu0  ;;  %1493 = vadd.xlane.f32.xlu1 %v11393_v33  ;;  %v10239_v23 = vld [vmem:[%s14277_s7 + $0x60] ss:$12 sps:$4 sm:$0xff]   ;;  %v10245_v34 = vld [vmem:[%s14277_s7 + $0x7c] ss:$12 sps:$4 sm:$0xff]  }
 0x144   : > { %v9288_v36 = vpop.f32.mrb[27].mxu0  ;;  %1796 = vmatpush1.bf16.msra.mxu1 %v10239_v23 }
 0x145   : > { %v11397_v37 = vadd.f32 %v9286_v26, %v1404_v59  ;;  %v9289_v38 = vadd.f32 %v9288_v36, %v9287_v35  ;;  %v10246_v26 = vld [vmem:[%s14277_s7 + $0x50] ss:$12 sps:$4 sm:$0xff]   ;;  %v10243_v35 = vld [vmem:[%s14277_s7 + $0x78] ss:$12 sps:$4 sm:$0xff]   ;;  %1797 = vmatprep.subr.bf16.mxu1 %v10245_v34  ;;  %v10249_v36 = vld [vmem:[%s14277_s7 + $0x94] ss:$12 sps:$4 sm:$0xff]  }
 0x146   : > { %9613 = vmatprep.subr.bf16.mxu0 %v10246_v26 }
 0x147   : > { %v11399_v39 = vadd.f32 %v9289_v38, %v1407_v62  ;;  %1495 = vadd.xlane.f32.xlu0 %v11397_v37  ;;  %9614 = vmatpush3.bf16.msra.mxu0 %v10246_v26  ;;  %v10250_v38 = vld [vmem:[%s14277_s7 + $0x68] ss:$12 sps:$4 sm:$0xff]  }
 0x148   : > { %1798 = vmatpush1.bf16.msra.mxu1 %v10243_v35  ;;  %9615 = vmatprep.subr.bf16.mxu0 %v10250_v38 }
 0x149   : > { %v9290_v40 = vpop.f32.mrb[28].mxu0  ;;  %1497 = vadd.xlane.f32.xlu1 %v11399_v39  ;;  %1799 = vmatprep.subr.bf16.mxu1 %v10249_v36 }
 0x14a   : > { %v9291_v41 = vpop.f32.mrb[29].mxu0 }
 0x14b   : > { %v9292_v42 = vadd.f32 %v9291_v41, %v9290_v40  ;;  %v9293_v43 = vpop.f32.mrb[30].mxu0  ;;  %v10247_v40 = vld [vmem:[%s14277_s7 + $0x90] ss:$12 sps:$4 sm:$0xff]   ;;  %9616 = vmatpush3.bf16.msra.mxu0 %v10250_v38  ;;  %v10253_v41 = vld [vmem:[%s14277_s7 + $0xac] ss:$12 sps:$4 sm:$0xff]  }
 0x14c   : > { %v9294_v44 = vpop.f32.mrb[31].mxu0  ;;  %1800 = vmatpush1.bf16.msra.mxu1 %v10247_v40 }
 0x14d   : > { %v11403_v45 = vadd.f32 %v9292_v42, %v1412_v13  ;;  %v9295_v46 = vadd.f32 %v9294_v44, %v9293_v43  ;;  %v10254_v42 = vld [vmem:[%s14277_s7 + $0x80] ss:$12 sps:$4 sm:$0xff]   ;;  %v10251_v43 = vld [vmem:[%s14277_s7 + $0xa8] ss:$12 sps:$4 sm:$0xff]   ;;  %1801 = vmatprep.subr.bf16.mxu1 %v10253_v41  ;;  %v10255_v44 = vld [vmem:[%s14277_s7 + $0x98] ss:$12 sps:$4 sm:$0xff]  }
 0x14e   : > { %9617 = vmatprep.subr.bf16.mxu0 %v10254_v42 }
 0x14f   : > { %v11405_v47 = vadd.f32 %v9295_v46, %v1415_v15  ;;  %1499 = vadd.xlane.f32.xlu0 %v11403_v45  ;;  %9618 = vmatpush3.bf16.msra.mxu0 %v10254_v42  ;;  %v14248_v46 = vmov 0  }
 0x150   : > { %1802 = vmatpush1.bf16.msra.mxu1 %v10251_v43  ;;  %1819 = vmatprep.mubr.bf16.mxu1 %v14248_v46 }
 0x151   : > { %1501 = vadd.xlane.f32.xlu1 %v11405_v47  ;;  %9619 = vmatprep.subr.bf16.mxu0 %v10255_v44 }
 0x153   : > { %9620 = vmatpush3.bf16.msra.mxu0 %v10255_v44 }
 0x154   : > { %9621 = vmatprep.subr.bf16.mxu0 %v10256_v48 }
 0x157   : > { %9622 = vmatpush3.bf16.msra.mxu0 %v10256_v48 }
 0x1c4   : > { %v1488_v52 = vpop.xlane.xlu0 %1487 }
 0x1c5   : > { %v1504_v53 = vmul.f32 0.0078125, %v1488_v52 }
 0x1c7   : > { %v11422_v54 = vsub.f32 %v11385_v21, %v1504_v53 }
 0x1c8   : > { %v1490_v55 = vpop.xlane.xlu0 %1489 }
 0x1c9   : > { %v1505_v56 = vmul.f32 0.0078125, %v1490_v55  ;;  %v1520_v57 = vmul.f32 %v11422_v54, %v11422_v54 }
 0x1cb   : > { %1528 = vadd.xlane.f32.xlu0 %v1520_v57  ;;  %v11427_v58 = vsub.f32 %v11387_v24, %v1505_v56 }
 0x1cc   : > { %v1492_v59 = vpop.xlane.xlu1 %1491 }
 0x1cd   : > { %v1506_v60 = vmul.f32 0.0078125, %v1492_v59  ;;  %v1521_v61 = vmul.f32 %v11427_v58, %v11427_v58 }
 0x1cf   : > { %1530 = vadd.xlane.f32.xlu1 %v1521_v61  ;;  %v11432_v62 = vsub.f32 %v11391_v31, %v1506_v60 }
 0x1d0   : > { %v1494_v63 = vpop.xlane.xlu1 %1493 }
 0x1d1   : > { %v1507_v0 = vmul.f32 0.0078125, %v1494_v63  ;;  %v1522_v1 = vmul.f32 %v11432_v62, %v11432_v62 }
 0x1d3   : > { %1532 = vadd.xlane.f32.xlu0 %v1522_v1  ;;  %v11437_v2 = vsub.f32 %v11393_v33, %v1507_v0 }
 0x1d4   : > { %v1496_v3 = vpop.xlane.xlu0 %1495 }
 0x1d5   : > { %v1508_v4 = vmul.f32 0.0078125, %v1496_v3  ;;  %v1523_v5 = vmul.f32 %v11437_v2, %v11437_v2 }
 0x1d6   : > { %v1498_v6 = vpop.xlane.xlu1 %1497 }
 0x1d7   : > { %v1509_v7 = vmul.f32 0.0078125, %v1498_v6  ;;  %1534 = vadd.xlane.f32.xlu1 %v1523_v5  ;;  %v11442_v8 = vsub.f32 %v11397_v37, %v1508_v4  ;;  %v8638_v4 = vld [vmem:[%s14278_s28] ss:$0 sm:$0xff] }
 0x1d9   : > { %v1524_v9 = vmul.f32 %v11442_v8, %v11442_v8  ;;  %v11447_v10 = vsub.f32 %v11399_v39, %v1509_v7 }
 0x1db   : > { %1536 = vadd.xlane.f32.xlu0 %v1524_v9  ;;  %v1525_v13 = vmul.f32 %v11447_v10, %v11447_v10 }
 0x1dc   : > { %v1500_v15 = vpop.xlane.xlu0 %1499 }
 0x1dd   : > { %v1510_v16 = vmul.f32 0.0078125, %v1500_v15  ;;  %1538 = vadd.xlane.f32.xlu1 %v1525_v13 }
 0x1de   : > { %v1502_v17 = vpop.xlane.xlu1 %1501 }
 0x1df   : > { %v1511_v20 = vmul.f32 0.0078125, %v1502_v17  ;;  %v11467_v22 = vsub.f32 %v11403_v45, %v1510_v16 }
 0x1e1   : > { %v1526_v27 = vmul.f32 %v11467_v22, %v11467_v22  ;;  %v11475_v28 = vsub.f32 %v11405_v47, %v1511_v20 }
 0x1e3   : > { %1540 = vadd.xlane.f32.xlu0 %v1526_v27  ;;  %v1527_v32 = vmul.f32 %v11475_v28, %v11475_v28 }
 0x1e5   : > { %1542 = vadd.xlane.f32.xlu1 %v1527_v32 }
 0x258   : > { %v1529_v49 = vpop.xlane.xlu0 %1528 }
 0x259   : > { %v1544_v50 = vmul.f32 0.0078125, %v1529_v49 }
 0x25b   : > { %v1552_v51 = vadd.f32 1e-06, %v1544_v50 }
 0x25c   : > { %v1531_v52 = vpop.xlane.xlu1 %1530 }
 0x25d   : > { %10649 = vrsqrt.f32 %v1552_v51  ;;  %v1545_v53 = vmul.f32 0.0078125, %v1531_v52 }
 0x25f   : > { %v1553_v55 = vadd.f32 1e-06, %v1545_v53 }
 0x260   : > { %v1533_v56 = vpop.xlane.xlu0 %1532 }
 0x261   : > { %10651 = vrsqrt.f32 %v1553_v55  ;;  %v1546_v57 = vmul.f32 0.0078125, %v1533_v56 }
 0x263   : > { %v1554_v59 = vadd.f32 1e-06, %v1546_v57 }
 0x264   : > { %v1535_v60 = vpop.xlane.xlu1 %1534 }
 0x265   : > { %10653 = vrsqrt.f32 %v1554_v59  ;;  %v1547_v61 = vmul.f32 0.0078125, %v1535_v60  ;;  %v1483_v60 = vlaneseq }
 0x267   : > { %v10650_v63 = vpop.eup %10649  ;;  %v1555_v0 = vadd.f32 1e-06, %v1547_v61  ;;  %v11540_v61 = vshrl.u32 %v1483_v60, 7 }
 0x268   : > { %v1568_v1 = vmul.f32 %v10650_v63, %v11422_v54  ;;  %v1537_v3 = vpop.xlane.xlu0 %1536  ;;  %v8639_v54 = vld [vmem:[%s14279_s3] ss:$0 sm:$0xff] }
 0x269   : > { %10655 = vrsqrt.f32 %v1555_v0  ;;  %v1548_v5 = vmul.f32 0.0078125, %v1537_v3  ;;  %v11549_v63 = vsub.s32 1, %v11540_v61 }
 0x26a   : > { %v1539_v6 = vpop.xlane.xlu1 %1538  ;;  %v1583_v12 = vmul.f32 %v8638_v4, %v1568_v1 }
 0x26b   : > { %v10652_v7 = vpop.eup %10651  ;;  %v1556_v9 = vadd.f32 1e-06, %v1548_v5  ;;  %v1549_v11 = vmul.f32 0.0078125, %v1539_v6 }
 0x26c   : > { %v1569_v13 = vmul.f32 %v10652_v7, %v11427_v58  ;;  %v1598_v18 = vadd.f32 %v8639_v54, %v1583_v12 }
 0x26d   : > { %10657 = vrsqrt.f32 %v1556_v9  ;;  %v1557_v14 = vadd.f32 1e-06, %v1549_v11  ;;  %v11560_v11 = vsub.s32 2, %v11540_v61 }
 0x26e   : > { %v1584_v15 = vmul.f32 %v8638_v4, %v1569_v13 }
 0x26f   : > { %v10654_v16 = vpop.eup %10653  ;;  %10659 = vrsqrt.f32 %v1557_v14  ;;  %14281 = vst [vmem:[#allocation3_spill] sm:$0xff] %v11560_v11 }
 0x270   : > { %v1541_v17 = vpop.xlane.xlu0 %1540  ;;  %v1599_v19 = vadd.f32 %v8639_v54, %v1584_v15  ;;  %v1570_v20 = vmul.f32 %v10654_v16, %v11432_v62 }
 0x271   : > { %v1550_v25 = vmul.f32 0.0078125, %v1541_v17 }
 0x272   : > { %v1543_v27 = vpop.xlane.xlu1 %1542  ;;  %v1606_v29 = vpack.c.bf16 %v1599_v19, %v1598_v18  ;;  %v1585_v34 = vmul.f32 %v8638_v4, %v1570_v20 }
 0x273   : > { %v10656_v30 = vpop.eup %10655  ;;  %v1558_v32 = vadd.f32 1e-06, %v1550_v25  ;;  %v1551_v58 = vmul.f32 0.0078125, %v1543_v27 }
 0x274   : > { %1820 = vmatmul.mubr.bf16.vlgmr.msra.gmra.mrb[16].mxu1 %v1606_v29  ;;  %9623 = vmatprep.mubr.bf16.mxu0 %v1606_v29  ;;  %v1571_v23 = vmul.f32 %v10656_v30, %v11437_v2  ;;  %v1600_v38 = vadd.f32 %v8639_v54, %v1585_v34 }
 0x275   : > { %10661 = vrsqrt.f32 %v1558_v32  ;;  %v1559_v26 = vadd.f32 1e-06, %v1551_v58  ;;  %1829 = vmatprep.mubr.bf16.mxu1 %v14248_v46 }
 0x276   : > { %v1586_v35 = vmul.f32 %v8638_v4, %v1571_v23 }
 0x277   : > { %v10658_v36 = vpop.eup %10657  ;;  %10663 = vrsqrt.f32 %v1559_v26 }
 0x278   : > { %v1601_v62 = vadd.f32 %v8639_v54, %v1586_v35  ;;  %v1572_v40 = vmul.f32 %v10658_v36, %v11442_v8 }
 0x279   : > { %v10660_v41 = vpop.eup %10659 }
 0x27a   : > { %v1607_v42 = vpack.c.bf16 %v1601_v62, %v1600_v38  ;;  %v1573_v43 = vmul.f32 %v10660_v41, %v11447_v10  ;;  %v1587_v44 = vmul.f32 %v8638_v4, %v1572_v40 }
 0x27c   : > { %1830 = vmatmul.mubr.bf16.gmra.mrb[20].mxu1 %v1607_v42  ;;  %9624 = vmatmul.mubr.bf16.vlgmr.msra.gmra.mrb[32].mxu0 %v1607_v42  ;;  %v1588_v2 = vmul.f32 %v8638_v4, %v1573_v43  ;;  %v1602_v48 = vadd.f32 %v8639_v54, %v1587_v44 }
 0x27d   : > { %1839 = vmatprep.mubr.bf16.mxu1 %v14248_v46 }
 0x27e   : > { %v1603_v49 = vadd.f32 %v8639_v54, %v1588_v2 }
 0x27f   : > { %v10662_v50 = vpop.eup %10661 }
 0x280   : > { %v1608_v51 = vpack.c.bf16 %v1603_v49, %v1602_v48  ;;  %v1574_v52 = vmul.f32 %v10662_v50, %v11467_v22  ;;  %v11543_v22 = vsub.s32 0, %v11540_v61 }
 0x281   : > { %v10664_v53 = vpop.eup %10663 }
 0x282   : > { %9627 = vmatprep.mubr.bf16.mxu0 %v1608_v51  ;;  %v1575_v8 = vmul.f32 %v10664_v53, %v11475_v28  ;;  %v1589_v55 = vmul.f32 %v8638_v4, %v1574_v52  ;;  %v1642_v28 = vld [vmem:[%s14280_s8] sm:$0x7] }
 0x283   : > { %v11552_v0 = vrot.slane %v1642_v28, %v11543_v22  ;;  %v11555_v3 = vrot.slane %v1642_v28, %v11549_v63  ;;  %v1655_v15 = vrot.slane %v1642_v28, %v11560_v11 }
 0x284   : > { %1840 = vmatmul.mubr.bf16.gmra.mrb[24].mxu1 %v1608_v51  ;;  %v1590_v56 = vmul.f32 %v8638_v4, %v1575_v8  ;;  %v1604_v10 = vadd.f32 %v8639_v54, %v1589_v55 }
 0x285   : > { %1849 = vmatprep.mubr.bf16.mxu1 %v14248_v46 }
 0x286   : > { %v1605_v57 = vadd.f32 %v8639_v54, %v1590_v56 }
 0x288   : > { %v1609_v59 = vpack.c.bf16 %v1605_v57, %v1604_v10 }
 0x28a   : > { %9628 = vmatmul.mubr.bf16.gmra.mrb[36].mxu0 %v1609_v59 }
 0x28c   : > { %1850 = vmatmul.mubr.bf16.gmra.mrb[28].mxu1 %v1609_v59 }
 0x347   : > { %v1821_v1 = vpop.f32.mrb[16].mxu1 }
 0x348   : > { %v1823_v4 = vpop.f32.mrb[17].mxu1  ;;  %v1822_v6 = vadd.f32 %v1821_v1, %v11552_v0 }
 0x349   : > { %v1825_v5 = vpop.f32.mrb[18].mxu1  ;;  %v1824_v12 = vadd.f32 %v1823_v4, %v11555_v3 }
 0x34a   : > { %v1826_v7 = vadd.f32 %v1825_v5, %v11552_v0  ;;  %v1827_v9 = vpop.f32.mrb[19].mxu1 }
 0x34b   : > { %v1828_v13 = vadd.f32 %v1827_v9, %v11555_v3 }
 0x34c   : > { %v11564_v14 = vpack.c.bf16 %v1826_v7, %v1822_v6 }
 0x34d   : > { %v11566_v54 = vpack.c.bf16 %v1828_v13, %v1824_v12 }
 0x34e   : > { %9639 = vmatprep.mubr.msk.bf16.mxu1 %vm1937_vm0, %v11564_v14 }
 0x34f   : > { %2237 = vrot.lane.b32.xlu0 %v11566_v54, %s14250_s1  ;;  %v1831_v16 = vpop.f32.mrb[20].mxu1  ;;  %v9625_v17 = vpop.f32.mrb[32].mxu0  ;;  %10093 = vmatprep.subr.msk.bf16.mxu1 %vm1937_vm0, %v11566_v54  ;;  %v1951_v18 = vsel %vm1937_vm0, %v11566_v54, 0 }
 0x350   : > { %v1833_v19 = vpop.f32.mrb[21].mxu1  ;;  %v1894_v20 = vpop.f32.mrb[33].mxu0  ;;  %9632 = vmatpush3.bf16.xpose.msra.mxu1 %v1951_v18  ;;  %v1832_v29 = vadd.f32 %v1831_v16, %v11552_v0  ;;  %v1903_v30 = vadd.f32 %v9625_v17, %v1655_v15 }
 0x351   : > { %v1835_v25 = vpop.f32.mrb[22].mxu1  ;;  %v9626_v27 = vpop.f32.mrb[34].mxu0  ;;  %v1834_v26 = vadd.f32 %v1833_v19, %v11555_v3  ;;  %v1895_v35 = vadd.f32 %v1894_v20, %v1655_v15 }
 0x352   : > { %v1836_v32 = vadd.f32 %v1835_v25, %v11552_v0  ;;  %v1906_v58 = vadd.f32 %v9626_v27, %v1655_v15  ;;  %v1837_v23 = vpop.f32.mrb[23].mxu1  ;;  %v1897_v34 = vpop.f32.mrb[35].mxu0 }
 0x353   : > { %v1838_v36 = vadd.f32 %v1837_v23, %v11555_v3  ;;  %v1898_v38 = vadd.f32 %v1897_v34, %v1655_v15  ;;  %2225 = vrot.lane.b32.xlu0 %v11564_v14, %s14250_s1 }
 0x354   : > { %v11583_v62 = vpack.c.bf16 %v1836_v32, %v1832_v29  ;;  %v11585_v40 = vpack.c.bf16 %v1906_v58, %v1903_v30 }
 0x355   : > { %v11587_v41 = vpack.c.bf16 %v1838_v36, %v1834_v26  ;;  %v11589_v42 = vpack.c.bf16 %v1898_v38, %v1895_v35 }
 0x357   : > { %9647 = vmatprep.subr.bf16.mxu0 %v11589_v42  ;;  %2239 = vrot.lane.b32.xlu1 %v11587_v41, %s14250_s1  ;;  %v1841_v43 = vpop.f32.mrb[24].mxu1  ;;  %v1954_v44 = vsel %vm1937_vm0, %v11587_v41, 0 }
 0x358   : > { %10094 = vmatprep.subr.msk.bf16.mxu1 %vm1937_vm0, %v11587_v41  ;;  %v1843_v2 = vpop.f32.mrb[25].mxu1  ;;  %9648 = vmatpush3.bf16.msra.mxu0 %v11589_v42  ;;  %v1842_v49 = vadd.f32 %v1841_v43, %v11552_v0 }
 0x359   : > { %9634 = vmatpush3.bf16.xpose.msra.mxu1 %v1954_v44  ;;  %v1845_v48 = vpop.f32.mrb[26].mxu1  ;;  %9649 = vmatprep.subr.bf16.mxu0 %v11585_v40  ;;  %v1844_v52 = vadd.f32 %v1843_v2, %v11555_v3 }
 0x35a   : > { %v1846_v50 = vadd.f32 %v1845_v48, %v11552_v0  ;;  %v1847_v51 = vpop.f32.mrb[27].mxu1 }
 0x35b   : > { %v1848_v53 = vadd.f32 %v1847_v51, %v11555_v3 }
 0x35c   : > { %v11604_v8 = vpack.c.bf16 %v1846_v50, %v1842_v49  ;;  %9650 = vmatpush3.bf16.msra.mxu0 %v11585_v40 }
 0x35d   : > { %v11607_v55 = vpack.c.bf16 %v1848_v53, %v1844_v52  ;;  %v9629_v56 = vpop.f32.mrb[36].mxu0 }
 0x35e   : > { %2229 = vrot.lane.b32.xlu0 %v11604_v8, %s14250_s1  ;;  %v1910_v10 = vpop.f32.mrb[37].mxu0  ;;  %v1919_v1 = vadd.f32 %v9629_v56, %v1655_v15 }
 0x35f   : > { %2241 = vrot.lane.b32.xlu1 %v11607_v55, %s14250_s1  ;;  %v1851_v57 = vpop.f32.mrb[28].mxu1  ;;  %v9630_v59 = vpop.f32.mrb[38].mxu0  ;;  %10095 = vmatprep.subr.msk.bf16.mxu1 %vm1937_vm0, %v11607_v55  ;;  %v1957_v28 = vsel %vm1937_vm0, %v11607_v55, 0  ;;  %v1911_v7 = vadd.f32 %v1910_v10, %v1655_v15 }
 0x360   : > { %v1922_v4 = vadd.f32 %v9630_v59, %v1655_v15  ;;  %v1853_v5 = vpop.f32.mrb[29].mxu1  ;;  %v1913_v6 = vpop.f32.mrb[39].mxu0  ;;  %v1852_v13 = vadd.f32 %v1851_v57, %v11552_v0 }
 0x361   : > { %v1914_v9 = vadd.f32 %v1913_v6, %v1655_v15  ;;  %9636 = vmatpush3.bf16.xpose.msra.mxu1 %v1957_v28  ;;  %v1855_v12 = vpop.f32.mrb[30].mxu1  ;;  %v1854_v19 = vadd.f32 %v1853_v5, %v11555_v3  ;;  %v1484_v28 = vand.u32 127, %v1483_v60 }
 0x362   : > { %v11618_v16 = vpack.c.bf16 %v1922_v4, %v1919_v1  ;;  %v1856_v17 = vadd.f32 %v1855_v12, %v11552_v0  ;;  %2730 = vrot.lane.b32.xlu0 %v11566_v54, %s14254_s27  ;;  %v1857_v18 = vpop.f32.mrb[31].mxu1  ;;  %v11044_v1 = vmov -1e+30  }
 0x363   : > { %v11624_v20 = vpack.c.bf16 %v1914_v9, %v1911_v7  ;;  %v1858_v25 = vadd.f32 %v1857_v18, %v11555_v3  ;;  %vm1485_vm1 = vcmp.lt.s32.totalorder %v1484_v28, 50 }
 0x364   : > { %v11627_v15 = vpack.c.bf16 %v1856_v17, %v1852_v13  ;;  %v11690_v4 = vsel %vm1485_vm1, 0.0, %v11044_v1 }
 0x365   : > { %v11629_v27 = vpack.c.bf16 %v1858_v25, %v1854_v19  ;;  %9651 = vmatprep.subr.bf16.mxu0 %v11624_v20 }
 0x366   : > { %2734 = vrot.lane.b32.xlu0 %v11607_v55, %s14254_s27  ;;  %9652 = vmatpush3.bf16.msra.mxu0 %v11624_v20 }
 0x367   : > { %9653 = vmatprep.subr.bf16.mxu0 %v11618_v16  ;;  %2243 = vrot.lane.b32.xlu1 %v11629_v27, %s14250_s1  ;;  %v1960_v0 = vsel %vm1937_vm0, %v11629_v27, 0 }
 0x368   : > { %10096 = vmatprep.subr.msk.bf16.mxu1 %vm1937_vm0, %v11629_v27 }
 0x369   : > { %9638 = vmatpush3.bf16.xpose.msra.mxu1 %v1960_v0 }
 0x36a   : > { %2722 = vrot.lane.b32.xlu0 %v11564_v14, %s14254_s27  ;;  %9654 = vmatpush3.bf16.msra.mxu0 %v11618_v16 }
 0x36b   : > { %2227 = vrot.lane.b32.xlu1 %v11583_v62, %s14250_s1 }
 0x36e   : > { %2726 = vrot.lane.b32.xlu0 %v11604_v8, %s14254_s27 }
 0x36f   : > { %2231 = vrot.lane.b32.xlu1 %v11627_v15, %s14250_s1 }
 0x370   : > { %9640 = vmatmul.mubr.msk.bf16.vlgmr.msra.gmra.mrb[32].mxu1 %vm1937_vm0, %v11583_v62 }
 0x371   : > { %9643 = vmatprep.mubr.msk.bf16.mxu1 %vm1937_vm0, %v11604_v8 }
 0x373   : > { %2732 = vrot.lane.b32.xlu1 %v11587_v41, %s14254_s27 }
 0x377   : > { %2724 = vrot.lane.b32.xlu1 %v11583_v62, %s14254_s27 }
 0x378   : > { %9644 = vmatmul.mubr.msk.bf16.gmra.mrb[36].mxu1 %vm1937_vm0, %v11627_v15 }
 0x37b   : > { %2728 = vrot.lane.b32.xlu1 %v11627_v15, %s14254_s27 }
 0x37f   : > { %2736 = vrot.lane.b32.xlu1 %v11629_v27, %s14254_s27 }
 0x3c1   : > { %v2238_v3 = vpop.permute.xlu0 %2237 }
 0x3c2   : > { %10097 = vmatprep.subr.msk.bf16.mxu1 %vm1937_vm0, %v2238_v3  ;;  %v2258_v29 = vsel %vm1937_vm0, %v2238_v3, 0 }
 0x3c3   : > { %9664 = vmatpush3.bf16.xpose.msra.mxu1 %v2258_v29 }
 0x3c5   : > { %v2226_v30 = vpop.permute.xlu0 %2225 }
 0x3c6   : > { %9671 = vmatprep.mubr.msk.bf16.mxu1 %vm1937_vm0, %v2226_v30 }
 0x3c9   : > { %v2240_v32 = vpop.permute.xlu1 %2239 }
 0x3ca   : > { %10098 = vmatprep.subr.msk.bf16.mxu1 %vm1937_vm0, %v2240_v32  ;;  %v2261_v58 = vsel %vm1937_vm0, %v2240_v32, 0 }
 0x3cb   : > { %9666 = vmatpush3.bf16.xpose.msra.mxu1 %v2261_v58 }
 0x3d0   : > { %v2230_v26 = vpop.permute.xlu0 %2229 }
 0x3d1   : > { %v2242_v23 = vpop.permute.xlu1 %2241 }
 0x3d2   : > { %10099 = vmatprep.subr.msk.bf16.mxu1 %vm1937_vm0, %v2242_v23  ;;  %v2264_v34 = vsel %vm1937_vm0, %v2242_v23, 0 }
 0x3d3   : > { %9668 = vmatpush3.bf16.xpose.msra.mxu1 %v2264_v34 }
 0x3d4   : > { %v2731_v38 = vpop.permute.xlu0 %2730 }
 0x3d5   : > { %v2751_v2 = vsel %vm1937_vm0, %v2731_v38, 0 }
 0x3d8   : > { %v2735_v48 = vpop.permute.xlu0 %2734 }
 0x3d9   : > { %v2244_v35 = vpop.permute.xlu1 %2243  ;;  %v2757_v56 = vsel %vm1937_vm0, %v2735_v48, 0 }
 0x3da   : > { %10100 = vmatprep.subr.msk.bf16.mxu1 %vm1937_vm0, %v2244_v35  ;;  %v2267_v36 = vsel %vm1937_vm0, %v2244_v35, 0 }
 0x3db   : > { %9670 = vmatpush3.bf16.xpose.msra.mxu1 %v2267_v36 }
 0x3dc   : > { %10101 = vmatprep.subr.msk.bf16.mxu1 %vm1937_vm0, %v2731_v38  ;;  %v2723_v51 = vpop.permute.xlu0 %2722 }
 0x3dd   : > { %v2228_v43 = vpop.permute.xlu1 %2227 }
 0x3e0   : > { %v2727_v59 = vpop.permute.xlu0 %2726 }
 0x3e1   : > { %v2232_v44 = vpop.permute.xlu1 %2231 }
 0x3e2   : > { %9672 = vmatmul.mubr.msk.bf16.vlgmr.msra.gmra.mrb[40].mxu1 %vm1937_vm0, %v2228_v43 }
 0x3e3   : > { %9675 = vmatprep.mubr.msk.bf16.mxu1 %vm1937_vm0, %v2230_v26  ;;  %9720 = vmatpush3.bf16.xpose.msra.mxu1 %v2751_v2 }
 0x3e5   : > { %v2733_v49 = vpop.permute.xlu1 %2732 }
 0x3e6   : > { %10102 = vmatprep.subr.msk.bf16.mxu1 %vm1937_vm0, %v2733_v49  ;;  %v2754_v52 = vsel %vm1937_vm0, %v2733_v49, 0 }
 0x3e9   : > { %v2725_v50 = vpop.permute.xlu1 %2724 }
 0x3ea   : > { %9676 = vmatmul.mubr.msk.bf16.gmra.mrb[44].mxu1 %vm1937_vm0, %v2232_v44 }
 0x3eb   : > { %9722 = vmatpush3.bf16.xpose.msra.mxu1 %v2754_v52  ;;  %9727 = vmatprep.mubr.msk.bf16.mxu1 %vm1937_vm0, %v2723_v51 }
 0x3ec   : > { %10103 = vmatprep.subr.msk.bf16.mxu1 %vm1937_vm0, %v2735_v48 }
 0x3ed   : > { %v2729_v53 = vpop.permute.xlu1 %2728 }
 0x3f1   : > { %v2737_v10 = vpop.permute.xlu1 %2736 }
 0x3f2   : > { %v2760_v57 = vsel %vm1937_vm0, %v2737_v10, 0 }
 0x3f3   : > { %9724 = vmatpush3.bf16.xpose.msra.mxu1 %v2757_v56 }
 0x3f4   : > { %10104 = vmatprep.subr.msk.bf16.mxu1 %vm1937_vm0, %v2737_v10 }
 0x3fb   : > { %9726 = vmatpush3.bf16.xpose.msra.mxu1 %v2760_v57 }
 0x402   : > { %9728 = vmatmul.mubr.msk.bf16.vlgmr.msra.gmra.mrb[48].mxu1 %vm1937_vm0, %v2725_v50 }
 0x403   : > { %9731 = vmatprep.mubr.msk.bf16.mxu1 %vm1937_vm0, %v2727_v59 }
 0x40a   : > { %9732 = vmatmul.mubr.msk.bf16.gmra.mrb[52].mxu1 %vm1937_vm0, %v2729_v53 }
 0x443   : > { %v9641_v5 = vpop.f32.mrb[32].mxu1 }
 0x444   : > { %v2029_v6 = vmul.f32 0.17677669, %v9641_v5  ;;  %v1996_v7 = vpop.f32.mrb[33].mxu1 }
 0x445   : > { %v2027_v9 = vmul.f32 0.17677669, %v1996_v7  ;;  %v9642_v12 = vpop.f32.mrb[34].mxu1 }
 0x446   : > { %v1999_v13 = vpop.f32.mrb[35].mxu1  ;;  %v11693_v17 = vadd.f32 %v2029_v6, %v11690_v4  ;;  %v2030_v19 = vmul.f32 0.17677669, %v9642_v12 }
 0x447   : > { %v2028_v18 = vmul.f32 0.17677669, %v1999_v13  ;;  %v11698_v60 = vadd.f32 %v2027_v9, %v11690_v4 }
 0x448   : > { %v2050_v25 = vsel %vm2043_vm2, %v11693_v17, -inf  ;;  %v11708_v58 = vadd.f32 %v2030_v19, %v11690_v4 }
 0x449   : > { %2051 = vmax.xlane.f32.xlu0 %v2050_v25  ;;  %v11701_v0 = vadd.f32 %v2028_v18, %v11690_v4  ;;  %v2044_v32 = vsel %vm2043_vm2, %v11698_v60, -inf }
 0x44a   : > { %v2053_v43 = vsel %vm2043_vm2, %v11708_v58, -inf }
 0x44b   : > { %v9645_v3 = vpop.f32.mrb[36].mxu1  ;;  %v2047_v29 = vsel %vm2043_vm2, %v11701_v0, -inf }
 0x44c   : > { %2048 = vmax.xlane.f32.xlu1 %v2047_v29  ;;  %v2012_v30 = vpop.f32.mrb[37].mxu1  ;;  %v2033_v38 = vmul.f32 0.17677669, %v9645_v3 }
 0x44d   : > { %v2031_v23 = vmul.f32 0.17677669, %v2012_v30  ;;  %2045 = vmax.xlane.f32.xlu0 %v2044_v32  ;;  %v9646_v34 = vpop.f32.mrb[38].mxu1 }
 0x44e   : > { %v2034_v26 = vmul.f32 0.17677669, %v9646_v34  ;;  %v2015_v35 = vpop.f32.mrb[39].mxu1  ;;  %v11726_v51 = vadd.f32 %v2033_v38, %v11690_v4 }
 0x44f   : > { %v2032_v36 = vmul.f32 0.17677669, %v2015_v35  ;;  %v11716_v2 = vadd.f32 %v2031_v23, %v11690_v4 }
 0x450   : > { %v11713_v44 = vadd.f32 %v2034_v26, %v11690_v4  ;;  %v2062_v53 = vsel %vm2043_vm2, %v11726_v51, -inf }
 0x451   : > { %2054 = vmax.xlane.f32.xlu0 %v2053_v43  ;;  %v11721_v49 = vadd.f32 %v2032_v36, %v11690_v4  ;;  %v2056_v50 = vsel %vm2043_vm2, %v11716_v2, -inf }
 0x452   : > { %v2065_v48 = vsel %vm2043_vm2, %v11713_v44, -inf }
 0x453   : > { %2066 = vmax.xlane.f32.xlu1 %v2065_v48  ;;  %v2059_v52 = vsel %vm2043_vm2, %v11721_v49, -inf }
 0x455   : > { %2057 = vmax.xlane.f32.xlu0 %v2056_v50 }
 0x457   : > { %2060 = vmax.xlane.f32.xlu1 %v2059_v52 }
 0x459   : > { %2063 = vmax.xlane.f32.xlu0 %v2062_v53 }
 0x4b5   : > { %v9673_v56 = vpop.f32.mrb[40].mxu1 }
 0x4b6   : > { %v2303_v10 = vpop.f32.mrb[41].mxu1  ;;  %v2336_v57 = vmul.f32 0.17677669, %v9673_v56 }
 0x4b7   : > { %v2334_v59 = vmul.f32 0.17677669, %v2303_v10  ;;  %v9674_v28 = vpop.f32.mrb[42].mxu1 }
 0x4b8   : > { %v2337_v1 = vmul.f32 0.17677669, %v9674_v28  ;;  %v2306_v5 = vpop.f32.mrb[43].mxu1  ;;  %v11741_v13 = vadd.f32 %v2336_v57, %v11690_v4 }
 0x4b9   : > { %v2335_v6 = vmul.f32 0.17677669, %v2306_v5  ;;  %v11733_v7 = vadd.f32 %v2334_v59, %v11690_v4 }
 0x4ba   : > { %v11736_v9 = vadd.f32 %v2337_v1, %v11690_v4  ;;  %v2356_v23 = vsel %vm2043_vm2, %v11741_v13, -inf }
 0x4bb   : > { %v2350_v12 = vsel %vm2043_vm2, %v11733_v7, -inf  ;;  %v11746_v19 = vadd.f32 %v2335_v6, %v11690_v4 }
 0x4bc   : > { %2351 = vmax.xlane.f32.xlu0 %v2350_v12  ;;  %v2359_v18 = vsel %vm2043_vm2, %v11736_v9, -inf }
 0x4bd   : > { %2360 = vmax.xlane.f32.xlu1 %v2359_v18  ;;  %v9677_v25 = vpop.f32.mrb[44].mxu1  ;;  %v2353_v35 = vsel %vm2043_vm2, %v11746_v19, -inf }
 0x4be   : > { %v2319_v3 = vpop.f32.mrb[45].mxu1  ;;  %v2340_v29 = vmul.f32 0.17677669, %v9677_v25 }
 0x4bf   : > { %v2338_v30 = vmul.f32 0.17677669, %v2319_v3  ;;  %v9678_v32 = vpop.f32.mrb[46].mxu1 }
 0x4c0   : > { %v2341_v34 = vmul.f32 0.17677669, %v9678_v32  ;;  %2357 = vmax.xlane.f32.xlu0 %v2356_v23  ;;  %v2322_v26 = vpop.f32.mrb[47].mxu1  ;;  %v11761_v50 = vadd.f32 %v2340_v29, %v11690_v4 }
 0x4c1   : > { %v2339_v36 = vmul.f32 0.17677669, %v2322_v26  ;;  %2354 = vmax.xlane.f32.xlu1 %v2353_v35  ;;  %v11753_v38 = vadd.f32 %v2338_v30, %v11690_v4 }
 0x4c2   : > { %v11756_v43 = vadd.f32 %v2341_v34, %v11690_v4  ;;  %v2368_v56 = vsel %vm2043_vm2, %v11761_v50, -inf }
 0x4c3   : > { %v2362_v48 = vsel %vm2043_vm2, %v11753_v38, -inf  ;;  %v11766_v53 = vadd.f32 %v2339_v36, %v11690_v4 }
 0x4c4   : > { %2363 = vmax.xlane.f32.xlu0 %v2362_v48  ;;  %v2371_v52 = vsel %vm2043_vm2, %v11756_v43, -inf }
 0x4c5   : > { %2372 = vmax.xlane.f32.xlu1 %v2371_v52  ;;  %v2365_v10 = vsel %vm2043_vm2, %v11766_v53, -inf }
 0x4c8   : > { %2369 = vmax.xlane.f32.xlu0 %v2368_v56 }
 0x4c9   : > { %2366 = vmax.xlane.f32.xlu1 %v2365_v10 }
 0x4d5   : > { %v11772_v57 = vpop.f32.mrb[48].mxu1 }
 0x4d6   : > { %v2052_v59 = vpop.xlane.xlu0 %2051  ;;  %v11774_v28 = vpop.f32.mrb[49].mxu1 }
 0x4d7   : > { %v2070_v1 = vsub.f32 %v11693_v17, %v2052_v59  ;;  %v11777_v5 = vpop.f32.mrb[50].mxu1 }
 0x4d8   : > { %v11779_v6 = vpop.f32.mrb[51].mxu1 }
 0x4d9   : > { %v2080_v12 = vmul.f32 1.442695, %v2070_v1  ;;  %v2049_v18 = vpop.xlane.xlu1 %2048 }
 0x4da   : > { %v2046_v25 = vpop.xlane.xlu0 %2045  ;;  %v2069_v29 = vsub.f32 %v11701_v0, %v2049_v18 }
 0x4db   : > { %10665 = vpow2.f32 %v2080_v12  ;;  %v2068_v3 = vsub.f32 %v11698_v60, %v2046_v25 }
 0x4dc   : > { %v2078_v48 = vmul.f32 1.442695, %v2069_v29 }
 0x4dd   : > { %v2076_v30 = vmul.f32 1.442695, %v2068_v3  ;;  %v11783_v32 = vpop.f32.mrb[52].mxu1 }
 0x4de   : > { %v2055_v23 = vpop.xlane.xlu0 %2054  ;;  %v11785_v34 = vpop.f32.mrb[53].mxu1 }
 0x4df   : > { %10667 = vpow2.f32 %v2076_v30  ;;  %v2071_v17 = vsub.f32 %v11708_v58, %v2055_v23  ;;  %v11788_v26 = vpop.f32.mrb[54].mxu1 }
 0x4e0   : > { %v2067_v35 = vpop.xlane.xlu1 %2066  ;;  %v11790_v36 = vpop.f32.mrb[55].mxu1 }
 0x4e1   : > { %v2082_v52 = vmul.f32 1.442695, %v2071_v17  ;;  %v2075_v60 = vsub.f32 %v11713_v44, %v2067_v35 }
 0x4e2   : > { %v2058_v56 = vpop.xlane.xlu0 %2057 }
 0x4e3   : > { %10669 = vpow2.f32 %v2082_v52  ;;  %v2072_v0 = vsub.f32 %v11716_v2, %v2058_v56  ;;  %v2090_v1 = vmul.f32 1.442695, %v2075_v60 }
 0x4e4   : > { %v2061_v10 = vpop.xlane.xlu1 %2060  ;;  %10671 = vpow2.f32 %v2078_v48 }
 0x4e5   : > { %v11794_v59 = vpop.eup %10665  ;;  %v2073_v58 = vsub.f32 %v11721_v49, %v2061_v10  ;;  %v2084_v3 = vmul.f32 1.442695, %v2072_v0  ;;  %10673 = vpow2.f32 %v2090_v1 }
 0x4e6   : > { %v2064_v12 = vpop.xlane.xlu0 %2063  ;;  %v2098_v18 = vsel %vm2043_vm2, %v11794_v59, 0.0 }
 0x4e7   : > { %v2074_v25 = vsub.f32 %v11726_v51, %v2064_v12  ;;  %2099 = vadd.xlane.f32.xlu0 %v2098_v18  ;;  %v2086_v29 = vmul.f32 1.442695, %v2073_v58 }
 0x4e9   : > { %v11800_v44 = vpop.eup %10667  ;;  %v2088_v2 = vmul.f32 1.442695, %v2074_v25 }
 0x4ea   : > { %v2092_v30 = vsel %vm2043_vm2, %v11800_v44, 0.0 }
 0x4eb   : > { %10675 = vpow2.f32 %v2088_v2  ;;  %2093 = vadd.xlane.f32.xlu0 %v2092_v30 }
 0x4ec   : > { %10677 = vpow2.f32 %v2084_v3 }
 0x4ed   : > { %v11804_v49 = vpop.eup %10669  ;;  %10679 = vpow2.f32 %v2086_v29 }
 0x4ee   : > { %v2101_v23 = vsel %vm2043_vm2, %v11804_v49, 0.0  ;;  %v11808_v51 = vpop.eup %10671 }
 0x4ef   : > { %2102 = vadd.xlane.f32.xlu1 %v2101_v23  ;;  %v2095_v17 = vsel %vm2043_vm2, %v11808_v51, 0.0  ;;  %v11812_v35 = vpop.eup %10673 }
 0x4f0   : > { %v2113_v60 = vsel %vm2043_vm2, %v11812_v35, 0.0 }
 0x4f3   : > { %2096 = vadd.xlane.f32.xlu1 %v2095_v17 }
 0x4f5   : > { %v11814_v48 = vpop.eup %10675 }
 0x4f6   : > { %v11816_v52 = vpop.eup %10677  ;;  %v2110_v56 = vsel %vm2043_vm2, %v11814_v48, 0.0 }
 0x4f7   : > { %v11822_v0 = vpop.eup %10679  ;;  %2114 = vadd.xlane.f32.xlu1 %v2113_v60  ;;  %2111 = vadd.xlane.f32.xlu0 %v2110_v56  ;;  %v2104_v1 = vsel %vm2043_vm2, %v11816_v52, 0.0 }
 0x4f8   : > { %v2107_v10 = vsel %vm2043_vm2, %v11822_v0, 0.0 }
 0x4fb   : > { %2108 = vadd.xlane.f32.xlu1 %v2107_v10  ;;  %2105 = vadd.xlane.f32.xlu0 %v2104_v1 }
 0x549   : > { %v2352_v58 = vpop.xlane.xlu0 %2351 }
 0x54a   : > { %v2361_v12 = vpop.xlane.xlu1 %2360  ;;  %v2374_v25 = vsub.f32 %v11733_v7, %v2352_v58 }
 0x54b   : > { %v2377_v18 = vsub.f32 %v11736_v9, %v2361_v12 }
 0x54c   : > { %v2382_v17 = vmul.f32 1.442695, %v2374_v25 }
 0x54d   : > { %v2388_v3 = vmul.f32 1.442695, %v2377_v18  ;;  %v2358_v29 = vpop.xlane.xlu0 %2357 }
 0x54e   : > { %v2376_v2 = vsub.f32 %v11741_v13, %v2358_v29  ;;  %v2355_v30 = vpop.xlane.xlu1 %2354 }
 0x54f   : > { %10681 = vpow2.f32 %v2388_v3  ;;  %v2375_v23 = vsub.f32 %v11746_v19, %v2355_v30 }
 0x550   : > { %v2386_v60 = vmul.f32 1.442695, %v2376_v2 }
 0x551   : > { %v2384_v56 = vmul.f32 1.442695, %v2375_v23  ;;  %v2364_v46 = vpop.xlane.xlu0 %2363 }
 0x552   : > { %10683 = vpow2.f32 %v2386_v60  ;;  %v2378_v10 = vsub.f32 %v11753_v38, %v2364_v46  ;;  %v2373_v23 = vpop.xlane.xlu1 %2372 }
 0x553   : > { %10685 = vpow2.f32 %v2384_v56 }
 0x554   : > { %10687 = vpow2.f32 %v2382_v17  ;;  %v2390_v1 = vmul.f32 1.442695, %v2378_v10 }
 0x555   : > { %v2370_v9 = vpop.xlane.xlu0 %2369 }
 0x556   : > { %v2380_v7 = vsub.f32 %v11761_v50, %v2370_v9  ;;  %v2367_v60 = vpop.xlane.xlu1 %2366  ;;  %v2381_v9 = vsub.f32 %v11756_v43, %v2373_v23 }
 0x558   : > { %v2394_v58 = vmul.f32 1.442695, %v2380_v7 }
 0x559   : > { %v11834_v12 = vpop.eup %10681 }
 0x55a   : > { %10689 = vpow2.f32 %v2394_v58  ;;  %v2407_v13 = vsel %vm2043_vm2, %v11834_v12, 0.0 }
 0x55b   : > { %2408 = vadd.xlane.f32.xlu1 %v2407_v13  ;;  %10691 = vpow2.f32 %v2390_v1  ;;  %v2396_v1 = vmul.f32 1.442695, %v2381_v9 }
 0x55c   : > { %v11838_v19 = vpop.eup %10683 }
 0x55d   : > { %v11840_v18 = vpop.eup %10685  ;;  %v2404_v46 = vsel %vm2043_vm2, %v11838_v19, 0.0 }
 0x55e   : > { %v11844_v38 = vpop.eup %10687  ;;  %2405 = vadd.xlane.f32.xlu0 %v2404_v46  ;;  %v2401_v50 = vsel %vm2043_vm2, %v11840_v18, 0.0  ;;  %v2379_v46 = vsub.f32 %v11766_v53, %v2367_v60 }
 0x55f   : > { %2402 = vadd.xlane.f32.xlu1 %v2401_v50  ;;  %v2398_v25 = vsel %vm2043_vm2, %v11844_v38, 0.0 }
 0x560   : > { %v2392_v23 = vmul.f32 1.442695, %v2379_v46 }
 0x562   : > { %2399 = vadd.xlane.f32.xlu0 %v2398_v25 }
 0x564   : > { %v11850_v3 = vpop.eup %10689 }
 0x565   : > { %v2416_v29 = vsel %vm2043_vm2, %v11850_v3, 0.0  ;;  %v11854_v2 = vpop.eup %10691 }
 0x566   : > { %2417 = vadd.xlane.f32.xlu0 %v2416_v29  ;;  %v2410_v30 = vsel %vm2043_vm2, %v11854_v2, 0.0 }
 0x56a   : > { %2411 = vadd.xlane.f32.xlu0 %v2410_v30 }
 0x570   : > { %2448 = vrot.lane.b32.xlu1 %v11585_v40, %s14250_s1 }
 0x574   : > { %2450 = vrot.lane.b32.xlu1 %v11624_v20, %s14250_s1  ;;  %v2100_v17 = vpop.xlane.xlu0 %2099 }
 0x578   : > { %v2094_v56 = vpop.xlane.xlu0 %2093 }
 0x57c   : > { %v2103_v10 = vpop.xlane.xlu1 %2102 }
 0x57d   : > { %10693 = vrcp.f32 %v2103_v10 }
 0x57e   : > { %10695 = vrcp.f32 %v2094_v56 }
 0x57f   : > { %10697 = vrcp.f32 %v2100_v17 }
 0x580   : > { %v2097_v7 = vpop.xlane.xlu1 %2096  ;;  %2446 = vrot.lane.b32.xlu0 %v11589_v42, %s14250_s1 }
 0x581   : > { %10699 = vrcp.f32 %v2097_v7 }
 0x584   : > { %v2115_v58 = vpop.xlane.xlu1 %2114  ;;  %v2112_v13 = vpop.xlane.xlu0 %2111  ;;  %3138 = vrot.lane.b32.xlu0 %v11566_v54, %s14252_s29 }
 0x585   : > { %10701 = vrcp.f32 %v2115_v58 }
 0x586   : > { %10703 = vrcp.f32 %v2112_v13 }
 0x587   : > { %v10694_v50 = vpop.eup %10693  ;;  %10705 = vpow2.f32 %v2396_v1 }
 0x588   : > { %v2109_v43 = vpop.xlane.xlu1 %2108  ;;  %v2106_v25 = vpop.xlane.xlu0 %2105  ;;  %3142 = vrot.lane.b32.xlu0 %v11607_v55, %s14252_s29  ;;  %v2127_v56 = vmul.f32 %v10694_v50, %v11804_v49 }
 0x589   : > { %v10696_v29 = vpop.eup %10695  ;;  %10707 = vrcp.f32 %v2109_v43  ;;  %v2830_v43 = vmul.f32 0.17677669, %v11777_v5  ;;  %v2833_v5 = vmul.f32 0.17677669, %v11783_v32  ;;  %v2828_v32 = vmul.f32 0.17677669, %v11779_v6 }
 0x58a   : > { %v10698_v30 = vpop.eup %10697  ;;  %10709 = vrcp.f32 %v2106_v25  ;;  %v2124_v54 = vmul.f32 %v10696_v29, %v11800_v44 }
 0x58b   : > { %v10700_v17 = vpop.eup %10699  ;;  %v2126_v60 = vmul.f32 %v10698_v30, %v11794_v59  ;;  %10711 = vpow2.f32 %v2392_v23  ;;  %v11913_v30 = vadd.f32 %v2830_v43, %v11690_v4 }
 0x58c   : > { %3130 = vrot.lane.b32.xlu0 %v11564_v14, %s14252_s29  ;;  %v2125_v53 = vmul.f32 %v10700_v17, %v11808_v51 }
 0x58d   : > { %v2133_v55 = vpack.c.bf16 %v2127_v56, %v2126_v60  ;;  %v2852_v23 = vsel %vm2043_vm2, %v11913_v30, -inf  ;;  %v2832_v56 = vmul.f32 0.17677669, %v11790_v36 }
 0x58e   : > { %v2132_v10 = vpack.c.bf16 %v2125_v53, %v2124_v54  ;;  %v2834_v54 = vmul.f32 0.17677669, %v11788_v26 }
 0x58f   : > { %v10702_v9 = vpop.eup %10701  ;;  %v11943_v60 = vadd.f32 %v2832_v56, %v11690_v4 }
 0x590   : > { %9655 = vmatprep.mubr.msk.bf16.mxu0 %vm2043_vm2, %v2132_v10  ;;  %3134 = vrot.lane.b32.xlu0 %v11604_v8, %s14252_s29  ;;  %v10704_v7 = vpop.eup %10703  ;;  %v2131_v1 = vmul.f32 %v10702_v9, %v11812_v35  ;;  %v2827_v35 = vmul.f32 0.17677669, %v11774_v28  ;;  %v11948_v10 = vadd.f32 %v2834_v54, %v11690_v4 }
 0x591   : > { %9656 = vmatmul.mubr.msk.bf16.vlgmr.msra.gmra.mrb[40].mxu0 %vm2043_vm2, %v2133_v55  ;;  %v11880_v49 = vpop.eup %10705  ;;  %v2130_v59 = vmul.f32 %v10704_v7, %v11814_v48  ;;  %v2829_v48 = vmul.f32 0.17677669, %v11772_v57  ;;  %v2831_v57 = vmul.f32 0.17677669, %v11785_v34  ;;  %v11928_v34 = vadd.f32 %v2833_v5, %v11690_v4 }
 0x592   : > { %v2419_v46 = vsel %vm2043_vm2, %v11880_v49, 0.0  ;;  %v2864_v36 = vsel %vm2043_vm2, %v11948_v10, -inf }
 0x593   : > { %v10708_v14 = vpop.eup %10707  ;;  %v2135_v50 = vpack.c.bf16 %v2131_v1, %v2130_v59  ;;  %v11905_v29 = vadd.f32 %v2829_v48, %v11690_v4  ;;  %v11921_v17 = vadd.f32 %v2831_v57, %v11690_v4 }
 0x594   : > { %v10710_v44 = vpop.eup %10709  ;;  %v2129_v51 = vmul.f32 %v10708_v14, %v11822_v0 }
 0x595   : > { %v2128_v58 = vmul.f32 %v10710_v44, %v11816_v52  ;;  %v11888_v8 = vpop.eup %10711  ;;  %v11897_v52 = vadd.f32 %v2827_v35, %v11690_v4  ;;  %v2849_v28 = vsel %vm2043_vm2, %v11905_v29, -inf }
 0x596   : > { %v2413_v0 = vsel %vm2043_vm2, %v11888_v8, 0.0 }
 0x597   : > { %v2134_v13 = vpack.c.bf16 %v2129_v51, %v2128_v58  ;;  %v2843_v25 = vsel %vm2043_vm2, %v11897_v52, -inf }
 0x598   : > { %2420 = vadd.xlane.f32.xlu1 %v2419_v46 }
 0x599   : > { %9659 = vmatprep.mubr.msk.bf16.mxu0 %vm2043_vm2, %v2134_v13 }
 0x59a   : > { %9660 = vmatmul.mubr.msk.bf16.gmra.mrb[44].mxu0 %vm2043_vm2, %v2135_v50 }
 0x59c   : > { %2414 = vadd.xlane.f32.xlu1 %v2413_v0 }
 0x5ad   : > { %2452 = vrot.lane.b32.xlu1 %v11618_v16, %s14250_s1 }
 0x5af   : > { %2844 = vmax.xlane.f32.xlu0 %v2843_v25 }
 0x5b1   : > { %3140 = vrot.lane.b32.xlu1 %v11587_v41, %s14252_s29  ;;  %v2855_v41 = vsel %vm2043_vm2, %v11921_v17, -inf }
 0x5b3   : > { %2850 = vmax.xlane.f32.xlu0 %v2849_v28 }
 0x5b5   : > { %3144 = vrot.lane.b32.xlu1 %v11629_v27, %s14252_s29  ;;  %v2861_v27 = vsel %vm2043_vm2, %v11928_v34, -inf }
 0x5b7   : > { %2853 = vmax.xlane.f32.xlu0 %v2852_v23 }
 0x5b9   : > { %3132 = vrot.lane.b32.xlu1 %v11583_v62, %s14252_s29  ;;  %v11937_v62 = vadd.f32 %v2828_v32, %v11690_v4 }
 0x5bb   : > { %2856 = vmax.xlane.f32.xlu0 %v2855_v41  ;;  %v2846_v53 = vsel %vm2043_vm2, %v11937_v62, -inf }
 0x5bd   : > { %3136 = vrot.lane.b32.xlu1 %v11627_v15, %s14252_s29  ;;  %v2858_v15 = vsel %vm2043_vm2, %v11943_v60, -inf }
 0x5bf   : > { %2862 = vmax.xlane.f32.xlu0 %v2861_v27 }
 0x5e1   : > { %2847 = vmax.xlane.f32.xlu1 %v2846_v53 }
 0x5e5   : > { %2859 = vmax.xlane.f32.xlu1 %v2858_v15 }
 0x5e8   : > { %v2409_v6 = vpop.xlane.xlu1 %2408 }
 0x5e9   : > { %2865 = vmax.xlane.f32.xlu1 %v2864_v36 }
 0x5eb   : > { %v2406_v26 = vpop.xlane.xlu0 %2405 }
 0x5ec   : > { %v2403_v55 = vpop.xlane.xlu1 %2402 }
 0x5ed   : > { %10713 = vrcp.f32 %v2403_v55 }
 0x5ef   : > { %v2400_v9 = vpop.xlane.xlu0 %2399 }
 0x5f0   : > { %10715 = vrcp.f32 %v2400_v9  ;;  %v2449_v59 = vpop.permute.xlu1 %2448 }
 0x5f1   : > { %10717 = vrcp.f32 %v2406_v26 }
 0x5f2   : > { %10719 = vrcp.f32 %v2409_v6 }
 0x5f3   : > { %v2418_v7 = vpop.xlane.xlu0 %2417 }
 0x5f4   : > { %v2451_v35 = vpop.permute.xlu1 %2450 }
 0x5f7   : > { %v2412_v14 = vpop.xlane.xlu0 %2411  ;;  %v10714_v44 = vpop.eup %10713 }
 0x5f8   : > { %v2431_v13 = vmul.f32 %v10714_v44, %v11840_v18 }
 0x5fa   : > { %v10716_v51 = vpop.eup %10715 }
 0x5fb   : > { %v2447_v1 = vpop.permute.xlu0 %2446  ;;  %v2430_v58 = vmul.f32 %v10716_v51, %v11844_v38  ;;  %v10718_v43 = vpop.eup %10717 }
 0x5fc   : > { %9679 = vmatprep.subr.bf16.mxu0 %v2447_v1  ;;  %v10720_v57 = vpop.eup %10719  ;;  %v2432_v28 = vmul.f32 %v10718_v43, %v11838_v19 }
 0x5fd   : > { %9680 = vmatpush3.bf16.msra.mxu0 %v2447_v1  ;;  %v2438_v46 = vpack.c.bf16 %v2431_v13, %v2430_v58  ;;  %v2433_v23 = vmul.f32 %v10720_v57, %v11834_v12 }
 0x5fe   : > { %9681 = vmatprep.subr.bf16.mxu0 %v2449_v59 }
 0x5ff   : > { %9687 = vmatprep.mubr.msk.bf16.mxu0 %vm2043_vm2, %v2438_v46  ;;  %v3139_v50 = vpop.permute.xlu0 %3138  ;;  %v2439_v41 = vpack.c.bf16 %v2433_v23, %v2432_v28 }
 0x600   : > { %10105 = vmatprep.subr.msk.bf16.mxu1 %vm1937_vm0, %v3139_v50  ;;  %v3159_v0 = vsel %vm1937_vm0, %v3139_v50, 0 }
 0x601   : > { %9682 = vmatpush3.bf16.msra.mxu0 %v2449_v59  ;;  %9764 = vmatpush3.bf16.xpose.msra.mxu1 %v3159_v0 }
 0x602   : > { %9683 = vmatprep.subr.bf16.mxu0 %v2451_v35 }
 0x603   : > { %v3143_v48 = vpop.permute.xlu0 %3142 }
 0x605   : > { %9684 = vmatpush3.bf16.msra.mxu0 %v2451_v35 }
 0x607   : > { %v3131_v38 = vpop.permute.xlu0 %3130 }
 0x608   : > { %9771 = vmatprep.mubr.msk.bf16.mxu1 %vm1937_vm0, %v3131_v38 }
 0x60b   : > { %v3135_v55 = vpop.permute.xlu0 %3134 }
 0x625   : > { %v2421_v18 = vpop.xlane.xlu1 %2420 }
 0x626   : > { %10721 = vrcp.f32 %v2421_v18 }
 0x627   : > { %10723 = vrcp.f32 %v2412_v14 }
 0x628   : > { %10725 = vrcp.f32 %v2418_v7  ;;  %v3165_v7 = vsel %vm1937_vm0, %v3143_v48, 0 }
 0x629   : > { %v2415_v25 = vpop.xlane.xlu1 %2414 }
 0x62a   : > { %10727 = vrcp.f32 %v2415_v25  ;;  %v14282_v25 = vmov 0  }
 0x62d   : > { %v2453_v5 = vpop.permute.xlu1 %2452 }
 0x62e   : > { %9685 = vmatprep.subr.bf16.mxu0 %v2453_v5 }
 0x62f   : > { %9686 = vmatpush3.bf16.msra.mxu0 %v2453_v5 }
 0x630   : > { %v10722_v27 = vpop.eup %10721 }
 0x631   : > { %v3141_v32 = vpop.permute.xlu1 %3140  ;;  %v10724_v56 = vpop.eup %10723  ;;  %v2437_v19 = vmul.f32 %v10722_v27, %v11880_v49 }
 0x632   : > { %9688 = vmatmul.mubr.msk.bf16.vlgmr.msra.gmra.mrb[48].mxu0 %vm2043_vm2, %v2439_v41  ;;  %10106 = vmatprep.subr.msk.bf16.mxu1 %vm1937_vm0, %v3141_v32  ;;  %v3162_v54 = vsel %vm1937_vm0, %v3141_v32, 0  ;;  %v10726_v53 = vpop.eup %10725  ;;  %v2434_v12 = vmul.f32 %v10724_v56, %v11854_v2 }
 0x633   : > { %9766 = vmatpush3.bf16.xpose.msra.mxu1 %v3162_v54  ;;  %v2436_v36 = vmul.f32 %v10726_v53, %v11850_v3 }
 0x634   : > { %v10728_v15 = vpop.eup %10727  ;;  %10107 = vmatprep.subr.msk.bf16.mxu1 %vm1937_vm0, %v3143_v48 }
 0x635   : > { %v2435_v6 = vmul.f32 %v10728_v15, %v11888_v8  ;;  %v2441_v9 = vpack.c.bf16 %v2437_v19, %v2436_v36  ;;  %v3145_v14 = vpop.permute.xlu1 %3144 }
 0x636   : > { %v3168_v3 = vsel %vm1937_vm0, %v3145_v14, 0 }
 0x637   : > { %v2440_v26 = vpack.c.bf16 %v2435_v6, %v2434_v12 }
 0x639   : > { %9691 = vmatprep.mubr.msk.bf16.mxu0 %vm2043_vm2, %v2440_v26  ;;  %v3133_v50 = vpop.permute.xlu1 %3132 }
 0x63a   : > { %9692 = vmatmul.mubr.msk.bf16.gmra.mrb[52].mxu0 %vm2043_vm2, %v2441_v9 }
 0x63b   : > { %9768 = vmatpush3.bf16.xpose.msra.mxu1 %v3165_v7 }
 0x63c   : > { %10108 = vmatprep.subr.msk.bf16.mxu1 %vm1937_vm0, %v3145_v14  ;;  %v2845_v49 = vpop.xlane.xlu0 %2844 }
 0x63d   : > { %v2867_v2 = vsub.f32 %v11897_v52, %v2845_v49  ;;  %v3137_v43 = vpop.permute.xlu1 %3136  ;;  %v10257_v49 = vld [vmem:[%s14283_s2 + $0x10] sm:$0xff]  }
 0x63e   : > { %9695 = vmatprep.subr.bf16.mxu0 %v10257_v49 }
 0x63f   : > { %v2875_v51 = vmul.f32 1.442695, %v2867_v2  ;;  %9696 = vmatpush3.bf16.msra.mxu0 %v10257_v49 }
 0x640   : > { %v2851_v44 = vpop.xlane.xlu0 %2850 }
 0x641   : > { %v2869_v8 = vsub.f32 %v11905_v29, %v2851_v44  ;;  %v10258_v44 = vld [vmem:[%s14283_s2 + $0x18] sm:$0xff]  }
 0x642   : > { %9697 = vmatprep.subr.bf16.mxu0 %v10258_v44 }
 0x643   : > { %v2879_v59 = vmul.f32 1.442695, %v2869_v8  ;;  %9770 = vmatpush3.bf16.xpose.msra.mxu1 %v3168_v3  ;;  %9698 = vmatpush3.bf16.msra.mxu0 %v10258_v44  ;;  %v10259_v8 = vld [vmem:[%s14283_s2] sm:$0xff]  }
 0x644   : > { %v2854_v1 = vpop.xlane.xlu0 %2853  ;;  %9707 = vmatprep.subr.bf16.mxu0 %v10259_v8 }
 0x645   : > { %10729 = vpow2.f32 %v2879_v59  ;;  %v2870_v58 = vsub.f32 %v11913_v30, %v2854_v1 }
 0x646   : > { %10731 = vpow2.f32 %v2875_v51 }
 0x647   : > { %v2881_v13 = vmul.f32 1.442695, %v2870_v58 }
 0x648   : > { %v2857_v46 = vpop.xlane.xlu0 %2856 }
 0x649   : > { %10733 = vpow2.f32 %v2881_v13  ;;  %v2871_v52 = vsub.f32 %v11921_v17, %v2857_v46 }
 0x64a   : > { %9772 = vmatmul.mubr.msk.bf16.vlgmr.msra.gmra.mrb[56].mxu1 %vm1937_vm0, %v3133_v50 }
 0x64b   : > { %9775 = vmatprep.mubr.msk.bf16.mxu1 %vm1937_vm0, %v3135_v55  ;;  %v2883_v48 = vmul.f32 1.442695, %v2871_v52 }
 0x64c   : > { %v2863_v29 = vpop.xlane.xlu0 %2862 }
 0x64d   : > { %v2873_v0 = vsub.f32 %v11928_v34, %v2863_v29 }
 0x64f   : > { %v11980_v35 = vpop.eup %10729  ;;  %v2887_v38 = vmul.f32 1.442695, %v2873_v0 }
 0x650   : > { %v2897_v30 = vsel %vm2043_vm2, %v11980_v35, 0.0  ;;  %v11984_v18 = vpop.eup %10731 }
 0x651   : > { %10735 = vpow2.f32 %v2887_v38  ;;  %2898 = vadd.xlane.f32.xlu0 %v2897_v30  ;;  %v2891_v34 = vsel %vm2043_vm2, %v11984_v18, 0.0 }
 0x652   : > { %9776 = vmatmul.mubr.msk.bf16.gmra.mrb[60].mxu1 %vm1937_vm0, %v3137_v43  ;;  %10737 = vpow2.f32 %v2883_v48 }
 0x653   : > { %v11987_v17 = vpop.eup %10733  ;;  %3823 = vmatprep.mubr.bf16.mxu1 %v14282_v25 }
 0x654   : > { %v2900_v57 = vsel %vm2043_vm2, %v11987_v17, 0.0 }
 0x655   : > { %2892 = vadd.xlane.f32.xlu0 %v2891_v34  ;;  %2901 = vadd.xlane.f32.xlu1 %v2900_v57 }
 0x65b   : > { %v11994_v28 = vpop.eup %10735 }
 0x65c   : > { %v2909_v5 = vsel %vm2043_vm2, %v11994_v28, 0.0  ;;  %v11998_v23 = vpop.eup %10737 }
 0x65d   : > { %2910 = vadd.xlane.f32.xlu0 %v2909_v5  ;;  %v2903_v41 = vsel %vm2043_vm2, %v11998_v23, 0.0 }
 0x661   : > { %2904 = vadd.xlane.f32.xlu0 %v2903_v41  ;;  %v10260_v41 = vld [vmem:[%s14283_s2 + $0x8] sm:$0xff]  }
 0x664   : > { %v12002_v27 = vpop.f32.mrb[40].mxu0 }
 0x665   : > { %v12004_v32 = vpop.f32.mrb[41].mxu0 }
 0x666   : > { %v12006_v56 = vpop.f32.mrb[42].mxu0 }
 0x667   : > { %v2214_v54 = vpack.c.bf16 %v12006_v56, %v12002_v27  ;;  %v12010_v53 = vpop.f32.mrb[43].mxu0 }
 0x668   : > { %v2213_v15 = vpack.c.bf16 %v12010_v53, %v12004_v32 }
 0x66d   : > { %v12014_v19 = vpop.f32.mrb[44].mxu0 }
 0x66e   : > { %v12016_v12 = vpop.f32.mrb[45].mxu0  ;;  %v2848_v6 = vpop.xlane.xlu1 %2847 }
 0x66f   : > { %v12018_v36 = vpop.f32.mrb[46].mxu0  ;;  %v2868_v26 = vsub.f32 %v11937_v62, %v2848_v6 }
 0x670   : > { %v2216_v55 = vpack.c.bf16 %v12018_v36, %v12014_v19  ;;  %v12023_v9 = vpop.f32.mrb[47].mxu0 }
 0x671   : > { %v2877_v7 = vmul.f32 1.442695, %v2868_v26  ;;  %v2215_v14 = vpack.c.bf16 %v12023_v9, %v12016_v12 }
 0x672   : > { %v2860_v3 = vpop.xlane.xlu1 %2859 }
 0x673   : > { %10739 = vpow2.f32 %v2877_v7  ;;  %v2872_v1 = vsub.f32 %v11943_v60, %v2860_v3 }
 0x675   : > { %v2885_v13 = vmul.f32 1.442695, %v2872_v1 }
 0x676   : > { %v2866_v51 = vpop.xlane.xlu1 %2865 }
 0x677   : > { %2935 = vrot.lane.b32.xlu0 %v11589_v42, %s14254_s27  ;;  %v2874_v59 = vsub.f32 %v11948_v10, %v2866_v51 }
 0x679   : > { %v2889_v58 = vmul.f32 1.442695, %v2874_v59 }
 0x67b   : > { %10741 = vpow2.f32 %v2889_v58 }
 0x67c   : > { %10743 = vpow2.f32 %v2885_v13 }
 0x67d   : > { %v12032_v62 = vpop.eup %10739 }
 0x67e   : > { %v2894_v2 = vsel %vm2043_vm2, %v12032_v62, 0.0 }
 0x67f   : > { %2895 = vadd.xlane.f32.xlu1 %v2894_v2 }
 0x685   : > { %v12048_v46 = vpop.eup %10741 }
 0x686   : > { %v2912_v50 = vsel %vm2043_vm2, %v12048_v46, 0.0  ;;  %v12052_v52 = vpop.eup %10743 }
 0x687   : > { %v2906_v29 = vsel %vm2043_vm2, %v12052_v52, 0.0 }
 0x690   : > { %2937 = vrot.lane.b32.xlu1 %v11585_v40, %s14254_s27 }
 0x694   : > { %2939 = vrot.lane.b32.xlu1 %v11624_v20, %s14254_s27 }
 0x6b8   : > { %2913 = vadd.xlane.f32.xlu1 %v2912_v50 }
 0x6bc   : > { %2907 = vadd.xlane.f32.xlu1 %v2906_v29 }
 0x6cd   : > { %2941 = vrot.lane.b32.xlu1 %v11618_v16, %s14254_s27  ;;  %s14289_s27 = sld [smem:[#allocation13_spill]] }
 0x6de   : > { %v12058_v60 = vpop.xlane.xlu0 %2898 }
 0x6e2   : > { %v2893_v10 = vpop.xlane.xlu0 %2892  ;;  %v12062_v5 = vpop.xlane.xlu1 %2901 }
 0x6ea   : > { %v12060_v0 = vpop.xlane.xlu0 %2910 }
 0x6ee   : > { %v12067_v6 = vpop.xlane.xlu0 %2904 }
 0x6f2   : > { %v2936_v51 = vpop.permute.xlu0 %2935 }
 0x705   : > { %v9689_v48 = vpop.f32.mrb[48].mxu0 }
 0x706   : > { %v2504_v38 = vpop.f32.mrb[49].mxu0 }
 0x707   : > { %v9690_v30 = vpop.f32.mrb[50].mxu0 }
 0x708   : > { %v2536_v43 = vpack.c.bf16 %v9690_v30, %v9689_v48  ;;  %v2507_v34 = vpop.f32.mrb[51].mxu0 }
 0x709   : > { %v2535_v57 = vpack.c.bf16 %v2507_v34, %v2504_v38 }
 0x70b   : > { %9699 = vmatprep.mubr.msk.bf16.mxu0 %vm1937_vm0, %v2535_v57 }
 0x70c   : > { %9700 = vmatmul.mubr.msk.bf16.vlgmr.msra.gmra.mrb[56].mxu0 %vm1937_vm0, %v2536_v43  ;;  %v2896_v7 = vpop.xlane.xlu1 %2895 }
 0x70d   : > { %9708 = vmatpush3.bf16.msra.mxu0 %v10259_v8  ;;  %v9693_v26 = vpop.f32.mrb[52].mxu0  ;;  %10745 = vrcp.f32 %v2896_v7 }
 0x70e   : > { %v2520_v49 = vpop.f32.mrb[53].mxu0  ;;  %9709 = vmatprep.subr.bf16.mxu0 %v10260_v41  ;;  %10747 = vrcp.f32 %v2893_v10 }
 0x70f   : > { %v9694_v2 = vpop.f32.mrb[54].mxu0  ;;  %10749 = vrcp.f32 %v12062_v5  ;;  %v10261_v5 = vld [vmem:[%s14283_s2 + $0x20] sm:$0xff]  }
 0x710   : > { %v2538_v44 = vpack.c.bf16 %v9694_v2, %v9693_v26  ;;  %v2523_v3 = vpop.f32.mrb[55].mxu0  ;;  %v2938_v1 = vpop.permute.xlu1 %2937  ;;  %10751 = vrcp.f32 %v12058_v60 }
 0x711   : > { %v2537_v59 = vpack.c.bf16 %v2523_v3, %v2520_v49  ;;  %9710 = vmatpush3.bf16.msra.mxu0 %v10260_v41 }
 0x712   : > { %9735 = vmatprep.subr.bf16.mxu0 %v2936_v51 }
 0x713   : > { %9703 = vmatprep.mubr.msk.bf16.mxu0 %vm1937_vm0, %v2537_v59 }
 0x714   : > { %9704 = vmatmul.mubr.msk.bf16.gmra.mrb[60].mxu0 %vm1937_vm0, %v2538_v44  ;;  %v2940_v56 = vpop.permute.xlu1 %2939 }
 0x715   : > { %9711 = vmatprep.mubr.msk.bf16.mxu0 %vm1937_vm0, %v2213_v15 }
 0x717   : > { %v10746_v8 = vpop.eup %10745 }
 0x718   : > { %v10748_v58 = vpop.eup %10747  ;;  %v2924_v32 = vmul.f32 %v10746_v8, %v12032_v62 }
 0x719   : > { %v2923_v27 = vmul.f32 %v10748_v58, %v11984_v18 }
 0x71b   : > { %v2931_v12 = vpack.c.bf16 %v2924_v32, %v2923_v27 }
 0x71c   : > { %9712 = vmatmul.mubr.msk.bf16.vlgmr.msra.gmra.mrb[56].mxu0 %vm1937_vm0, %v2214_v54 }
 0x71d   : > { %9736 = vmatpush3.bf16.msra.mxu0 %v2936_v51  ;;  %9715 = vmatprep.mubr.msk.bf16.mxu0 %vm1937_vm0, %v2215_v14  ;;  %v9773_v13 = vpop.f32.mrb[56].mxu1 }
 0x71e   : > { %9737 = vmatprep.subr.bf16.mxu0 %v2938_v1  ;;  %v3204_v50 = vpop.f32.mrb[57].mxu1  ;;  %v3237_v53 = vmul.f32 0.17677669, %v9773_v13 }
 0x71f   : > { %v3235_v15 = vmul.f32 0.17677669, %v3204_v50  ;;  %v9774_v29 = vpop.f32.mrb[58].mxu1  ;;  %v10750_v50 = vpop.eup %10749 }
 0x720   : > { %v3207_v10 = vpop.f32.mrb[59].mxu1  ;;  %v3238_v9 = vmul.f32 0.17677669, %v9774_v29  ;;  %v12096_v38 = vadd.f32 %v3237_v53, %v11690_v4  ;;  %v10752_v53 = vpop.eup %10751 }
 0x721   : > { %9738 = vmatpush3.bf16.msra.mxu0 %v2938_v1  ;;  %v3236_v54 = vmul.f32 0.17677669, %v3207_v10  ;;  %v12088_v48 = vadd.f32 %v3235_v15, %v11690_v4  ;;  %v2926_v15 = vmul.f32 %v10750_v50, %v11987_v17  ;;  %v2925_v29 = vmul.f32 %v10752_v53, %v11980_v35 }
 0x722   : > { %9739 = vmatprep.subr.bf16.mxu0 %v2940_v56  ;;  %v12106_v34 = vadd.f32 %v3238_v9, %v11690_v4  ;;  %v3257_v19 = vsel %vm2043_vm2, %v12096_v38, -inf }
 0x723   : > { %v12091_v14 = vadd.f32 %v3236_v54, %v11690_v4  ;;  %v3251_v62 = vsel %vm2043_vm2, %v12088_v48, -inf }
 0x724   : > { %9716 = vmatmul.mubr.msk.bf16.gmra.mrb[60].mxu0 %vm1937_vm0, %v2216_v55  ;;  %3252 = vmax.xlane.f32.xlu0 %v3251_v62  ;;  %v3260_v44 = vsel %vm2043_vm2, %v12106_v34, -inf }
 0x725   : > { %9740 = vmatpush3.bf16.msra.mxu0 %v2940_v56  ;;  %9743 = vmatprep.mubr.msk.bf16.mxu0 %vm2043_vm2, %v2931_v12  ;;  %v9777_v18 = vpop.f32.mrb[60].mxu1  ;;  %v3254_v30 = vsel %vm2043_vm2, %v12091_v14, -inf }
 0x726   : > { %v3220_v43 = vpop.f32.mrb[61].mxu1  ;;  %3255 = vmax.xlane.f32.xlu1 %v3254_v30  ;;  %v3241_v7 = vmul.f32 0.17677669, %v9777_v18 }
 0x727   : > { %v3239_v57 = vmul.f32 0.17677669, %v3220_v43  ;;  %v9778_v41 = vpop.f32.mrb[62].mxu1 }
 0x728   : > { %v3223_v36 = vpop.f32.mrb[63].mxu1  ;;  %3258 = vmax.xlane.f32.xlu0 %v3257_v19  ;;  %v3242_v55 = vmul.f32 0.17677669, %v9778_v41  ;;  %v12124_v59 = vadd.f32 %v3241_v7, %v11690_v4 }
 0x729   : > { %v3240_v26 = vmul.f32 0.17677669, %v3223_v36  ;;  %v12111_v49 = vadd.f32 %v3239_v57, %v11690_v4 }
 0x72a   : > { %v12119_v3 = vadd.f32 %v3242_v55, %v11690_v4  ;;  %v3269_v58 = vsel %vm2043_vm2, %v12124_v59, -inf }
 0x72b   : > { %v12114_v2 = vadd.f32 %v3240_v26, %v11690_v4  ;;  %v3263_v8 = vsel %vm2043_vm2, %v12111_v49, -inf }
 0x72c   : > { %3261 = vmax.xlane.f32.xlu0 %v3260_v44  ;;  %v3272_v1 = vsel %vm2043_vm2, %v12119_v3, -inf }
 0x72d   : > { %v3266_v51 = vsel %vm2043_vm2, %v12114_v2, -inf }
 0x72e   : > { %3267 = vmax.xlane.f32.xlu1 %v3266_v51 }
 0x730   : > { %3264 = vmax.xlane.f32.xlu0 %v3263_v8 }
 0x732   : > { %3273 = vmax.xlane.f32.xlu1 %v3272_v1 }
 0x734   : > { %3270 = vmax.xlane.f32.xlu0 %v3269_v58 }
 0x745   : > { %v2914_v13 = vpop.xlane.xlu1 %2913 }
 0x746   : > { %10753 = vrcp.f32 %v2914_v13 }
 0x747   : > { %10755 = vrcp.f32 %v12067_v6  ;;  %v2932_v6 = vpack.c.bf16 %v2926_v15, %v2925_v29 }
 0x748   : > { %10757 = vrcp.f32 %v12060_v0  ;;  %v10262_v0 = vld [vmem:[%s14283_s2 + $0x28] sm:$0xff]  }
 0x749   : > { %v2908_v32 = vpop.xlane.xlu1 %2907 }
 0x74a   : > { %10759 = vrcp.f32 %v2908_v32  ;;  %3343 = vrot.lane.b32.xlu0 %v11589_v42, %s14252_s29 }
 0x74d   : > { %v2942_v60 = vpop.permute.xlu1 %2941 }
 0x74e   : > { %9741 = vmatprep.subr.bf16.mxu0 %v2942_v60 }
 0x74f   : > { %9742 = vmatpush3.bf16.msra.mxu0 %v2942_v60 }
 0x750   : > { %9751 = vmatprep.subr.bf16.mxu0 %v10261_v5  ;;  %v10754_v10 = vpop.eup %10753 }
 0x751   : > { %v10756_v42 = vpop.eup %10755  ;;  %v2930_v56 = vmul.f32 %v10754_v10, %v12048_v46 }
 0x752   : > { %9744 = vmatmul.mubr.msk.bf16.vlgmr.msra.gmra.mrb[64].mxu0 %vm2043_vm2, %v2932_v6  ;;  %v10758_v17 = vpop.eup %10757  ;;  %v2927_v35 = vmul.f32 %v10756_v42, %v11998_v23 }
 0x753   : > { %9752 = vmatpush3.bf16.msra.mxu0 %v10261_v5  ;;  %v2929_v12 = vmul.f32 %v10758_v17, %v11994_v28 }
 0x754   : > { %v10760_v27 = vpop.eup %10759  ;;  %9753 = vmatprep.subr.bf16.mxu0 %v10262_v0 }
 0x755   : > { %v2928_v54 = vmul.f32 %v10760_v27, %v12052_v52  ;;  %v2934_v62 = vpack.c.bf16 %v2930_v56, %v2929_v12 }
 0x757   : > { %v2933_v9 = vpack.c.bf16 %v2928_v54, %v2927_v35  ;;  %9754 = vmatpush3.bf16.msra.mxu0 %v10262_v0 }
 0x759   : > { %9747 = vmatprep.mubr.msk.bf16.mxu0 %vm2043_vm2, %v2933_v9 }
 0x75a   : > { %9748 = vmatmul.mubr.msk.bf16.gmra.mrb[68].mxu0 %vm2043_vm2, %v2934_v62 }
 0x7b1   : > { %v3253_v18 = vpop.xlane.xlu0 %3252 }
 0x7b2   : > { %v3275_v30 = vsub.f32 %v12088_v48, %v3253_v18 }
 0x7b3   : > { %v3256_v43 = vpop.xlane.xlu1 %3255 }
 0x7b4   : > { %v3283_v41 = vmul.f32 1.442695, %v3275_v30  ;;  %v3276_v23 = vsub.f32 %v12091_v14, %v3256_v43 }
 0x7b5   : > { %v3259_v57 = vpop.xlane.xlu0 %3258 }
 0x7b6   : > { %v3277_v46 = vsub.f32 %v12096_v38, %v3259_v57  ;;  %v3285_v55 = vmul.f32 1.442695, %v3276_v23 }
 0x7b8   : > { %v3287_v52 = vmul.f32 1.442695, %v3277_v46 }
 0x7b9   : > { %v3262_v19 = vpop.xlane.xlu0 %3261 }
 0x7ba   : > { %10761 = vpow2.f32 %v3287_v52  ;;  %v3278_v28 = vsub.f32 %v12106_v34, %v3262_v19 }
 0x7bb   : > { %v3268_v36 = vpop.xlane.xlu1 %3267  ;;  %10763 = vpow2.f32 %v3283_v41 }
 0x7bc   : > { %v3289_v26 = vmul.f32 1.442695, %v3278_v28 }
 0x7bd   : > { %v3265_v7 = vpop.xlane.xlu0 %3264 }
 0x7be   : > { %10765 = vpow2.f32 %v3289_v26  ;;  %v3279_v48 = vsub.f32 %v12111_v49, %v3265_v7  ;;  %v3280_v49 = vsub.f32 %v12114_v2, %v3268_v36 }
 0x7bf   : > { %10767 = vpow2.f32 %v3285_v55  ;;  %v3274_v44 = vpop.xlane.xlu1 %3273 }
 0x7c0   : > { %v3291_v14 = vmul.f32 1.442695, %v3279_v48  ;;  %v3282_v1 = vsub.f32 %v12119_v3, %v3274_v44  ;;  %v3293_v5 = vmul.f32 1.442695, %v3280_v49  ;;  %v10263_v49 = vld [vmem:[%s14283_s2 + $0x30] sm:$0xff]  }
 0x7c1   : > { %v3271_v51 = vpop.xlane.xlu0 %3270 }
 0x7c2   : > { %v3281_v38 = vsub.f32 %v12124_v59, %v3271_v51  ;;  %v3297_v59 = vmul.f32 1.442695, %v3282_v1 }
 0x7c4   : > { %v12159_v8 = vpop.eup %10761  ;;  %v3295_v58 = vmul.f32 1.442695, %v3281_v38 }
 0x7c5   : > { %v3344_v34 = vpop.permute.xlu0 %3343  ;;  %v3305_v13 = vsel %vm2043_vm2, %v12159_v8, 0.0  ;;  %v10764_v50 = vpop.eup %10763 }
 0x7c6   : > { %10769 = vpow2.f32 %v3295_v58  ;;  %3306 = vadd.xlane.f32.xlu0 %v3305_v13  ;;  %9779 = vmatprep.subr.bf16.mxu0 %v3344_v34  ;;  %v3299_v53 = vsel %vm2043_vm2, %v10764_v50, 0.0 }
 0x7c7   : > { %10771 = vpow2.f32 %v3291_v14 }
 0x7c8   : > { %v12164_v32 = vpop.eup %10765  ;;  %10773 = vpow2.f32 %v3297_v59 }
 0x7c9   : > { %v3308_v3 = vsel %vm2043_vm2, %v12164_v32, 0.0  ;;  %v10768_v15 = vpop.eup %10767  ;;  %10775 = vpow2.f32 %v3293_v5  ;;  %v10264_v5 = vld [vmem:[%s14283_s2 + $0x38] sm:$0xff]  }
 0x7ca   : > { %3300 = vadd.xlane.f32.xlu0 %v3299_v53  ;;  %3309 = vadd.xlane.f32.xlu1 %v3308_v3  ;;  %v3302_v60 = vsel %vm2043_vm2, %v10768_v15, 0.0 }
 0x7ce   : > { %3303 = vadd.xlane.f32.xlu1 %v3302_v60 }
 0x7d0   : > { %v12171_v29 = vpop.eup %10769 }
 0x7d1   : > { %v3317_v2 = vsel %vm2043_vm2, %v12171_v29, 0.0  ;;  %v12175_v6 = vpop.eup %10771 }
 0x7d2   : > { %3318 = vadd.xlane.f32.xlu1 %v3317_v2  ;;  %v3311_v0 = vsel %vm2043_vm2, %v12175_v6, 0.0  ;;  %v12179_v10 = vpop.eup %10773 }
 0x7d3   : > { %v3320_v42 = vsel %vm2043_vm2, %v12179_v10, 0.0  ;;  %v10776_v17 = vpop.eup %10775 }
 0x7d4   : > { %v3314_v27 = vsel %vm2043_vm2, %v10776_v17, 0.0 }
 0x7d6   : > { %3312 = vadd.xlane.f32.xlu1 %v3311_v0 }
 0x7da   : > { %3321 = vadd.xlane.f32.xlu1 %v3320_v42 }
 0x7de   : > { %3315 = vadd.xlane.f32.xlu1 %v3314_v27 }
 0x7e0   : > { %3347 = vrot.lane.b32.xlu0 %v11624_v20, %s14252_s29 }
 0x7e4   : > { %3349 = vrot.lane.b32.xlu0 %v11618_v16, %s14252_s29 }
 0x7ef   : > { %3345 = vrot.lane.b32.xlu1 %v11585_v40, %s14252_s29  ;;  %s750_s29 = scalar_lea.vmem %s14289_s27, %s14292_s26 }
 0x825   : > { %v9745_v56 = vpop.f32.mrb[64].mxu0 }
 0x826   : > { %v2993_v35 = vpop.f32.mrb[65].mxu0 }
 0x827   : > { %v9746_v54 = vpop.f32.mrb[66].mxu0 }
 0x828   : > { %v3025_v12 = vpack.c.bf16 %v9746_v54, %v9745_v56  ;;  %v2996_v9 = vpop.f32.mrb[67].mxu0 }
 0x829   : > { %v3024_v62 = vpack.c.bf16 %v2996_v9, %v2993_v35 }
 0x82b   : > { %9755 = vmatprep.mubr.msk.bf16.mxu0 %vm1937_vm0, %v3024_v62 }
 0x82c   : > { %9756 = vmatmul.mubr.msk.bf16.vlgmr.msra.gmra.mrb[56].mxu0 %vm1937_vm0, %v3025_v12 }
 0x82d   : > { %9780 = vmatpush3.bf16.msra.mxu0 %v3344_v34  ;;  %v9749_v18 = vpop.f32.mrb[68].mxu0 }
 0x82e   : > { %v3009_v30 = vpop.f32.mrb[69].mxu0 }
 0x82f   : > { %v9750_v20 = vpop.f32.mrb[70].mxu0 }
 0x830   : > { %v3027_v43 = vpack.c.bf16 %v9750_v20, %v9749_v18  ;;  %v3012_v57 = vpop.f32.mrb[71].mxu0  ;;  %v8732_v20 = vld [vmem:[%s14225_s9] ss:$0 sm:$0xff] }
 0x831   : > { %v3026_v16 = vpack.c.bf16 %v3012_v57, %v3009_v30 }
 0x833   : > { %9759 = vmatprep.mubr.msk.bf16.mxu0 %vm1937_vm0, %v3026_v16 }
 0x834   : > { %9760 = vmatmul.mubr.msk.bf16.gmra.mrb[60].mxu0 %vm1937_vm0, %v3027_v43 }
 0x853   : > { %v3307_v40 = vpop.xlane.xlu0 %3306 }
 0x857   : > { %v3310_v46 = vpop.xlane.xlu1 %3309  ;;  %v3301_v41 = vpop.xlane.xlu0 %3300 }
 0x858   : > { %10777 = vrcp.f32 %v3301_v41 }
 0x85b   : > { %v3304_v23 = vpop.xlane.xlu1 %3303  ;;  %v3348_v51 = vpop.permute.xlu0 %3347 }
 0x85c   : > { %10779 = vrcp.f32 %v3304_v23 }
 0x85d   : > { %10781 = vrcp.f32 %v3310_v46 }
 0x85e   : > { %10783 = vrcp.f32 %v3307_v40 }
 0x85f   : > { %v3319_v52 = vpop.xlane.xlu1 %3318  ;;  %v3350_v34 = vpop.permute.xlu0 %3349 }
 0x862   : > { %v10778_v28 = vpop.eup %10777 }
 0x863   : > { %v3313_v19 = vpop.xlane.xlu1 %3312  ;;  %v3331_v26 = vmul.f32 %v10778_v28, %v10764_v50 }
 0x864   : > { %10785 = vrcp.f32 %v3313_v19 }
 0x866   : > { %v10780_v36 = vpop.eup %10779 }
 0x867   : > { %v3322_v55 = vpop.xlane.xlu1 %3321  ;;  %v3332_v7 = vmul.f32 %v10780_v36, %v10768_v15  ;;  %v10782_v14 = vpop.eup %10781 }
 0x868   : > { %v10784_v1 = vpop.eup %10783  ;;  %v3334_v50 = vmul.f32 %v10782_v14, %v12164_v32 }
 0x869   : > { %v3339_v48 = vpack.c.bf16 %v3332_v7, %v3331_v26  ;;  %v3333_v53 = vmul.f32 %v10784_v1, %v12159_v8 }
 0x86b   : > { %v3316_v44 = vpop.xlane.xlu1 %3315  ;;  %9787 = vmatprep.mubr.msk.bf16.mxu0 %vm2043_vm2, %v3339_v48  ;;  %v3340_v15 = vpack.c.bf16 %v3334_v50, %v3333_v53 }
 0x86c   : > { %10787 = vrcp.f32 %v3316_v44 }
 0x86d   : > { %10789 = vrcp.f32 %v3322_v55 }
 0x86e   : > { %10791 = vrcp.f32 %v3319_v52  ;;  %v10786_v58 = vpop.eup %10785 }
 0x86f   : > { %v3346_v38 = vpop.permute.xlu1 %3345  ;;  %v3335_v3 = vmul.f32 %v10786_v58, %v12175_v6 }
 0x870   : > { %9781 = vmatprep.subr.bf16.mxu0 %v3346_v38 }
 0x871   : > { %9782 = vmatpush3.bf16.msra.mxu0 %v3346_v38 }
 0x872   : > { %9783 = vmatprep.subr.bf16.mxu0 %v3348_v51 }
 0x875   : > { %9784 = vmatpush3.bf16.msra.mxu0 %v3348_v51 }
 0x876   : > { %v10788_v13 = vpop.eup %10787  ;;  %9785 = vmatprep.subr.bf16.mxu0 %v3350_v34 }
 0x877   : > { %v3336_v59 = vmul.f32 %v10788_v13, %v10776_v17  ;;  %v10790_v60 = vpop.eup %10789 }
 0x878   : > { %v10792_v32 = vpop.eup %10791  ;;  %v3338_v0 = vmul.f32 %v10790_v60, %v12179_v10 }
 0x879   : > { %9786 = vmatpush3.bf16.msra.mxu0 %v3350_v34  ;;  %v3341_v2 = vpack.c.bf16 %v3336_v59, %v3335_v3  ;;  %v3337_v8 = vmul.f32 %v10792_v32, %v12171_v29 }
 0x87a   : > { %9795 = vmatprep.subr.bf16.mxu0 %v10263_v49 }
 0x87b   : > { %v3342_v6 = vpack.c.bf16 %v3338_v0, %v3337_v8 }
 0x87c   : > { %9788 = vmatmul.mubr.msk.bf16.vlgmr.msra.gmra.mrb[72].mxu0 %vm2043_vm2, %v3340_v15 }
 0x87d   : > { %9791 = vmatprep.mubr.msk.bf16.mxu0 %vm2043_vm2, %v3341_v2  ;;  %9796 = vmatpush3.bf16.msra.mxu0 %v10263_v49 }
 0x87e   : > { %9797 = vmatprep.subr.bf16.mxu0 %v10264_v5 }
 0x881   : > { %9798 = vmatpush3.bf16.msra.mxu0 %v10264_v5 }
 0x884   : > { %9792 = vmatmul.mubr.msk.bf16.gmra.mrb[76].mxu0 %vm2043_vm2, %v3342_v6 }
 0x94f   : > { %v9789_v42 = vpop.f32.mrb[72].mxu0 }
 0x950   : > { %v3401_v17 = vpop.f32.mrb[73].mxu0 }
 0x951   : > { %v9790_v27 = vpop.f32.mrb[74].mxu0 }
 0x952   : > { %v3433_v56 = vpack.c.bf16 %v9790_v27, %v9789_v42  ;;  %v3404_v35 = vpop.f32.mrb[75].mxu0 }
 0x953   : > { %v3432_v54 = vpack.c.bf16 %v3404_v35, %v3401_v17 }
 0x955   : > { %9799 = vmatprep.mubr.msk.bf16.mxu0 %vm1937_vm0, %v3432_v54 }
 0x956   : > { %9800 = vmatmul.mubr.msk.bf16.vlgmr.msra.gmra.mrb[56].mxu0 %vm1937_vm0, %v3433_v56 }
 0x957   : > { %v9793_v12 = vpop.f32.mrb[76].mxu0 }
 0x958   : > { %v3417_v9 = vpop.f32.mrb[77].mxu0 }
 0x959   : > { %v9794_v10 = vpop.f32.mrb[78].mxu0 }
 0x95a   : > { %v3435_v62 = vpack.c.bf16 %v9794_v10, %v9793_v12  ;;  %v3420_v18 = vpop.f32.mrb[79].mxu0 }
 0x95b   : > { %v3434_v29 = vpack.c.bf16 %v3420_v18, %v3417_v9 }
 0x95d   : > { %9803 = vmatprep.mubr.msk.bf16.mxu0 %vm1937_vm0, %v3434_v29 }
 0x95e   : > { %9804 = vmatmul.mubr.msk.bf16.gmra.mrb[60].mxu0 %vm1937_vm0, %v3435_v62 }
 0xa29   : > { %v9801_v30 = vpop.f32.mrb[56].mxu0 }
 0xa2a   : > { %v3499_v43 = vpop.f32.mrb[57].mxu0  ;;  %v3540_v46 = vadd.f32 %v9801_v30, %v11391_v31 }
 0xa2b   : > { %v3538_v57 = vadd.f32 %v3499_v43, %v11385_v21  ;;  %v9802_v16 = vpop.f32.mrb[58].mxu0 }
 0xa2c   : > { %v3502_v40 = vpop.f32.mrb[59].mxu0  ;;  %v12224_v19 = vadd.f32 %v8732_v20, %v3540_v46  ;;  %v3541_v28 = vadd.f32 %v9802_v16, %v11393_v33  ;;  %v10271_v16 = vld [vmem:[%s14228_s12 + $0x20] ss:$8 sps:$4 sm:$0xff]   ;;  %v10274_v46 = vld [vmem:[%s14228_s12 + $0x30] ss:$8 sps:$4 sm:$0xff]  }
 0xa2d   : > { %v12218_v41 = vadd.f32 %v8732_v20, %v3538_v57  ;;  %v3539_v23 = vadd.f32 %v3502_v40, %v11387_v24  ;;  %v10273_v57 = vld [vmem:[%s14228_s12 + $0x24] ss:$8 sps:$4 sm:$0xff]   ;;  %v10276_v40 = vld [vmem:[%s14228_s12 + $0x34] ss:$8 sps:$4 sm:$0xff]  }
 0xa2e   : > { %v12229_v26 = vadd.f32 %v8732_v20, %v3541_v28  ;;  %v10277_v28 = vld [vmem:[%s14228_s12 + $0x40] ss:$8 sps:$4 sm:$0xff]  }
 0xa2f   : > { %v12221_v52 = vadd.f32 %v8732_v20, %v3539_v23  ;;  %3561 = vadd.xlane.f32.xlu0 %v12218_v41  ;;  %v10279_v23 = vld [vmem:[%s14228_s12 + $0x44] ss:$8 sps:$4 sm:$0xff]  }
 0xa31   : > { %3563 = vadd.xlane.f32.xlu1 %v12221_v52  ;;  %v9805_v36 = vpop.f32.mrb[60].mxu0 }
 0xa32   : > { %v3515_v21 = vpop.f32.mrb[61].mxu0  ;;  %v3544_v33 = vadd.f32 %v9805_v36, %v11403_v45  ;;  %v10270_v45 = vld [vmem:[%s14228_s12 + $0x14] ss:$8 sps:$4 sm:$0xff]  }
 0xa33   : > { %3565 = vadd.xlane.f32.xlu0 %v12224_v19  ;;  %v9806_v55 = vpop.f32.mrb[62].mxu0  ;;  %v3542_v24 = vadd.f32 %v3515_v21, %v11397_v37  ;;  %v10265_v37 = vld [vmem:[%s14228_s12] ss:$8 sps:$4 sm:$0xff]   ;;  %v10282_v36 = vld [vmem:[%s14228_s12 + $0x54] ss:$8 sps:$4 sm:$0xff]  }
 0xa34   : > { %v3518_v31 = vpop.f32.mrb[63].mxu0  ;;  %v3545_v48 = vadd.f32 %v9806_v55, %v11405_v47  ;;  %v12244_v14 = vadd.f32 %v8732_v20, %v3544_v33  ;;  %v10268_v47 = vld [vmem:[%s14228_s12 + $0x10] ss:$8 sps:$4 sm:$0xff]   ;;  %v10285_v55 = vld [vmem:[%s14228_s12 + $0x64] ss:$8 sps:$4 sm:$0xff]  }
 0xa35   : > { %v3543_v7 = vadd.f32 %v3518_v31, %v11399_v39  ;;  %v12238_v51 = vadd.f32 %v8732_v20, %v3542_v24  ;;  %v10267_v39 = vld [vmem:[%s14228_s12 + $0x4] ss:$8 sps:$4 sm:$0xff]   ;;  %v10280_v21 = vld [vmem:[%s14228_s12 + $0x50] ss:$8 sps:$4 sm:$0xff]   ;;  %v10283_v31 = vld [vmem:[%s14228_s12 + $0x60] ss:$8 sps:$4 sm:$0xff]  }
 0xa36   : > { %v12241_v38 = vadd.f32 %v8732_v20, %v3545_v48  ;;  %3791 = vmatprep.subr.bf16.mxu1 %v10267_v39  ;;  %v10286_v24 = vld [vmem:[%s14228_s12 + $0x70] ss:$8 sps:$4 sm:$0xff]  }
 0xa37   : > { %v12234_v44 = vadd.f32 %v8732_v20, %v3543_v7  ;;  %3567 = vadd.xlane.f32.xlu0 %v12229_v26  ;;  %3792 = vmatpush1.bf16.msra.mxu1 %v10265_v37  ;;  %v10288_v7 = vld [vmem:[%s14228_s12 + $0x74] ss:$8 sps:$4 sm:$0xff]  }
 0xa38   : > { %3793 = vmatprep.subr.bf16.mxu1 %v10270_v45 }
 0xa39   : > { %3571 = vadd.xlane.f32.xlu1 %v12234_v44 }
 0xa3b   : > { %3569 = vadd.xlane.f32.xlu0 %v12238_v51  ;;  %3794 = vmatpush1.bf16.msra.mxu1 %v10268_v47 }
 0xa3c   : > { %3795 = vmatprep.subr.bf16.mxu1 %v10273_v57 }
 0xa3d   : > { %3575 = vadd.xlane.f32.xlu1 %v12241_v38 }
 0xa3f   : > { %3573 = vadd.xlane.f32.xlu0 %v12244_v14  ;;  %3796 = vmatpush1.bf16.msra.mxu1 %v10271_v16  ;;  %v8734_v16 = vld [vmem:[%s14227_s11] ss:$0 sm:$0xff] }
 0xa40   : > { %3797 = vmatprep.subr.bf16.mxu1 %v10276_v40 }
 0xa43   : > { %3798 = vmatpush1.bf16.msra.mxu1 %v10274_v46 }
 0xa44   : > { %3799 = vmatprep.subr.bf16.mxu1 %v10279_v23 }
 0xa47   : > { %3800 = vmatpush1.bf16.msra.mxu1 %v10277_v28 }
 0xa48   : > { %3801 = vmatprep.subr.bf16.mxu1 %v10282_v36 }
 0xa4b   : > { %3802 = vmatpush1.bf16.msra.mxu1 %v10280_v21 }
 0xa4c   : > { %3803 = vmatprep.subr.bf16.mxu1 %v10285_v55 }
 0xa4f   : > { %3804 = vmatpush1.bf16.msra.mxu1 %v10283_v31 }
 0xa50   : > { %3805 = vmatprep.subr.bf16.mxu1 %v10288_v7 }
 0xa53   : > { %3806 = vmatpush1.bf16.msra.mxu1 %v10286_v24 }
 0xabc   : > { %v3562_v1 = vpop.xlane.xlu0 %3561 }
 0xabd   : > { %v3577_v58 = vmul.f32 0.0078125, %v3562_v1 }
 0xabe   : > { %v3564_v34 = vpop.xlane.xlu1 %3563 }
 0xabf   : > { %v12261_v13 = vsub.f32 %v12218_v41, %v3577_v58  ;;  %v3578_v50 = vmul.f32 0.0078125, %v3564_v34 }
 0xac0   : > { %v3566_v49 = vpop.xlane.xlu0 %3565 }
 0xac1   : > { %v12264_v59 = vsub.f32 %v12221_v52, %v3578_v50  ;;  %v3579_v53 = vmul.f32 0.0078125, %v3566_v49  ;;  %v3593_v3 = vmul.f32 %v12261_v13, %v12261_v13 }
 0xac3   : > { %v12269_v15 = vsub.f32 %v12224_v19, %v3579_v53  ;;  %3601 = vadd.xlane.f32.xlu0 %v3593_v3  ;;  %v3594_v5 = vmul.f32 %v12264_v59, %v12264_v59 }
 0xac4   : > { %v3568_v60 = vpop.xlane.xlu0 %3567 }
 0xac5   : > { %v3580_v2 = vmul.f32 0.0078125, %v3568_v60  ;;  %3603 = vadd.xlane.f32.xlu1 %v3594_v5  ;;  %v3595_v32 = vmul.f32 %v12269_v15, %v12269_v15 }
 0xac6   : > { %v3572_v0 = vpop.xlane.xlu1 %3571 }
 0xac7   : > { %v12276_v8 = vsub.f32 %v12229_v26, %v3580_v2  ;;  %v3582_v6 = vmul.f32 0.0078125, %v3572_v0  ;;  %3605 = vadd.xlane.f32.xlu0 %v3595_v32  ;;  %v8733_v0 = vld [vmem:[%s14226_s10] ss:$0 sm:$0xff] }
 0xac8   : > { %v3570_v42 = vpop.xlane.xlu0 %3569 }
 0xac9   : > { %v12279_v17 = vsub.f32 %v12234_v44, %v3582_v6  ;;  %v3581_v27 = vmul.f32 0.0078125, %v3570_v42  ;;  %v3596_v56 = vmul.f32 %v12276_v8, %v12276_v8 }
 0xaca   : > { %v3576_v35 = vpop.xlane.xlu1 %3575 }
 0xacb   : > { %v12284_v54 = vsub.f32 %v12238_v51, %v3581_v27  ;;  %v3584_v12 = vmul.f32 0.0078125, %v3576_v35  ;;  %3607 = vadd.xlane.f32.xlu1 %v3596_v56  ;;  %v3598_v29 = vmul.f32 %v12279_v17, %v12279_v17 }
 0xacc   : > { %v3574_v9 = vpop.xlane.xlu0 %3573 }
 0xacd   : > { %v12287_v10 = vsub.f32 %v12241_v38, %v3584_v12  ;;  %v3583_v62 = vmul.f32 0.0078125, %v3574_v9  ;;  %v3597_v18 = vmul.f32 %v12284_v54, %v12284_v54 }
 0xacf   : > { %v12294_v30 = vsub.f32 %v12244_v14, %v3583_v62  ;;  %3609 = vadd.xlane.f32.xlu0 %v3597_v18  ;;  %3611 = vadd.xlane.f32.xlu1 %v3598_v29  ;;  %v3600_v43 = vmul.f32 %v12287_v10, %v12287_v10 }
 0xad1   : > { %v3599_v20 = vmul.f32 %v12294_v30, %v12294_v30 }
 0xad3   : > { %3613 = vadd.xlane.f32.xlu0 %v3599_v20  ;;  %3615 = vadd.xlane.f32.xlu1 %v3600_v43 }
 0xb50   : > { %v3602_v48 = vpop.xlane.xlu0 %3601 }
 0xb51   : > { %v3617_v33 = vmul.f32 0.0078125, %v3602_v48 }
 0xb52   : > { %v3604_v37 = vpop.xlane.xlu1 %3603 }
 0xb53   : > { %v3625_v39 = vadd.f32 1e-06, %v3617_v33  ;;  %v3618_v45 = vmul.f32 0.0078125, %v3604_v37 }
 0xb54   : > { %v3606_v47 = vpop.xlane.xlu0 %3605 }
 0xb55   : > { %10793 = vrsqrt.f32 %v3625_v39  ;;  %v3626_v1 = vadd.f32 1e-06, %v3618_v45  ;;  %v3619_v58 = vmul.f32 0.0078125, %v3606_v47 }
 0xb57   : > { %10795 = vrsqrt.f32 %v3626_v1  ;;  %v3627_v34 = vadd.f32 1e-06, %v3619_v58 }
 0xb58   : > { %v3608_v50 = vpop.xlane.xlu1 %3607 }
 0xb59   : > { %10797 = vrsqrt.f32 %v3627_v34  ;;  %v3620_v49 = vmul.f32 0.0078125, %v3608_v50 }
 0xb5b   : > { %v3628_v53 = vadd.f32 1e-06, %v3620_v49 }
 0xb5c   : > { %v3610_v3 = vpop.xlane.xlu0 %3609  ;;  %v3612_v5 = vpop.xlane.xlu1 %3611 }
 0xb5d   : > { %10799 = vrsqrt.f32 %v3628_v53  ;;  %v3621_v60 = vmul.f32 0.0078125, %v3610_v3  ;;  %v3622_v2 = vmul.f32 0.0078125, %v3612_v5 }
 0xb5f   : > { %v10794_v32 = vpop.eup %10793  ;;  %v3629_v6 = vadd.f32 1e-06, %v3621_v60  ;;  %v3630_v42 = vadd.f32 1e-06, %v3622_v2  ;;  %v10289_v60 = vld [vmem:[%s14230_s14 + $0x40] sm:$0xff]   ;;  %v10292_v2 = vld [vmem:[%s14230_s14 + $0x8] sm:$0xff]  }
 0xb60   : > { %v3641_v27 = vmul.f32 %v10794_v32, %v12261_v13  ;;  %v3614_v56 = vpop.xlane.xlu0 %3613  ;;  %v3616_v35 = vpop.xlane.xlu1 %3615  ;;  %9396 = vmatprep.subr.bf16.mxu0 %v10289_v60  ;;  %v10293_v32 = vld [vmem:[%s14230_s14 + $0x50] sm:$0xff]  }
 0xb61   : > { %v10796_v12 = vpop.eup %10795  ;;  %10801 = vrsqrt.f32 %v3629_v6  ;;  %v3623_v9 = vmul.f32 0.0078125, %v3614_v56  ;;  %v3624_v62 = vmul.f32 0.0078125, %v3616_v35  ;;  %v10295_v6 = vld [vmem:[%s14230_s14 + $0x58] sm:$0xff]   ;;  %v10298_v56 = vld [vmem:[%s14230_s14 + $0x20] sm:$0xff]   ;;  %v10299_v35 = vld [vmem:[%s14230_s14 + $0x68] sm:$0xff]  }
 0xb62   : > { %v3656_v18 = vmul.f32 %v8733_v0, %v3641_v27  ;;  %v3642_v29 = vmul.f32 %v10796_v12, %v12264_v59  ;;  %10803 = vrsqrt.f32 %v3630_v42  ;;  %v10296_v42 = vld [vmem:[%s14230_s14 + $0x18] sm:$0xff]   ;;  %v10297_v27 = vld [vmem:[%s14230_s14 + $0x60] sm:$0xff]   ;;  %v10300_v12 = vld [vmem:[%s14230_s14 + $0x28] sm:$0xff]  }
 0xb63   : > { %v10798_v20 = vpop.eup %10797  ;;  %v3631_v43 = vadd.f32 1e-06, %v3623_v9  ;;  %v3632_v57 = vadd.f32 1e-06, %v3624_v62  ;;  %v10301_v9 = vld [vmem:[%s14230_s14 + $0x70] sm:$0xff]  }
 0xb64   : > { %v3657_v40 = vmul.f32 %v8733_v0, %v3642_v29  ;;  %v3671_v13 = vadd.f32 %v8734_v16, %v3656_v18  ;;  %v3643_v23 = vmul.f32 %v10798_v20, %v12269_v15  ;;  %v10302_v62 = vld [vmem:[%s14230_s14 + $0x30] sm:$0xff]   ;;  %v10303_v18 = vld [vmem:[%s14230_s14 + $0x78] sm:$0xff]   ;;  %v3699_v20 = vld [vmem:[%s14229_s13] sm:$0x3] }
 0xb65   : > { %10805 = vrsqrt.f32 %v3631_v43  ;;  %v10304_v29 = vld [vmem:[%s14230_s14 + $0x38] sm:$0xff]   ;;  %v12406_v43 = vrot.slane %v3699_v20, %v11543_v22 }
 0xb66   : > { %v3672_v46 = vadd.f32 %v8734_v16, %v3657_v40  ;;  %10807 = vrsqrt.f32 %v3632_v57  ;;  %v3658_v59 = vmul.f32 %v8733_v0, %v3643_v23  ;;  %v12409_v57 = vrot.slane %v3699_v20, %v11549_v63 }
 0xb67   : > { %v10800_v28 = vpop.eup %10799 }
 0xb68   : > { %v3679_v36 = vpack.c.bf16 %v3672_v46, %v3671_v13  ;;  %v3644_v21 = vmul.f32 %v10800_v28, %v12276_v8  ;;  %v3673_v37 = vadd.f32 %v8734_v16, %v3658_v59 }
 0xb6a   : > { %3824 = vmatmul.mubr.bf16.vlgmr.msra.gmra.mrb[64].mxu1 %v3679_v36  ;;  %v3659_v55 = vmul.f32 %v8733_v0, %v3644_v21 }
 0xb6b   : > { %v10802_v31 = vpop.eup %10801  ;;  %3833 = vmatprep.mubr.bf16.mxu1 %v14282_v25 }
 0xb6c   : > { %v10804_v24 = vpop.eup %10803  ;;  %v3674_v7 = vadd.f32 %v8734_v16, %v3659_v55  ;;  %v3645_v48 = vmul.f32 %v10802_v31, %v12284_v54 }
 0xb6d   : > { %v3646_v33 = vmul.f32 %v10804_v24, %v12279_v17 }
 0xb6e   : > { %v3680_v15 = vpack.c.bf16 %v3674_v7, %v3673_v37  ;;  %v3660_v45 = vmul.f32 %v8733_v0, %v3645_v48 }
 0xb6f   : > { %v10806_v39 = vpop.eup %10805  ;;  %v3661_v47 = vmul.f32 %v8733_v0, %v3646_v33 }
 0xb70   : > { %v10808_v1 = vpop.eup %10807  ;;  %v3675_v8 = vadd.f32 %v8734_v16, %v3660_v45  ;;  %v3647_v34 = vmul.f32 %v10806_v39, %v12294_v30  ;;  %v10291_v30 = vld [vmem:[%s14230_s14 + $0x48] sm:$0xff]  }
 0xb71   : > { %v3676_v58 = vadd.f32 %v8734_v16, %v3661_v47  ;;  %v3648_v50 = vmul.f32 %v10808_v1, %v12287_v10  ;;  %v10290_v10 = vld [vmem:[%s14230_s14] sm:$0xff]  }
 0xb72   : > { %3834 = vmatmul.mubr.bf16.gmra.mrb[68].mxu1 %v3680_v15  ;;  %v3662_v53 = vmul.f32 %v8733_v0, %v3647_v34  ;;  %9397 = vmatpush3.bf16.msra.mxu0 %v10290_v10 }
 0xb73   : > { %3843 = vmatprep.mubr.bf16.mxu1 %v14282_v25  ;;  %v3681_v49 = vpack.c.bf16 %v3676_v58, %v3675_v8  ;;  %v3663_v54 = vmul.f32 %v8733_v0, %v3648_v50  ;;  %9398 = vmatprep.subr.bf16.mxu0 %v10291_v30  ;;  %v10294_v0 = vld [vmem:[%s14230_s14 + $0x10] sm:$0xff]  }
 0xb74   : > { %v3677_v17 = vadd.f32 %v8734_v16, %v3662_v53 }
 0xb75   : > { %v3678_v3 = vadd.f32 %v8734_v16, %v3663_v54 }
 0xb76   : > { %9399 = vmatpush3.bf16.msra.mxu0 %v10292_v2 }
 0xb77   : > { %v3682_v5 = vpack.c.bf16 %v3678_v3, %v3677_v17  ;;  %9400 = vmatprep.subr.bf16.mxu0 %v10293_v32 }
 0xb7a   : > { %3844 = vmatmul.mubr.bf16.gmra.mrb[72].mxu1 %v3681_v49  ;;  %9401 = vmatpush3.bf16.msra.mxu0 %v10294_v0 }
 0xb7b   : > { %3853 = vmatprep.mubr.bf16.mxu1 %v14282_v25  ;;  %9402 = vmatprep.subr.bf16.mxu0 %v10295_v6 }
 0xb7e   : > { %9403 = vmatpush3.bf16.msra.mxu0 %v10296_v42 }
 0xb7f   : > { %9404 = vmatprep.subr.bf16.mxu0 %v10297_v27 }
 0xb82   : > { %3854 = vmatmul.mubr.bf16.gmra.mrb[76].mxu1 %v3682_v5  ;;  %9405 = vmatpush3.bf16.msra.mxu0 %v10298_v56 }
 0xb83   : > { %4559 = vmatprep.mubr.bf16.mxu1 %v14282_v25  ;;  %9406 = vmatprep.subr.bf16.mxu0 %v10299_v35 }
 0xb86   : > { %9407 = vmatpush3.bf16.msra.mxu0 %v10300_v12 }
 0xb87   : > { %9408 = vmatprep.subr.bf16.mxu0 %v10301_v9 }
 0xb8a   : > { %9409 = vmatpush3.bf16.msra.mxu0 %v10302_v62 }
 0xb8b   : > { %9410 = vmatprep.subr.bf16.mxu0 %v10303_v18 }
 0xb8e   : > { %9411 = vmatpush3.bf16.msra.mxu0 %v10304_v29 }
 0xc3d   : > { %v3825_v16 = vpop.f32.mrb[64].mxu1 }
 0xc3e   : > { %v12412_v40 = vadd.f32 %v3825_v16, %v12406_v43  ;;  %v3827_v13 = vpop.f32.mrb[65].mxu1 }
 0xc3f   : > { %v12415_v46 = vadd.f32 %v3827_v13, %v12409_v57  ;;  %v3829_v23 = vpop.f32.mrb[66].mxu1 }
 0xc40   : > { %v3864_v28 = vmul.f32 %v12412_v40, %v12412_v40  ;;  %v12420_v36 = vadd.f32 %v3829_v23, %v12406_v43  ;;  %v3831_v21 = vpop.f32.mrb[67].mxu1 }
 0xc41   : > { %v3865_v59 = vmul.f32 %v12415_v46, %v12415_v46  ;;  %v12425_v55 = vadd.f32 %v3831_v21, %v12409_v57 }
 0xc42   : > { %v3880_v31 = vmul.f32 %v3864_v28, %v12412_v40  ;;  %v3866_v24 = vmul.f32 %v12420_v36, %v12420_v36 }
 0xc43   : > { %v3881_v7 = vmul.f32 %v3865_v59, %v12415_v46  ;;  %v3867_v48 = vmul.f32 %v12425_v55, %v12425_v55 }
 0xc44   : > { %v3896_v33 = vmul.f32 0.044715, %v3880_v31  ;;  %v3882_v37 = vmul.f32 %v3866_v24, %v12420_v36 }
 0xc45   : > { %v3897_v39 = vmul.f32 0.044715, %v3881_v7  ;;  %v3883_v15 = vmul.f32 %v3867_v48, %v12425_v55  ;;  %v3835_v45 = vpop.f32.mrb[68].mxu1 }
 0xc46   : > { %v3912_v47 = vadd.f32 %v3896_v33, %v12412_v40  ;;  %v3898_v1 = vmul.f32 0.044715, %v3882_v37  ;;  %v12437_v8 = vadd.f32 %v3835_v45, %v12406_v43  ;;  %v3837_v58 = vpop.f32.mrb[69].mxu1 }
 0xc47   : > { %v3913_v34 = vadd.f32 %v3897_v39, %v12415_v46  ;;  %v3899_v50 = vmul.f32 0.044715, %v3883_v15  ;;  %v12441_v49 = vadd.f32 %v3837_v58, %v12409_v57  ;;  %v3839_v53 = vpop.f32.mrb[70].mxu1 }
 0xc48   : > { %v3928_v54 = vmul.f32 0.7978846, %v3912_v47  ;;  %v3914_v17 = vadd.f32 %v3898_v1, %v12420_v36  ;;  %v3868_v3 = vmul.f32 %v12437_v8, %v12437_v8  ;;  %v12447_v5 = vadd.f32 %v3839_v53, %v12406_v43  ;;  %v3841_v60 = vpop.f32.mrb[71].mxu1 }
 0xc49   : > { %v3929_v10 = vmul.f32 0.7978846, %v3913_v34  ;;  %v3915_v30 = vadd.f32 %v3899_v50, %v12425_v55  ;;  %v3869_v2 = vmul.f32 %v12441_v49, %v12441_v49  ;;  %v12453_v32 = vadd.f32 %v3841_v60, %v12409_v57 }
 0xc4a   : > { %10809 = vtanh.f32 %v3928_v54  ;;  %v3930_v0 = vmul.f32 0.7978846, %v3914_v17  ;;  %v3884_v6 = vmul.f32 %v3868_v3, %v12437_v8  ;;  %v3870_v42 = vmul.f32 %v12447_v5, %v12447_v5 }
 0xc4b   : > { %10811 = vtanh.f32 %v3929_v10  ;;  %v3931_v27 = vmul.f32 0.7978846, %v3915_v30  ;;  %v3885_v56 = vmul.f32 %v3869_v2, %v12441_v49  ;;  %v3871_v35 = vmul.f32 %v12453_v32, %v12453_v32 }
 0xc4c   : > { %10813 = vtanh.f32 %v3930_v0  ;;  %v3900_v12 = vmul.f32 0.044715, %v3884_v6  ;;  %v3886_v9 = vmul.f32 %v3870_v42, %v12447_v5 }
 0xc4d   : > { %v3901_v62 = vmul.f32 0.044715, %v3885_v56  ;;  %v3887_v18 = vmul.f32 %v3871_v35, %v12453_v32  ;;  %v3845_v29 = vpop.f32.mrb[72].mxu1  ;;  %10815 = vtanh.f32 %v3931_v27 }
 0xc4e   : > { %v3916_v20 = vadd.f32 %v3900_v12, %v12437_v8  ;;  %v3902_v16 = vmul.f32 0.044715, %v3886_v9  ;;  %v12465_v13 = vadd.f32 %v3845_v29, %v12406_v43  ;;  %v3847_v23 = vpop.f32.mrb[73].mxu1 }
 0xc4f   : > { %v3917_v28 = vadd.f32 %v3901_v62, %v12441_v49  ;;  %v3903_v21 = vmul.f32 0.044715, %v3887_v18  ;;  %v12469_v59 = vadd.f32 %v3847_v23, %v12409_v57  ;;  %v3849_v31 = vpop.f32.mrb[74].mxu1 }
 0xc50   : > { %v3932_v24 = vmul.f32 0.7978846, %v3916_v20  ;;  %v3918_v7 = vadd.f32 %v3902_v16, %v12447_v5  ;;  %v3872_v48 = vmul.f32 %v12465_v13, %v12465_v13  ;;  %v12475_v33 = vadd.f32 %v3849_v31, %v12406_v43  ;;  %v3851_v37 = vpop.f32.mrb[75].mxu1 }
 0xc51   : > { %v3933_v39 = vmul.f32 0.7978846, %v3917_v28  ;;  %v3919_v15 = vadd.f32 %v3903_v21, %v12453_v32  ;;  %v3873_v45 = vmul.f32 %v12469_v59, %v12469_v59  ;;  %v12481_v47 = vadd.f32 %v3851_v37, %v12409_v57 }
 0xc52   : > { %10817 = vtanh.f32 %v3932_v24  ;;  %v3934_v1 = vmul.f32 0.7978846, %v3918_v7  ;;  %v3888_v58 = vmul.f32 %v3872_v48, %v12465_v13  ;;  %v3874_v34 = vmul.f32 %v12475_v33, %v12475_v33 }
 0xc53   : > { %10819 = vtanh.f32 %v3933_v39  ;;  %v3935_v50 = vmul.f32 0.7978846, %v3919_v15  ;;  %v3889_v53 = vmul.f32 %v3873_v45, %v12469_v59  ;;  %v3875_v54 = vmul.f32 %v12481_v47, %v12481_v47 }
 0xc54   : > { %v10810_v17 = vpop.eup %10809  ;;  %10821 = vtanh.f32 %v3934_v1  ;;  %v3904_v3 = vmul.f32 0.044715, %v3888_v58  ;;  %v3890_v60 = vmul.f32 %v3874_v34, %v12475_v33 }
 0xc55   : > { %v10812_v10 = vpop.eup %10811  ;;  %v3960_v30 = vadd.f32 1.0, %v10810_v17  ;;  %10823 = vtanh.f32 %v3935_v50  ;;  %v3905_v2 = vmul.f32 0.044715, %v3889_v53  ;;  %v3891_v0 = vmul.f32 %v3875_v54, %v12481_v47  ;;  %v3855_v6 = vpop.f32.mrb[76].mxu1 }
 0xc56   : > { %v10814_v42 = vpop.eup %10813  ;;  %v3920_v27 = vadd.f32 %v3904_v3, %v12465_v13  ;;  %v3906_v56 = vmul.f32 0.044715, %v3890_v60  ;;  %v12493_v35 = vadd.f32 %v3855_v6, %v12406_v43  ;;  %v3857_v12 = vpop.f32.mrb[77].mxu1  ;;  %v3961_v9 = vadd.f32 1.0, %v10812_v10 }
 0xc57   : > { %v3976_v62 = vmul.f32 0.5, %v3960_v30  ;;  %v3962_v18 = vadd.f32 1.0, %v10814_v42  ;;  %v3921_v29 = vadd.f32 %v3905_v2, %v12469_v59  ;;  %v3907_v20 = vmul.f32 0.044715, %v3891_v0  ;;  %v3859_v16 = vpop.f32.mrb[78].mxu1  ;;  %v10816_v7 = vpop.eup %10815 }
 0xc58   : > { %v3936_v23 = vmul.f32 0.7978846, %v3920_v27  ;;  %v3922_v28 = vadd.f32 %v3906_v56, %v12475_v33  ;;  %v3876_v21 = vmul.f32 %v12493_v35, %v12493_v35  ;;  %v12500_v31 = vadd.f32 %v3857_v12, %v12409_v57  ;;  %v3861_v24 = vpop.f32.mrb[79].mxu1 }
 0xc59   : > { %v3992_v48 = vmul.f32 %v3976_v62, %v12412_v40  ;;  %v3978_v37 = vmul.f32 0.5, %v3962_v18  ;;  %v3937_v39 = vmul.f32 0.7978846, %v3921_v29  ;;  %v3923_v15 = vadd.f32 %v3907_v20, %v12481_v47 }
 0xc5a   : > { %10825 = vtanh.f32 %v3936_v23  ;;  %v3938_v45 = vmul.f32 0.7978846, %v3922_v28  ;;  %v3892_v1 = vmul.f32 %v3876_v21, %v12493_v35  ;;  %v3877_v58 = vmul.f32 %v12500_v31, %v12500_v31 }
 0xc5b   : > { %v3994_v34 = vmul.f32 %v3978_v37, %v12420_v36  ;;  %10827 = vtanh.f32 %v3937_v39  ;;  %v3939_v50 = vmul.f32 0.7978846, %v3923_v15  ;;  %v12509_v53 = vadd.f32 %v3859_v16, %v12406_v43 }
 0xc5c   : > { %v10818_v54 = vpop.eup %10817  ;;  %10829 = vtanh.f32 %v3938_v45  ;;  %v3908_v40 = vmul.f32 0.044715, %v3892_v1  ;;  %v3893_v17 = vmul.f32 %v3877_v58, %v12500_v31  ;;  %v12513_v3 = vadd.f32 %v3861_v24, %v12409_v57 }
 0xc5d   : > { %v10820_v60 = vpop.eup %10819  ;;  %v4008_v10 = vpack.c.bf16 %v3994_v34, %v3992_v48  ;;  %10831 = vtanh.f32 %v3939_v50  ;;  %v3878_v30 = vmul.f32 %v12509_v53, %v12509_v53  ;;  %v3963_v36 = vadd.f32 1.0, %v10816_v7 }
 0xc5e   : > { %v10822_v2 = vpop.eup %10821  ;;  %v3924_v0 = vadd.f32 %v3908_v40, %v12493_v35  ;;  %v3909_v43 = vmul.f32 0.044715, %v3893_v17  ;;  %v3879_v6 = vmul.f32 %v12513_v3, %v12513_v3  ;;  %v3977_v42 = vmul.f32 0.5, %v3961_v9 }
 0xc5f   : > { %v10824_v27 = vpop.eup %10823  ;;  %v3894_v56 = vmul.f32 %v3878_v30, %v12509_v53  ;;  %v3979_v57 = vmul.f32 0.5, %v3963_v36  ;;  %v3965_v12 = vadd.f32 1.0, %v10820_v60  ;;  %v3964_v62 = vadd.f32 1.0, %v10818_v54 }
 0xc60   : > { %v3940_v18 = vmul.f32 0.7978846, %v3924_v0  ;;  %v3925_v29 = vadd.f32 %v3909_v43, %v12500_v31  ;;  %v3895_v20 = vmul.f32 %v3879_v6, %v12513_v3  ;;  %v3993_v16 = vmul.f32 %v3977_v42, %v12415_v46 }
 0xc61   : > { %v3910_v23 = vmul.f32 0.044715, %v3894_v56  ;;  %v3995_v28 = vmul.f32 %v3979_v57, %v12425_v55  ;;  %v3967_v21 = vadd.f32 1.0, %v10824_v27  ;;  %v3981_v24 = vmul.f32 0.5, %v3965_v12 }
 0xc62   : > { %10833 = vtanh.f32 %v3940_v18  ;;  %v3941_v9 = vmul.f32 0.7978846, %v3925_v29  ;;  %v3911_v7 = vmul.f32 0.044715, %v3895_v20  ;;  %v3966_v48 = vadd.f32 1.0, %v10822_v2 }
 0xc63   : > { %v3926_v37 = vadd.f32 %v3910_v23, %v12509_v53  ;;  %v4009_v39 = vpack.c.bf16 %v3995_v28, %v3993_v16  ;;  %v3983_v15 = vmul.f32 0.5, %v3967_v21  ;;  %v3980_v58 = vmul.f32 0.5, %v3964_v62 }
 0xc64   : > { %v10826_v45 = vpop.eup %10825  ;;  %10835 = vtanh.f32 %v3941_v9  ;;  %v3927_v1 = vadd.f32 %v3911_v7, %v12513_v3  ;;  %v3982_v34 = vmul.f32 0.5, %v3966_v48  ;;  %v3997_v55 = vmul.f32 %v3981_v24, %v12441_v49 }
 0xc65   : > { %v10828_v46 = vpop.eup %10827  ;;  %v3942_v50 = vmul.f32 0.7978846, %v3926_v37  ;;  %4183 = vmatprep.mubr.bf16.mxu0 %v4009_v39  ;;  %v3999_v54 = vmul.f32 %v3983_v15, %v12453_v32  ;;  %v3968_v40 = vadd.f32 1.0, %v10826_v45  ;;  %v3996_v30 = vmul.f32 %v3980_v58, %v12437_v8  ;;  %v8751_v58 = vld [vmem:[%s14231_s15] ss:$0 sm:$0xff] }
 0xc66   : > { %v10830_v17 = vpop.eup %10829  ;;  %v3943_v60 = vmul.f32 0.7978846, %v3927_v1  ;;  %4184 = vmatmul.mubr.bf16.vlgmr.msra.gmra.mrb[80].mxu0 %v4008_v10  ;;  %v3998_v36 = vmul.f32 %v3982_v34, %v12447_v5  ;;  %v3969_v2 = vadd.f32 1.0, %v10828_v46 }
 0xc67   : > { %v10832_v0 = vpop.eup %10831  ;;  %10837 = vtanh.f32 %v3942_v50  ;;  %v4011_v43 = vpack.c.bf16 %v3999_v54, %v3997_v55  ;;  %v3970_v6 = vadd.f32 1.0, %v10830_v17  ;;  %v3984_v42 = vmul.f32 0.5, %v3968_v40 }
 0xc68   : > { %10839 = vtanh.f32 %v3943_v60  ;;  %v4010_v27 = vpack.c.bf16 %v3998_v36, %v3996_v30  ;;  %v3971_v56 = vadd.f32 1.0, %v10832_v0  ;;  %v3985_v49 = vmul.f32 0.5, %v3969_v2 }
 0xc69   : > { %4191 = vmatprep.mubr.bf16.mxu0 %v4011_v43  ;;  %v3986_v32 = vmul.f32 0.5, %v3970_v6  ;;  %v4000_v12 = vmul.f32 %v3984_v42, %v12465_v13 }
 0xc6a   : > { %v3987_v57 = vmul.f32 0.5, %v3971_v56  ;;  %v4001_v5 = vmul.f32 %v3985_v49, %v12469_v59 }
 0xc6b   : > { %v4002_v10 = vmul.f32 %v3986_v32, %v12475_v33 }
 0xc6c   : > { %v10834_v8 = vpop.eup %10833  ;;  %v4003_v62 = vmul.f32 %v3987_v57, %v12481_v47 }
 0xc6d   : > { %v4012_v18 = vpack.c.bf16 %v4002_v10, %v4000_v12  ;;  %v3972_v16 = vadd.f32 1.0, %v10834_v8 }
 0xc6e   : > { %v10836_v29 = vpop.eup %10835  ;;  %4192 = vmatmul.mubr.bf16.gmra.mrb[84].mxu0 %v4010_v27  ;;  %v4013_v20 = vpack.c.bf16 %v4003_v62, %v4001_v5 }
 0xc6f   : > { %v3973_v23 = vadd.f32 1.0, %v10836_v29  ;;  %v3988_v9 = vmul.f32 0.5, %v3972_v16 }
 0xc70   : > { %4199 = vmatprep.mubr.bf16.mxu0 %v4013_v20 }
 0xc71   : > { %v10838_v28 = vpop.eup %10837  ;;  %v3989_v13 = vmul.f32 0.5, %v3973_v23  ;;  %v4004_v59 = vmul.f32 %v3988_v9, %v12493_v35 }
 0xc72   : > { %v10840_v21 = vpop.eup %10839  ;;  %v3974_v24 = vadd.f32 1.0, %v10838_v28  ;;  %v10307_v28 = vld [vmem:[%s14277_s7 + $0xc4] ss:$12 sps:$4 sm:$0xff]  }
 0xc73   : > { %v3975_v7 = vadd.f32 1.0, %v10840_v21  ;;  %v4005_v37 = vmul.f32 %v3989_v13, %v12500_v31  ;;  %4527 = vmatprep.subr.bf16.mxu1 %v10307_v28  ;;  %v10333_v28 = vld [vmem:[%s14277_s7 + $0x16c] ss:$12 sps:$4 sm:$0xff]  }
 0xc74   : > { %v3990_v48 = vmul.f32 0.5, %v3974_v24 }
 0xc75   : > { %v3991_v33 = vmul.f32 0.5, %v3975_v7 }
 0xc76   : > { %4200 = vmatmul.mubr.bf16.gmra.mrb[88].mxu0 %v4012_v18  ;;  %v4006_v47 = vmul.f32 %v3990_v48, %v12509_v53 }
 0xc77   : > { %v4007_v39 = vmul.f32 %v3991_v33, %v12513_v3 }
 0xc78   : > { %v4014_v15 = vpack.c.bf16 %v4006_v47, %v4004_v59 }
 0xc79   : > { %v4015_v45 = vpack.c.bf16 %v4007_v39, %v4005_v37 }
 0xc7b   : > { %4207 = vmatprep.mubr.bf16.mxu0 %v4015_v45 }
 0xc7e   : > { %4208 = vmatmul.mubr.bf16.gmra.mrb[92].mxu0 %v4014_v15 }
 0xd39   : > { %v9412_v1 = vpop.f32.mrb[80].mxu0 }
 0xd3a   : > { %v9413_v34 = vpop.f32.mrb[81].mxu0 }
 0xd3b   : > { %v9414_v46 = vadd.f32 %v9413_v34, %v9412_v1  ;;  %v9415_v50 = vpop.f32.mrb[82].mxu0 }
 0xd3c   : > { %v9416_v55 = vpop.f32.mrb[83].mxu0 }
 0xd3d   : > { %v4186_v35 = vadd.f32 %v9414_v46, %v8751_v58  ;;  %v9417_v54 = vadd.f32 %v9416_v55, %v9415_v50 }
 0xd3f   : > { %v4189_v53 = vadd.f32 %v9417_v54, %v8751_v58  ;;  %v12543_v31 = vadd.f32 %v4186_v35, %v12218_v41 }
 0xd41   : > { %4224 = vadd.xlane.f32.xlu0 %v12543_v31  ;;  %v9418_v3 = vpop.f32.mrb[84].mxu0  ;;  %v12547_v40 = vadd.f32 %v4189_v53, %v12221_v52 }
 0xd42   : > { %v9419_v17 = vpop.f32.mrb[85].mxu0 }
 0xd43   : > { %v9420_v60 = vadd.f32 %v9419_v17, %v9418_v3  ;;  %4226 = vadd.xlane.f32.xlu1 %v12547_v40  ;;  %v9421_v30 = vpop.f32.mrb[86].mxu0  ;;  %v10313_v17 = vld [vmem:[%s14277_s7 + $0xf4] ss:$12 sps:$4 sm:$0xff]  }
 0xd44   : > { %v9422_v36 = vpop.f32.mrb[87].mxu0 }
 0xd45   : > { %v4194_v2 = vadd.f32 %v9420_v60, %v8751_v58  ;;  %v9423_v0 = vadd.f32 %v9422_v36, %v9421_v30  ;;  %v10314_v60 = vld [vmem:[%s14277_s7 + $0xc8] ss:$12 sps:$4 sm:$0xff]   ;;  %v10311_v30 = vld [vmem:[%s14277_s7 + $0xf0] ss:$12 sps:$4 sm:$0xff]  }
 0xd46   : > { %9807 = vmatprep.subr.bf16.mxu0 %v10314_v60 }
 0xd47   : > { %v4197_v43 = vadd.f32 %v9423_v0, %v8751_v58  ;;  %v12551_v6 = vadd.f32 %v4194_v2, %v12224_v19  ;;  %9808 = vmatpush3.bf16.msra.mxu0 %v10314_v60 }
 0xd49   : > { %4228 = vadd.xlane.f32.xlu0 %v12551_v6  ;;  %v9424_v41 = vpop.f32.mrb[88].mxu0  ;;  %v12555_v42 = vadd.f32 %v4197_v43, %v12229_v26  ;;  %v10317_v43 = vld [vmem:[%s14277_s7 + $0x10c] ss:$12 sps:$4 sm:$0xff]  }
 0xd4a   : > { %v9425_v52 = vpop.f32.mrb[89].mxu0 }
 0xd4b   : > { %v9426_v27 = vadd.f32 %v9425_v52, %v9424_v41  ;;  %4230 = vadd.xlane.f32.xlu1 %v12555_v42  ;;  %v9427_v56 = vpop.f32.mrb[90].mxu0  ;;  %v10318_v41 = vld [vmem:[%s14277_s7 + $0xe0] ss:$12 sps:$4 sm:$0xff]  }
 0xd4c   : > { %v9428_v49 = vpop.f32.mrb[91].mxu0  ;;  %9809 = vmatprep.subr.bf16.mxu0 %v10318_v41 }
 0xd4d   : > { %v4202_v32 = vadd.f32 %v9426_v27, %v8751_v58  ;;  %v9429_v57 = vadd.f32 %v9428_v49, %v9427_v56  ;;  %v10315_v27 = vld [vmem:[%s14277_s7 + $0x108] ss:$12 sps:$4 sm:$0xff]   ;;  %9810 = vmatpush3.bf16.msra.mxu0 %v10318_v41 }
 0xd4f   : > { %v4205_v12 = vadd.f32 %v9429_v57, %v8751_v58  ;;  %v12559_v10 = vadd.f32 %v4202_v32, %v12238_v51 }
 0xd51   : > { %4232 = vadd.xlane.f32.xlu0 %v12559_v10  ;;  %v9430_v19 = vpop.f32.mrb[92].mxu0  ;;  %v12563_v8 = vadd.f32 %v4205_v12, %v12234_v44  ;;  %v10305_v44 = vld [vmem:[%s14277_s7 + $0xc0] ss:$12 sps:$4 sm:$0xff]   ;;  %v10321_v12 = vld [vmem:[%s14277_s7 + $0x124] ss:$12 sps:$4 sm:$0xff]  }
 0xd52   : > { %v9431_v26 = vpop.f32.mrb[93].mxu0  ;;  %4528 = vmatpush1.bf16.msra.mxu1 %v10305_v44  ;;  %v10327_v44 = vld [vmem:[%s14277_s7 + $0x150] ss:$12 sps:$4 sm:$0xff]  }
 0xd53   : > { %v9432_v5 = vadd.f32 %v9431_v26, %v9430_v19  ;;  %4234 = vadd.xlane.f32.xlu1 %v12563_v8  ;;  %v9433_v62 = vpop.f32.mrb[94].mxu0  ;;  %v10322_v19 = vld [vmem:[%s14277_s7 + $0xf8] ss:$12 sps:$4 sm:$0xff]   ;;  %v10319_v26 = vld [vmem:[%s14277_s7 + $0x120] ss:$12 sps:$4 sm:$0xff]  }
 0xd54   : > { %v9434_v18 = vpop.f32.mrb[95].mxu0  ;;  %9811 = vmatprep.subr.bf16.mxu0 %v10322_v19 }
 0xd55   : > { %v4210_v29 = vadd.f32 %v9432_v5, %v8751_v58  ;;  %v9435_v20 = vadd.f32 %v9434_v18, %v9433_v62  ;;  %9812 = vmatpush3.bf16.msra.mxu0 %v10322_v19  ;;  %v10325_v62 = vld [vmem:[%s14277_s7 + $0x13c] ss:$12 sps:$4 sm:$0xff]  }
 0xd56   : > { %v10326_v18 = vld [vmem:[%s14277_s7 + $0x110] ss:$12 sps:$4 sm:$0xff]  }
 0xd57   : > { %v4213_v16 = vadd.f32 %v9435_v20, %v8751_v58  ;;  %v12567_v23 = vadd.f32 %v4210_v29, %v12244_v14  ;;  %v10310_v14 = vld [vmem:[%s14277_s7 + $0xdc] ss:$12 sps:$4 sm:$0xff]   ;;  %v10323_v29 = vld [vmem:[%s14277_s7 + $0x138] ss:$12 sps:$4 sm:$0xff]   ;;  %9813 = vmatprep.subr.bf16.mxu0 %v10326_v18  ;;  %v10329_v20 = vld [vmem:[%s14277_s7 + $0x154] ss:$12 sps:$4 sm:$0xff]  }
 0xd58   : > { %4529 = vmatprep.subr.bf16.mxu1 %v10310_v14  ;;  %v10334_v14 = vld [vmem:[%s14277_s7 + $0x140] ss:$12 sps:$4 sm:$0xff]  }
 0xd59   : > { %4236 = vadd.xlane.f32.xlu0 %v12567_v23  ;;  %v12571_v51 = vadd.f32 %v4213_v16, %v12241_v38  ;;  %v10308_v38 = vld [vmem:[%s14277_s7 + $0xd8] ss:$12 sps:$4 sm:$0xff]   ;;  %9814 = vmatpush3.bf16.msra.mxu0 %v10326_v18  ;;  %v10330_v16 = vld [vmem:[%s14277_s7 + $0x128] ss:$12 sps:$4 sm:$0xff]  }
 0xd5a   : > { %4530 = vmatpush1.bf16.msra.mxu1 %v10308_v38  ;;  %9815 = vmatprep.subr.bf16.mxu0 %v10330_v16  ;;  %v10331_v38 = vld [vmem:[%s14277_s7 + $0x168] ss:$12 sps:$4 sm:$0xff]  }
 0xd5b   : > { %4238 = vadd.xlane.f32.xlu1 %v12571_v51  ;;  %4531 = vmatprep.subr.bf16.mxu1 %v10313_v17 }
 0xd5d   : > { %9816 = vmatpush3.bf16.msra.mxu0 %v10330_v16 }
 0xd5e   : > { %4532 = vmatpush1.bf16.msra.mxu1 %v10311_v30  ;;  %9817 = vmatprep.subr.bf16.mxu0 %v10334_v14 }
 0xd5f   : > { %4533 = vmatprep.subr.bf16.mxu1 %v10317_v43 }
 0xd61   : > { %9818 = vmatpush3.bf16.msra.mxu0 %v10334_v14 }
 0xd62   : > { %4534 = vmatpush1.bf16.msra.mxu1 %v10315_v27 }
 0xd63   : > { %4535 = vmatprep.subr.bf16.mxu1 %v10321_v12 }
 0xd66   : > { %4536 = vmatpush1.bf16.msra.mxu1 %v10319_v26 }
 0xd67   : > { %4537 = vmatprep.subr.bf16.mxu1 %v10325_v62 }
 0xd6a   : > { %4538 = vmatpush1.bf16.msra.mxu1 %v10323_v29 }
 0xd6b   : > { %4539 = vmatprep.subr.bf16.mxu1 %v10329_v20 }
 0xd6e   : > { %4540 = vmatpush1.bf16.msra.mxu1 %v10327_v44 }
 0xd6f   : > { %4541 = vmatprep.subr.bf16.mxu1 %v10333_v28 }
 0xd72   : > { %4542 = vmatpush1.bf16.msra.mxu1 %v10331_v38 }
 0xdce   : > { %v4225_v21 = vpop.xlane.xlu0 %4224 }
 0xdcf   : > { %v4240_v24 = vmul.f32 0.0078125, %v4225_v21  ;;  %v10335_v21 = vld [vmem:[%s14277_s7 + $0x158] ss:$12 sps:$4 sm:$0xff]  }
 0xdd0   : > { %v4227_v9 = vpop.xlane.xlu1 %4226  ;;  %9819 = vmatprep.subr.bf16.mxu0 %v10335_v21 }
 0xdd1   : > { %v12587_v7 = vsub.f32 %v12543_v31, %v4240_v24  ;;  %v4241_v13 = vmul.f32 0.0078125, %v4227_v9  ;;  %9820 = vmatpush3.bf16.msra.mxu0 %v10335_v21  ;;  %v10336_v24 = vld [vmem:[%s14277_s7 + $0x170] ss:$12 sps:$4 sm:$0xff]  }
 0xdd2   : > { %9821 = vmatprep.subr.bf16.mxu0 %v10336_v24 }
 0xdd3   : > { %v12590_v48 = vsub.f32 %v12547_v40, %v4241_v13  ;;  %v4256_v33 = vmul.f32 %v12587_v7, %v12587_v7 }
 0xdd5   : > { %4264 = vadd.xlane.f32.xlu0 %v4256_v33  ;;  %v4257_v59 = vmul.f32 %v12590_v48, %v12590_v48  ;;  %9822 = vmatpush3.bf16.msra.mxu0 %v10336_v24 }
 0xdd6   : > { %v4229_v47 = vpop.xlane.xlu0 %4228 }
 0xdd7   : > { %v4242_v37 = vmul.f32 0.0078125, %v4229_v47  ;;  %4266 = vadd.xlane.f32.xlu1 %v4257_v59 }
 0xdd8   : > { %v4231_v39 = vpop.xlane.xlu1 %4230 }
 0xdd9   : > { %v12597_v15 = vsub.f32 %v12551_v6, %v4242_v37  ;;  %v4243_v45 = vmul.f32 0.0078125, %v4231_v39 }
 0xddb   : > { %v12600_v1 = vsub.f32 %v12555_v42, %v4243_v45  ;;  %v4258_v58 = vmul.f32 %v12597_v15, %v12597_v15 }
 0xddd   : > { %4268 = vadd.xlane.f32.xlu0 %v4258_v58  ;;  %v4259_v34 = vmul.f32 %v12600_v1, %v12600_v1 }
 0xdde   : > { %v4233_v46 = vpop.xlane.xlu0 %4232 }
 0xddf   : > { %v4244_v50 = vmul.f32 0.0078125, %v4233_v46  ;;  %4270 = vadd.xlane.f32.xlu1 %v4259_v34 }
 0xde0   : > { %v4235_v55 = vpop.xlane.xlu1 %4234 }
 0xde1   : > { %v12607_v35 = vsub.f32 %v12559_v10, %v4244_v50  ;;  %v4245_v54 = vmul.f32 0.0078125, %v4235_v55 }
 0xde3   : > { %v12610_v53 = vsub.f32 %v12563_v8, %v4245_v54  ;;  %v4260_v3 = vmul.f32 %v12607_v35, %v12607_v35  ;;  %v8769_v54 = vld [vmem:[%s14278_s28 + $0x1] ss:$0 sm:$0xff] }
 0xde5   : > { %4272 = vadd.xlane.f32.xlu0 %v4260_v3  ;;  %v4261_v36 = vmul.f32 %v12610_v53, %v12610_v53 }
 0xde6   : > { %v4237_v2 = vpop.xlane.xlu0 %4236 }
 0xde7   : > { %v4246_v0 = vmul.f32 0.0078125, %v4237_v2  ;;  %4274 = vadd.xlane.f32.xlu1 %v4261_v36 }
 0xde8   : > { %v4239_v52 = vpop.xlane.xlu1 %4238 }
 0xde9   : > { %v12635_v56 = vsub.f32 %v12567_v23, %v4246_v0  ;;  %v4247_v49 = vmul.f32 0.0078125, %v4239_v52  ;;  %v8771_v52 = vld [vmem:[%s14279_s3 + $0x1] ss:$0 sm:$0xff] }
 0xdeb   : > { %v12638_v32 = vsub.f32 %v12571_v51, %v4247_v49  ;;  %v4262_v57 = vmul.f32 %v12635_v56, %v12635_v56 }
 0xded   : > { %4276 = vadd.xlane.f32.xlu0 %v4262_v57  ;;  %v4263_v5 = vmul.f32 %v12638_v32, %v12638_v32 }
 0xdef   : > { %4278 = vadd.xlane.f32.xlu1 %v4263_v5 }
 0xe62   : > { %v4265_v9 = vpop.xlane.xlu0 %4264 }
 0xe63   : > { %v4280_v13 = vmul.f32 0.0078125, %v4265_v9 }
 0xe64   : > { %v4267_v33 = vpop.xlane.xlu1 %4266 }
 0xe65   : > { %v4288_v59 = vadd.f32 1e-06, %v4280_v13  ;;  %v4281_v47 = vmul.f32 0.0078125, %v4267_v33 }
 0xe67   : > { %10841 = vrsqrt.f32 %v4288_v59  ;;  %v4289_v37 = vadd.f32 1e-06, %v4281_v47 }
 0xe69   : > { %10843 = vrsqrt.f32 %v4289_v37 }
 0xe6a   : > { %v4269_v39 = vpop.xlane.xlu0 %4268 }
 0xe6b   : > { %v4282_v45 = vmul.f32 0.0078125, %v4269_v39 }
 0xe6c   : > { %v4271_v58 = vpop.xlane.xlu1 %4270 }
 0xe6d   : > { %v4290_v34 = vadd.f32 1e-06, %v4282_v45  ;;  %v4283_v46 = vmul.f32 0.0078125, %v4271_v58 }
 0xe6f   : > { %10845 = vrsqrt.f32 %v4290_v34  ;;  %v4291_v50 = vadd.f32 1e-06, %v4283_v46 }
 0xe71   : > { %v10842_v55 = vpop.eup %10841  ;;  %10847 = vrsqrt.f32 %v4291_v50 }
 0xe72   : > { %v4304_v3 = vmul.f32 %v10842_v55, %v12587_v7  ;;  %v4273_v17 = vpop.xlane.xlu0 %4272 }
 0xe73   : > { %v10844_v60 = vpop.eup %10843  ;;  %v4284_v30 = vmul.f32 0.0078125, %v4273_v17  ;;  %v8804_v17 = vld [vmem:[%s14280_s8 + $0x3] sm:$0x7] }
 0xe74   : > { %v4320_v36 = vmul.f32 %v8769_v54, %v4304_v3  ;;  %v4305_v2 = vmul.f32 %v10844_v60, %v12590_v48  ;;  %v4275_v0 = vpop.xlane.xlu1 %4274 }
 0xe75   : > { %v4292_v43 = vadd.f32 1e-06, %v4284_v30  ;;  %v4285_v41 = vmul.f32 0.0078125, %v4275_v0  ;;  %v12710_v30 = vrot.slane %v8804_v17, %v11549_v63 }
 0xe76   : > { %v4321_v27 = vmul.f32 %v8769_v54, %v4305_v2  ;;  %v4336_v57 = vadd.f32 %v8771_v52, %v4320_v36 }
 0xe77   : > { %10849 = vrsqrt.f32 %v4292_v43  ;;  %v4293_v49 = vadd.f32 1e-06, %v4285_v41 }
 0xe78   : > { %v4337_v12 = vadd.f32 %v8771_v52, %v4321_v27 }
 0xe79   : > { %v10846_v19 = vpop.eup %10845  ;;  %10851 = vrsqrt.f32 %v4293_v49  ;;  %v12723_v49 = vrot.slane %v8804_v17, %v11560_v11 }
 0xe7a   : > { %v4277_v7 = vpop.xlane.xlu0 %4276  ;;  %v4344_v26 = vpack.c.bf16 %v4337_v12, %v4336_v57  ;;  %v4306_v5 = vmul.f32 %v10846_v19, %v12597_v15 }
 0xe7b   : > { %v10848_v62 = vpop.eup %10847  ;;  %v4286_v48 = vmul.f32 0.0078125, %v4277_v7 }
 0xe7c   : > { %4560 = vmatmul.mubr.bf16.vlgmr.msra.gmra.mrb[80].mxu1 %v4344_v26  ;;  %9823 = vmatprep.mubr.bf16.mxu0 %v4344_v26  ;;  %v4279_v18 = vpop.xlane.xlu1 %4278  ;;  %v4307_v29 = vmul.f32 %v10848_v62, %v12600_v1  ;;  %v4322_v20 = vmul.f32 %v8769_v54, %v4306_v5 }
 0xe7d   : > { %v4294_v16 = vadd.f32 1e-06, %v4286_v48  ;;  %v4287_v44 = vmul.f32 0.0078125, %v4279_v18  ;;  %4569 = vmatprep.mubr.bf16.mxu1 %v14282_v25 }
 0xe7e   : > { %v4323_v28 = vmul.f32 %v8769_v54, %v4307_v29  ;;  %v4338_v38 = vadd.f32 %v8771_v52, %v4322_v20 }
 0xe7f   : > { %10853 = vrsqrt.f32 %v4294_v16  ;;  %v4295_v14 = vadd.f32 1e-06, %v4287_v44 }
 0xe80   : > { %v4339_v21 = vadd.f32 %v8771_v52, %v4323_v28 }
 0xe81   : > { %v10850_v24 = vpop.eup %10849  ;;  %10855 = vrsqrt.f32 %v4295_v14 }
 0xe82   : > { %v4345_v15 = vpack.c.bf16 %v4339_v21, %v4338_v38  ;;  %v4308_v9 = vmul.f32 %v10850_v24, %v12607_v35 }
 0xe83   : > { %v10852_v13 = vpop.eup %10851 }
 0xe84   : > { %4570 = vmatmul.mubr.bf16.gmra.mrb[84].mxu1 %v4345_v15  ;;  %9824 = vmatmul.mubr.bf16.vlgmr.msra.gmra.mrb[96].mxu0 %v4345_v15  ;;  %v4309_v1 = vmul.f32 %v10852_v13, %v12610_v53  ;;  %v4324_v33 = vmul.f32 %v8769_v54, %v4308_v9 }
 0xe85   : > { %4579 = vmatprep.mubr.bf16.mxu1 %v14282_v25 }
 0xe86   : > { %v4325_v59 = vmul.f32 %v8769_v54, %v4309_v1  ;;  %v4340_v47 = vadd.f32 %v8771_v52, %v4324_v33 }
 0xe88   : > { %v4341_v37 = vadd.f32 %v8771_v52, %v4325_v59 }
 0xe89   : > { %v10854_v39 = vpop.eup %10853 }
 0xe8a   : > { %v4346_v45 = vpack.c.bf16 %v4341_v37, %v4340_v47  ;;  %v4310_v58 = vmul.f32 %v10854_v39, %v12635_v56  ;;  %v12707_v56 = vrot.slane %v8804_v17, %v11543_v22 }
 0xe8b   : > { %v10856_v34 = vpop.eup %10855 }
 0xe8c   : > { %4580 = vmatmul.mubr.bf16.gmra.mrb[88].mxu1 %v4346_v45  ;;  %9827 = vmatprep.mubr.bf16.mxu0 %v4346_v45  ;;  %v4311_v35 = vmul.f32 %v10856_v34, %v12638_v32  ;;  %v4326_v46 = vmul.f32 %v8769_v54, %v4310_v58 }
 0xe8d   : > { %4589 = vmatprep.mubr.bf16.mxu1 %v14282_v25 }
 0xe8e   : > { %v4327_v50 = vmul.f32 %v8769_v54, %v4311_v35  ;;  %v4342_v53 = vadd.f32 %v8771_v52, %v4326_v46 }
 0xe90   : > { %v4343_v55 = vadd.f32 %v8771_v52, %v4327_v50 }
 0xe92   : > { %v4347_v3 = vpack.c.bf16 %v4343_v55, %v4342_v53 }
 0xe94   : > { %4590 = vmatmul.mubr.bf16.gmra.mrb[92].mxu1 %v4347_v3  ;;  %9828 = vmatmul.mubr.bf16.gmra.mrb[100].mxu0 %v4347_v3 }
 0xf4f   : > { %v4561_v60 = vpop.f32.mrb[80].mxu1 }
 0xf50   : > { %v4563_v32 = vpop.f32.mrb[81].mxu1  ;;  %v4562_v54 = vadd.f32 %v4561_v60, %v12707_v56 }
 0xf51   : > { %v4565_v36 = vpop.f32.mrb[82].mxu1  ;;  %v4564_v43 = vadd.f32 %v4563_v32, %v12710_v30 }
 0xf52   : > { %v4566_v2 = vadd.f32 %v4565_v36, %v12707_v56  ;;  %v4567_v0 = vpop.f32.mrb[83].mxu1 }
 0xf53   : > { %v4568_v41 = vadd.f32 %v4567_v0, %v12710_v30 }
 0xf54   : > { %v12716_v52 = vpack.c.bf16 %v4566_v2, %v4562_v54 }
 0xf55   : > { %v12718_v27 = vpack.c.bf16 %v4568_v41, %v4564_v43 }
 0xf56   : > { %9839 = vmatprep.mubr.msk.bf16.mxu1 %vm1937_vm0, %v12716_v52 }
 0xf57   : > { %4976 = vrot.lane.b32.xlu0 %v12718_v27, %s14284_s6  ;;  %v4571_v57 = vpop.f32.mrb[84].mxu1  ;;  %v9825_v12 = vpop.f32.mrb[96].mxu0  ;;  %10109 = vmatprep.subr.msk.bf16.mxu1 %vm1937_vm0, %v12718_v27  ;;  %v4690_v19 = vsel %vm1937_vm0, %v12718_v27, 0 }
 0xf58   : > { %v4573_v7 = vpop.f32.mrb[85].mxu1  ;;  %v4634_v26 = vpop.f32.mrb[97].mxu0  ;;  %9832 = vmatpush3.bf16.xpose.msra.mxu1 %v4690_v19  ;;  %v4572_v48 = vadd.f32 %v4571_v57, %v12707_v56  ;;  %v4643_v18 = vadd.f32 %v9825_v12, %v12723_v49 }
 0xf59   : > { %v4575_v5 = vpop.f32.mrb[86].mxu1  ;;  %v9826_v62 = vpop.f32.mrb[98].mxu0  ;;  %v4574_v28 = vadd.f32 %v4573_v7, %v12710_v30  ;;  %v4635_v14 = vadd.f32 %v4634_v26, %v12723_v49 }
 0xf5a   : > { %v4576_v29 = vadd.f32 %v4575_v5, %v12707_v56  ;;  %v4646_v20 = vadd.f32 %v9826_v62, %v12723_v49  ;;  %v4577_v16 = vpop.f32.mrb[87].mxu1  ;;  %v4637_v44 = vpop.f32.mrb[99].mxu0 }
 0xf5b   : > { %v4578_v38 = vadd.f32 %v4577_v16, %v12710_v30  ;;  %v4638_v21 = vadd.f32 %v4637_v44, %v12723_v49  ;;  %4964 = vrot.lane.b32.xlu0 %v12716_v52, %s14284_s6 }
 0xf5c   : > { %v12741_v24 = vpack.c.bf16 %v4576_v29, %v4572_v48  ;;  %v12743_v15 = vpack.c.bf16 %v4646_v20, %v4643_v18 }
 0xf5d   : > { %v12745_v9 = vpack.c.bf16 %v4578_v38, %v4574_v28  ;;  %v12747_v13 = vpack.c.bf16 %v4638_v21, %v4635_v14 }
 0xf5f   : > { %9847 = vmatprep.subr.bf16.mxu0 %v12747_v13  ;;  %4978 = vrot.lane.b32.xlu1 %v12745_v9, %s14284_s6  ;;  %v4581_v1 = vpop.f32.mrb[88].mxu1  ;;  %v4693_v33 = vsel %vm1937_vm0, %v12745_v9, 0 }
 0xf60   : > { %10110 = vmatprep.subr.msk.bf16.mxu1 %vm1937_vm0, %v12745_v9  ;;  %v4583_v59 = vpop.f32.mrb[89].mxu1  ;;  %9848 = vmatpush3.bf16.msra.mxu0 %v12747_v13  ;;  %v4582_v37 = vadd.f32 %v4581_v1, %v12707_v56 }
 0xf61   : > { %9834 = vmatpush3.bf16.xpose.msra.mxu1 %v4693_v33  ;;  %v4585_v47 = vpop.f32.mrb[90].mxu1  ;;  %9849 = vmatprep.subr.bf16.mxu0 %v12743_v15  ;;  %v4584_v58 = vadd.f32 %v4583_v59, %v12710_v30 }
 0xf62   : > { %v4586_v39 = vadd.f32 %v4585_v47, %v12707_v56  ;;  %v4587_v45 = vpop.f32.mrb[91].mxu1 }
 0xf63   : > { %v4588_v34 = vadd.f32 %v4587_v45, %v12710_v30 }
 0xf64   : > { %v12762_v35 = vpack.c.bf16 %v4586_v39, %v4582_v37  ;;  %9850 = vmatpush3.bf16.msra.mxu0 %v12743_v15 }
 0xf65   : > { %v12765_v46 = vpack.c.bf16 %v4588_v34, %v4584_v58 }
 0xf66   : > { %4968 = vrot.lane.b32.xlu0 %v12762_v35, %s14284_s6 }
 0xf67   : > { %4980 = vrot.lane.b32.xlu1 %v12765_v46, %s14284_s6  ;;  %v4591_v50 = vpop.f32.mrb[92].mxu1  ;;  %v9829_v53 = vpop.f32.mrb[100].mxu0  ;;  %10111 = vmatprep.subr.msk.bf16.mxu1 %vm1937_vm0, %v12765_v46  ;;  %v4696_v55 = vsel %vm1937_vm0, %v12765_v46, 0 }
 0xf68   : > { %v4593_v3 = vpop.f32.mrb[93].mxu1  ;;  %v4650_v17 = vpop.f32.mrb[101].mxu0  ;;  %v4592_v36 = vadd.f32 %v4591_v50, %v12707_v56  ;;  %v4659_v54 = vadd.f32 %v9829_v53, %v12723_v49 }
 0xf69   : > { %9836 = vmatpush3.bf16.xpose.msra.mxu1 %v4696_v55  ;;  %v4595_v60 = vpop.f32.mrb[94].mxu1  ;;  %v9830_v32 = vpop.f32.mrb[102].mxu0  ;;  %v4594_v57 = vadd.f32 %v4593_v3, %v12710_v30  ;;  %v4651_v12 = vadd.f32 %v4650_v17, %v12723_v49 }
 0xf6a   : > { %v4596_v2 = vadd.f32 %v4595_v60, %v12707_v56  ;;  %v4662_v0 = vadd.f32 %v9830_v32, %v12723_v49  ;;  %5469 = vrot.lane.b32.xlu0 %v12718_v27, %s14285_s4  ;;  %v4597_v43 = vpop.f32.mrb[95].mxu1  ;;  %v4653_v41 = vpop.f32.mrb[103].mxu0 }
 0xf6b   : > { %v4598_v19 = vadd.f32 %v4597_v43, %v12710_v30  ;;  %v4654_v7 = vadd.f32 %v4653_v41, %v12723_v49 }
 0xf6c   : > { %v12785_v26 = vpack.c.bf16 %v4596_v2, %v4592_v36  ;;  %v12787_v5 = vpack.c.bf16 %v4662_v0, %v4659_v54 }
 0xf6d   : > { %v12789_v56 = vpack.c.bf16 %v4598_v19, %v4594_v57  ;;  %v12791_v62 = vpack.c.bf16 %v4654_v7, %v4651_v12 }
 0xf6e   : > { %5473 = vrot.lane.b32.xlu0 %v12765_v46, %s14285_s4 }
 0xf6f   : > { %9851 = vmatprep.subr.bf16.mxu0 %v12791_v62  ;;  %4982 = vrot.lane.b32.xlu1 %v12789_v56, %s14284_s6  ;;  %v4699_v30 = vsel %vm1937_vm0, %v12789_v56, 0 }
 0xf70   : > { %10112 = vmatprep.subr.msk.bf16.mxu1 %vm1937_vm0, %v12789_v56  ;;  %9852 = vmatpush3.bf16.msra.mxu0 %v12791_v62 }
 0xf71   : > { %9838 = vmatpush3.bf16.xpose.msra.mxu1 %v4699_v30  ;;  %9853 = vmatprep.subr.bf16.mxu0 %v12787_v5 }
 0xf72   : > { %5461 = vrot.lane.b32.xlu0 %v12716_v52, %s14285_s4 }
 0xf73   : > { %4966 = vrot.lane.b32.xlu1 %v12741_v24, %s14284_s6 }
 0xf74   : > { %9854 = vmatpush3.bf16.msra.mxu0 %v12787_v5 }
 0xf76   : > { %5465 = vrot.lane.b32.xlu0 %v12762_v35, %s14285_s4 }
 0xf77   : > { %4970 = vrot.lane.b32.xlu1 %v12785_v26, %s14284_s6 }
 0xf78   : > { %9840 = vmatmul.mubr.msk.bf16.vlgmr.msra.gmra.mrb[96].mxu1 %vm1937_vm0, %v12741_v24 }
 0xf79   : > { %9843 = vmatprep.mubr.msk.bf16.mxu1 %vm1937_vm0, %v12762_v35 }
 0xf7b   : > { %5471 = vrot.lane.b32.xlu1 %v12745_v9, %s14285_s4 }
 0xf7f   : > { %5463 = vrot.lane.b32.xlu1 %v12741_v24, %s14285_s4 }
 0xf80   : > { %9844 = vmatmul.mubr.msk.bf16.gmra.mrb[100].mxu1 %vm1937_vm0, %v12785_v26 }
 0xf83   : > { %5467 = vrot.lane.b32.xlu1 %v12785_v26, %s14285_s4 }
 0xf87   : > { %5475 = vrot.lane.b32.xlu1 %v12789_v56, %s14285_s4 }
 0xfc9   : > { %v4977_v49 = vpop.permute.xlu0 %4976 }
 0xfca   : > { %10113 = vmatprep.subr.msk.bf16.mxu1 %vm1937_vm0, %v4977_v49  ;;  %v4997_v48 = vsel %vm1937_vm0, %v4977_v49, 0 }
 0xfcb   : > { %9864 = vmatpush3.bf16.xpose.msra.mxu1 %v4997_v48 }
 0xfcd   : > { %v4965_v18 = vpop.permute.xlu0 %4964 }
 0xfce   : > { %9871 = vmatprep.mubr.msk.bf16.mxu1 %vm1937_vm0, %v4965_v18 }
 0xfd1   : > { %v4979_v29 = vpop.permute.xlu1 %4978 }
 0xfd2   : > { %10114 = vmatprep.subr.msk.bf16.mxu1 %vm1937_vm0, %v4979_v29  ;;  %v5000_v20 = vsel %vm1937_vm0, %v4979_v29, 0 }
 0xfd3   : > { %9866 = vmatpush3.bf16.xpose.msra.mxu1 %v5000_v20 }
 0xfd8   : > { %v4969_v28 = vpop.permute.xlu0 %4968 }
 0xfd9   : > { %v4981_v16 = vpop.permute.xlu1 %4980 }
 0xfda   : > { %10115 = vmatprep.subr.msk.bf16.mxu1 %vm1937_vm0, %v4981_v16  ;;  %v5003_v44 = vsel %vm1937_vm0, %v4981_v16, 0 }
 0xfdb   : > { %9868 = vmatpush3.bf16.xpose.msra.mxu1 %v5003_v44 }
 0xfdc   : > { %v5470_v21 = vpop.permute.xlu0 %5469 }
 0xfdd   : > { %v5490_v59 = vsel %vm1937_vm0, %v5470_v21, 0 }
 0xfe0   : > { %v5474_v47 = vpop.permute.xlu0 %5473 }
 0xfe1   : > { %v4983_v14 = vpop.permute.xlu1 %4982  ;;  %v5496_v50 = vsel %vm1937_vm0, %v5474_v47, 0 }
 0xfe2   : > { %10116 = vmatprep.subr.msk.bf16.mxu1 %vm1937_vm0, %v4983_v14  ;;  %v5006_v38 = vsel %vm1937_vm0, %v4983_v14, 0 }
 0xfe3   : > { %9870 = vmatpush3.bf16.xpose.msra.mxu1 %v5006_v38 }
 0xfe4   : > { %10117 = vmatprep.subr.msk.bf16.mxu1 %vm1937_vm0, %v5470_v21  ;;  %v5462_v45 = vpop.permute.xlu0 %5461 }
 0xfe5   : > { %v4967_v1 = vpop.permute.xlu1 %4966 }
 0xfe8   : > { %v5466_v3 = vpop.permute.xlu0 %5465 }
 0xfe9   : > { %v4971_v33 = vpop.permute.xlu1 %4970 }
 0xfea   : > { %9872 = vmatmul.mubr.msk.bf16.vlgmr.msra.gmra.mrb[104].mxu1 %vm1937_vm0, %v4967_v1 }
 0xfeb   : > { %9875 = vmatprep.mubr.msk.bf16.mxu1 %vm1937_vm0, %v4969_v28  ;;  %9920 = vmatpush3.bf16.xpose.msra.mxu1 %v5490_v59 }
 0xfed   : > { %v5472_v37 = vpop.permute.xlu1 %5471 }
 0xfee   : > { %10118 = vmatprep.subr.msk.bf16.mxu1 %vm1937_vm0, %v5472_v37  ;;  %v5493_v58 = vsel %vm1937_vm0, %v5472_v37, 0 }
 0xff1   : > { %v5464_v39 = vpop.permute.xlu1 %5463 }
 0xff2   : > { %9876 = vmatmul.mubr.msk.bf16.gmra.mrb[108].mxu1 %vm1937_vm0, %v4971_v33 }
 0xff3   : > { %9922 = vmatpush3.bf16.xpose.msra.mxu1 %v5493_v58  ;;  %9927 = vmatprep.mubr.msk.bf16.mxu1 %vm1937_vm0, %v5462_v45 }
 0xff4   : > { %10119 = vmatprep.subr.msk.bf16.mxu1 %vm1937_vm0, %v5474_v47 }
 0xff5   : > { %v5468_v34 = vpop.permute.xlu1 %5467 }
 0xff9   : > { %v5476_v53 = vpop.permute.xlu1 %5475 }
 0xffa   : > { %v5499_v55 = vsel %vm1937_vm0, %v5476_v53, 0 }
 0xffb   : > { %9924 = vmatpush3.bf16.xpose.msra.mxu1 %v5496_v50 }
 0xffc   : > { %10120 = vmatprep.subr.msk.bf16.mxu1 %vm1937_vm0, %v5476_v53 }
0x1003   : > { %9926 = vmatpush3.bf16.xpose.msra.mxu1 %v5499_v55 }
0x100a   : > { %9928 = vmatmul.mubr.msk.bf16.vlgmr.msra.gmra.mrb[112].mxu1 %vm1937_vm0, %v5464_v39 }
0x100b   : > { %9931 = vmatprep.mubr.msk.bf16.mxu1 %vm1937_vm0, %v5466_v3 }
0x1012   : > { %9932 = vmatmul.mubr.msk.bf16.gmra.mrb[116].mxu1 %vm1937_vm0, %v5468_v34 }
0x104b   : > { %v9841_v17 = vpop.f32.mrb[96].mxu1 }
0x104c   : > { %v4768_v60 = vmul.f32 0.17677669, %v9841_v17  ;;  %v4735_v32 = vpop.f32.mrb[97].mxu1 }
0x104d   : > { %v4766_v36 = vmul.f32 0.17677669, %v4735_v32  ;;  %v9842_v54 = vpop.f32.mrb[98].mxu1 }
0x104e   : > { %v12852_v2 = vadd.f32 %v4768_v60, %v11690_v4  ;;  %v4738_v0 = vpop.f32.mrb[99].mxu1  ;;  %v4769_v57 = vmul.f32 0.17677669, %v9842_v54 }
0x104f   : > { %v4767_v43 = vmul.f32 0.17677669, %v4738_v0  ;;  %v12855_v41 = vadd.f32 %v4766_v36, %v11690_v4 }
0x1050   : > { %v4788_v12 = vsel %vm2043_vm2, %v12852_v2, -inf  ;;  %v12865_v49 = vadd.f32 %v4769_v57, %v11690_v4 }
0x1051   : > { %v12860_v19 = vadd.f32 %v4767_v43, %v11690_v4  ;;  %4789 = vmax.xlane.f32.xlu0 %v4788_v12  ;;  %v4782_v18 = vsel %vm2043_vm2, %v12855_v41, -inf }
0x1052   : > { %v4791_v1 = vsel %vm2043_vm2, %v12865_v49, -inf }
0x1053   : > { %v9845_v7 = vpop.f32.mrb[100].mxu1  ;;  %v4785_v30 = vsel %vm2043_vm2, %v12860_v19, -inf }
0x1054   : > { %4786 = vmax.xlane.f32.xlu1 %v4785_v30  ;;  %v4751_v48 = vpop.f32.mrb[101].mxu1  ;;  %v4772_v14 = vmul.f32 0.17677669, %v9845_v7 }
0x1055   : > { %v4770_v29 = vmul.f32 0.17677669, %v4751_v48  ;;  %4783 = vmax.xlane.f32.xlu0 %v4782_v18  ;;  %v9846_v20 = vpop.f32.mrb[102].mxu1 }
0x1056   : > { %v4773_v16 = vmul.f32 0.17677669, %v9846_v20  ;;  %v4754_v44 = vpop.f32.mrb[103].mxu1  ;;  %v12883_v47 = vadd.f32 %v4772_v14, %v11690_v4 }
0x1057   : > { %v4771_v28 = vmul.f32 0.17677669, %v4754_v44  ;;  %v12870_v38 = vadd.f32 %v4770_v29, %v11690_v4 }
0x1058   : > { %v12873_v21 = vadd.f32 %v4773_v16, %v11690_v4  ;;  %v4800_v45 = vsel %vm2043_vm2, %v12883_v47, -inf }
0x1059   : > { %4792 = vmax.xlane.f32.xlu0 %v4791_v1  ;;  %v12878_v33 = vadd.f32 %v4771_v28, %v11690_v4  ;;  %v4794_v37 = vsel %vm2043_vm2, %v12870_v38, -inf }
0x105a   : > { %v4803_v59 = vsel %vm2043_vm2, %v12873_v21, -inf }
0x105b   : > { %4804 = vmax.xlane.f32.xlu1 %v4803_v59  ;;  %v4797_v39 = vsel %vm2043_vm2, %v12878_v33, -inf }
0x105d   : > { %4795 = vmax.xlane.f32.xlu0 %v4794_v37 }
0x105f   : > { %4798 = vmax.xlane.f32.xlu1 %v4797_v39 }
0x1061   : > { %4801 = vmax.xlane.f32.xlu0 %v4800_v45 }
0x10bd   : > { %v9873_v58 = vpop.f32.mrb[104].mxu1 }
0x10be   : > { %v5042_v34 = vpop.f32.mrb[105].mxu1  ;;  %v5075_v50 = vmul.f32 0.17677669, %v9873_v58 }
0x10bf   : > { %v5073_v53 = vmul.f32 0.17677669, %v5042_v34  ;;  %v9874_v55 = vpop.f32.mrb[106].mxu1 }
0x10c0   : > { %v5076_v3 = vmul.f32 0.17677669, %v9874_v55  ;;  %v5045_v17 = vpop.f32.mrb[107].mxu1  ;;  %v12898_v54 = vadd.f32 %v5075_v50, %v11690_v4 }
0x10c1   : > { %v12892_v60 = vadd.f32 %v5073_v53, %v11690_v4  ;;  %v5074_v32 = vmul.f32 0.17677669, %v5045_v17 }
0x10c2   : > { %v12895_v36 = vadd.f32 %v5076_v3, %v11690_v4  ;;  %v5095_v29 = vsel %vm2043_vm2, %v12898_v54, -inf }
0x10c3   : > { %v5089_v0 = vsel %vm2043_vm2, %v12892_v60, -inf  ;;  %v12903_v43 = vadd.f32 %v5074_v32, %v11690_v4 }
0x10c4   : > { %5090 = vmax.xlane.f32.xlu0 %v5089_v0  ;;  %v5098_v57 = vsel %vm2043_vm2, %v12895_v36, -inf }
0x10c5   : > { %5099 = vmax.xlane.f32.xlu1 %v5098_v57  ;;  %v9877_v12 = vpop.f32.mrb[108].mxu1  ;;  %v5092_v44 = vsel %vm2043_vm2, %v12903_v43, -inf }
0x10c6   : > { %v5058_v7 = vpop.f32.mrb[109].mxu1  ;;  %v5079_v30 = vmul.f32 0.17677669, %v9877_v12 }
0x10c7   : > { %v5077_v48 = vmul.f32 0.17677669, %v5058_v7  ;;  %v9878_v18 = vpop.f32.mrb[110].mxu1 }
0x10c8   : > { %v5080_v20 = vmul.f32 0.17677669, %v9878_v18  ;;  %5096 = vmax.xlane.f32.xlu0 %v5095_v29  ;;  %v5061_v16 = vpop.f32.mrb[111].mxu1  ;;  %v12918_v59 = vadd.f32 %v5079_v30, %v11690_v4 }
0x10c9   : > { %v12912_v28 = vadd.f32 %v5077_v48, %v11690_v4  ;;  %v5078_v14 = vmul.f32 0.17677669, %v5061_v16  ;;  %5093 = vmax.xlane.f32.xlu1 %v5092_v44 }
0x10ca   : > { %v12915_v1 = vadd.f32 %v5080_v20, %v11690_v4  ;;  %v5107_v58 = vsel %vm2043_vm2, %v12918_v59, -inf }
0x10cb   : > { %v5101_v37 = vsel %vm2043_vm2, %v12912_v28, -inf  ;;  %v12923_v39 = vadd.f32 %v5078_v14, %v11690_v4 }
0x10cc   : > { %5102 = vmax.xlane.f32.xlu0 %v5101_v37  ;;  %v5110_v45 = vsel %vm2043_vm2, %v12915_v1, -inf }
0x10cd   : > { %5111 = vmax.xlane.f32.xlu1 %v5110_v45  ;;  %v5104_v34 = vsel %vm2043_vm2, %v12923_v39, -inf }
0x10d0   : > { %5108 = vmax.xlane.f32.xlu0 %v5107_v58 }
0x10d1   : > { %5105 = vmax.xlane.f32.xlu1 %v5104_v34 }
0x10dd   : > { %v12931_v50 = vpop.f32.mrb[112].mxu1 }
0x10de   : > { %v4790_v53 = vpop.xlane.xlu0 %4789  ;;  %v12933_v55 = vpop.f32.mrb[113].mxu1 }
0x10df   : > { %v4808_v3 = vsub.f32 %v12852_v2, %v4790_v53  ;;  %v12936_v17 = vpop.f32.mrb[114].mxu1 }
0x10e0   : > { %v12938_v32 = vpop.f32.mrb[115].mxu1 }
0x10e1   : > { %v4818_v0 = vmul.f32 1.442695, %v4808_v3  ;;  %v4787_v57 = vpop.xlane.xlu1 %4786 }
0x10e2   : > { %v4784_v12 = vpop.xlane.xlu0 %4783  ;;  %v4807_v30 = vsub.f32 %v12860_v19, %v4787_v57 }
0x10e3   : > { %10857 = vpow2.f32 %v4818_v0  ;;  %v4806_v7 = vsub.f32 %v12855_v41, %v4784_v12 }
0x10e4   : > { %v4816_v37 = vmul.f32 1.442695, %v4807_v30 }
0x10e5   : > { %v4814_v48 = vmul.f32 1.442695, %v4806_v7  ;;  %v12942_v18 = vpop.f32.mrb[116].mxu1 }
0x10e6   : > { %v4793_v29 = vpop.xlane.xlu0 %4792  ;;  %v12944_v20 = vpop.f32.mrb[117].mxu1 }
0x10e7   : > { %10859 = vpow2.f32 %v4814_v48  ;;  %v4809_v2 = vsub.f32 %v12865_v49, %v4793_v29  ;;  %v12947_v16 = vpop.f32.mrb[118].mxu1 }
0x10e8   : > { %v4805_v44 = vpop.xlane.xlu1 %4804  ;;  %v12949_v14 = vpop.f32.mrb[119].mxu1 }
0x10e9   : > { %v4820_v45 = vmul.f32 1.442695, %v4809_v2  ;;  %v4813_v41 = vsub.f32 %v12873_v21, %v4805_v44 }
0x10ea   : > { %v4796_v58 = vpop.xlane.xlu0 %4795 }
0x10eb   : > { %10861 = vpow2.f32 %v4820_v45  ;;  %v4810_v19 = vsub.f32 %v12870_v38, %v4796_v58  ;;  %v4828_v3 = vmul.f32 1.442695, %v4813_v41 }
0x10ec   : > { %v4799_v34 = vpop.xlane.xlu1 %4798  ;;  %10863 = vpow2.f32 %v4816_v37 }
0x10ed   : > { %v12953_v53 = vpop.eup %10857  ;;  %v4811_v49 = vsub.f32 %v12878_v33, %v4799_v34  ;;  %v4822_v7 = vmul.f32 1.442695, %v4810_v19  ;;  %10865 = vpow2.f32 %v4828_v3 }
0x10ee   : > { %v4802_v0 = vpop.xlane.xlu0 %4801  ;;  %v4836_v57 = vsel %vm2043_vm2, %v12953_v53, 0.0 }
0x10ef   : > { %v4812_v12 = vsub.f32 %v12883_v47, %v4802_v0  ;;  %4837 = vadd.xlane.f32.xlu0 %v4836_v57  ;;  %v4824_v30 = vmul.f32 1.442695, %v4811_v49 }
0x10f1   : > { %v12959_v21 = vpop.eup %10859  ;;  %v4826_v38 = vmul.f32 1.442695, %v4812_v12 }
0x10f2   : > { %v4830_v48 = vsel %vm2043_vm2, %v12959_v21, 0.0 }
0x10f3   : > { %10867 = vpow2.f32 %v4826_v38  ;;  %4831 = vadd.xlane.f32.xlu0 %v4830_v48 }
0x10f4   : > { %10869 = vpow2.f32 %v4822_v7 }
0x10f5   : > { %v12963_v33 = vpop.eup %10861  ;;  %10871 = vpow2.f32 %v4824_v30 }
0x10f6   : > { %v4839_v29 = vsel %vm2043_vm2, %v12963_v33, 0.0  ;;  %v12967_v47 = vpop.eup %10863 }
0x10f7   : > { %4840 = vadd.xlane.f32.xlu1 %v4839_v29  ;;  %v4833_v2 = vsel %vm2043_vm2, %v12967_v47, 0.0  ;;  %v12971_v44 = vpop.eup %10865 }
0x10f8   : > { %v4851_v58 = vsel %vm2043_vm2, %v12971_v44, 0.0 }
0x10fb   : > { %4834 = vadd.xlane.f32.xlu1 %v4833_v2 }
0x10fd   : > { %v12973_v37 = vpop.eup %10867 }
0x10fe   : > { %v12975_v45 = vpop.eup %10869  ;;  %v4848_v41 = vsel %vm2043_vm2, %v12973_v37, 0.0 }
0x10ff   : > { %v12981_v19 = vpop.eup %10871  ;;  %4849 = vadd.xlane.f32.xlu0 %v4848_v41  ;;  %4852 = vadd.xlane.f32.xlu1 %v4851_v58  ;;  %v4842_v34 = vsel %vm2043_vm2, %v12975_v45, 0.0 }
0x1100   : > { %v4845_v3 = vsel %vm2043_vm2, %v12981_v19, 0.0 }
0x1103   : > { %4843 = vadd.xlane.f32.xlu0 %v4842_v34  ;;  %4846 = vadd.xlane.f32.xlu1 %v4845_v3 }
0x1151   : > { %v5091_v49 = vpop.xlane.xlu0 %5090 }
0x1152   : > { %v5100_v0 = vpop.xlane.xlu1 %5099  ;;  %v5113_v12 = vsub.f32 %v12892_v60, %v5091_v49 }
0x1153   : > { %v5116_v57 = vsub.f32 %v12895_v36, %v5100_v0 }
0x1154   : > { %v5121_v2 = vmul.f32 1.442695, %v5113_v12 }
0x1155   : > { %v5127_v7 = vmul.f32 1.442695, %v5116_v57  ;;  %v5097_v30 = vpop.xlane.xlu0 %5096 }
0x1156   : > { %v5115_v38 = vsub.f32 %v12898_v54, %v5097_v30  ;;  %v5094_v48 = vpop.xlane.xlu1 %5093 }
0x1157   : > { %10873 = vpow2.f32 %v5127_v7  ;;  %v5114_v29 = vsub.f32 %v12903_v43, %v5094_v48 }
0x1158   : > { %v5125_v41 = vmul.f32 1.442695, %v5115_v38 }
0x1159   : > { %v5123_v58 = vmul.f32 1.442695, %v5114_v29  ;;  %v5103_v11 = vpop.xlane.xlu0 %5102 }
0x115a   : > { %10875 = vpow2.f32 %v5125_v41  ;;  %v5117_v34 = vsub.f32 %v12912_v28, %v5103_v11  ;;  %v5112_v29 = vpop.xlane.xlu1 %5111 }
0x115b   : > { %10877 = vpow2.f32 %v5123_v58 }
0x115c   : > { %10879 = vpow2.f32 %v5121_v2  ;;  %v5129_v3 = vmul.f32 1.442695, %v5117_v34 }
0x115d   : > { %v5109_v36 = vpop.xlane.xlu0 %5108 }
0x115e   : > { %v5119_v60 = vsub.f32 %v12918_v59, %v5109_v36  ;;  %v5106_v41 = vpop.xlane.xlu1 %5105  ;;  %v5120_v36 = vsub.f32 %v12915_v1, %v5112_v29 }
0x1160   : > { %v5133_v49 = vmul.f32 1.442695, %v5119_v60 }
0x1161   : > { %v12993_v0 = vpop.eup %10873 }
0x1162   : > { %10881 = vpow2.f32 %v5133_v49  ;;  %v5146_v54 = vsel %vm2043_vm2, %v12993_v0, 0.0 }
0x1163   : > { %5147 = vadd.xlane.f32.xlu1 %v5146_v54  ;;  %10883 = vpow2.f32 %v5129_v3  ;;  %v5135_v3 = vmul.f32 1.442695, %v5120_v36 }
0x1164   : > { %v12997_v43 = vpop.eup %10875 }
0x1165   : > { %v12999_v57 = vpop.eup %10877  ;;  %v5143_v11 = vsel %vm2043_vm2, %v12997_v43, 0.0 }
0x1166   : > { %v13003_v28 = vpop.eup %10879  ;;  %5144 = vadd.xlane.f32.xlu0 %v5143_v11  ;;  %v5140_v59 = vsel %vm2043_vm2, %v12999_v57, 0.0  ;;  %v5118_v11 = vsub.f32 %v12923_v39, %v5106_v41 }
0x1167   : > { %5141 = vadd.xlane.f32.xlu1 %v5140_v59  ;;  %v5137_v12 = vsel %vm2043_vm2, %v13003_v28, 0.0 }
0x1168   : > { %v5131_v29 = vmul.f32 1.442695, %v5118_v11 }
0x116a   : > { %5138 = vadd.xlane.f32.xlu0 %v5137_v12 }
0x116c   : > { %v13009_v7 = vpop.eup %10881 }
0x116d   : > { %v5155_v30 = vsel %vm2043_vm2, %v13009_v7, 0.0  ;;  %v13013_v38 = vpop.eup %10883 }
0x116e   : > { %5156 = vadd.xlane.f32.xlu0 %v5155_v30  ;;  %v5149_v48 = vsel %vm2043_vm2, %v13013_v38, 0.0 }
0x1172   : > { %5150 = vadd.xlane.f32.xlu0 %v5149_v48 }
0x1178   : > { %5187 = vrot.lane.b32.xlu1 %v12743_v15, %s14284_s6 }
0x117c   : > { %5189 = vrot.lane.b32.xlu1 %v12791_v62, %s14284_s6  ;;  %v4838_v2 = vpop.xlane.xlu0 %4837 }
0x1180   : > { %v4832_v58 = vpop.xlane.xlu0 %4831 }
0x1184   : > { %v4841_v34 = vpop.xlane.xlu1 %4840 }
0x1185   : > { %10885 = vrcp.f32 %v4841_v34 }
0x1186   : > { %10887 = vrcp.f32 %v4832_v58 }
0x1187   : > { %10889 = vrcp.f32 %v4838_v2 }
0x1188   : > { %v4835_v60 = vpop.xlane.xlu1 %4834  ;;  %5185 = vrot.lane.b32.xlu0 %v12747_v13, %s14284_s6 }
0x1189   : > { %10891 = vrcp.f32 %v4835_v60 }
0x118c   : > { %v4850_v49 = vpop.xlane.xlu0 %4849  ;;  %v4853_v54 = vpop.xlane.xlu1 %4852  ;;  %5877 = vrot.lane.b32.xlu0 %v12718_v27, %s14286_s24 }
0x118d   : > { %10893 = vrcp.f32 %v4850_v49 }
0x118e   : > { %10895 = vrcp.f32 %v4853_v54 }
0x118f   : > { %v10886_v59 = vpop.eup %10885  ;;  %10897 = vpow2.f32 %v5135_v3 }
0x1190   : > { %v4844_v12 = vpop.xlane.xlu0 %4843  ;;  %v4847_v1 = vpop.xlane.xlu1 %4846  ;;  %5881 = vrot.lane.b32.xlu0 %v12765_v46, %s14286_s24  ;;  %v4865_v58 = vmul.f32 %v10886_v59, %v12963_v33 }
0x1191   : > { %v10888_v30 = vpop.eup %10887  ;;  %10899 = vrcp.f32 %v4844_v12 }
0x1192   : > { %v10890_v48 = vpop.eup %10889  ;;  %10901 = vrcp.f32 %v4847_v1  ;;  %v4862_v27 = vmul.f32 %v10888_v30, %v12959_v21  ;;  %v5569_v30 = vmul.f32 0.17677669, %v12936_v17  ;;  %v5572_v17 = vmul.f32 0.17677669, %v12942_v18 }
0x1193   : > { %v10892_v2 = vpop.eup %10891  ;;  %v4864_v41 = vmul.f32 %v10890_v48, %v12953_v53  ;;  %10903 = vpow2.f32 %v5131_v29  ;;  %v5567_v18 = vmul.f32 0.17677669, %v12938_v32 }
0x1194   : > { %5869 = vrot.lane.b32.xlu0 %v12716_v52, %s14286_s24  ;;  %v4863_v39 = vmul.f32 %v10892_v2, %v12967_v47  ;;  %v13065_v29 = vadd.f32 %v5569_v30, %v11690_v4 }
0x1195   : > { %v4871_v46 = vpack.c.bf16 %v4865_v58, %v4864_v41  ;;  %v5573_v41 = vmul.f32 0.17677669, %v12947_v16 }
0x1196   : > { %v4870_v34 = vpack.c.bf16 %v4863_v39, %v4862_v27  ;;  %v5591_v58 = vsel %vm2043_vm2, %v13065_v29, -inf  ;;  %v13091_v39 = vadd.f32 %v5567_v18, %v11690_v4 }
0x1197   : > { %v10894_v36 = vpop.eup %10893 }
0x1198   : > { %9855 = vmatprep.mubr.msk.bf16.mxu0 %vm2043_vm2, %v4870_v34  ;;  %v10896_v60 = vpop.eup %10895  ;;  %v4868_v21 = vmul.f32 %v10894_v36, %v12973_v37  ;;  %v5568_v37 = vmul.f32 0.17677669, %v12931_v50  ;;  %v5570_v50 = vmul.f32 0.17677669, %v12944_v20  ;;  %v13081_v20 = vadd.f32 %v5572_v17, %v11690_v4 }
0x1199   : > { %9856 = vmatmul.mubr.msk.bf16.vlgmr.msra.gmra.mrb[104].mxu0 %vm2043_vm2, %v4871_v46  ;;  %v13037_v3 = vpop.eup %10897  ;;  %v4869_v47 = vmul.f32 %v10896_v60, %v12971_v44  ;;  %v5566_v44 = vmul.f32 0.17677669, %v12933_v55  ;;  %v5585_v46 = vsel %vm2043_vm2, %v13091_v39, -inf }
0x119a   : > { %v5158_v11 = vsel %vm2043_vm2, %v13037_v3, 0.0  ;;  %v13057_v1 = vadd.f32 %v5568_v37, %v11690_v4  ;;  %v13074_v2 = vadd.f32 %v5570_v50, %v11690_v4 }
0x119b   : > { %v10900_v33 = vpop.eup %10899  ;;  %v4873_v12 = vpack.c.bf16 %v4869_v47, %v4868_v21 }
0x119c   : > { %v10902_v49 = vpop.eup %10901  ;;  %v4866_v52 = vmul.f32 %v10900_v33, %v12975_v45  ;;  %v5588_v55 = vsel %vm2043_vm2, %v13057_v1, -inf  ;;  %v5594_v27 = vsel %vm2043_vm2, %v13074_v2, -inf }
0x119d   : > { %v4867_v53 = vmul.f32 %v10902_v49, %v12981_v19  ;;  %v13045_v59 = vpop.eup %10903  ;;  %v13054_v19 = vadd.f32 %v5566_v44, %v11690_v4 }
0x119e   : > { %v5152_v45 = vsel %vm2043_vm2, %v13045_v59, 0.0 }
0x119f   : > { %v4872_v54 = vpack.c.bf16 %v4867_v53, %v4866_v52  ;;  %v5582_v48 = vsel %vm2043_vm2, %v13054_v19, -inf }
0x11a0   : > { %5159 = vadd.xlane.f32.xlu1 %v5158_v11 }
0x11a1   : > { %9859 = vmatprep.mubr.msk.bf16.mxu0 %vm2043_vm2, %v4872_v54 }
0x11a2   : > { %9860 = vmatmul.mubr.msk.bf16.gmra.mrb[108].mxu0 %vm2043_vm2, %v4873_v12 }
0x11a4   : > { %5153 = vadd.xlane.f32.xlu1 %v5152_v45 }
0x11b3   : > { %5583 = vmax.xlane.f32.xlu0 %v5582_v48 }
0x11b5   : > { %5191 = vrot.lane.b32.xlu1 %v12787_v5, %s14284_s6 }
0x11b7   : > { %5589 = vmax.xlane.f32.xlu0 %v5588_v55 }
0x11b9   : > { %5879 = vrot.lane.b32.xlu1 %v12745_v9, %s14286_s24  ;;  %v5600_v9 = vsel %vm2043_vm2, %v13081_v20, -inf }
0x11bb   : > { %5592 = vmax.xlane.f32.xlu0 %v5591_v58 }
0x11bd   : > { %5883 = vrot.lane.b32.xlu1 %v12789_v56, %s14286_s24  ;;  %v5571_v56 = vmul.f32 0.17677669, %v12949_v14 }
0x11bf   : > { %5595 = vmax.xlane.f32.xlu0 %v5594_v27  ;;  %v13096_v34 = vadd.f32 %v5571_v56, %v11690_v4 }
0x11c1   : > { %5871 = vrot.lane.b32.xlu1 %v12741_v24, %s14286_s24  ;;  %v13101_v24 = vadd.f32 %v5573_v41, %v11690_v4  ;;  %v5597_v32 = vsel %vm2043_vm2, %v13096_v34, -inf }
0x11c3   : > { %5601 = vmax.xlane.f32.xlu0 %v5600_v9  ;;  %v5603_v36 = vsel %vm2043_vm2, %v13101_v24, -inf }
0x11e5   : > { %5586 = vmax.xlane.f32.xlu1 %v5585_v46 }
0x11e9   : > { %5598 = vmax.xlane.f32.xlu1 %v5597_v32 }
0x11ed   : > { %5604 = vmax.xlane.f32.xlu1 %v5603_v36 }
0x11f0   : > { %v5148_v14 = vpop.xlane.xlu1 %5147 }
0x11f3   : > { %v5145_v16 = vpop.xlane.xlu0 %5144 }
0x11f4   : > { %v5142_v60 = vpop.xlane.xlu1 %5141 }
0x11f5   : > { %10905 = vrcp.f32 %v5142_v60 }
0x11f7   : > { %v5139_v33 = vpop.xlane.xlu0 %5138 }
0x11f8   : > { %10907 = vrcp.f32 %v5139_v33  ;;  %v5188_v53 = vpop.permute.xlu1 %5187 }
0x11f9   : > { %10909 = vrcp.f32 %v5145_v16 }
0x11fa   : > { %10911 = vrcp.f32 %v5148_v14 }
0x11fb   : > { %v5157_v49 = vpop.xlane.xlu0 %5156 }
0x11fc   : > { %v5190_v30 = vpop.permute.xlu1 %5189 }
0x11ff   : > { %v5151_v52 = vpop.xlane.xlu0 %5150  ;;  %v10906_v21 = vpop.eup %10905 }
0x1200   : > { %v5170_v12 = vmul.f32 %v10906_v21, %v12999_v57 }
0x1202   : > { %v10908_v47 = vpop.eup %10907 }
0x1203   : > { %v5186_v54 = vpop.permute.xlu0 %5185  ;;  %v5169_v11 = vmul.f32 %v10908_v47, %v13003_v28  ;;  %v10910_v50 = vpop.eup %10909 }
0x1204   : > { %9879 = vmatprep.subr.bf16.mxu0 %v5186_v54  ;;  %v10912_v17 = vpop.eup %10911  ;;  %v5171_v58 = vmul.f32 %v10910_v50, %v12997_v43 }
0x1205   : > { %9880 = vmatpush3.bf16.msra.mxu0 %v5186_v54  ;;  %v5177_v45 = vpack.c.bf16 %v5170_v12, %v5169_v11  ;;  %v5172_v9 = vmul.f32 %v10912_v17, %v12993_v0 }
0x1206   : > { %9881 = vmatprep.subr.bf16.mxu0 %v5188_v53 }
0x1207   : > { %v5878_v44 = vpop.permute.xlu0 %5877  ;;  %9887 = vmatprep.mubr.msk.bf16.mxu0 %vm2043_vm2, %v5177_v45  ;;  %v5178_v18 = vpack.c.bf16 %v5172_v9, %v5171_v58 }
0x1208   : > { %v5898_v37 = vsel %vm1937_vm0, %v5878_v44, 0  ;;  %10121 = vmatprep.subr.msk.bf16.mxu1 %vm1937_vm0, %v5878_v44 }
0x1209   : > { %9882 = vmatpush3.bf16.msra.mxu0 %v5188_v53  ;;  %9964 = vmatpush3.bf16.xpose.msra.mxu1 %v5898_v37 }
0x120a   : > { %9883 = vmatprep.subr.bf16.mxu0 %v5190_v30 }
0x120b   : > { %v5882_v48 = vpop.permute.xlu0 %5881 }
0x120c   : > { %v5904_v21 = vsel %vm1937_vm0, %v5882_v48, 0 }
0x120d   : > { %9884 = vmatpush3.bf16.msra.mxu0 %v5190_v30 }
0x120f   : > { %v5870_v28 = vpop.permute.xlu0 %5869 }
0x1210   : > { %9971 = vmatprep.mubr.msk.bf16.mxu1 %vm1937_vm0, %v5870_v28 }
0x122d   : > { %v5160_v57 = vpop.xlane.xlu1 %5159 }
0x122e   : > { %10913 = vrcp.f32 %v5160_v57 }
0x122f   : > { %10915 = vrcp.f32 %v5151_v52 }
0x1230   : > { %10917 = vrcp.f32 %v5157_v49 }
0x1231   : > { %v5154_v55 = vpop.xlane.xlu1 %5153 }
0x1232   : > { %10919 = vrcp.f32 %v5154_v55 }
0x1235   : > { %v5192_v27 = vpop.permute.xlu1 %5191 }
0x1236   : > { %9885 = vmatprep.subr.bf16.mxu0 %v5192_v27 }
0x1237   : > { %9886 = vmatpush3.bf16.msra.mxu0 %v5192_v27 }
0x1238   : > { %v10914_v56 = vpop.eup %10913 }
0x1239   : > { %v5880_v41 = vpop.permute.xlu1 %5879  ;;  %v10916_v46 = vpop.eup %10915  ;;  %v5176_v43 = vmul.f32 %v10914_v56, %v13037_v3 }
0x123a   : > { %v5901_v32 = vsel %vm1937_vm0, %v5880_v41, 0  ;;  %9888 = vmatmul.mubr.msk.bf16.vlgmr.msra.gmra.mrb[112].mxu0 %vm2043_vm2, %v5178_v18  ;;  %10122 = vmatprep.subr.msk.bf16.mxu1 %vm1937_vm0, %v5880_v41  ;;  %v10918_v36 = vpop.eup %10917  ;;  %v5173_v0 = vmul.f32 %v10916_v46, %v13013_v38 }
0x123b   : > { %9966 = vmatpush3.bf16.xpose.msra.mxu1 %v5901_v32  ;;  %v5175_v60 = vmul.f32 %v10918_v36, %v13009_v7 }
0x123c   : > { %v10920_v14 = vpop.eup %10919  ;;  %10123 = vmatprep.subr.msk.bf16.mxu1 %vm1937_vm0, %v5882_v48 }
0x123d   : > { %v5174_v16 = vmul.f32 %v10920_v14, %v13045_v59  ;;  %v5180_v52 = vpack.c.bf16 %v5176_v43, %v5175_v60  ;;  %v5884_v47 = vpop.permute.xlu1 %5883 }
0x123e   : > { %v5907_v12 = vsel %vm1937_vm0, %v5884_v47, 0 }
0x123f   : > { %v5179_v33 = vpack.c.bf16 %v5174_v16, %v5173_v0 }
0x1240   : > { %v5584_v49 = vpop.xlane.xlu0 %5583 }
0x1241   : > { %9891 = vmatprep.mubr.msk.bf16.mxu0 %vm2043_vm2, %v5179_v33  ;;  %v5606_v53 = vsub.f32 %v13054_v19, %v5584_v49  ;;  %v5872_v30 = vpop.permute.xlu1 %5871 }
0x1242   : > { %9892 = vmatmul.mubr.msk.bf16.gmra.mrb[116].mxu0 %vm2043_vm2, %v5180_v52 }
0x1243   : > { %9968 = vmatpush3.bf16.xpose.msra.mxu1 %v5904_v21  ;;  %v5614_v59 = vmul.f32 1.442695, %v5606_v53 }
0x1244   : > { %v5590_v3 = vpop.xlane.xlu0 %5589  ;;  %10124 = vmatprep.subr.msk.bf16.mxu1 %vm1937_vm0, %v5884_v47 }
0x1245   : > { %v5608_v38 = vsub.f32 %v13057_v1, %v5590_v3  ;;  %v10338_v3 = vld [vmem:[%s14283_s2 + $0x58] sm:$0xff]  }
0x1247   : > { %v5618_v7 = vmul.f32 1.442695, %v5608_v38  ;;  %v10339_v38 = vld [vmem:[%s14283_s2 + $0x40] sm:$0xff]  }
0x1248   : > { %v5593_v54 = vpop.xlane.xlu0 %5592 }
0x1249   : > { %10921 = vpow2.f32 %v5618_v7  ;;  %v5609_v11 = vsub.f32 %v13065_v29, %v5593_v54 }
0x124a   : > { %10923 = vpow2.f32 %v5614_v59 }
0x124b   : > { %v5620_v45 = vmul.f32 1.442695, %v5609_v11  ;;  %9970 = vmatpush3.bf16.xpose.msra.mxu1 %v5907_v12 }
0x124c   : > { %v5596_v44 = vpop.xlane.xlu0 %5595 }
0x124d   : > { %10925 = vpow2.f32 %v5620_v45  ;;  %v5610_v19 = vsub.f32 %v13074_v2, %v5596_v44 }
0x124f   : > { %v5622_v28 = vmul.f32 1.442695, %v5610_v19 }
0x1250   : > { %v5602_v37 = vpop.xlane.xlu0 %5601 }
0x1251   : > { %v5612_v48 = vsub.f32 %v13081_v20, %v5602_v37 }
0x1252   : > { %9972 = vmatmul.mubr.msk.bf16.vlgmr.msra.gmra.mrb[120].mxu1 %vm1937_vm0, %v5872_v30 }
0x1253   : > { %v13134_v1 = vpop.eup %10921  ;;  %v5626_v57 = vmul.f32 1.442695, %v5612_v48 }
0x1254   : > { %v5636_v29 = vsel %vm2043_vm2, %v13134_v1, 0.0  ;;  %v13138_v50 = vpop.eup %10923 }
0x1255   : > { %10927 = vpow2.f32 %v5626_v57  ;;  %5637 = vadd.xlane.f32.xlu0 %v5636_v29  ;;  %v5630_v2 = vsel %vm2043_vm2, %v13138_v50, 0.0 }
0x1256   : > { %10929 = vpow2.f32 %v5622_v28 }
0x1257   : > { %v13140_v55 = vpop.eup %10925 }
0x1258   : > { %v5639_v20 = vsel %vm2043_vm2, %v13140_v55, 0.0 }
0x1259   : > { %5631 = vadd.xlane.f32.xlu0 %v5630_v2  ;;  %5640 = vadd.xlane.f32.xlu1 %v5639_v20 }
0x125f   : > { %v13146_v17 = vpop.eup %10927 }
0x1260   : > { %v5648_v58 = vsel %vm2043_vm2, %v13146_v17, 0.0  ;;  %v13150_v27 = vpop.eup %10929 }
0x1261   : > { %5649 = vadd.xlane.f32.xlu0 %v5648_v58  ;;  %v5642_v9 = vsel %vm2043_vm2, %v13150_v27, 0.0 }
0x1265   : > { %5643 = vadd.xlane.f32.xlu0 %v5642_v9 }
0x126c   : > { %v13154_v18 = vpop.f32.mrb[104].mxu0 }
0x126d   : > { %v13156_v56 = vpop.f32.mrb[105].mxu0 }
0x126e   : > { %v13158_v41 = vpop.f32.mrb[106].mxu0 }
0x126f   : > { %v4952_v46 = vpack.c.bf16 %v13158_v41, %v13154_v18  ;;  %v13162_v32 = vpop.f32.mrb[107].mxu0 }
0x1270   : > { %v4951_v36 = vpack.c.bf16 %v13162_v32, %v13156_v56 }
0x1272   : > { %v5587_v14 = vpop.xlane.xlu1 %5586 }
0x1273   : > { %v5607_v43 = vsub.f32 %v13091_v39, %v5587_v14  ;;  %v10337_v39 = vld [vmem:[%s14283_s2 + $0x50] sm:$0xff]  }
0x1274   : > { %9895 = vmatprep.subr.bf16.mxu0 %v10337_v39 }
0x1275   : > { %v5616_v0 = vmul.f32 1.442695, %v5607_v43  ;;  %v13167_v16 = vpop.f32.mrb[108].mxu0  ;;  %9896 = vmatpush3.bf16.msra.mxu0 %v10337_v39 }
0x1276   : > { %v13169_v60 = vpop.f32.mrb[109].mxu0  ;;  %9897 = vmatprep.subr.bf16.mxu0 %v10338_v3 }
0x1277   : > { %10931 = vpow2.f32 %v5616_v0  ;;  %v13171_v33 = vpop.f32.mrb[110].mxu0 }
0x1278   : > { %v4954_v49 = vpack.c.bf16 %v13171_v33, %v13167_v16  ;;  %v13175_v52 = vpop.f32.mrb[111].mxu0 }
0x1279   : > { %v4953_v21 = vpack.c.bf16 %v13175_v52, %v13169_v60  ;;  %9898 = vmatpush3.bf16.msra.mxu0 %v10338_v3 }
0x127a   : > { %9907 = vmatprep.subr.bf16.mxu0 %v10339_v38 }
0x127b   : > { %5674 = vrot.lane.b32.xlu0 %v12747_v13, %s14285_s4 }
0x127f   : > { %5873 = vrot.lane.b32.xlu0 %v12762_v35, %s14286_s24  ;;  %v5599_v35 = vpop.xlane.xlu1 %5598 }
0x1280   : > { %v5611_v54 = vsub.f32 %v13096_v34, %v5599_v35 }
0x1281   : > { %v13186_v47 = vpop.eup %10931 }
0x1282   : > { %v5633_v53 = vsel %vm2043_vm2, %v13186_v47, 0.0  ;;  %v5624_v12 = vmul.f32 1.442695, %v5611_v54 }
0x1283   : > { %5634 = vadd.xlane.f32.xlu1 %v5633_v53  ;;  %v5605_v59 = vpop.xlane.xlu1 %5604 }
0x1284   : > { %v5613_v7 = vsub.f32 %v13101_v24, %v5605_v59 }
0x1286   : > { %v5628_v11 = vmul.f32 1.442695, %v5613_v7 }
0x1288   : > { %10933 = vpow2.f32 %v5628_v11 }
0x1289   : > { %10935 = vpow2.f32 %v5624_v12 }
0x1292   : > { %v13202_v45 = vpop.eup %10933 }
0x1293   : > { %v5651_v44 = vsel %vm2043_vm2, %v13202_v45, 0.0  ;;  %v13206_v19 = vpop.eup %10935 }
0x1294   : > { %5676 = vrot.lane.b32.xlu1 %v12743_v15, %s14285_s4  ;;  %v5645_v37 = vsel %vm2043_vm2, %v13206_v19, 0.0 }
0x1298   : > { %5678 = vrot.lane.b32.xlu1 %v12791_v62, %s14285_s4 }
0x12bc   : > { %5652 = vadd.xlane.f32.xlu1 %v5651_v44 }
0x12c0   : > { %5646 = vadd.xlane.f32.xlu1 %v5645_v37 }
0x12d1   : > { %5680 = vrot.lane.b32.xlu1 %v12787_v5, %s14285_s4 }
0x12d5   : > { %5875 = vrot.lane.b32.xlu1 %v12785_v26, %s14286_s24  ;;  %v10340_v26 = vld [vmem:[%s14283_s2 + $0x48] sm:$0xff]  }
0x12e2   : > { %v13214_v34 = vpop.xlane.xlu0 %5637 }
0x12e6   : > { %v5632_v24 = vpop.xlane.xlu0 %5631  ;;  %v5641_v43 = vpop.xlane.xlu1 %5640 }
0x12ee   : > { %v13216_v30 = vpop.xlane.xlu0 %5649 }
0x12f2   : > { %v13218_v48 = vpop.xlane.xlu0 %5643 }
0x12f6   : > { %v5675_v28 = vpop.permute.xlu0 %5674 }
0x12fa   : > { %v5874_v57 = vpop.permute.xlu0 %5873 }
0x12fb   : > { %9975 = vmatprep.mubr.msk.bf16.mxu1 %vm1937_vm0, %v5874_v57 }
0x130d   : > { %v9889_v29 = vpop.f32.mrb[112].mxu0 }
0x130e   : > { %v5243_v2 = vpop.f32.mrb[113].mxu0 }
0x130f   : > { %v9890_v20 = vpop.f32.mrb[114].mxu0 }
0x1310   : > { %v5275_v58 = vpack.c.bf16 %v9890_v20, %v9889_v29  ;;  %v5246_v9 = vpop.f32.mrb[115].mxu0  ;;  %v5635_v39 = vpop.xlane.xlu1 %5634 }
0x1311   : > { %v5274_v14 = vpack.c.bf16 %v5246_v9, %v5243_v2  ;;  %10937 = vrcp.f32 %v5635_v39 }
0x1312   : > { %10939 = vrcp.f32 %v5632_v24 }
0x1313   : > { %9899 = vmatprep.mubr.msk.bf16.mxu0 %vm1937_vm0, %v5274_v14  ;;  %10941 = vrcp.f32 %v5641_v43 }
0x1314   : > { %9900 = vmatmul.mubr.msk.bf16.vlgmr.msra.gmra.mrb[120].mxu0 %vm1937_vm0, %v5275_v58  ;;  %v5677_v54 = vpop.permute.xlu1 %5676  ;;  %10943 = vrcp.f32 %v13214_v34 }
0x1315   : > { %9908 = vmatpush3.bf16.msra.mxu0 %v10339_v38  ;;  %v9893_v0 = vpop.f32.mrb[116].mxu0 }
0x1316   : > { %v5259_v53 = vpop.f32.mrb[117].mxu0  ;;  %9909 = vmatprep.subr.bf16.mxu0 %v10340_v26 }
0x1317   : > { %v9894_v3 = vpop.f32.mrb[118].mxu0 }
0x1318   : > { %v5277_v35 = vpack.c.bf16 %v9894_v3, %v9893_v0  ;;  %v5262_v59 = vpop.f32.mrb[119].mxu0  ;;  %v5679_v41 = vpop.permute.xlu1 %5678 }
0x1319   : > { %v5276_v7 = vpack.c.bf16 %v5262_v59, %v5259_v53  ;;  %9910 = vmatpush3.bf16.msra.mxu0 %v10340_v26 }
0x131a   : > { %9935 = vmatprep.subr.bf16.mxu0 %v5675_v28 }
0x131b   : > { %9903 = vmatprep.mubr.msk.bf16.mxu0 %vm1937_vm0, %v5276_v7  ;;  %v10938_v38 = vpop.eup %10937 }
0x131c   : > { %9904 = vmatmul.mubr.msk.bf16.gmra.mrb[124].mxu0 %vm1937_vm0, %v5277_v35  ;;  %v10940_v11 = vpop.eup %10939  ;;  %v5663_v56 = vmul.f32 %v10938_v38, %v13186_v47  ;;  %v10341_v35 = vld [vmem:[%s14283_s2 + $0x60] sm:$0xff]  }
0x131d   : > { %9911 = vmatprep.mubr.msk.bf16.mxu0 %vm1937_vm0, %v4951_v36  ;;  %v5662_v18 = vmul.f32 %v10940_v11, %v13138_v50  ;;  %v10942_v33 = vpop.eup %10941 }
0x131e   : > { %v10944_v58 = vpop.eup %10943  ;;  %v5665_v9 = vmul.f32 %v10942_v33, %v13140_v55 }
0x131f   : > { %v5670_v60 = vpack.c.bf16 %v5663_v56, %v5662_v18 }
0x1324   : > { %9912 = vmatmul.mubr.msk.bf16.vlgmr.msra.gmra.mrb[120].mxu0 %vm1937_vm0, %v4952_v46 }
0x1325   : > { %9936 = vmatpush3.bf16.msra.mxu0 %v5675_v28  ;;  %9915 = vmatprep.mubr.msk.bf16.mxu0 %vm1937_vm0, %v4953_v21  ;;  %v9973_v12 = vpop.f32.mrb[120].mxu1 }
0x1326   : > { %9937 = vmatprep.subr.bf16.mxu0 %v5677_v54  ;;  %v5943_v44 = vpop.f32.mrb[121].mxu1  ;;  %v5976_v32 = vmul.f32 0.17677669, %v9973_v12 }
0x1327   : > { %v5974_v36 = vmul.f32 0.17677669, %v5943_v44  ;;  %v9974_v37 = vpop.f32.mrb[122].mxu1 }
0x1328   : > { %v5946_v24 = vpop.f32.mrb[123].mxu1  ;;  %v5984_v52 = vadd.f32 %v5976_v32, %v11690_v4  ;;  %v5977_v21 = vmul.f32 0.17677669, %v9974_v37 }
0x1329   : > { %v13243_v46 = vadd.f32 %v5974_v36, %v11690_v4  ;;  %9938 = vmatpush3.bf16.msra.mxu0 %v5677_v54  ;;  %v5975_v28 = vmul.f32 0.17677669, %v5946_v24 }
0x132a   : > { %9939 = vmatprep.subr.bf16.mxu0 %v5679_v41  ;;  %v5985_v29 = vadd.f32 %v5977_v21, %v11690_v4  ;;  %v5996_v2 = vsel %vm2043_vm2, %v5984_v52, -inf }
0x132b   : > { %v13247_v57 = vadd.f32 %v5975_v28, %v11690_v4  ;;  %v5990_v47 = vsel %vm2043_vm2, %v13243_v46, -inf }
0x132c   : > { %9916 = vmatmul.mubr.msk.bf16.gmra.mrb[124].mxu0 %vm1937_vm0, %v4954_v49  ;;  %5991 = vmax.xlane.f32.xlu0 %v5990_v47  ;;  %v5999_v20 = vsel %vm2043_vm2, %v5985_v29, -inf }
0x132d   : > { %9940 = vmatpush3.bf16.msra.mxu0 %v5679_v41  ;;  %9943 = vmatprep.mubr.msk.bf16.mxu0 %vm2043_vm2, %v5670_v60  ;;  %v5993_v50 = vsel %vm2043_vm2, %v13247_v57, -inf }
0x132e   : > { %5994 = vmax.xlane.f32.xlu1 %v5993_v50 }
0x1330   : > { %5997 = vmax.xlane.f32.xlu0 %v5996_v2 }
0x1334   : > { %6000 = vmax.xlane.f32.xlu0 %v5999_v20 }
0x133f   : > { %6084 = vrot.lane.b32.xlu1 %v12743_v15, %s14286_s24  ;;  %v5664_v15 = vmul.f32 %v10944_v58, %v13134_v1 }
0x1343   : > { %6086 = vrot.lane.b32.xlu1 %v12791_v62, %s14286_s24  ;;  %v5671_v62 = vpack.c.bf16 %v5665_v9, %v5664_v15 }
0x1349   : > { %v5653_v16 = vpop.xlane.xlu1 %5652 }
0x134a   : > { %10945 = vrcp.f32 %v5653_v16 }
0x134b   : > { %10947 = vrcp.f32 %v13218_v48 }
0x134c   : > { %10949 = vrcp.f32 %v13216_v30 }
0x134d   : > { %v5647_v49 = vpop.xlane.xlu1 %5646 }
0x134e   : > { %10951 = vrcp.f32 %v5647_v49 }
0x1351   : > { %v5681_v14 = vpop.permute.xlu1 %5680 }
0x1352   : > { %9941 = vmatprep.subr.bf16.mxu0 %v5681_v14 }
0x1353   : > { %9942 = vmatpush3.bf16.msra.mxu0 %v5681_v14 }
0x1354   : > { %v10946_v43 = vpop.eup %10945  ;;  %9951 = vmatprep.subr.bf16.mxu0 %v10341_v35 }
0x1355   : > { %v5876_v34 = vpop.permute.xlu1 %5875  ;;  %v10948_v26 = vpop.eup %10947  ;;  %v5669_v0 = vmul.f32 %v10946_v43, %v13202_v45 }
0x1356   : > { %9944 = vmatmul.mubr.msk.bf16.vlgmr.msra.gmra.mrb[128].mxu0 %vm2043_vm2, %v5671_v62  ;;  %9976 = vmatmul.mubr.msk.bf16.gmra.mrb[124].mxu1 %vm1937_vm0, %v5876_v34  ;;  %v10950_v48 = vpop.eup %10949  ;;  %v5666_v55 = vmul.f32 %v10948_v26, %v13150_v27  ;;  %v10342_v27 = vld [vmem:[%s14283_s2 + $0x68] sm:$0xff]  }
0x1357   : > { %6567 = vmatprep.mubr.bf16.mxu1 %v14282_v25  ;;  %v5668_v39 = vmul.f32 %v10950_v48, %v13146_v17  ;;  %9952 = vmatpush3.bf16.msra.mxu0 %v10341_v35 }
0x1358   : > { %v10952_v30 = vpop.eup %10951  ;;  %9953 = vmatprep.subr.bf16.mxu0 %v10342_v27 }
0x1359   : > { %v5667_v1 = vmul.f32 %v10952_v30, %v13206_v19  ;;  %v5673_v3 = vpack.c.bf16 %v5669_v0, %v5668_v39 }
0x135b   : > { %v5672_v53 = vpack.c.bf16 %v5667_v1, %v5666_v55  ;;  %9954 = vmatpush3.bf16.msra.mxu0 %v10342_v27 }
0x135d   : > { %9947 = vmatprep.mubr.msk.bf16.mxu0 %vm2043_vm2, %v5672_v53 }
0x135e   : > { %9948 = vmatmul.mubr.msk.bf16.gmra.mrb[132].mxu0 %vm2043_vm2, %v5673_v3 }
0x13b9   : > { %v5992_v45 = vpop.xlane.xlu0 %5991 }
0x13ba   : > { %v6014_v17 = vsub.f32 %v13243_v46, %v5992_v45 }
0x13bb   : > { %v5995_v19 = vpop.xlane.xlu1 %5994 }
0x13bc   : > { %v6022_v38 = vmul.f32 1.442695, %v6014_v17  ;;  %v6015_v54 = vsub.f32 %v13247_v57, %v5995_v19 }
0x13bd   : > { %v5998_v59 = vpop.xlane.xlu0 %5997 }
0x13be   : > { %v6016_v7 = vsub.f32 %v5984_v52, %v5998_v59  ;;  %v6024_v56 = vmul.f32 1.442695, %v6015_v54 }
0x13bf   : > { %v6085_v3 = vpop.permute.xlu1 %6084 }
0x13c0   : > { %v6026_v11 = vmul.f32 1.442695, %v6016_v7 }
0x13c1   : > { %v6001_v12 = vpop.xlane.xlu0 %6000 }
0x13c2   : > { %10953 = vpow2.f32 %v6026_v11  ;;  %v6017_v44 = vsub.f32 %v5985_v29, %v6001_v12 }
0x13c3   : > { %10955 = vpow2.f32 %v6022_v38  ;;  %v6087_v35 = vpop.permute.xlu1 %6086 }
0x13c4   : > { %v6028_v32 = vmul.f32 1.442695, %v6017_v44 }
0x13c6   : > { %10957 = vpow2.f32 %v6028_v32 }
0x13c7   : > { %10959 = vpow2.f32 %v6024_v56 }
0x13cc   : > { %v13287_v36 = vpop.eup %10953 }
0x13cd   : > { %v6044_v37 = vsel %vm2043_vm2, %v13287_v36, 0.0  ;;  %v13291_v24 = vpop.eup %10955 }
0x13ce   : > { %6045 = vadd.xlane.f32.xlu0 %v6044_v37  ;;  %v6038_v41 = vsel %vm2043_vm2, %v13291_v24, 0.0 }
0x13d0   : > { %v13293_v18 = vpop.eup %10957 }
0x13d1   : > { %v6047_v46 = vsel %vm2043_vm2, %v13293_v18, 0.0  ;;  %v13299_v28 = vpop.eup %10959 }
0x13d2   : > { %6039 = vadd.xlane.f32.xlu0 %v6038_v41  ;;  %6048 = vadd.xlane.f32.xlu1 %v6047_v46  ;;  %v6041_v60 = vsel %vm2043_vm2, %v13299_v28, 0.0 }
0x13d6   : > { %6042 = vadd.xlane.f32.xlu1 %v6041_v60 }
0x13e7   : > { %6088 = vrot.lane.b32.xlu1 %v12787_v5, %s14286_s24 }
0x13e8   : > { %6082 = vrot.lane.b32.xlu0 %v12747_v13, %s14286_s24 }
0x1429   : > { %v9945_v52 = vpop.f32.mrb[128].mxu0  ;;  %v9977_v21 = vpop.f32.mrb[124].mxu1 }
0x142a   : > { %v5732_v57 = vpop.f32.mrb[129].mxu0  ;;  %v5959_v47 = vpop.f32.mrb[125].mxu1  ;;  %v5980_v50 = vmul.f32 0.17677669, %v9977_v21 }
0x142b   : > { %v5978_v29 = vmul.f32 0.17677669, %v5959_v47  ;;  %v9946_v2 = vpop.f32.mrb[130].mxu0  ;;  %v9978_v20 = vpop.f32.mrb[126].mxu1 }
0x142c   : > { %v5764_v16 = vpack.c.bf16 %v9946_v2, %v9945_v52  ;;  %v5735_v33 = vpop.f32.mrb[131].mxu0  ;;  %v5962_v49 = vpop.f32.mrb[127].mxu1  ;;  %v13309_v5 = vadd.f32 %v5980_v50, %v11690_v4  ;;  %v5981_v15 = vmul.f32 0.17677669, %v9978_v20 }
0x142d   : > { %v5986_v58 = vadd.f32 %v5978_v29, %v11690_v4  ;;  %v5763_v9 = vpack.c.bf16 %v5735_v33, %v5732_v57  ;;  %v5979_v14 = vmul.f32 0.17677669, %v5962_v49 }
0x142e   : > { %v5989_v48 = vadd.f32 %v5981_v15, %v11690_v4  ;;  %v6008_v0 = vsel %vm2043_vm2, %v13309_v5, -inf  ;;  %v10344_v15 = vld [vmem:[%s14283_s2 + $0x78] sm:$0xff]  }
0x142f   : > { %v5987_v13 = vadd.f32 %v5979_v14, %v11690_v4  ;;  %9955 = vmatprep.mubr.msk.bf16.mxu0 %vm1937_vm0, %v5763_v9  ;;  %v6002_v62 = vsel %vm2043_vm2, %v5986_v58, -inf }
0x1430   : > { %9956 = vmatmul.mubr.msk.bf16.vlgmr.msra.gmra.mrb[120].mxu0 %vm1937_vm0, %v5764_v16  ;;  %6003 = vmax.xlane.f32.xlu0 %v6002_v62  ;;  %v6011_v53 = vsel %vm2043_vm2, %v5989_v48, -inf }
0x1431   : > { %v9949_v43 = vpop.f32.mrb[132].mxu0  ;;  %v6005_v34 = vsel %vm2043_vm2, %v5987_v13, -inf }
0x1432   : > { %v5748_v26 = vpop.f32.mrb[133].mxu0  ;;  %6006 = vmax.xlane.f32.xlu1 %v6005_v34 }
0x1433   : > { %v9950_v30 = vpop.f32.mrb[134].mxu0 }
0x1434   : > { %v5766_v55 = vpack.c.bf16 %v9950_v30, %v9949_v43  ;;  %v5751_v1 = vpop.f32.mrb[135].mxu0  ;;  %6009 = vmax.xlane.f32.xlu0 %v6008_v0 }
0x1435   : > { %v5765_v39 = vpack.c.bf16 %v5751_v1, %v5748_v26 }
0x1437   : > { %9959 = vmatprep.mubr.msk.bf16.mxu0 %vm1937_vm0, %v5765_v39 }
0x1438   : > { %9960 = vmatmul.mubr.msk.bf16.gmra.mrb[124].mxu0 %vm1937_vm0, %v5766_v55  ;;  %6012 = vmax.xlane.f32.xlu0 %v6011_v53 }
0x145b   : > { %v6046_v27 = vpop.xlane.xlu0 %6045 }
0x145f   : > { %v6040_v45 = vpop.xlane.xlu0 %6039  ;;  %v6049_v4 = vpop.xlane.xlu1 %6048 }
0x1460   : > { %10961 = vrcp.f32 %v6049_v4 }
0x1461   : > { %10963 = vrcp.f32 %v6040_v45 }
0x1462   : > { %10965 = vrcp.f32 %v6046_v27 }
0x1463   : > { %v6083_v17 = vpop.permute.xlu0 %6082  ;;  %v6043_v19 = vpop.xlane.xlu1 %6042 }
0x1464   : > { %10967 = vrcp.f32 %v6043_v19  ;;  %9979 = vmatprep.subr.bf16.mxu0 %v6083_v17 }
0x1465   : > { %9980 = vmatpush3.bf16.msra.mxu0 %v6083_v17 }
0x1466   : > { %9981 = vmatprep.subr.bf16.mxu0 %v6085_v3 }
0x1467   : > { %v6089_v54 = vpop.permute.xlu1 %6088 }
0x1469   : > { %9982 = vmatpush3.bf16.msra.mxu0 %v6085_v3 }
0x146a   : > { %9983 = vmatprep.subr.bf16.mxu0 %v6087_v35  ;;  %v10962_v59 = vpop.eup %10961 }
0x146b   : > { %v10964_v7 = vpop.eup %10963  ;;  %v6073_v12 = vmul.f32 %v10962_v59, %v13293_v18 }
0x146c   : > { %v10966_v38 = vpop.eup %10965  ;;  %v6070_v44 = vmul.f32 %v10964_v7, %v13291_v24 }
0x146d   : > { %9984 = vmatpush3.bf16.msra.mxu0 %v6087_v35  ;;  %v6072_v32 = vmul.f32 %v10966_v38, %v13287_v36 }
0x146e   : > { %v10968_v11 = vpop.eup %10967  ;;  %9985 = vmatprep.subr.bf16.mxu0 %v6089_v54 }
0x146f   : > { %v6071_v56 = vmul.f32 %v10968_v11, %v13299_v28  ;;  %v6079_v41 = vpack.c.bf16 %v6073_v12, %v6072_v32  ;;  %v13348_v32 = vld [vmem:[%s14225_s9 + $0x1] ss:$0 sm:$0xff] }
0x1471   : > { %9986 = vmatpush3.bf16.msra.mxu0 %v6089_v54  ;;  %v6078_v37 = vpack.c.bf16 %v6071_v56, %v6070_v44 }
0x1473   : > { %9987 = vmatprep.mubr.msk.bf16.mxu0 %vm2043_vm2, %v6078_v37 }
0x1474   : > { %9988 = vmatmul.mubr.msk.bf16.vlgmr.msra.gmra.mrb[136].mxu0 %vm2043_vm2, %v6079_v41 }
0x14bd   : > { %v6004_v46 = vpop.xlane.xlu0 %6003 }
0x14be   : > { %v6018_v60 = vsub.f32 %v5986_v58, %v6004_v46 }
0x14bf   : > { %v6007_v52 = vpop.xlane.xlu1 %6006 }
0x14c0   : > { %v6030_v21 = vmul.f32 1.442695, %v6018_v60  ;;  %v6019_v57 = vsub.f32 %v5987_v13, %v6007_v52 }
0x14c1   : > { %v6010_v18 = vpop.xlane.xlu0 %6009 }
0x14c2   : > { %10969 = vpow2.f32 %v6030_v21  ;;  %v6032_v47 = vmul.f32 1.442695, %v6019_v57  ;;  %v6020_v24 = vsub.f32 %v13309_v5, %v6010_v18  ;;  %v10343_v5 = vld [vmem:[%s14283_s2 + $0x70] sm:$0xff]   ;;  %v10345_v18 = vld [vmem:[%s14228_s12 + $0x80] ss:$8 sps:$4 sm:$0xff]   ;;  %s747_s2 = scalar_lea.vmem %s14287_s5, %s8565_s25 }
0x14c3   : > { %9995 = vmatprep.subr.bf16.mxu0 %v10343_v5 }
0x14c4   : > { %10971 = vpow2.f32 %v6032_v47  ;;  %v6034_v28 = vmul.f32 1.442695, %v6020_v24  ;;  %9996 = vmatpush3.bf16.msra.mxu0 %v10343_v5  ;;  %v10350_v47 = vld [vmem:[%s14228_s12 + $0x94] ss:$8 sps:$4 sm:$0xff]   ;;  %v10354_v5 = vld [vmem:[%s14228_s12 + $0xb0] ss:$8 sps:$4 sm:$0xff]  }
0x14c5   : > { %v6013_v36 = vpop.xlane.xlu0 %6012  ;;  %9997 = vmatprep.subr.bf16.mxu0 %v10344_v15 }
0x14c6   : > { %10973 = vpow2.f32 %v6034_v28  ;;  %v6021_v50 = vsub.f32 %v5989_v48, %v6013_v36 }
0x14c8   : > { %v6036_v29 = vmul.f32 1.442695, %v6021_v50  ;;  %9998 = vmatpush3.bf16.msra.mxu0 %v10344_v15  ;;  %v10359_v15 = vld [vmem:[%s14228_s12 + $0xc4] ss:$8 sps:$4 sm:$0xff]  }
0x14ca   : > { %10975 = vpow2.f32 %v6036_v29 }
0x14cc   : > { %v10970_v2 = vpop.eup %10969 }
0x14cd   : > { %v6050_v20 = vsel %vm2043_vm2, %v10970_v2, 0.0 }
0x14ce   : > { %v10972_v16 = vpop.eup %10971  ;;  %6051 = vadd.xlane.f32.xlu0 %v6050_v20 }
0x14cf   : > { %v6053_v33 = vsel %vm2043_vm2, %v10972_v16, 0.0 }
0x14d0   : > { %v10974_v49 = vpop.eup %10973  ;;  %6054 = vadd.xlane.f32.xlu1 %v6053_v33 }
0x14d1   : > { %v6056_v58 = vsel %vm2043_vm2, %v10974_v49, 0.0 }
0x14d2   : > { %6057 = vadd.xlane.f32.xlu0 %v6056_v58 }
0x14d4   : > { %v10976_v9 = vpop.eup %10975 }
0x14d5   : > { %v6059_v14 = vsel %vm2043_vm2, %v10976_v9, 0.0 }
0x14d6   : > { %6060 = vadd.xlane.f32.xlu1 %v6059_v14  ;;  %v10351_v14 = vld [vmem:[%s14228_s12 + $0xa0] ss:$8 sps:$4 sm:$0xff]  }
0x1547   : > { %v9989_v13 = vpop.f32.mrb[136].mxu0 }
0x1548   : > { %v6140_v62 = vpop.f32.mrb[137].mxu0 }
0x1549   : > { %v9990_v43 = vpop.f32.mrb[138].mxu0 }
0x154a   : > { %v6172_v34 = vpack.c.bf16 %v9990_v43, %v9989_v13  ;;  %v6143_v26 = vpop.f32.mrb[139].mxu0  ;;  %v10357_v13 = vld [vmem:[%s14228_s12 + $0xc0] ss:$8 sps:$4 sm:$0xff]   ;;  %v10360_v43 = vld [vmem:[%s14228_s12 + $0xd0] ss:$8 sps:$4 sm:$0xff]  }
0x154b   : > { %v6171_v48 = vpack.c.bf16 %v6143_v26, %v6140_v62  ;;  %v10362_v62 = vld [vmem:[%s14228_s12 + $0xd4] ss:$8 sps:$4 sm:$0xff]   ;;  %v10363_v26 = vld [vmem:[%s14228_s12 + $0xe0] ss:$8 sps:$4 sm:$0xff]  }
0x155b   : > { %v6052_v30 = vpop.xlane.xlu0 %6051 }
0x155c   : > { %10977 = vrcp.f32 %v6052_v30  ;;  %v10366_v30 = vld [vmem:[%s14228_s12 + $0xf0] ss:$8 sps:$4 sm:$0xff]  }
0x155d   : > { %v6055_v0 = vpop.xlane.xlu1 %6054 }
0x155e   : > { %10979 = vrcp.f32 %v6055_v0 }
0x155f   : > { %v6058_v55 = vpop.xlane.xlu0 %6057 }
0x1560   : > { %10981 = vrcp.f32 %v6058_v55 }
0x1563   : > { %v6061_v1 = vpop.xlane.xlu1 %6060 }
0x1564   : > { %10983 = vrcp.f32 %v6061_v1 }
0x1566   : > { %v10978_v39 = vpop.eup %10977 }
0x1567   : > { %v6074_v3 = vmul.f32 %v10978_v39, %v10970_v2 }
0x1568   : > { %v10980_v53 = vpop.eup %10979 }
0x1569   : > { %v6075_v35 = vmul.f32 %v10980_v53, %v10972_v16 }
0x156a   : > { %v10982_v45 = vpop.eup %10981 }
0x156b   : > { %v6080_v27 = vpack.c.bf16 %v6075_v35, %v6074_v3  ;;  %v6076_v17 = vmul.f32 %v10982_v45, %v10974_v49 }
0x156d   : > { %9991 = vmatprep.mubr.msk.bf16.mxu0 %vm2043_vm2, %v6080_v27 }
0x156e   : > { %v10984_v4 = vpop.eup %10983 }
0x156f   : > { %v6077_v19 = vmul.f32 %v10984_v4, %v10976_v9 }
0x1571   : > { %v6081_v59 = vpack.c.bf16 %v6077_v19, %v6076_v17 }
0x1573   : > { %9992 = vmatmul.mubr.msk.bf16.gmra.mrb[140].mxu0 %vm2043_vm2, %v6081_v59 }
0x1574   : > { %9999 = vmatprep.mubr.msk.bf16.mxu0 %vm1937_vm0, %v6171_v48  ;;  %v10368_v48 = vld [vmem:[%s14228_s12 + $0xf4] ss:$8 sps:$4 sm:$0xff]  }
0x157b   : > { %10000 = vmatmul.mubr.msk.bf16.vlgmr.msra.gmra.mrb[120].mxu0 %vm1937_vm0, %v6172_v34  ;;  %v10365_v34 = vld [vmem:[%s14228_s12 + $0xe4] ss:$8 sps:$4 sm:$0xff]  }
0x1646   : > { %v9993_v7 = vpop.f32.mrb[140].mxu0 }
0x1647   : > { %v6156_v38 = vpop.f32.mrb[141].mxu0 }
0x1648   : > { %v9994_v54 = vpop.f32.mrb[142].mxu0 }
0x1649   : > { %v6174_v11 = vpack.c.bf16 %v9994_v54, %v9993_v7  ;;  %v6159_v12 = vpop.f32.mrb[143].mxu0 }
0x164a   : > { %v6173_v44 = vpack.c.bf16 %v6159_v12, %v6156_v38 }
0x164c   : > { %10003 = vmatprep.mubr.msk.bf16.mxu0 %vm1937_vm0, %v6173_v44 }
0x164d   : > { %10004 = vmatmul.mubr.msk.bf16.gmra.mrb[124].mxu0 %vm1937_vm0, %v6174_v11 }
0x164e   : > { %v10001_v56 = vpop.f32.mrb[120].mxu0 }
0x164f   : > { %v6238_v37 = vpop.f32.mrb[121].mxu0  ;;  %v6279_v2 = vadd.f32 %v10001_v56, %v12551_v6  ;;  %v10353_v6 = vld [vmem:[%s14228_s12 + $0xa4] ss:$8 sps:$4 sm:$0xff]  }
0x1650   : > { %v6277_v41 = vadd.f32 %v6238_v37, %v12543_v31  ;;  %v10002_v46 = vpop.f32.mrb[122].mxu0  ;;  %v10347_v31 = vld [vmem:[%s14228_s12 + $0x84] ss:$8 sps:$4 sm:$0xff]  }
0x1651   : > { %v6241_v60 = vpop.f32.mrb[123].mxu0  ;;  %6535 = vmatprep.subr.bf16.mxu1 %v10347_v31  ;;  %v6280_v33 = vadd.f32 %v10002_v46, %v12555_v42  ;;  %v6295_v58 = vadd.f32 %v13348_v32, %v6279_v2  ;;  %v10356_v42 = vld [vmem:[%s14228_s12 + $0xb4] ss:$8 sps:$4 sm:$0xff]   ;;  %v13437_v46 = vld [vmem:[%s14226_s10 + $0x1] ss:$0 sm:$0xff] }
0x1652   : > { %v13352_v52 = vadd.f32 %v13348_v32, %v6277_v41  ;;  %v6278_v21 = vadd.f32 %v6241_v60, %v12547_v40  ;;  %6536 = vmatpush1.bf16.msra.mxu1 %v10345_v18  ;;  %v10348_v40 = vld [vmem:[%s14228_s12 + $0x90] ss:$8 sps:$4 sm:$0xff]   ;;  %v13445_v31 = vld [vmem:[%s14227_s11 + $0x1] ss:$0 sm:$0xff] }
0x1653   : > { %6537 = vmatprep.subr.bf16.mxu1 %v10350_v47  ;;  %v6296_v9 = vadd.f32 %v13348_v32, %v6280_v33 }
0x1654   : > { %v6294_v57 = vadd.f32 %v13348_v32, %v6278_v21  ;;  %6301 = vadd.xlane.f32.xlu0 %v13352_v52 }
0x1656   : > { %6303 = vadd.xlane.f32.xlu1 %v6294_v57  ;;  %6538 = vmatpush1.bf16.msra.mxu1 %v10348_v40 }
0x1657   : > { %6539 = vmatprep.subr.bf16.mxu1 %v10353_v6 }
0x165a   : > { %6540 = vmatpush1.bf16.msra.mxu1 %v10351_v14 }
0x165b   : > { %6541 = vmatprep.subr.bf16.mxu1 %v10356_v42 }
0x165e   : > { %6542 = vmatpush1.bf16.msra.mxu1 %v10354_v5 }
0x165f   : > { %6543 = vmatprep.subr.bf16.mxu1 %v10359_v15 }
0x1662   : > { %6544 = vmatpush1.bf16.msra.mxu1 %v10357_v13 }
0x1663   : > { %6545 = vmatprep.subr.bf16.mxu1 %v10362_v62  ;;  %v10369_v62 = vld [vmem:[%s14230_s14 + $0xc0] sm:$0xff]  }
0x1664   : > { %9536 = vmatprep.subr.bf16.mxu0 %v10369_v62 }
0x1666   : > { %6546 = vmatpush1.bf16.msra.mxu1 %v10360_v43  ;;  %v10370_v43 = vld [vmem:[%s14230_s14 + $0x80] sm:$0xff]  }
0x1667   : > { %6547 = vmatprep.subr.bf16.mxu1 %v10365_v34  ;;  %9537 = vmatpush3.bf16.msra.mxu0 %v10370_v43  ;;  %v10371_v34 = vld [vmem:[%s14230_s14 + $0xc8] sm:$0xff]  }
0x1668   : > { %9538 = vmatprep.subr.bf16.mxu0 %v10371_v34 }
0x166a   : > { %6548 = vmatpush1.bf16.msra.mxu1 %v10363_v26  ;;  %v10372_v26 = vld [vmem:[%s14230_s14 + $0x88] sm:$0xff]  }
0x166b   : > { %6549 = vmatprep.subr.bf16.mxu1 %v10368_v48  ;;  %9539 = vmatpush3.bf16.msra.mxu0 %v10372_v26  ;;  %v10373_v48 = vld [vmem:[%s14230_s14 + $0xd0] sm:$0xff]  }
0x166c   : > { %9540 = vmatprep.subr.bf16.mxu0 %v10373_v48 }
0x166e   : > { %6550 = vmatpush1.bf16.msra.mxu1 %v10366_v30  ;;  %v10374_v30 = vld [vmem:[%s14230_s14 + $0x90] sm:$0xff]  }
0x166f   : > { %9541 = vmatpush3.bf16.msra.mxu0 %v10374_v30 }
0x16e1   : > { %v6302_v24 = vpop.xlane.xlu0 %6301 }
0x16e2   : > { %v6317_v28 = vmul.f32 0.0078125, %v6302_v24 }
0x16e3   : > { %v6304_v36 = vpop.xlane.xlu1 %6303 }
0x16e4   : > { %v13370_v50 = vsub.f32 %v13352_v52, %v6317_v28  ;;  %v6318_v29 = vmul.f32 0.0078125, %v6304_v36 }
0x16e6   : > { %v13373_v20 = vsub.f32 %v6294_v57, %v6318_v29  ;;  %v6333_v16 = vmul.f32 %v13370_v50, %v13370_v50 }
0x16e8   : > { %6341 = vadd.xlane.f32.xlu0 %v6333_v16  ;;  %v6334_v49 = vmul.f32 %v13373_v20, %v13373_v20 }
0x16ea   : > { %6343 = vadd.xlane.f32.xlu1 %v6334_v49 }
0x16ec   : > { %6305 = vadd.xlane.f32.xlu0 %v6295_v58 }
0x16ee   : > { %6307 = vadd.xlane.f32.xlu1 %v6296_v9 }
0x1720   : > { %v10005_v0 = vpop.f32.mrb[124].mxu0 }
0x1721   : > { %v6254_v55 = vpop.f32.mrb[125].mxu0  ;;  %v6283_v3 = vadd.f32 %v10005_v0, %v12567_v23  ;;  %v10375_v0 = vld [vmem:[%s14230_s14 + $0xd8] sm:$0xff]  }
0x1722   : > { %v6281_v1 = vadd.f32 %v6254_v55, %v12559_v10  ;;  %v10006_v39 = vpop.f32.mrb[126].mxu0  ;;  %v10376_v55 = vld [vmem:[%s14230_s14 + $0x98] sm:$0xff]   ;;  %9542 = vmatprep.subr.bf16.mxu0 %v10375_v0 }
0x1723   : > { %v6257_v53 = vpop.f32.mrb[127].mxu0  ;;  %v6284_v45 = vadd.f32 %v10006_v39, %v12571_v51  ;;  %v6299_v17 = vadd.f32 %v13348_v32, %v6283_v3  ;;  %9543 = vmatpush3.bf16.msra.mxu0 %v10376_v55  ;;  %v10378_v39 = vld [vmem:[%s14230_s14 + $0xa0] sm:$0xff]   ;;  %v10380_v3 = vld [vmem:[%s14230_s14 + $0xa8] sm:$0xff]  }
0x1724   : > { %v6297_v35 = vadd.f32 %v13348_v32, %v6281_v1  ;;  %v6282_v27 = vadd.f32 %v6257_v53, %v12563_v8  ;;  %v10377_v1 = vld [vmem:[%s14230_s14 + $0xe0] sm:$0xff]   ;;  %v10379_v53 = vld [vmem:[%s14230_s14 + $0xe8] sm:$0xff]  }
0x1725   : > { %v6300_v19 = vadd.f32 %v13348_v32, %v6284_v45  ;;  %9544 = vmatprep.subr.bf16.mxu0 %v10377_v1  ;;  %v10383_v45 = vld [vmem:[%s14230_s14 + $0xf8] sm:$0xff]  }
0x1726   : > { %v6298_v4 = vadd.f32 %v13348_v32, %v6282_v27  ;;  %6309 = vadd.xlane.f32.xlu0 %v6297_v35  ;;  %v10382_v27 = vld [vmem:[%s14230_s14 + $0xb0] sm:$0xff]  }
0x1727   : > { %9545 = vmatpush3.bf16.msra.mxu0 %v10378_v39 }
0x1728   : > { %6311 = vadd.xlane.f32.xlu1 %v6298_v4  ;;  %9546 = vmatprep.subr.bf16.mxu0 %v10379_v53 }
0x172a   : > { %6313 = vadd.xlane.f32.xlu0 %v6299_v17 }
0x172b   : > { %9547 = vmatpush3.bf16.msra.mxu0 %v10380_v3 }
0x172c   : > { %6315 = vadd.xlane.f32.xlu1 %v6300_v19 }
0x1775   : > { %v6342_v10 = vpop.xlane.xlu0 %6341 }
0x1776   : > { %v6357_v59 = vmul.f32 0.0078125, %v6342_v10 }
0x1777   : > { %v6344_v7 = vpop.xlane.xlu1 %6343 }
0x1778   : > { %v6365_v23 = vadd.f32 1e-06, %v6357_v59  ;;  %v6358_v38 = vmul.f32 0.0078125, %v6344_v7 }
0x1779   : > { %v6306_v54 = vpop.xlane.xlu0 %6305 }
0x177a   : > { %10985 = vrsqrt.f32 %v6365_v23  ;;  %v6366_v8 = vadd.f32 1e-06, %v6358_v38  ;;  %v6319_v11 = vmul.f32 0.0078125, %v6306_v54 }
0x177b   : > { %v6308_v51 = vpop.xlane.xlu1 %6307 }
0x177c   : > { %10987 = vrsqrt.f32 %v6366_v8  ;;  %v13426_v12 = vsub.f32 %v6295_v58, %v6319_v11  ;;  %v6320_v44 = vmul.f32 0.0078125, %v6308_v51 }
0x177e   : > { %v13428_v56 = vsub.f32 %v6296_v9, %v6320_v44  ;;  %v6335_v32 = vmul.f32 %v13426_v12, %v13426_v12 }
0x1780   : > { %6345 = vadd.xlane.f32.xlu0 %v6335_v32  ;;  %v6336_v37 = vmul.f32 %v13428_v56, %v13428_v56 }
0x1782   : > { %6347 = vadd.xlane.f32.xlu1 %v6336_v37 }
0x1784   : > { %v10986_v41 = vpop.eup %10985 }
0x1785   : > { %v6381_v60 = vmul.f32 %v10986_v41, %v13370_v50 }
0x1786   : > { %v10988_v21 = vpop.eup %10987 }
0x1787   : > { %v6397_v57 = vmul.f32 %v13437_v46, %v6381_v60  ;;  %v6382_v18 = vmul.f32 %v10988_v21, %v13373_v20 }
0x1789   : > { %v6398_v47 = vmul.f32 %v13437_v46, %v6382_v18  ;;  %v6413_v40 = vadd.f32 %v13445_v31, %v6397_v57 }
0x178b   : > { %v6414_v24 = vadd.f32 %v13445_v31, %v6398_v47 }
0x178d   : > { %v6421_v28 = vpack.c.bf16 %v6414_v24, %v6413_v40 }
0x178f   : > { %6568 = vmatmul.mubr.bf16.vlgmr.msra.gmra.mrb[128].mxu1 %v6421_v28 }
0x1790   : > { %6577 = vmatprep.mubr.bf16.mxu1 %v14282_v25 }
0x17b3   : > { %v6310_v36 = vpop.xlane.xlu0 %6309 }
0x17b4   : > { %v6321_v50 = vmul.f32 0.0078125, %v6310_v36 }
0x17b5   : > { %v6312_v29 = vpop.xlane.xlu1 %6311 }
0x17b6   : > { %v13451_v2 = vsub.f32 %v6297_v35, %v6321_v50  ;;  %v6322_v20 = vmul.f32 0.0078125, %v6312_v29  ;;  %v10381_v35 = vld [vmem:[%s14230_s14 + $0xf0] sm:$0xff]  }
0x17b7   : > { %v6314_v16 = vpop.xlane.xlu0 %6313  ;;  %9548 = vmatprep.subr.bf16.mxu0 %v10381_v35 }
0x17b8   : > { %v13453_v33 = vsub.f32 %v6298_v4, %v6322_v20  ;;  %v6323_v49 = vmul.f32 0.0078125, %v6314_v16  ;;  %v6337_v58 = vmul.f32 %v13451_v2, %v13451_v2  ;;  %9549 = vmatpush3.bf16.msra.mxu0 %v10382_v27  ;;  %v10384_v4 = vld [vmem:[%s14230_s14 + $0xb8] sm:$0xff]  }
0x17b9   : > { %v6316_v9 = vpop.xlane.xlu1 %6315  ;;  %9550 = vmatprep.subr.bf16.mxu0 %v10383_v45 }
0x17ba   : > { %v13457_v6 = vsub.f32 %v6299_v17, %v6323_v49  ;;  %v6324_v14 = vmul.f32 0.0078125, %v6316_v9  ;;  %6349 = vadd.xlane.f32.xlu0 %v6337_v58  ;;  %v6338_v42 = vmul.f32 %v13453_v33, %v13453_v33 }
0x17bc   : > { %v13461_v5 = vsub.f32 %v6300_v19, %v6324_v14  ;;  %6351 = vadd.xlane.f32.xlu1 %v6338_v42  ;;  %v6339_v15 = vmul.f32 %v13457_v6, %v13457_v6  ;;  %9551 = vmatpush3.bf16.msra.mxu0 %v10384_v4 }
0x17be   : > { %6353 = vadd.xlane.f32.xlu0 %v6339_v15  ;;  %v6340_v13 = vmul.f32 %v13461_v5, %v13461_v5  ;;  %v8923_v15 = vld [vmem:[%s14229_s13 + $0x2] sm:$0x3] }
0x17bf   : > { %v13538_v48 = vrot.slane %v8923_v15, %v11549_v63 }
0x17c0   : > { %6355 = vadd.xlane.f32.xlu1 %v6340_v13 }
0x180d   : > { %v6346_v17 = vpop.xlane.xlu0 %6345 }
0x180e   : > { %v6359_v19 = vmul.f32 0.0078125, %v6346_v17 }
0x180f   : > { %v6348_v10 = vpop.xlane.xlu1 %6347 }
0x1810   : > { %v6367_v59 = vadd.f32 1e-06, %v6359_v19  ;;  %v6360_v7 = vmul.f32 0.0078125, %v6348_v10 }
0x1812   : > { %10989 = vrsqrt.f32 %v6367_v59  ;;  %v6368_v23 = vadd.f32 1e-06, %v6360_v7 }
0x1814   : > { %10991 = vrsqrt.f32 %v6368_v23 }
0x181c   : > { %v10990_v38 = vpop.eup %10989 }
0x181d   : > { %v6383_v54 = vmul.f32 %v10990_v38, %v13426_v12 }
0x181e   : > { %v10992_v8 = vpop.eup %10991 }
0x181f   : > { %v6384_v11 = vmul.f32 %v10992_v8, %v13428_v56  ;;  %v6399_v51 = vmul.f32 %v13437_v46, %v6383_v54 }
0x1821   : > { %v6400_v44 = vmul.f32 %v13437_v46, %v6384_v11  ;;  %v6415_v32 = vadd.f32 %v13445_v31, %v6399_v51 }
0x1823   : > { %v6416_v37 = vadd.f32 %v13445_v31, %v6400_v44 }
0x1825   : > { %v6422_v41 = vpack.c.bf16 %v6416_v37, %v6415_v32 }
0x1827   : > { %6578 = vmatmul.mubr.bf16.gmra.mrb[132].mxu1 %v6422_v41 }
0x1828   : > { %6587 = vmatprep.mubr.bf16.mxu1 %v14282_v25 }
0x1847   : > { %v6350_v60 = vpop.xlane.xlu0 %6349 }
0x1848   : > { %v6361_v21 = vmul.f32 0.0078125, %v6350_v60 }
0x1849   : > { %v6352_v57 = vpop.xlane.xlu1 %6351 }
0x184a   : > { %v6369_v18 = vadd.f32 1e-06, %v6361_v21  ;;  %v6362_v12 = vmul.f32 0.0078125, %v6352_v57 }
0x184b   : > { %v6354_v47 = vpop.xlane.xlu0 %6353 }
0x184c   : > { %10993 = vrsqrt.f32 %v6369_v18  ;;  %v6370_v56 = vadd.f32 1e-06, %v6362_v12  ;;  %v6363_v40 = vmul.f32 0.0078125, %v6354_v47 }
0x184d   : > { %v6356_v24 = vpop.xlane.xlu1 %6355 }
0x184e   : > { %10995 = vrsqrt.f32 %v6370_v56  ;;  %v6371_v28 = vadd.f32 1e-06, %v6363_v40  ;;  %v6364_v36 = vmul.f32 0.0078125, %v6356_v24 }
0x1850   : > { %10997 = vrsqrt.f32 %v6371_v28  ;;  %v6372_v50 = vadd.f32 1e-06, %v6364_v36 }
0x1852   : > { %10999 = vrsqrt.f32 %v6372_v50 }
0x1856   : > { %v10994_v29 = vpop.eup %10993 }
0x1857   : > { %v6385_v20 = vmul.f32 %v10994_v29, %v13451_v2 }
0x1858   : > { %v10996_v16 = vpop.eup %10995 }
0x1859   : > { %v6386_v49 = vmul.f32 %v10996_v16, %v13453_v33  ;;  %v6401_v58 = vmul.f32 %v13437_v46, %v6385_v20  ;;  %v13534_v33 = vrot.slane %v8923_v15, %v11543_v22  ;;  %v10385_v15 = vld [vmem:[%s14232_s16] ss:$16 sps:$4 sm:$0xff]  }
0x185a   : > { %v10998_v9 = vpop.eup %10997 }
0x185b   : > { %v6402_v14 = vmul.f32 %v13437_v46, %v6386_v49  ;;  %v6417_v13 = vadd.f32 %v13445_v31, %v6401_v58  ;;  %v6387_v43 = vmul.f32 %v10998_v9, %v13457_v6 }
0x185c   : > { %v11000_v42 = vpop.eup %10999 }
0x185d   : > { %v6418_v62 = vadd.f32 %v13445_v31, %v6402_v14  ;;  %v6388_v2 = vmul.f32 %v11000_v42, %v13461_v5  ;;  %v6403_v30 = vmul.f32 %v13437_v46, %v6387_v43  ;;  %v10391_v43 = vld [vmem:[%s14232_s16 + $0x8] ss:$16 sps:$4 sm:$0xff]  }
0x185f   : > { %v6423_v34 = vpack.c.bf16 %v6418_v62, %v6417_v13  ;;  %v6404_v26 = vmul.f32 %v13437_v46, %v6388_v2  ;;  %v6419_v27 = vadd.f32 %v13445_v31, %v6403_v30  ;;  %v10387_v13 = vld [vmem:[%s14232_s16 + $0x4] ss:$16 sps:$4 sm:$0xff]   ;;  %v10393_v2 = vld [vmem:[%s14232_s16 + $0xc] ss:$16 sps:$4 sm:$0xff]  }
0x1860   : > { %v10390_v62 = vld [vmem:[%s14232_s16 + $0x24] ss:$16 sps:$4 sm:$0xff]   ;;  %7569 = vmatprep.subr.bf16.mxu1 %v10387_v13  ;;  %7651 = vmatprep.subr.bf16.mxu0 %v10393_v2  ;;  %v13735_v2 = vld [vmem:[%s747_s2] sm:$0x3] }
0x1861   : > { %6588 = vmatmul.mubr.bf16.gmra.mrb[136].mxu1 %v6423_v34  ;;  %v6420_v5 = vadd.f32 %v13445_v31, %v6404_v26  ;;  %v10388_v34 = vld [vmem:[%s14232_s16 + $0x20] ss:$16 sps:$4 sm:$0xff]   ;;  %v10399_v26 = vld [vmem:[%s14232_s16 + $0x2c] ss:$16 sps:$4 sm:$0xff]   ;;  %v10396_v30 = vld [vmem:[%s14232_s16 + $0x44] ss:$16 sps:$4 sm:$0xff]  }
0x1862   : > { %v6569_v0 = vpop.f32.mrb[128].mxu1  ;;  %6597 = vmatprep.mubr.bf16.mxu1 %v14282_v25  ;;  %7570 = vmatpush1.bf16.msra.mxu1 %v10385_v15  ;;  %v10469_v15 = vld [vmem:[%s14232_s16 + $0x1a8] ss:$16 sps:$4 sm:$0xff]   ;;  %v10474_v13 = vld [vmem:[%s14232_s16 + $0x1e4] ss:$16 sps:$4 sm:$0xff]  }
0x1863   : > { %v6570_v55 = vadd.f32 %v6569_v0, %v13534_v33  ;;  %v6571_v6 = vpop.f32.mrb[129].mxu1  ;;  %v6424_v19 = vpack.c.bf16 %v6420_v5, %v6419_v27  ;;  %7571 = vmatprep.subr.bf16.mxu1 %v10390_v62  ;;  %v10397_v0 = vld [vmem:[%s14232_s16 + $0x28] ss:$16 sps:$4 sm:$0xff]   ;;  %v10402_v5 = vld [vmem:[%s14232_s16 + $0x64] ss:$16 sps:$4 sm:$0xff]  }
0x1864   : > { %v6572_v1 = vadd.f32 %v6571_v6, %v13538_v48  ;;  %v6573_v39 = vpop.f32.mrb[130].mxu1  ;;  %v10394_v6 = vld [vmem:[%s14232_s16 + $0x40] ss:$16 sps:$4 sm:$0xff]  }
0x1865   : > { %v6608_v53 = vmul.f32 %v6570_v55, %v6570_v55  ;;  %v6574_v3 = vadd.f32 %v6573_v39, %v13534_v33  ;;  %v6575_v35 = vpop.f32.mrb[131].mxu1  ;;  %v10411_v39 = vld [vmem:[%s14232_s16 + $0x6c] ss:$16 sps:$4 sm:$0xff]   ;;  %v10406_v27 = vld [vmem:[%s14232_s16 + $0x80] ss:$16 sps:$4 sm:$0xff]  }
0x1866   : > { %v6609_v45 = vmul.f32 %v6572_v1, %v6572_v1  ;;  %v6576_v46 = vadd.f32 %v6575_v35, %v13538_v48  ;;  %7572 = vmatpush1.bf16.msra.mxu1 %v10388_v34  ;;  %v10409_v35 = vld [vmem:[%s14232_s16 + $0x68] ss:$16 sps:$4 sm:$0xff]   ;;  %v10472_v62 = vld [vmem:[%s14232_s16 + $0x1e0] ss:$16 sps:$4 sm:$0xff]  }
0x1867   : > { %v6624_v4 = vmul.f32 %v6608_v53, %v6570_v55  ;;  %v6610_v17 = vmul.f32 %v6574_v3, %v6574_v3  ;;  %7573 = vmatprep.subr.bf16.mxu1 %v10396_v30  ;;  %v10400_v53 = vld [vmem:[%s14232_s16 + $0x60] ss:$16 sps:$4 sm:$0xff]   ;;  %v10475_v34 = vld [vmem:[%s14232_s16 + $0x1c8] ss:$16 sps:$4 sm:$0xff]   ;;  %v10480_v30 = vld [vmem:[%s14232_s16 + $0x204] ss:$16 sps:$4 sm:$0xff]  }
0x1868   : > { %v6625_v10 = vmul.f32 %v6609_v45, %v6572_v1  ;;  %v6611_v59 = vmul.f32 %v6576_v46, %v6576_v46  ;;  %v10414_v45 = vld [vmem:[%s14232_s16 + $0xa4] ss:$16 sps:$4 sm:$0xff]  }
0x1869   : > { %v6640_v7 = vmul.f32 0.044715, %v6624_v4  ;;  %v6626_v23 = vmul.f32 %v6610_v17, %v6574_v3  ;;  %6598 = vmatmul.mubr.bf16.gmra.mrb[140].mxu1 %v6424_v19  ;;  %v10417_v4 = vld [vmem:[%s14232_s16 + $0x8c] ss:$16 sps:$4 sm:$0xff]   ;;  %v10415_v17 = vld [vmem:[%s14232_s16 + $0x88] ss:$16 sps:$4 sm:$0xff]  }
0x186a   : > { %v6641_v38 = vmul.f32 0.044715, %v6625_v10  ;;  %v6627_v54 = vmul.f32 %v6611_v59, %v6576_v46  ;;  %7574 = vmatpush1.bf16.msra.mxu1 %v10394_v6  ;;  %v10420_v19 = vld [vmem:[%s14232_s16 + $0xc4] ss:$16 sps:$4 sm:$0xff]   ;;  %v10418_v10 = vld [vmem:[%s14232_s16 + $0xc0] ss:$16 sps:$4 sm:$0xff]  }
0x186b   : > { %v6656_v8 = vadd.f32 %v6640_v7, %v6570_v55  ;;  %v6642_v11 = vmul.f32 0.044715, %v6626_v23  ;;  %7575 = vmatprep.subr.bf16.mxu1 %v10402_v5  ;;  %v10423_v59 = vld [vmem:[%s14232_s16 + $0xac] ss:$16 sps:$4 sm:$0xff]   ;;  %v10421_v7 = vld [vmem:[%s14232_s16 + $0xa8] ss:$16 sps:$4 sm:$0xff]  }
0x186c   : > { %v6657_v51 = vadd.f32 %v6641_v38, %v6572_v1  ;;  %v6643_v44 = vmul.f32 0.044715, %v6627_v54  ;;  %v10426_v23 = vld [vmem:[%s14232_s16 + $0xe4] ss:$16 sps:$4 sm:$0xff]   ;;  %v10424_v38 = vld [vmem:[%s14232_s16 + $0xe0] ss:$16 sps:$4 sm:$0xff]  }
0x186d   : > { %v6672_v32 = vmul.f32 0.7978846, %v6656_v8  ;;  %v6658_v37 = vadd.f32 %v6642_v11, %v6574_v3  ;;  %v10429_v54 = vld [vmem:[%s14232_s16 + $0xcc] ss:$16 sps:$4 sm:$0xff]   ;;  %v10427_v8 = vld [vmem:[%s14232_s16 + $0xc8] ss:$16 sps:$4 sm:$0xff]  }
0x186e   : > { %v6673_v31 = vmul.f32 0.7978846, %v6657_v51  ;;  %v6659_v41 = vadd.f32 %v6643_v44, %v6576_v46  ;;  %7576 = vmatpush1.bf16.msra.mxu1 %v10400_v53  ;;  %v10432_v11 = vld [vmem:[%s14232_s16 + $0x104] ss:$16 sps:$4 sm:$0xff]   ;;  %v10430_v51 = vld [vmem:[%s14232_s16 + $0x100] ss:$16 sps:$4 sm:$0xff]  }
0x186f   : > { %11001 = vtanh.f32 %v6672_v32  ;;  %v6674_v60 = vmul.f32 0.7978846, %v6658_v37  ;;  %v10435_v44 = vld [vmem:[%s14232_s16 + $0xec] ss:$16 sps:$4 sm:$0xff]   ;;  %v10433_v32 = vld [vmem:[%s14232_s16 + $0xe8] ss:$16 sps:$4 sm:$0xff]  }
0x1870   : > { %11003 = vtanh.f32 %v6673_v31  ;;  %v6675_v21 = vmul.f32 0.7978846, %v6659_v41  ;;  %v10438_v37 = vld [vmem:[%s14232_s16 + $0x124] ss:$16 sps:$4 sm:$0xff]   ;;  %v10436_v31 = vld [vmem:[%s14232_s16 + $0x120] ss:$16 sps:$4 sm:$0xff]  }
0x1871   : > { %11005 = vtanh.f32 %v6674_v60  ;;  %v10441_v41 = vld [vmem:[%s14232_s16 + $0x10c] ss:$16 sps:$4 sm:$0xff]   ;;  %v10439_v60 = vld [vmem:[%s14232_s16 + $0x108] ss:$16 sps:$4 sm:$0xff]  }
0x1872   : > { %11007 = vtanh.f32 %v6675_v21  ;;  %v10444_v21 = vld [vmem:[%s14232_s16 + $0x144] ss:$16 sps:$4 sm:$0xff]   ;;  %v10481_v6 = vld [vmem:[%s14232_s16 + $0x1e8] ss:$16 sps:$4 sm:$0xff]   ;;  %v10489_v5 = vld [vmem:[%s14232_s16 + $0x20c] ss:$16 sps:$4 sm:$0xff]  }
0x1879   : > { %v11002_v57 = vpop.eup %11001 }
0x187a   : > { %v11004_v18 = vpop.eup %11003  ;;  %v6704_v12 = vadd.f32 1.0, %v11002_v57  ;;  %v10442_v57 = vld [vmem:[%s14232_s16 + $0x140] ss:$16 sps:$4 sm:$0xff]  }
0x187b   : > { %v11006_v47 = vpop.eup %11005  ;;  %v6705_v56 = vadd.f32 1.0, %v11004_v18  ;;  %v10447_v18 = vld [vmem:[%s14232_s16 + $0x12c] ss:$16 sps:$4 sm:$0xff]  }
0x187c   : > { %v11008_v40 = vpop.eup %11007  ;;  %v6720_v24 = vmul.f32 0.5, %v6704_v12  ;;  %v6706_v28 = vadd.f32 1.0, %v11006_v47  ;;  %v10445_v12 = vld [vmem:[%s14232_s16 + $0x128] ss:$16 sps:$4 sm:$0xff]   ;;  %v10450_v47 = vld [vmem:[%s14232_s16 + $0x164] ss:$16 sps:$4 sm:$0xff]  }
0x187d   : > { %v6707_v36 = vadd.f32 1.0, %v11008_v40  ;;  %v6721_v50 = vmul.f32 0.5, %v6705_v56  ;;  %v10448_v56 = vld [vmem:[%s14232_s16 + $0x160] ss:$16 sps:$4 sm:$0xff]   ;;  %v10453_v40 = vld [vmem:[%s14232_s16 + $0x14c] ss:$16 sps:$4 sm:$0xff]  }
0x187e   : > { %v6722_v29 = vmul.f32 0.5, %v6706_v28  ;;  %v6736_v16 = vmul.f32 %v6720_v24, %v6570_v55  ;;  %v10405_v55 = vld [vmem:[%s14232_s16 + $0x4c] ss:$16 sps:$4 sm:$0xff]   ;;  %v10451_v24 = vld [vmem:[%s14232_s16 + $0x148] ss:$16 sps:$4 sm:$0xff]  }
0x187f   : > { %v6723_v20 = vmul.f32 0.5, %v6707_v36  ;;  %v6737_v58 = vmul.f32 %v6721_v50, %v6572_v1  ;;  %v10403_v1 = vld [vmem:[%s14232_s16 + $0x48] ss:$16 sps:$4 sm:$0xff]   ;;  %v10456_v28 = vld [vmem:[%s14232_s16 + $0x184] ss:$16 sps:$4 sm:$0xff]  }
0x1880   : > { %v6738_v49 = vmul.f32 %v6722_v29, %v6574_v3  ;;  %v10408_v3 = vld [vmem:[%s14232_s16 + $0x84] ss:$16 sps:$4 sm:$0xff]   ;;  %v10459_v36 = vld [vmem:[%s14232_s16 + $0x16c] ss:$16 sps:$4 sm:$0xff]   ;;  %v10454_v50 = vld [vmem:[%s14232_s16 + $0x180] ss:$16 sps:$4 sm:$0xff]  }
0x1881   : > { %v6739_v9 = vmul.f32 %v6723_v20, %v6576_v46  ;;  %7577 = vmatprep.subr.bf16.mxu1 %v10408_v3  ;;  %v10412_v46 = vld [vmem:[%s14232_s16 + $0xa0] ss:$16 sps:$4 sm:$0xff]   ;;  %v10457_v29 = vld [vmem:[%s14232_s16 + $0x168] ss:$16 sps:$4 sm:$0xff]   ;;  %v10462_v20 = vld [vmem:[%s14232_s16 + $0x1a4] ss:$16 sps:$4 sm:$0xff]  }
0x1882   : > { %v6752_v14 = vpack.c.bf16 %v6738_v49, %v6736_v16  ;;  %7578 = vmatpush1.bf16.msra.mxu1 %v10406_v27  ;;  %v10460_v16 = vld [vmem:[%s14232_s16 + $0x1a0] ss:$16 sps:$4 sm:$0xff]   ;;  %v10463_v49 = vld [vmem:[%s14232_s16 + $0x188] ss:$16 sps:$4 sm:$0xff]  }
0x1883   : > { %v6753_v42 = vpack.c.bf16 %v6739_v9, %v6737_v58  ;;  %7579 = vmatprep.subr.bf16.mxu1 %v10414_v45  ;;  %v10465_v58 = vld [vmem:[%s14232_s16 + $0x18c] ss:$16 sps:$4 sm:$0xff]   ;;  %v10468_v9 = vld [vmem:[%s14232_s16 + $0x1c4] ss:$16 sps:$4 sm:$0xff]  }
0x1885   : > { %6929 = vmatprep.mubr.bf16.mxu0 %v6753_v42  ;;  %v10471_v42 = vld [vmem:[%s14232_s16 + $0x1ac] ss:$16 sps:$4 sm:$0xff]  }
0x1886   : > { %6930 = vmatmul.mubr.bf16.vlgmr.msra.gmra.mrb[144].mxu0 %v6752_v14  ;;  %7580 = vmatpush1.bf16.msra.mxu1 %v10412_v46  ;;  %v10466_v14 = vld [vmem:[%s14232_s16 + $0x1c0] ss:$16 sps:$4 sm:$0xff]  }
0x1887   : > { %7652 = vmatpush1.bf16.msra.mxu0 %v10391_v43  ;;  %7581 = vmatprep.subr.bf16.mxu1 %v10420_v19  ;;  %v10477_v43 = vld [vmem:[%s14232_s16 + $0x1cc] ss:$16 sps:$4 sm:$0xff]  }
0x1888   : > { %7653 = vmatprep.subr.bf16.mxu0 %v10399_v26  ;;  %v6961_v26 = vrot.slane %v13735_v2, %v11543_v22 }
0x188a   : > { %7582 = vmatpush1.bf16.msra.mxu1 %v10418_v10 }
0x188b   : > { %7654 = vmatpush1.bf16.msra.mxu0 %v10397_v0  ;;  %7583 = vmatprep.subr.bf16.mxu1 %v10426_v23  ;;  %v13745_v0 = vpack.c.bf16 %v6961_v26, %v6961_v26 }
0x188c   : > { %7655 = vmatprep.subr.bf16.mxu0 %v10405_v55  ;;  %v10483_v55 = vld [vmem:[%s14232_s16 + $0x1ec] ss:$16 sps:$4 sm:$0xff]  }
0x188d   : > { %7601 = vmatprep.mubr.bf16.mxu1 %v13745_v0 }
0x188e   : > { %7584 = vmatpush1.bf16.msra.mxu1 %v10424_v38 }
0x188f   : > { %7656 = vmatpush1.bf16.msra.mxu0 %v10403_v1  ;;  %7585 = vmatprep.subr.bf16.mxu1 %v10432_v11 }
0x1890   : > { %7657 = vmatprep.subr.bf16.mxu0 %v10411_v39 }
0x1892   : > { %7586 = vmatpush1.bf16.msra.mxu1 %v10430_v51 }
0x1893   : > { %7658 = vmatpush1.bf16.msra.mxu0 %v10409_v35  ;;  %7587 = vmatprep.subr.bf16.mxu1 %v10438_v37 }
0x1894   : > { %7659 = vmatprep.subr.bf16.mxu0 %v10417_v4 }
0x1896   : > { %7588 = vmatpush1.bf16.msra.mxu1 %v10436_v31 }
0x1897   : > { %7660 = vmatpush1.bf16.msra.mxu0 %v10415_v17  ;;  %7589 = vmatprep.subr.bf16.mxu1 %v10444_v21 }
0x1898   : > { %7661 = vmatprep.subr.bf16.mxu0 %v10423_v59 }
0x189a   : > { %7590 = vmatpush1.bf16.msra.mxu1 %v10442_v57 }
0x189b   : > { %7662 = vmatpush1.bf16.msra.mxu0 %v10421_v7  ;;  %7591 = vmatprep.subr.bf16.mxu1 %v10450_v47 }
0x189c   : > { %7663 = vmatprep.subr.bf16.mxu0 %v10429_v54 }
0x189e   : > { %7592 = vmatpush1.bf16.msra.mxu1 %v10448_v56 }
0x189f   : > { %7664 = vmatpush1.bf16.msra.mxu0 %v10427_v8  ;;  %7593 = vmatprep.subr.bf16.mxu1 %v10456_v28 }
0x18a0   : > { %7665 = vmatprep.subr.bf16.mxu0 %v10435_v44 }
0x18a2   : > { %7594 = vmatpush1.bf16.msra.mxu1 %v10454_v50 }
0x18a3   : > { %7666 = vmatpush1.bf16.msra.mxu0 %v10433_v32  ;;  %7595 = vmatprep.subr.bf16.mxu1 %v10462_v20 }
0x18a4   : > { %7667 = vmatprep.subr.bf16.mxu0 %v10441_v41 }
0x18a6   : > { %7596 = vmatpush1.bf16.msra.mxu1 %v10460_v16 }
0x18a7   : > { %7668 = vmatpush1.bf16.msra.mxu0 %v10439_v60  ;;  %7597 = vmatprep.subr.bf16.mxu1 %v10468_v9 }
0x18a8   : > { %7669 = vmatprep.subr.bf16.mxu0 %v10447_v18 }
0x18aa   : > { %7598 = vmatpush1.bf16.msra.mxu1 %v10466_v14 }
0x18ab   : > { %7670 = vmatpush1.bf16.msra.mxu0 %v10445_v12  ;;  %7599 = vmatprep.subr.bf16.mxu1 %v10474_v13 }
0x18ac   : > { %7671 = vmatprep.subr.bf16.mxu0 %v10453_v40 }
0x18ae   : > { %7600 = vmatpush1.bf16.msra.mxu1 %v10472_v62 }
0x18af   : > { %7672 = vmatpush1.bf16.msra.mxu0 %v10451_v24  ;;  %7610 = vmatprep.subr.bf16.mxu1 %v10480_v30 }
0x18b0   : > { %7673 = vmatprep.subr.bf16.mxu0 %v10459_v36 }
0x18b3   : > { %7674 = vmatpush1.bf16.msra.mxu0 %v10457_v29 }
0x18b4   : > { %7675 = vmatprep.subr.bf16.mxu0 %v10465_v58 }
0x18b7   : > { %7676 = vmatpush1.bf16.msra.mxu0 %v10463_v49 }
0x18b8   : > { %7677 = vmatprep.subr.bf16.mxu0 %v10471_v42 }
0x18bb   : > { %7678 = vmatpush1.bf16.msra.mxu0 %v10469_v15 }
0x18bc   : > { %7679 = vmatprep.subr.bf16.mxu0 %v10477_v43 }
0x18bf   : > { %7680 = vmatpush1.bf16.msra.mxu0 %v10475_v34 }
0x18c0   : > { %7681 = vmatprep.subr.bf16.mxu0 %v10483_v55 }
0x18c3   : > { %7682 = vmatpush1.bf16.msra.mxu0 %v10481_v6 }
0x18c4   : > { %7692 = vmatprep.subr.bf16.mxu0 %v10489_v5 }
0x18fa   : > { %v6579_v1 = vpop.f32.mrb[132].mxu1 }
0x18fb   : > { %v6580_v39 = vadd.f32 %v6579_v1, %v13534_v33  ;;  %v6581_v53 = vpop.f32.mrb[133].mxu1 }
0x18fc   : > { %v6582_v3 = vadd.f32 %v6581_v53, %v13538_v48  ;;  %v6583_v35 = vpop.f32.mrb[134].mxu1 }
0x18fd   : > { %v6612_v27 = vmul.f32 %v6580_v39, %v6580_v39  ;;  %v6584_v45 = vadd.f32 %v6583_v35, %v13534_v33  ;;  %v6585_v46 = vpop.f32.mrb[135].mxu1 }
0x18fe   : > { %v6613_v4 = vmul.f32 %v6582_v3, %v6582_v3  ;;  %v6586_v17 = vadd.f32 %v6585_v46, %v13538_v48 }
0x18ff   : > { %v6628_v19 = vmul.f32 %v6612_v27, %v6580_v39  ;;  %v6614_v10 = vmul.f32 %v6584_v45, %v6584_v45 }
0x1900   : > { %v6629_v59 = vmul.f32 %v6613_v4, %v6582_v3  ;;  %v6615_v7 = vmul.f32 %v6586_v17, %v6586_v17 }
0x1901   : > { %v6644_v23 = vmul.f32 0.044715, %v6628_v19  ;;  %v6630_v38 = vmul.f32 %v6614_v10, %v6584_v45 }
0x1902   : > { %v6645_v54 = vmul.f32 0.044715, %v6629_v59  ;;  %v6631_v8 = vmul.f32 %v6615_v7, %v6586_v17 }
0x1903   : > { %v6660_v11 = vadd.f32 %v6644_v23, %v6580_v39  ;;  %v6646_v51 = vmul.f32 0.044715, %v6630_v38 }
0x1904   : > { %v6661_v44 = vadd.f32 %v6645_v54, %v6582_v3  ;;  %v6647_v32 = vmul.f32 0.044715, %v6631_v8 }
0x1905   : > { %v6676_v37 = vmul.f32 0.7978846, %v6660_v11  ;;  %v6662_v31 = vadd.f32 %v6646_v51, %v6584_v45 }
0x1906   : > { %v6677_v41 = vmul.f32 0.7978846, %v6661_v44  ;;  %v6663_v60 = vadd.f32 %v6647_v32, %v6586_v17 }
0x1907   : > { %11009 = vtanh.f32 %v6676_v37  ;;  %v6678_v21 = vmul.f32 0.7978846, %v6662_v31 }
0x1908   : > { %11011 = vtanh.f32 %v6677_v41  ;;  %v6679_v57 = vmul.f32 0.7978846, %v6663_v60 }
0x1909   : > { %11013 = vtanh.f32 %v6678_v21 }
0x190a   : > { %11015 = vtanh.f32 %v6679_v57 }
0x1911   : > { %v11010_v18 = vpop.eup %11009 }
0x1912   : > { %v11012_v12 = vpop.eup %11011  ;;  %v6708_v47 = vadd.f32 1.0, %v11010_v18 }
0x1913   : > { %v11014_v56 = vpop.eup %11013  ;;  %v6709_v40 = vadd.f32 1.0, %v11012_v12 }
0x1914   : > { %v11016_v24 = vpop.eup %11015  ;;  %v6710_v28 = vadd.f32 1.0, %v11014_v56  ;;  %v6724_v36 = vmul.f32 0.5, %v6708_v47 }
0x1915   : > { %v6711_v50 = vadd.f32 1.0, %v11016_v24  ;;  %v6725_v29 = vmul.f32 0.5, %v6709_v40 }
0x1916   : > { %v6726_v20 = vmul.f32 0.5, %v6710_v28  ;;  %v6740_v49 = vmul.f32 %v6724_v36, %v6580_v39 }
0x1917   : > { %v6727_v16 = vmul.f32 0.5, %v6711_v50  ;;  %v6741_v9 = vmul.f32 %v6725_v29, %v6582_v3 }
0x1918   : > { %v6742_v58 = vmul.f32 %v6726_v20, %v6584_v45 }
0x1919   : > { %v6743_v14 = vmul.f32 %v6727_v16, %v6586_v17 }
0x191a   : > { %v6754_v42 = vpack.c.bf16 %v6742_v58, %v6740_v49 }
0x191b   : > { %v6755_v15 = vpack.c.bf16 %v6743_v14, %v6741_v9 }
0x191d   : > { %6936 = vmatprep.mubr.bf16.mxu0 %v6755_v15 }
0x191e   : > { %6937 = vmatmul.mubr.bf16.gmra.mrb[148].mxu0 %v6754_v42 }
0x1934   : > { %v6589_v13 = vpop.f32.mrb[136].mxu1 }
0x1935   : > { %v13762_v62 = vadd.f32 %v6589_v13, %v13534_v33  ;;  %v6591_v43 = vpop.f32.mrb[137].mxu1 }
0x1936   : > { %v13765_v34 = vadd.f32 %v6591_v43, %v13538_v48  ;;  %v6593_v26 = vpop.f32.mrb[138].mxu1 }
0x1937   : > { %v6616_v30 = vmul.f32 %v13762_v62, %v13762_v62  ;;  %v13770_v55 = vadd.f32 %v6593_v26, %v13534_v33  ;;  %v6595_v6 = vpop.f32.mrb[139].mxu1 }
0x1938   : > { %v6617_v5 = vmul.f32 %v13765_v34, %v13765_v34  ;;  %v13775_v1 = vadd.f32 %v6595_v6, %v13538_v48 }
0x1939   : > { %v6632_v39 = vmul.f32 %v6616_v30, %v13762_v62  ;;  %v6618_v53 = vmul.f32 %v13770_v55, %v13770_v55 }
0x193a   : > { %v6633_v3 = vmul.f32 %v6617_v5, %v13765_v34  ;;  %v6619_v35 = vmul.f32 %v13775_v1, %v13775_v1 }
0x193b   : > { %v6648_v27 = vmul.f32 0.044715, %v6632_v39  ;;  %v6634_v45 = vmul.f32 %v6618_v53, %v13770_v55 }
0x193c   : > { %v6649_v46 = vmul.f32 0.044715, %v6633_v3  ;;  %v6635_v4 = vmul.f32 %v6619_v35, %v13775_v1  ;;  %v6599_v17 = vpop.f32.mrb[140].mxu1 }
0x193d   : > { %v6664_v19 = vadd.f32 %v6648_v27, %v13762_v62  ;;  %v6650_v10 = vmul.f32 0.044715, %v6634_v45  ;;  %v13787_v59 = vadd.f32 %v6599_v17, %v13534_v33  ;;  %v6601_v7 = vpop.f32.mrb[141].mxu1 }
0x193e   : > { %v6665_v23 = vadd.f32 %v6649_v46, %v13765_v34  ;;  %v6651_v38 = vmul.f32 0.044715, %v6635_v4  ;;  %v13791_v54 = vadd.f32 %v6601_v7, %v13538_v48  ;;  %v6603_v8 = vpop.f32.mrb[142].mxu1 }
0x193f   : > { %v6680_v11 = vmul.f32 0.7978846, %v6664_v19  ;;  %v6666_v51 = vadd.f32 %v6650_v10, %v13770_v55  ;;  %v6620_v44 = vmul.f32 %v13787_v59, %v13787_v59  ;;  %v13797_v32 = vadd.f32 %v6603_v8, %v13534_v33  ;;  %v6605_v37 = vpop.f32.mrb[143].mxu1 }
0x1940   : > { %v6681_v31 = vmul.f32 0.7978846, %v6665_v23  ;;  %v6667_v41 = vadd.f32 %v6651_v38, %v13775_v1  ;;  %v6621_v60 = vmul.f32 %v13791_v54, %v13791_v54  ;;  %v13803_v21 = vadd.f32 %v6605_v37, %v13538_v48 }
0x1941   : > { %11017 = vtanh.f32 %v6680_v11  ;;  %v6682_v57 = vmul.f32 0.7978846, %v6666_v51  ;;  %v6636_v18 = vmul.f32 %v6620_v44, %v13787_v59  ;;  %v6622_v12 = vmul.f32 %v13797_v32, %v13797_v32 }
0x1942   : > { %11019 = vtanh.f32 %v6681_v31  ;;  %v6683_v33 = vmul.f32 0.7978846, %v6667_v41  ;;  %v6637_v47 = vmul.f32 %v6621_v60, %v13791_v54  ;;  %v6623_v56 = vmul.f32 %v13803_v21, %v13803_v21 }
0x1943   : > { %11021 = vtanh.f32 %v6682_v57  ;;  %v6652_v40 = vmul.f32 0.044715, %v6636_v18  ;;  %v6638_v24 = vmul.f32 %v6622_v12, %v13797_v32 }
0x1944   : > { %11023 = vtanh.f32 %v6683_v33  ;;  %v6653_v48 = vmul.f32 0.044715, %v6637_v47  ;;  %v6639_v28 = vmul.f32 %v6623_v56, %v13803_v21 }
0x1945   : > { %v6668_v36 = vadd.f32 %v6652_v40, %v13787_v59  ;;  %v6654_v50 = vmul.f32 0.044715, %v6638_v24 }
0x1946   : > { %v6669_v29 = vadd.f32 %v6653_v48, %v13791_v54  ;;  %v6655_v20 = vmul.f32 0.044715, %v6639_v28 }
0x1947   : > { %v6684_v16 = vmul.f32 0.7978846, %v6668_v36  ;;  %v6670_v49 = vadd.f32 %v6654_v50, %v13797_v32 }
0x1948   : > { %v6685_v58 = vmul.f32 0.7978846, %v6669_v29  ;;  %v6671_v9 = vadd.f32 %v6655_v20, %v13803_v21  ;;  %v10490_v29 = vld [vmem:[%s14232_s16 + $0x240] ss:$16 sps:$4 sm:$0xff]   ;;  %v10493_v20 = vld [vmem:[%s14232_s16 + $0x228] ss:$16 sps:$4 sm:$0xff]  }
0x1949   : > { %11025 = vtanh.f32 %v6684_v16  ;;  %v6686_v14 = vmul.f32 0.7978846, %v6670_v49  ;;  %v10498_v16 = vld [vmem:[%s14232_s16 + $0x264] ss:$16 sps:$4 sm:$0xff]   ;;  %v10501_v49 = vld [vmem:[%s14232_s16 + $0x24c] ss:$16 sps:$4 sm:$0xff]  }
0x194a   : > { %11027 = vtanh.f32 %v6685_v58  ;;  %v6687_v42 = vmul.f32 0.7978846, %v6671_v9  ;;  %v10496_v58 = vld [vmem:[%s14232_s16 + $0x260] ss:$16 sps:$4 sm:$0xff]   ;;  %v10499_v9 = vld [vmem:[%s14232_s16 + $0x248] ss:$16 sps:$4 sm:$0xff]  }
0x194b   : > { %v11018_v15 = vpop.eup %11017  ;;  %11029 = vtanh.f32 %v6686_v14  ;;  %v10504_v14 = vld [vmem:[%s14232_s16 + $0x284] ss:$16 sps:$4 sm:$0xff]  }
0x194c   : > { %v11020_v13 = vpop.eup %11019  ;;  %11031 = vtanh.f32 %v6687_v42  ;;  %v6712_v43 = vadd.f32 1.0, %v11018_v15  ;;  %v10502_v42 = vld [vmem:[%s14232_s16 + $0x280] ss:$16 sps:$4 sm:$0xff]   ;;  %v10505_v15 = vld [vmem:[%s14232_s16 + $0x268] ss:$16 sps:$4 sm:$0xff]  }
0x194d   : > { %v11022_v26 = vpop.eup %11021  ;;  %v6713_v30 = vadd.f32 1.0, %v11020_v13  ;;  %v10510_v13 = vld [vmem:[%s14232_s16 + $0x2a4] ss:$16 sps:$4 sm:$0xff]  }
0x194e   : > { %v11024_v6 = vpop.eup %11023  ;;  %v6714_v5 = vadd.f32 1.0, %v11022_v26  ;;  %v6728_v39 = vmul.f32 0.5, %v6712_v43  ;;  %v10513_v43 = vld [vmem:[%s14232_s16 + $0x28c] ss:$16 sps:$4 sm:$0xff]   ;;  %v10508_v26 = vld [vmem:[%s14232_s16 + $0x2a0] ss:$16 sps:$4 sm:$0xff]  }
0x194f   : > { %v6715_v53 = vadd.f32 1.0, %v11024_v6  ;;  %v6729_v3 = vmul.f32 0.5, %v6713_v30  ;;  %v10511_v30 = vld [vmem:[%s14232_s16 + $0x288] ss:$16 sps:$4 sm:$0xff]   ;;  %v10516_v6 = vld [vmem:[%s14232_s16 + $0x2c4] ss:$16 sps:$4 sm:$0xff]  }
0x1950   : > { %v6730_v35 = vmul.f32 0.5, %v6714_v5  ;;  %v6744_v45 = vmul.f32 %v6728_v39, %v13762_v62  ;;  %v10519_v5 = vld [vmem:[%s14232_s16 + $0x2ac] ss:$16 sps:$4 sm:$0xff]   ;;  %v10514_v39 = vld [vmem:[%s14232_s16 + $0x2c0] ss:$16 sps:$4 sm:$0xff]  }
0x1951   : > { %v6731_v27 = vmul.f32 0.5, %v6715_v53  ;;  %v6745_v17 = vmul.f32 %v6729_v3, %v13765_v34  ;;  %v8973_v34 = vld [vmem:[%s14231_s15 + $0x1] ss:$0 sm:$0xff]  ;;  %v10517_v53 = vld [vmem:[%s14232_s16 + $0x2a8] ss:$16 sps:$4 sm:$0xff]  }
0x1952   : > { %v6746_v46 = vmul.f32 %v6730_v35, %v13770_v55  ;;  %v10522_v3 = vld [vmem:[%s14232_s16 + $0x2e4] ss:$16 sps:$4 sm:$0xff]   ;;  %v10525_v35 = vld [vmem:[%s14232_s16 + $0x2cc] ss:$16 sps:$4 sm:$0xff]  }
0x1953   : > { %v11026_v4 = vpop.eup %11025  ;;  %v6747_v19 = vmul.f32 %v6731_v27, %v13775_v1  ;;  %v6965_v27 = vrot.slane %v13735_v2, %v11549_v63  ;;  %v10528_v2 = vld [vmem:[%s14232_s16 + $0x2ec] ss:$16 sps:$4 sm:$0xff]  }
0x1954   : > { %v11028_v10 = vpop.eup %11027  ;;  %v6756_v7 = vpack.c.bf16 %v6746_v46, %v6744_v45  ;;  %v6716_v23 = vadd.f32 1.0, %v11026_v4  ;;  %v10520_v45 = vld [vmem:[%s14232_s16 + $0x2e0] ss:$16 sps:$4 sm:$0xff]   ;;  %v10523_v46 = vld [vmem:[%s14232_s16 + $0x2c8] ss:$16 sps:$4 sm:$0xff]  }
0x1955   : > { %v11030_v38 = vpop.eup %11029  ;;  %v6757_v8 = vpack.c.bf16 %v6747_v19, %v6745_v17  ;;  %v6717_v11 = vadd.f32 1.0, %v11028_v10  ;;  %v10531_v4 = vld [vmem:[%s14234_s18 + $0x4] ss:$8 sps:$4 sm:$0xff]   ;;  %v6970_v17 = vpack.c.bf16 %v6965_v27, %v6965_v27  ;;  %v10529_v19 = vld [vmem:[%s14234_s18] ss:$8 sps:$4 sm:$0xff]  }
0x1956   : > { %v11032_v51 = vpop.eup %11031  ;;  %v6718_v44 = vadd.f32 1.0, %v11030_v38  ;;  %v6732_v37 = vmul.f32 0.5, %v6716_v23  ;;  %v10526_v10 = vld [vmem:[%s14232_s16 + $0x2e8] ss:$16 sps:$4 sm:$0xff]   ;;  %v10537_v38 = vld [vmem:[%s14234_s18 + $0x24] ss:$8 sps:$4 sm:$0xff]  }
0x1957   : > { %6942 = vmatprep.mubr.bf16.mxu0 %v6757_v8  ;;  %v6719_v31 = vadd.f32 1.0, %v11032_v51  ;;  %v6733_v41 = vmul.f32 0.5, %v6717_v11  ;;  %v10532_v23 = vld [vmem:[%s14234_s18 + $0x10] ss:$8 sps:$4 sm:$0xff]   ;;  %v10535_v8 = vld [vmem:[%s14234_s18 + $0x20] ss:$8 sps:$4 sm:$0xff]  }
0x1958   : > { %6943 = vmatmul.mubr.bf16.gmra.mrb[152].mxu0 %v6756_v7  ;;  %v6734_v62 = vmul.f32 0.5, %v6718_v44  ;;  %v6748_v57 = vmul.f32 %v6732_v37, %v13787_v59  ;;  %v10478_v59 = vld [vmem:[%s14232_s16 + $0x200] ss:$16 sps:$4 sm:$0xff]   ;;  %v10534_v7 = vld [vmem:[%s14234_s18 + $0x14] ss:$8 sps:$4 sm:$0xff]  }
0x1959   : > { %v9552_v55 = vpop.f32.mrb[144].mxu0  ;;  %v6735_v60 = vmul.f32 0.5, %v6719_v31  ;;  %v6749_v47 = vmul.f32 %v6733_v41, %v13791_v54  ;;  %v10484_v54 = vld [vmem:[%s14232_s16 + $0x220] ss:$16 sps:$4 sm:$0xff]   ;;  %v10540_v11 = vld [vmem:[%s14234_s18 + $0x34] ss:$8 sps:$4 sm:$0xff]  }
0x195a   : > { %v9553_v1 = vpop.f32.mrb[145].mxu0  ;;  %v6750_v18 = vmul.f32 %v6734_v62, %v13797_v32  ;;  %v10486_v32 = vld [vmem:[%s14232_s16 + $0x224] ss:$16 sps:$4 sm:$0xff]   ;;  %v10538_v51 = vld [vmem:[%s14234_s18 + $0x30] ss:$8 sps:$4 sm:$0xff]  }
0x195b   : > { %v9554_v12 = vadd.f32 %v9553_v1, %v9552_v55  ;;  %v9555_v33 = vpop.f32.mrb[146].mxu0  ;;  %v6751_v56 = vmul.f32 %v6735_v60, %v13803_v21  ;;  %v10492_v21 = vld [vmem:[%s14232_s16 + $0x244] ss:$16 sps:$4 sm:$0xff]   ;;  %v10541_v44 = vld [vmem:[%s14234_s18 + $0x40] ss:$8 sps:$4 sm:$0xff]  }
0x195c   : > { %v9556_v40 = vpop.f32.mrb[147].mxu0  ;;  %v6758_v24 = vpack.c.bf16 %v6750_v18, %v6748_v57  ;;  %v10543_v37 = vld [vmem:[%s14234_s18 + $0x44] ss:$8 sps:$4 sm:$0xff]   ;;  %v10546_v31 = vld [vmem:[%s14234_s18 + $0x54] ss:$8 sps:$4 sm:$0xff]  }
0x195d   : > { %v6932_v48 = vadd.f32 %v9554_v12, %v8973_v34  ;;  %v6759_v28 = vpack.c.bf16 %v6751_v56, %v6749_v47  ;;  %v10544_v41 = vld [vmem:[%s14234_s18 + $0x50] ss:$8 sps:$4 sm:$0xff]   ;;  %v10547_v62 = vld [vmem:[%s14234_s18 + $0x60] ss:$8 sps:$4 sm:$0xff]   ;;  %v10549_v55 = vld [vmem:[%s14234_s18 + $0x64] ss:$8 sps:$4 sm:$0xff]  }
0x195e   : > { %v10552_v60 = vld [vmem:[%s14234_s18 + $0x74] ss:$8 sps:$4 sm:$0xff]   ;;  %v10550_v34 = vld [vmem:[%s14234_s18 + $0x70] ss:$8 sps:$4 sm:$0xff]   ;;  %v10555_v1 = vld [vmem:[%s14234_s18 + $0x84] ss:$8 sps:$4 sm:$0xff]  }
0x195f   : > { %v6955_v36 = vadd.f32 %v6932_v48, %v13352_v52  ;;  %6948 = vmatprep.mubr.bf16.mxu0 %v6759_v28  ;;  %v10487_v52 = vld [vmem:[%s14232_s16 + $0x208] ss:$16 sps:$4 sm:$0xff]   ;;  %v10558_v18 = vld [vmem:[%s14234_s18 + $0x94] ss:$8 sps:$4 sm:$0xff]   ;;  %v10561_v33 = vld [vmem:[%s14234_s18 + $0xa4] ss:$8 sps:$4 sm:$0xff]  }
0x1960   : > { %6949 = vmatmul.mubr.bf16.gmra.mrb[156].mxu0 %v6758_v24  ;;  %v10553_v57 = vld [vmem:[%s14234_s18 + $0x80] ss:$8 sps:$4 sm:$0xff]   ;;  %v10556_v12 = vld [vmem:[%s14234_s18 + $0x90] ss:$8 sps:$4 sm:$0xff]   ;;  %v10564_v56 = vld [vmem:[%s14234_s18 + $0xb4] ss:$8 sps:$4 sm:$0xff]  }
0x1961   : > { %v6968_v50 = vpack.c.bf16 %v6955_v36, %v6955_v36  ;;  %7683 = vmatprep.mubr.bf16.mxu0 %v13745_v0  ;;  %v10495_v0 = vld [vmem:[%s14232_s16 + $0x22c] ss:$16 sps:$4 sm:$0xff]   ;;  %v10559_v47 = vld [vmem:[%s14234_s18 + $0xa0] ss:$8 sps:$4 sm:$0xff]   ;;  %v10562_v40 = vld [vmem:[%s14234_s18 + $0xb0] ss:$8 sps:$4 sm:$0xff]  }
0x1962   : > { %v10567_v24 = vld [vmem:[%s14234_s18 + $0xc4] ss:$8 sps:$4 sm:$0xff]   ;;  %v10565_v48 = vld [vmem:[%s14234_s18 + $0xc0] ss:$8 sps:$4 sm:$0xff]   ;;  %v10570_v28 = vld [vmem:[%s14234_s18 + $0xd4] ss:$8 sps:$4 sm:$0xff]  }
0x1963   : > { %7602 = vmatmul.mubr.bf16.vlgmr.msra.gmra.mrb[144].mxu1 %v6968_v50  ;;  %v10568_v36 = vld [vmem:[%s14234_s18 + $0xd0] ss:$8 sps:$4 sm:$0xff]  }
0x1964   : > { %7611 = vmatpush1.bf16.msra.mxu1 %v10478_v59  ;;  %7642 = vmatprep.mubr.bf16.mxu1 %v14282_v25  ;;  %v10573_v59 = vld [vmem:[%s14234_s18 + $0xe4] ss:$8 sps:$4 sm:$0xff]  }
0x1965   : > { %7612 = vmatprep.subr.bf16.mxu1 %v10486_v32  ;;  %v10576_v32 = vld [vmem:[%s14234_s18 + $0xf4] ss:$8 sps:$4 sm:$0xff]  }
0x1968   : > { %7613 = vmatpush1.bf16.msra.mxu1 %v10484_v54  ;;  %7684 = vmatmul.mubr.bf16.vlgmr.msra.gmra.mrb[160].mxu0 %v6968_v50  ;;  %v10571_v50 = vld [vmem:[%s14234_s18 + $0xe0] ss:$8 sps:$4 sm:$0xff]   ;;  %v10574_v54 = vld [vmem:[%s14234_s18 + $0xf0] ss:$8 sps:$4 sm:$0xff]  }
0x1969   : > { %7693 = vmatpush1.bf16.msra.mxu0 %v10487_v52  ;;  %7614 = vmatprep.subr.bf16.mxu1 %v10492_v21  ;;  %v10579_v52 = vld [vmem:[%s14234_s18 + $0x104] ss:$8 sps:$4 sm:$0xff]  }
0x196a   : > { %7694 = vmatprep.subr.bf16.mxu0 %v10495_v0  ;;  %7724 = vmatprep.mubr.bf16.mxu0 %v14282_v25  ;;  %v10507_v25 = vld [vmem:[%s14232_s16 + $0x26c] ss:$16 sps:$4 sm:$0xff]  }
0x196c   : > { %7615 = vmatpush1.bf16.msra.mxu1 %v10490_v29 }
0x196d   : > { %7695 = vmatpush1.bf16.msra.mxu0 %v10493_v20  ;;  %7616 = vmatprep.subr.bf16.mxu1 %v10498_v16  ;;  %v10625_v16 = vld [vmem:[%s14236_s20 + $0x40] sm:$0xff]  }
0x196e   : > { %7696 = vmatprep.subr.bf16.mxu0 %v10501_v49  ;;  %v10626_v49 = vld [vmem:[%s14236_s20] sm:$0xff]  }
0x1970   : > { %7617 = vmatpush1.bf16.msra.mxu1 %v10496_v58  ;;  %v10627_v58 = vld [vmem:[%s14236_s20 + $0x48] sm:$0xff]  }
0x1971   : > { %7697 = vmatpush1.bf16.msra.mxu0 %v10499_v9  ;;  %7618 = vmatprep.subr.bf16.mxu1 %v10504_v14  ;;  %v10628_v9 = vld [vmem:[%s14236_s20 + $0x8] sm:$0xff]   ;;  %v10629_v14 = vld [vmem:[%s14236_s20 + $0x50] sm:$0xff]  }
0x1972   : > { %7698 = vmatprep.subr.bf16.mxu0 %v10507_v25  ;;  %v10630_v25 = vld [vmem:[%s14236_s20 + $0x10] sm:$0xff]  }
0x1974   : > { %7619 = vmatpush1.bf16.msra.mxu1 %v10502_v42  ;;  %v10631_v42 = vld [vmem:[%s14236_s20 + $0x58] sm:$0xff]  }
0x1975   : > { %7699 = vmatpush1.bf16.msra.mxu0 %v10505_v15  ;;  %7620 = vmatprep.subr.bf16.mxu1 %v10510_v13  ;;  %v10632_v15 = vld [vmem:[%s14236_s20 + $0x18] sm:$0xff]  }
0x1976   : > { %7700 = vmatprep.subr.bf16.mxu0 %v10513_v43  ;;  %v10633_v43 = vld [vmem:[%s14236_s20 + $0x60] sm:$0xff]  }
0x1978   : > { %7621 = vmatpush1.bf16.msra.mxu1 %v10508_v26 }
0x1979   : > { %7701 = vmatpush1.bf16.msra.mxu0 %v10511_v30  ;;  %7622 = vmatprep.subr.bf16.mxu1 %v10516_v6 }
0x197a   : > { %7702 = vmatprep.subr.bf16.mxu0 %v10519_v5  ;;  %v10634_v5 = vld [vmem:[%s14236_s20 + $0x20] sm:$0xff]  }
0x197c   : > { %7623 = vmatpush1.bf16.msra.mxu1 %v10514_v39  ;;  %v10635_v39 = vld [vmem:[%s14236_s20 + $0x68] sm:$0xff]  }
0x197d   : > { %7703 = vmatpush1.bf16.msra.mxu0 %v10517_v53  ;;  %7624 = vmatprep.subr.bf16.mxu1 %v10522_v3  ;;  %v10636_v53 = vld [vmem:[%s14236_s20 + $0x28] sm:$0xff]  }
0x197e   : > { %7704 = vmatprep.subr.bf16.mxu0 %v10525_v35 }
0x1980   : > { %7625 = vmatpush1.bf16.msra.mxu1 %v10520_v45 }
0x1981   : > { %7705 = vmatpush1.bf16.msra.mxu0 %v10523_v46  ;;  %8137 = vmatprep.subr.bf16.mxu1 %v10531_v4  ;;  %v7067_v46 = vld [vmem:[%s14233_s17] sm:$0xf] }
0x1982   : > { %7706 = vmatprep.subr.bf16.mxu0 %v10528_v2  ;;  %v7552_v4 = vrot.slane %v7067_v46, %v11543_v22  ;;  %v7556_v2 = vrot.slane %v7067_v46, %v11549_v63 }
0x1983   : > { %7643 = vmatmul.mubr.bf16.vlgmr.msra.gmra.mrb[144].mxu1 %v6970_v17 }
0x1984   : > { %8138 = vmatpush1.bf16.msra.mxu1 %v10529_v19 }
0x1985   : > { %7707 = vmatpush1.bf16.msra.mxu0 %v10526_v10  ;;  %8139 = vmatprep.subr.bf16.mxu1 %v10534_v7 }
0x1986   : > { %9576 = vmatprep.subr.bf16.mxu0 %v10625_v16  ;;  %v10606_v16 = vld [vmem:[%s14234_s18 + $0x194] ss:$8 sps:$4 sm:$0xff]  }
0x1988   : > { %7725 = vmatmul.mubr.bf16.vlgmr.msra.gmra.mrb[160].mxu0 %v6970_v17  ;;  %8140 = vmatpush1.bf16.msra.mxu1 %v10532_v23  ;;  %v7563_v17 = vsub.s32 3, %v11540_v61  ;;  %v10577_v61 = vld [vmem:[%s14234_s18 + $0x100] ss:$8 sps:$4 sm:$0xff]  }
0x1989   : > { %8141 = vmatprep.subr.bf16.mxu1 %v10537_v38  ;;  %9577 = vmatpush3.bf16.msra.mxu0 %v10626_v49  ;;  %v10604_v49 = vld [vmem:[%s14234_s18 + $0x190] ss:$8 sps:$4 sm:$0xff]  }
0x198a   : > { %9578 = vmatprep.subr.bf16.mxu0 %v10627_v58  ;;  %v10609_v58 = vld [vmem:[%s14234_s18 + $0x1a4] ss:$8 sps:$4 sm:$0xff]  }
0x198c   : > { %8142 = vmatpush1.bf16.msra.mxu1 %v10535_v8  ;;  %v14288_v8 = vld [vmem:[#allocation3_spill] sm:$0xff] }
0x198d   : > { %8143 = vmatprep.subr.bf16.mxu1 %v10540_v11  ;;  %9579 = vmatpush3.bf16.msra.mxu0 %v10628_v9  ;;  %v7560_v11 = vrot.slane %v7067_v46, %v14288_v8  ;;  %v10607_v9 = vld [vmem:[%s14234_s18 + $0x1a0] ss:$8 sps:$4 sm:$0xff]  }
0x198e   : > { %9580 = vmatprep.subr.bf16.mxu0 %v10629_v14  ;;  %v10612_v14 = vld [vmem:[%s14234_s18 + $0x1b4] ss:$8 sps:$4 sm:$0xff]  }
0x1990   : > { %8144 = vmatpush1.bf16.msra.mxu1 %v10538_v51 }
0x1991   : > { %8145 = vmatprep.subr.bf16.mxu1 %v10543_v37  ;;  %9581 = vmatpush3.bf16.msra.mxu0 %v10630_v25  ;;  %v7564_v37 = vrot.slane %v7067_v46, %v7563_v17  ;;  %v10610_v25 = vld [vmem:[%s14234_s18 + $0x1b0] ss:$8 sps:$4 sm:$0xff]   ;;  %v11046_v46 = vmov 0.0  }
0x1992   : > { %9582 = vmatprep.subr.bf16.mxu0 %v10631_v42  ;;  %v10615_v42 = vld [vmem:[%s14234_s18 + $0x1c4] ss:$8 sps:$4 sm:$0xff]  }
0x1994   : > { %8146 = vmatpush1.bf16.msra.mxu1 %v10541_v44 }
0x1995   : > { %8147 = vmatprep.subr.bf16.mxu1 %v10546_v31  ;;  %9583 = vmatpush3.bf16.msra.mxu0 %v10632_v15  ;;  %v10613_v15 = vld [vmem:[%s14234_s18 + $0x1c0] ss:$8 sps:$4 sm:$0xff]  }
0x1996   : > { %9584 = vmatprep.subr.bf16.mxu0 %v10633_v43  ;;  %v10616_v43 = vld [vmem:[%s14234_s18 + $0x1d0] ss:$8 sps:$4 sm:$0xff]  }
0x1998   : > { %8148 = vmatpush1.bf16.msra.mxu1 %v10544_v41 }
0x1999   : > { %8149 = vmatprep.subr.bf16.mxu1 %v10549_v55  ;;  %9585 = vmatpush3.bf16.msra.mxu0 %v10634_v5  ;;  %v10622_v5 = vld [vmem:[%s14234_s18 + $0x1f0] ss:$8 sps:$4 sm:$0xff]  }
0x199a   : > { %9586 = vmatprep.subr.bf16.mxu0 %v10635_v39 }
0x199c   : > { %8150 = vmatpush1.bf16.msra.mxu1 %v10547_v62 }
0x199d   : > { %8151 = vmatprep.subr.bf16.mxu1 %v10552_v60  ;;  %9587 = vmatpush3.bf16.msra.mxu0 %v10636_v53 }
0x19a0   : > { %8152 = vmatpush1.bf16.msra.mxu1 %v10550_v34 }
0x19a1   : > { %8153 = vmatprep.subr.bf16.mxu1 %v10555_v1 }
0x19a4   : > { %8154 = vmatpush1.bf16.msra.mxu1 %v10553_v57 }
0x19a5   : > { %8155 = vmatprep.subr.bf16.mxu1 %v10558_v18  ;;  %v10582_v18 = vld [vmem:[%s14234_s18 + $0x114] ss:$8 sps:$4 sm:$0xff]  }
0x19a8   : > { %8156 = vmatpush1.bf16.msra.mxu1 %v10556_v12 }
0x19a9   : > { %8157 = vmatprep.subr.bf16.mxu1 %v10561_v33 }
0x19ac   : > { %8158 = vmatpush1.bf16.msra.mxu1 %v10559_v47  ;;  %v10580_v47 = vld [vmem:[%s14234_s18 + $0x110] ss:$8 sps:$4 sm:$0xff]  }
0x19ad   : > { %8159 = vmatprep.subr.bf16.mxu1 %v10564_v56 }
0x19b0   : > { %8160 = vmatpush1.bf16.msra.mxu1 %v10562_v40  ;;  %v10585_v40 = vld [vmem:[%s14234_s18 + $0x124] ss:$8 sps:$4 sm:$0xff]  }
0x19b1   : > { %8161 = vmatprep.subr.bf16.mxu1 %v10567_v24  ;;  %v10583_v24 = vld [vmem:[%s14234_s18 + $0x120] ss:$8 sps:$4 sm:$0xff]  }
0x19b4   : > { %8162 = vmatpush1.bf16.msra.mxu1 %v10565_v48  ;;  %v10588_v48 = vld [vmem:[%s14234_s18 + $0x134] ss:$8 sps:$4 sm:$0xff]  }
0x19b5   : > { %8163 = vmatprep.subr.bf16.mxu1 %v10570_v28  ;;  %v10586_v28 = vld [vmem:[%s14234_s18 + $0x130] ss:$8 sps:$4 sm:$0xff]  }
0x19b8   : > { %8164 = vmatpush1.bf16.msra.mxu1 %v10568_v36  ;;  %v10591_v36 = vld [vmem:[%s14234_s18 + $0x144] ss:$8 sps:$4 sm:$0xff]  }
0x19b9   : > { %8165 = vmatprep.subr.bf16.mxu1 %v10573_v59  ;;  %v10589_v59 = vld [vmem:[%s14234_s18 + $0x140] ss:$8 sps:$4 sm:$0xff]  }
0x19bc   : > { %8166 = vmatpush1.bf16.msra.mxu1 %v10571_v50  ;;  %v10594_v50 = vld [vmem:[%s14234_s18 + $0x154] ss:$8 sps:$4 sm:$0xff]  }
0x19bd   : > { %8167 = vmatprep.subr.bf16.mxu1 %v10576_v32  ;;  %v10592_v32 = vld [vmem:[%s14234_s18 + $0x150] ss:$8 sps:$4 sm:$0xff]  }
0x19c0   : > { %8168 = vmatpush1.bf16.msra.mxu1 %v10574_v54  ;;  %v10597_v54 = vld [vmem:[%s14234_s18 + $0x164] ss:$8 sps:$4 sm:$0xff]  }
0x19c1   : > { %8178 = vmatprep.subr.bf16.mxu1 %v10579_v52  ;;  %v10595_v52 = vld [vmem:[%s14234_s18 + $0x160] ss:$8 sps:$4 sm:$0xff]  }
0x19f1   : > { %v9558_v21 = vpop.f32.mrb[148].mxu0 }
0x19f2   : > { %v9559_v0 = vpop.f32.mrb[149].mxu0  ;;  %v10600_v21 = vld [vmem:[%s14234_s18 + $0x174] ss:$8 sps:$4 sm:$0xff]  }
0x19f3   : > { %v9561_v29 = vpop.f32.mrb[150].mxu0  ;;  %v10598_v0 = vld [vmem:[%s14234_s18 + $0x170] ss:$8 sps:$4 sm:$0xff]  }
0x19f4   : > { %v9562_v20 = vpop.f32.mrb[151].mxu0  ;;  %v10603_v29 = vld [vmem:[%s14234_s18 + $0x184] ss:$8 sps:$4 sm:$0xff]  }
0x19f5   : > { %v10601_v20 = vld [vmem:[%s14234_s18 + $0x180] ss:$8 sps:$4 sm:$0xff]  }
0x1a2b   : > { %v9564_v13 = vpop.f32.mrb[152].mxu0 }
0x1a2c   : > { %v9565_v26 = vpop.f32.mrb[153].mxu0  ;;  %v10618_v13 = vld [vmem:[%s14234_s18 + $0x1d4] ss:$8 sps:$4 sm:$0xff]  }
0x1a2d   : > { %v9567_v30 = vpop.f32.mrb[154].mxu0  ;;  %v10621_v26 = vld [vmem:[%s14234_s18 + $0x1e4] ss:$8 sps:$4 sm:$0xff]  }
0x1a2e   : > { %v9568_v6 = vpop.f32.mrb[155].mxu0  ;;  %v10619_v30 = vld [vmem:[%s14234_s18 + $0x1e0] ss:$8 sps:$4 sm:$0xff]  }
0x1a2f   : > { %v10624_v6 = vld [vmem:[%s14234_s18 + $0x1f4] ss:$8 sps:$4 sm:$0xff]  }
0x1a33   : > { %v9570_v3 = vpop.f32.mrb[156].mxu0 }
0x1a34   : > { %v9571_v35 = vpop.f32.mrb[157].mxu0  ;;  %v10637_v3 = vld [vmem:[%s14236_s20 + $0x70] sm:$0xff]  }
0x1a35   : > { %v9573_v27 = vpop.f32.mrb[158].mxu0  ;;  %v10638_v35 = vld [vmem:[%s14236_s20 + $0x30] sm:$0xff]   ;;  %9588 = vmatprep.subr.bf16.mxu0 %v10637_v3 }
0x1a36   : > { %v9574_v45 = vpop.f32.mrb[159].mxu0  ;;  %9589 = vmatpush3.bf16.msra.mxu0 %v10638_v35  ;;  %v10639_v27 = vld [vmem:[%s14236_s20 + $0x78] sm:$0xff]  }
0x1a37   : > { %v10640_v45 = vld [vmem:[%s14236_s20 + $0x38] sm:$0xff]   ;;  %9590 = vmatprep.subr.bf16.mxu0 %v10639_v27 }
0x1a3a   : > { %9591 = vmatpush3.bf16.msra.mxu0 %v10640_v45 }
0x1a3b   : > { %10007 = vmatprep.subr.bf16.mxu0 %v11046_v46 }
0x1a56   : > { %v7644_v19 = vpop.f32.mrb[144].mxu1 }
0x1a57   : > { %v10027_v10 = vadd.f32 %v7644_v19, %v7552_v4  ;;  %v7646_v7 = vpop.f32.mrb[145].mxu1  ;;  %v7805_v4 = vld [vmem:[%s14235_s19] sm:$0x3] }
0x1a58   : > { %v10028_v23 = vadd.f32 %v7646_v7, %v7556_v2  ;;  %v7648_v38 = vpop.f32.mrb[146].mxu1  ;;  %v8130_v2 = vrot.slane %v7805_v4, %v11543_v22  ;;  %v8134_v17 = vrot.slane %v7805_v4, %v11549_v63  ;;  %v10642_v22 = vld [vmem:[%s14238_s22 + $0x8] sm:$0xff]   ;;  %v10643_v63 = vld [vmem:[%s14238_s22 + $0x10] sm:$0xff]  }
0x1a59   : > { %v7733_v51 = vmax.f32 %v10027_v10, 0.0  ;;  %v7649_v44 = vpop.f32.mrb[147].mxu1 }
0x1a5a   : > { %v7734_v31 = vmax.f32 %v10028_v23, 0.0 }
0x1a5b   : > { %v7726_v41 = vpop.f32.mrb[160].mxu0  ;;  %v7737_v34 = vpack.c.bf16 %v7733_v51, %v7733_v51 }
0x1a5c   : > { %v7738_v62 = vpack.c.bf16 %v7734_v31, %v7734_v31  ;;  %v14066_v55 = vadd.f32 %v7726_v41, %v7560_v11  ;;  %v7728_v60 = vpop.f32.mrb[161].mxu0  ;;  %v10644_v41 = vld [vmem:[%s14238_s22 + $0x18] sm:$0xff]  }
0x1a5d   : > { %v10030_v1 = vadd.f32 %v7728_v60, %v7564_v37  ;;  %v7730_v57 = vpop.f32.mrb[162].mxu0  ;;  %v10641_v37 = vld [vmem:[%s14238_s22] sm:$0xff]   ;;  %v10647_v60 = vld [vmem:[%s14238_s22 + $0x30] sm:$0xff]  }
0x1a5e   : > { %v7731_v12 = vpop.f32.mrb[163].mxu0  ;;  %8169 = vmatprep.mubr.bf16.mxu1 %v7738_v62  ;;  %v7735_v39 = vmax.f32 %v14066_v55, 0.0  ;;  %v10645_v62 = vld [vmem:[%s14238_s22 + $0x20] sm:$0xff]   ;;  %v10646_v55 = vld [vmem:[%s14238_s22 + $0x28] sm:$0xff]  }
0x1a5f   : > { %v7736_v33 = vmax.f32 %v10030_v1, 0.0  ;;  %8170 = vmatmul.mubr.bf16.vlgmr.msra.gmra.mrb[148].mxu1 %v7737_v34  ;;  %v8255_v1 = vld [vmem:[%s14237_s21] sm:$0x1] }
0x1a60   : > { %8179 = vmatpush1.bf16.msra.mxu1 %v10577_v61  ;;  %v7739_v53 = vpack.c.bf16 %v7735_v39, %v7735_v39  ;;  %v10648_v61 = vld [vmem:[%s14238_s22 + $0x38] sm:$0xff]  }
0x1a61   : > { %v7740_v56 = vpack.c.bf16 %v7736_v33, %v7736_v33  ;;  %8180 = vmatprep.subr.bf16.mxu1 %v10582_v18 }
0x1a63   : > { %8210 = vmatprep.mubr.bf16.mxu1 %v7740_v56 }
0x1a64   : > { %8181 = vmatpush1.bf16.msra.mxu1 %v10580_v47 }
0x1a65   : > { %8182 = vmatprep.subr.bf16.mxu1 %v10585_v40 }
0x1a68   : > { %8183 = vmatpush1.bf16.msra.mxu1 %v10583_v24  ;;  %v8410_v24 = vld [vmem:[%s14239_s23] sm:$0x1] }
0x1a69   : > { %8184 = vmatprep.subr.bf16.mxu1 %v10588_v48 }
0x1a6c   : > { %8185 = vmatpush1.bf16.msra.mxu1 %v10586_v28 }
0x1a6d   : > { %8186 = vmatprep.subr.bf16.mxu1 %v10591_v36 }
0x1a70   : > { %8187 = vmatpush1.bf16.msra.mxu1 %v10589_v59 }
0x1a71   : > { %8188 = vmatprep.subr.bf16.mxu1 %v10594_v50 }
0x1a74   : > { %8189 = vmatpush1.bf16.msra.mxu1 %v10592_v32 }
0x1a75   : > { %8190 = vmatprep.subr.bf16.mxu1 %v10597_v54 }
0x1a78   : > { %8191 = vmatpush1.bf16.msra.mxu1 %v10595_v52 }
0x1a79   : > { %8192 = vmatprep.subr.bf16.mxu1 %v10600_v21 }
0x1a7c   : > { %8193 = vmatpush1.bf16.msra.mxu1 %v10598_v0 }
0x1a7d   : > { %8194 = vmatprep.subr.bf16.mxu1 %v10603_v29 }
0x1a80   : > { %8195 = vmatpush1.bf16.msra.mxu1 %v10601_v20 }
0x1a81   : > { %8196 = vmatprep.subr.bf16.mxu1 %v10606_v16 }
0x1a84   : > { %8197 = vmatpush1.bf16.msra.mxu1 %v10604_v49 }
0x1a85   : > { %8198 = vmatprep.subr.bf16.mxu1 %v10609_v58 }
0x1a88   : > { %8199 = vmatpush1.bf16.msra.mxu1 %v10607_v9 }
0x1a89   : > { %8200 = vmatprep.subr.bf16.mxu1 %v10612_v14 }
0x1a8c   : > { %8201 = vmatpush1.bf16.msra.mxu1 %v10610_v25 }
0x1a8d   : > { %8202 = vmatprep.subr.bf16.mxu1 %v10615_v42 }
0x1a90   : > { %8203 = vmatpush1.bf16.msra.mxu1 %v10613_v15 }
0x1a91   : > { %8204 = vmatprep.subr.bf16.mxu1 %v10618_v13 }
0x1a94   : > { %8205 = vmatpush1.bf16.msra.mxu1 %v10616_v43 }
0x1a95   : > { %8206 = vmatprep.subr.bf16.mxu1 %v10621_v26 }
0x1a98   : > { %8207 = vmatpush1.bf16.msra.mxu1 %v10619_v30 }
0x1a99   : > { %8208 = vmatprep.subr.bf16.mxu1 %v10624_v6 }
0x1a9c   : > { %8209 = vmatpush1.bf16.msra.mxu1 %v10622_v5 }
0x1a9f   : > { %8211 = vmatmul.mubr.bf16.vlgmr.msra.gmra.mrb[148].mxu1 %v7739_v53 }
0x1b72   : > { %v8212_v19 = vpop.f32.mrb[148].mxu1 }
0x1b73   : > { %v10031_v10 = vadd.f32 %v8212_v19, %v8130_v2  ;;  %v8214_v7 = vpop.f32.mrb[149].mxu1 }
0x1b74   : > { %v10032_v23 = vadd.f32 %v8214_v7, %v8134_v17  ;;  %v8216_v38 = vpop.f32.mrb[150].mxu1 }
0x1b75   : > { %v8219_v8 = vmax.f32 %v10031_v10, 0.0  ;;  %v8217_v11 = vpop.f32.mrb[151].mxu1 }
0x1b76   : > { %v8220_v51 = vmax.f32 %v10032_v23, 0.0 }
0x1b77   : > { %v8221_v31 = vpack.c.bf16 %v8219_v8, %v8219_v8 }
0x1b78   : > { %v8222_v44 = vpack.c.bf16 %v8220_v51, %v8220_v51 }
0x1b7a   : > { %8384 = vmatprep.mubr.bf16.mxu0 %v8222_v44 }
0x1b7b   : > { %8385 = vmatmul.mubr.bf16.vlgmr.msra.gmra.mrb[164].mxu0 %v8221_v31 }
0x1b7c   : > { %10008 = vmatpush3.bf16.msra.mxu0 %v10641_v37  ;;  %10023 = vmatprep.mubr.msk.bf16.mxu0 %vm11047_vm3, %v11046_v46 }
0x1b7d   : > { %10009 = vmatprep.subr.bf16.mxu0 %v11046_v46 }
0x1b80   : > { %10010 = vmatpush3.bf16.msra.mxu0 %v10642_v22 }
0x1b81   : > { %10011 = vmatprep.subr.bf16.mxu0 %v11046_v46 }
0x1b84   : > { %10012 = vmatpush3.bf16.msra.mxu0 %v10643_v63 }
0x1b85   : > { %10013 = vmatprep.subr.bf16.mxu0 %v11046_v46 }
0x1b88   : > { %10014 = vmatpush3.bf16.msra.mxu0 %v10644_v41 }
0x1b89   : > { %10015 = vmatprep.subr.bf16.mxu0 %v11046_v46 }
0x1b8c   : > { %10016 = vmatpush3.bf16.msra.mxu0 %v10645_v62 }
0x1b8d   : > { %10017 = vmatprep.subr.bf16.mxu0 %v11046_v46 }
0x1b90   : > { %10018 = vmatpush3.bf16.msra.mxu0 %v10646_v55 }
0x1b91   : > { %10019 = vmatprep.subr.bf16.mxu0 %v11046_v46 }
0x1b94   : > { %10020 = vmatpush3.bf16.msra.mxu0 %v10647_v60 }
0x1b95   : > { %10021 = vmatprep.subr.bf16.mxu0 %v11046_v46 }
0x1b98   : > { %10022 = vmatpush3.bf16.msra.mxu0 %v10648_v61 }
0x1c4e   : > { %v9592_v34 = vpop.f32.mrb[164].mxu0 }
0x1c4f   : > { %v9593_v57 = vpop.f32.mrb[165].mxu0 }
0x1c50   : > { %v9594_v18 = vadd.f32 %v9593_v57, %v9592_v34  ;;  %v9595_v12 = vpop.f32.mrb[166].mxu0 }
0x1c51   : > { %v9596_v33 = vpop.f32.mrb[167].mxu0 }
0x1c52   : > { %v8387_v47 = vadd.f32 %v9594_v18, %v8255_v1 }
0x1c54   : > { %v8392_v56 = vmax.f32 %v8387_v47, 0.0 }
0x1c56   : > { %v8393_v40 = vpack.c.bf16 %v8392_v56, %v8392_v56 }
0x1c58   : > { %10024 = vmatmul.mubr.bf16.vlgmr.msra.gmra.mrb[168].mxu0 %v8393_v40 }
0x1d2b   : > { %v8493_v48 = vpop.f32.mrb[168].mxu0 }
0x1d2c   : > { %v8494_v28 = vadd.f32 %v8493_v48, %v8410_v24  ;;  %v10025_v36 = vpop.f32.mrb[169].mxu0 }
0x1d2d   : > { %v8496_v59 = vpop.f32.mrb[170].mxu0 }
0x1d2e   : > { %8499 = vst [vmem:[%s750_s29] sm:$0x1] %v8494_v28  ;;  %v10026_v50 = vpop.f32.mrb[171].mxu0 }
0x1d2f PF: > { %s14290_s24 = sld [smem:[#allocation2_spill]] }
0x1d35   : > { %s34_s5 = sadd.s32 1, %s14290_s24  }
0x1d36   : > { %p31_p4 = scmp.ge.s32.totalorder %s34_s5, 4  }
0x1d38   :  { %33 = sbr.rel (!%p31_p4) target bundleno = 11 (0xb), region = 167 }

</bundles_post_ra>
